<compile_context>
chip_gen: v6e
topology: v6e:2x2x1
jax: 0.10.0
libtpu: 0.0.40
codegen_flags: <defaults>
</compile_context>

<pallas_src>
import functools

import jax
import jax.numpy as jnp
from jax.experimental import pallas as pl
from jax.experimental.pallas import tpu as pltpu

NEG_INF = -1e30   # additive-mask value: large finite negative (exp underflows to 0)

ENC_PARAM_NAMES = (
    "in_w", "in_b",     # packed q/k/v projection: (D, 3D) bf16, (1, 3D) f32
    "out_w", "out_b",   # attn out-projection, per-head rows: (H, dh, D) bf16, (1, D)
    "l1_w", "l1_b",     # FFN linear1: (D, FF) bf16, (1, FF)
    "l2_w", "l2_b",     # FFN linear2: (FF, D) bf16, (1, D)
    "n1_g", "n1_b",     # LayerNorm1:  (1, D), (1, D)
    "n2_g", "n2_b",     # LayerNorm2:  (1, D), (1, D)
)

CROSS_PARAM_NAMES = (
    "q_w", "q_b",       # query projection (pre-sliced in wrapper): (D, D) bf16
    "kv_w", "kv_b",     # packed key/value projection: (D, 2D) bf16
    "out_w", "out_b",   # (H, dh, D) bf16, (1, D)
    "l1_w", "l1_b",
    "l2_w", "l2_b",
    "n1_g", "n1_b",
    "n2_g", "n2_b",
)


# ---------------------------------------------------------------------------
# In-kernel math helpers.
# ---------------------------------------------------------------------------
def _layer_norm(x, g, b, eps=1e-5):
    mu = jnp.mean(x, axis=-1, keepdims=True)
    var = jnp.mean((x - mu) ** 2, axis=-1, keepdims=True)
    return (x - mu) * jax.lax.rsqrt(var + eps) * g + b


def _masked_mha(q_f, k_f, v_f, out_w_h, out_b, nhead, add_mask, recip):
    """Multi-head attention over a flattened batch block.

    q_f: (R, D) f32, k_f/v_f: (C, D) f32, out_w_h: (nhead, dh, D) bf16,
    add_mask: (R, C) f32 additive mask (0 within a sample, -1e30 across samples).
    One (R, C) masked score matmul per head instead of per-sample tiny matmuls;
    the out-projection is folded into the head loop (no lane concat).
    """
    r, d = q_f.shape
    dh = d // nhead
    q = (q_f * (1.0 / dh ** 0.5)).astype(jnp.bfloat16)   # scale applied ONCE
    k = k_f.astype(jnp.bfloat16)
    v = v_f.astype(jnp.bfloat16)
    acc = jnp.zeros((r, d), jnp.float32)
    for h in range(nhead):                                # short static loop
        sl = slice(h * dh, (h + 1) * dh)
        s = jax.lax.dot_general(                          # (R, C) == Q_h @ K_h^T
            q[:, sl], k[:, sl], (((1,), (1,)), ((), ())),
            preferred_element_type=jnp.float32)
        s = s + add_mask                                  # kill cross-sample attn
        s = s - jnp.max(s, axis=-1, keepdims=True)
        e = jnp.exp(s)
        p = e * recip(jnp.sum(e, axis=-1, keepdims=True))  # softmax over keys
        oh = jnp.dot(p.astype(jnp.bfloat16), v[:, sl],
                     preferred_element_type=jnp.float32)           # (R, dh)
        acc = acc + jnp.dot(oh.astype(jnp.bfloat16), out_w_h[h],
                            preferred_element_type=jnp.float32)    # (R, D)
    return acc + out_b


def _ffn(x, p):
    h = jnp.dot(x.astype(jnp.bfloat16), p["l1_w"],
                preferred_element_type=jnp.float32) + p["l1_b"]
    h = jnp.maximum(h, 0.0).astype(jnp.bfloat16)          # ReLU; cast once for l2
    return jnp.dot(h, p["l2_w"], preferred_element_type=jnp.float32) + p["l2_b"]


def _encoder_block(src, p, nhead, add_mask, recip):
    """TransformerEncoderLayer (post-norm, ReLU, dropout=identity)."""
    d = src.shape[-1]
    qkv = jnp.dot(src.astype(jnp.bfloat16), p["in_w"],
                  preferred_element_type=jnp.float32) + p["in_b"]    # (R, 3D)
    attn = _masked_mha(qkv[:, :d], qkv[:, d:2 * d], qkv[:, 2 * d:],
                       p["out_w"], p["out_b"], nhead, add_mask, recip)
    x = _layer_norm(src + attn, p["n1_g"], p["n1_b"])
    return _layer_norm(x + _ffn(x, p), p["n2_g"], p["n2_b"])


def _cross_block(q_in, kv_in, p, nhead, add_mask, recip):
    """CrossAttentionLayer: query from modality 1, key/value from modality 2."""
    d = q_in.shape[-1]
    q_f = jnp.dot(q_in.astype(jnp.bfloat16), p["q_w"],
                  preferred_element_type=jnp.float32) + p["q_b"]     # (R, D)
    kv = jnp.dot(kv_in.astype(jnp.bfloat16), p["kv_w"],
                 preferred_element_type=jnp.float32) + p["kv_b"]     # (C, 2D)
    attn = _masked_mha(q_f, kv[:, :d], kv[:, d:],
                       p["out_w"], p["out_b"], nhead, add_mask, recip)
    x = _layer_norm(q_in + attn, p["n1_g"], p["n1_b"])
    return _layer_norm(x + _ffn(x, p), p["n2_g"], p["n2_b"])


# ---------------------------------------------------------------------------
# Pallas kernel: one grid step == one block of `bt` batch elements.
# ---------------------------------------------------------------------------
def contextual_transformer_kernel(nhead, bt, s1, s2, d,
                                  x1_ref, x2_ref, self_mask_ref, cross_mask_ref,
                                  *rest):
    n_enc = len(ENC_PARAM_NAMES)
    enc = {n: r[...] for n, r in zip(ENC_PARAM_NAMES, rest[:n_enc])}
    cro = {n: r[...] for n, r in zip(CROSS_PARAM_NAMES, rest[n_enc:-1])}
    out_ref = rest[-1]

    recip = lambda v: pl.reciprocal(v, approx=True)   # divide -> EUP slot

    x1 = x1_ref[...].reshape(bt * s1, d)   # flatten batch block for big matmuls
    x2 = x2_ref[...].reshape(bt * s2, d)
    self_mask = self_mask_ref[...]         # (bt*s1, bt*s1) additive mask
    cross_mask = cross_mask_ref[...]       # (bt*s1, bt*s2) additive mask

    f_single = _encoder_block(x1, enc, nhead, self_mask, recip)        # (bt*s1, d)
    f_co = _cross_block(f_single, x2, cro, nhead, cross_mask, recip)   # (bt*s1, d)

    inv_d = 1.0 / d
    # AdaptiveAvgPool1d(1) over the last (feature) dim == lane-reduce * (1/D).
    p1 = jnp.sum(f_single.reshape(bt, s1, d), axis=-1) * inv_d         # (bt, s1)
    p2 = jnp.sum(f_co.reshape(bt, s1, d), axis=-1) * inv_d             # (bt, s1)
    out_ref[...] = jnp.concatenate([p1, p2], axis=-1)                  # (bt, 2*s1)


# ---------------------------------------------------------------------------
# Wrapper.
# ---------------------------------------------------------------------------
def _additive_batch_mask(bt, sq, sk):
    """0 where query/key rows belong to the same sample, -1e30 otherwise."""
    q_ids = jnp.repeat(jnp.arange(bt, dtype=jnp.int32), sq)[:, None]   # (bt*sq, 1)
    k_ids = jnp.repeat(jnp.arange(bt, dtype=jnp.int32), sk)[None, :]   # (1, bt*sk)
    return jnp.where(q_ids == k_ids, 0.0, NEG_INF).astype(jnp.float32)


def contextual_transformer(x1, x2, enc_params, cross_params, nhead, *, block_b=None):
    B, S1, D = x1.shape
    _, S2, _ = x2.shape
    assert D % nhead == 0, (D, nhead)
    dh = D // nhead
    if block_b is None:
        # One fat grid step by default (v5e/v6e: single TensorCore, so a longer
        # grid is pure per-step overhead).  On v7x, pass block_b=B//2 so the
        # "parallel" batch axis can shard across the two TensorCores.
        block_b = B
    assert B % block_b == 0, (B, block_b)
    grid_b = B // block_b

    bf16 = jnp.bfloat16

    def prep_common(p):
        return {
            "out_w": p["out_w"].reshape(nhead, dh, D).astype(bf16),  # per-head rows
            "out_b": p["out_b"],
            "l1_w": p["l1_w"].astype(bf16), "l1_b": p["l1_b"],
            "l2_w": p["l2_w"].astype(bf16), "l2_b": p["l2_b"],
            "n1_g": p["n1_g"], "n1_b": p["n1_b"],
            "n2_g": p["n2_g"], "n2_b": p["n2_b"],
        }

    enc_p = dict(prep_common(enc_params),
                 in_w=enc_params["in_w"].astype(bf16),
                 in_b=enc_params["in_b"])
    # Cross-attention q / packed-kv weights pre-sliced + pre-cast here (no
    # in-kernel sub-128-lane weight slicing, no identity-based dispatch).
    cro_p = dict(prep_common(cross_params),
                 q_w=cross_params["in_w"][:, :D].astype(bf16),
                 q_b=cross_params["in_b"][:, :D],
                 kv_w=cross_params["in_w"][:, D:].astype(bf16),
                 kv_b=cross_params["in_b"][:, D:])

    flat = ([enc_p[n] for n in ENC_PARAM_NAMES]
            + [cro_p[n] for n in CROSS_PARAM_NAMES])

    self_mask = _additive_batch_mask(block_b, S1, S1)
    cross_mask = _additive_batch_mask(block_b, S1, S2)

    # Whole (small) parameter / mask arrays resident in VMEM for the entire
    # grid: no per-step re-fetch, no double-buffering.
    resident = pl.BlockSpec(memory_space=pltpu.MemorySpace.VMEM)

    in_specs = (
        [pl.BlockSpec((block_b, S1, D), lambda b: (b, 0, 0)),
         pl.BlockSpec((block_b, S2, D), lambda b: (b, 0, 0)),
         resident, resident]
        + [resident] * len(flat)
    )
    # Lane-dense output: (block_b, 2*S1) tile per step (no trailing size-1 dim).
    out_spec = pl.BlockSpec((block_b, 2 * S1), lambda b: (b, 0))

    out2d = pl.pallas_call(
        functools.partial(contextual_transformer_kernel,
                          nhead, block_b, S1, S2, D),
        out_shape=jax.ShapeDtypeStruct((B, 2 * S1), jnp.float32),
        grid=(grid_b,),
        in_specs=in_specs,
        out_specs=out_spec,
        compiler_params=pltpu.CompilerParams(dimension_semantics=("parallel",)),
    )(x1, x2, self_mask, cross_mask, *flat)

    # Restore the module's (B, 2*S1, 1) output layout outside the kernel.
    return out2d[..., None]


# ---------------------------------------------------------------------------
# Deterministic synthetic parameter init (shapes follow the module __init__).
# LayerNorm affine params are randomized so the pooled outputs (feature-mean of
# a LayerNorm output) are non-trivial and the correctness check is meaningful.
# ---------------------------------------------------------------------------
def init_layer_params(key, d_model, dim_ff, scale=0.05):
    ks = jax.random.split(key, 12)
    f32 = jnp.float32
    return {
        "in_w": jax.random.normal(ks[0], (d_model, 3 * d_model), f32) * scale,
        "in_b": jax.random.normal(ks[1], (1, 3 * d_model), f32) * scale,
        "out_w": jax.random.normal(ks[2], (d_model, d_model), f32) * scale,
        "out_b": jax.random.normal(ks[3], (1, d_model), f32) * scale,
        "l1_w": jax.random.normal(ks[4], (d_model, dim_ff), f32) * scale,
        "l1_b": jax.random.normal(ks[5], (1, dim_ff), f32) * scale,
        "l2_w": jax.random.normal(ks[6], (dim_ff, d_model), f32) * scale,
        "l2_b": jax.random.normal(ks[7], (1, d_model), f32) * scale,
        "n1_g": 1.0 + jax.random.normal(ks[8], (1, d_model), f32) * 0.2,
        "n1_b": jax.random.normal(ks[9], (1, d_model), f32) * 0.2,
        "n2_g": 1.0 + jax.random.normal(ks[10], (1, d_model), f32) * 0.2,
        "n2_b": jax.random.normal(ks[11], (1, d_model), f32) * 0.2,
    }


# ---------------------------------------------------------------------------
# Pure-JAX reference: standard per-sample multi-head attention (no flattening,
# no masking, exact softmax) with the same bf16-matmul / f32-accumulate
# arithmetic, so the test validates the masked-attention restructuring.
# ---------------------------------------------------------------------------
def _ref_linear(x, w, b):
    return jnp.dot(x.astype(jnp.bfloat16), w.astype(jnp.bfloat16),
                   preferred_element_type=jnp.float32) + b


def _ref_layer_norm(x, g, b, eps=1e-5):
    mu = jnp.mean(x, axis=-1, keepdims=True)
    var = jnp.mean((x - mu) ** 2, axis=-1, keepdims=True)
    return (x - mu) * jax.lax.rsqrt(var + eps) * g + b


def _ref_mha(q_in, kv_in, p, nhead):
    B, Sq, D = q_in.shape
    Sk = kv_in.shape[1]
    dh = D // nhead
    q = _ref_linear(q_in, p["in_w"][:, :D], p["in_b"][:, :D]) * (1.0 / dh ** 0.5)
    k = _ref_linear(kv_in, p["in_w"][:, D:2 * D], p["in_b"][:, D:2 * D])
    v = _ref_linear(kv_in, p["in_w"][:, 2 * D:], p["in_b"][:, 2 * D:])
    q = q.reshape(B, Sq, nhead, dh).astype(jnp.bfloat16)
    k = k.reshape(B, Sk, nhead, dh).astype(jnp.bfloat16)
    v = v.reshape(B, Sk, nhead, dh).astype(jnp.bfloat16)
    s = jnp.einsum("bqhd,bkhd->bhqk", q, k, preferred_element_type=jnp.float32)
    prob = jax.nn.softmax(s, axis=-1)
    o = jnp.einsum("bhqk,bkhd->bqhd", prob.astype(jnp.bfloat16), v,
                   preferred_element_type=jnp.float32).reshape(B, Sq, D)
    return _ref_linear(o, p["out_w"], p["out_b"])


def _ref_ffn(x, p):
    h = jnp.maximum(_ref_linear(x, p["l1_w"], p["l1_b"]), 0.0)
    return _ref_linear(h, p["l2_w"], p["l2_b"])


def _ref_block(q_in, kv_in, p, nhead):
    attn = _ref_mha(q_in, kv_in, p, nhead)
    x = _ref_layer_norm(q_in + attn, p["n1_g"], p["n1_b"])
    return _ref_layer_norm(x + _ref_ffn(x, p), p["n2_g"], p["n2_b"])


def reference(x1, x2, enc, cro, nhead):
    f_single = _ref_block(x1, x1, enc, nhead)
    f_co = _ref_block(f_single, x2, cro, nhead)
    p1 = jnp.mean(f_single, axis=-1)                       # (B, S1)
    p2 = jnp.mean(f_co, axis=-1)                           # (B, S1)
    return jnp.concatenate([p1, p2], axis=-1)[..., None]   # (B, 2*S1, 1)


if __name__ == "__main__":
    B, S1, S2, D, NHEAD, FF = 16, 8, 8, 32, 4, 64

    key = jax.random.PRNGKey(0)
    k1, k2, k3, k4 = jax.random.split(key, 4)
    input1 = jax.random.normal(k1, (B, S1, D), jnp.float32)
    input2 = jax.random.normal(k2, (B, S2, D), jnp.float32)
    enc_params = init_layer_params(k3, D, FF)
    cross_params = init_layer_params(k4, D, FF)

    # Default block_b == B -> single fat grid step (best on v5e/v6e; on v7x use
    # block_b=B//2 to shard the batch axis across both TensorCores).
    out = contextual_transformer(input1, input2, enc_params, cross_params, NHEAD)
    out = jax.block_until_ready(out)

    ref = reference(input1, input2, enc_params, cross_params, NHEAD)
    assert out.shape == (B, 2 * S1, 1), out.shape
    max_err = float(jnp.max(jnp.abs(out - ref)))
    # Tolerance covers the in-kernel approx reciprocal (EUP) vs exact softmax in
    # the reference plus MXU-vs-XLA accumulation-order differences; both sides
    # use the same bf16-input / f32-accumulate matmul arithmetic.
    assert jnp.allclose(out, ref, atol=1e-2, rtol=1e-2), max_err

    print("KERNEL_OK")
</pallas_src>

<mosaic_0001>
module attributes {stable_mosaic.version = 11 : i64} {
  func.func @contextual_transformer_kernel(%arg0: i32, %arg1: memref<16x8x32xf32, #tpu.memory_space<vmem>>, %arg2: memref<16x8x32xf32, #tpu.memory_space<vmem>>, %arg3: memref<128x128xf32, #tpu.memory_space<vmem>>, %arg4: memref<128x128xf32, #tpu.memory_space<vmem>>, %arg5: memref<32x96xbf16, #tpu.memory_space<vmem>>, %arg6: memref<1x96xf32, #tpu.memory_space<vmem>>, %arg7: memref<4x8x32xbf16, #tpu.memory_space<vmem>>, %arg8: memref<1x32xf32, #tpu.memory_space<vmem>>, %arg9: memref<32x64xbf16, #tpu.memory_space<vmem>>, %arg10: memref<1x64xf32, #tpu.memory_space<vmem>>, %arg11: memref<64x32xbf16, #tpu.memory_space<vmem>>, %arg12: memref<1x32xf32, #tpu.memory_space<vmem>>, %arg13: memref<1x32xf32, #tpu.memory_space<vmem>>, %arg14: memref<1x32xf32, #tpu.memory_space<vmem>>, %arg15: memref<1x32xf32, #tpu.memory_space<vmem>>, %arg16: memref<1x32xf32, #tpu.memory_space<vmem>>, %arg17: memref<32x32xbf16, #tpu.memory_space<vmem>>, %arg18: memref<1x32xf32, #tpu.memory_space<vmem>>, %arg19: memref<32x64xbf16, #tpu.memory_space<vmem>>, %arg20: memref<1x64xf32, #tpu.memory_space<vmem>>, %arg21: memref<4x8x32xbf16, #tpu.memory_space<vmem>>, %arg22: memref<1x32xf32, #tpu.memory_space<vmem>>, %arg23: memref<32x64xbf16, #tpu.memory_space<vmem>>, %arg24: memref<1x64xf32, #tpu.memory_space<vmem>>, %arg25: memref<64x32xbf16, #tpu.memory_space<vmem>>, %arg26: memref<1x32xf32, #tpu.memory_space<vmem>>, %arg27: memref<1x32xf32, #tpu.memory_space<vmem>>, %arg28: memref<1x32xf32, #tpu.memory_space<vmem>>, %arg29: memref<1x32xf32, #tpu.memory_space<vmem>>, %arg30: memref<1x32xf32, #tpu.memory_space<vmem>>, %arg31: memref<16x16xf32, #tpu.memory_space<vmem>>) attributes {dimension_semantics = [#tpu.dimension_semantics<parallel>], iteration_bounds = array<i64: 1>, scalar_prefetch = 0 : i64, scratch_operands = 0 : i64, tpu.core_type = #tpu.core_type<tc>, window_params = [{transform_indices = @transform_0, window_bounds = array<i64: 16, 8, 32>}, {transform_indices = @transform_1, window_bounds = array<i64: 16, 8, 32>}, {pipeline_mode = #tpu.pipeline_mode<synchronous>, transform_indices = @transform_2, window_bounds = array<i64: 128, 128>}, {pipeline_mode = #tpu.pipeline_mode<synchronous>, transform_indices = @transform_3, window_bounds = array<i64: 128, 128>}, {pipeline_mode = #tpu.pipeline_mode<synchronous>, transform_indices = @transform_4, window_bounds = array<i64: 32, 96>}, {pipeline_mode = #tpu.pipeline_mode<synchronous>, transform_indices = @transform_5, window_bounds = array<i64: 1, 96>}, {pipeline_mode = #tpu.pipeline_mode<synchronous>, transform_indices = @transform_6, window_bounds = array<i64: 4, 8, 32>}, {pipeline_mode = #tpu.pipeline_mode<synchronous>, transform_indices = @transform_7, window_bounds = array<i64: 1, 32>}, {pipeline_mode = #tpu.pipeline_mode<synchronous>, transform_indices = @transform_8, window_bounds = array<i64: 32, 64>}, {pipeline_mode = #tpu.pipeline_mode<synchronous>, transform_indices = @transform_9, window_bounds = array<i64: 1, 64>}, {pipeline_mode = #tpu.pipeline_mode<synchronous>, transform_indices = @transform_10, window_bounds = array<i64: 64, 32>}, {pipeline_mode = #tpu.pipeline_mode<synchronous>, transform_indices = @transform_11, window_bounds = array<i64: 1, 32>}, {pipeline_mode = #tpu.pipeline_mode<synchronous>, transform_indices = @transform_12, window_bounds = array<i64: 1, 32>}, {pipeline_mode = #tpu.pipeline_mode<synchronous>, transform_indices = @transform_13, window_bounds = array<i64: 1, 32>}, {pipeline_mode = #tpu.pipeline_mode<synchronous>, transform_indices = @transform_14, window_bounds = array<i64: 1, 32>}, {pipeline_mode = #tpu.pipeline_mode<synchronous>, transform_indices = @transform_15, window_bounds = array<i64: 1, 32>}, {pipeline_mode = #tpu.pipeline_mode<synchronous>, transform_indices = @transform_16, window_bounds = array<i64: 32, 32>}, {pipeline_mode = #tpu.pipeline_mode<synchronous>, transform_indices = @transform_17, window_bounds = array<i64: 1, 32>}, {pipeline_mode = #tpu.pipeline_mode<synchronous>, transform_indices = @transform_18, window_bounds = array<i64: 32, 64>}, {pipeline_mode = #tpu.pipeline_mode<synchronous>, transform_indices = @transform_19, window_bounds = array<i64: 1, 64>}, {pipeline_mode = #tpu.pipeline_mode<synchronous>, transform_indices = @transform_20, window_bounds = array<i64: 4, 8, 32>}, {pipeline_mode = #tpu.pipeline_mode<synchronous>, transform_indices = @transform_21, window_bounds = array<i64: 1, 32>}, {pipeline_mode = #tpu.pipeline_mode<synchronous>, transform_indices = @transform_22, window_bounds = array<i64: 32, 64>}, {pipeline_mode = #tpu.pipeline_mode<synchronous>, transform_indices = @transform_23, window_bounds = array<i64: 1, 64>}, {pipeline_mode = #tpu.pipeline_mode<synchronous>, transform_indices = @transform_24, window_bounds = array<i64: 64, 32>}, {pipeline_mode = #tpu.pipeline_mode<synchronous>, transform_indices = @transform_25, window_bounds = array<i64: 1, 32>}, {pipeline_mode = #tpu.pipeline_mode<synchronous>, transform_indices = @transform_26, window_bounds = array<i64: 1, 32>}, {pipeline_mode = #tpu.pipeline_mode<synchronous>, transform_indices = @transform_27, window_bounds = array<i64: 1, 32>}, {pipeline_mode = #tpu.pipeline_mode<synchronous>, transform_indices = @transform_28, window_bounds = array<i64: 1, 32>}, {pipeline_mode = #tpu.pipeline_mode<synchronous>, transform_indices = @transform_29, window_bounds = array<i64: 1, 32>}, {transform_indices = @transform_30, window_bounds = array<i64: 16, 16>}]} {
    %c0 = arith.constant 0 : index
    %c0_0 = arith.constant 0 : index
    %0 = vector.load %arg5[%c0, %c0_0] : memref<32x96xbf16, #tpu.memory_space<vmem>>, vector<32x96xbf16>
    %c0_1 = arith.constant 0 : index
    %c0_2 = arith.constant 0 : index
    %1 = vector.load %arg6[%c0_1, %c0_2] : memref<1x96xf32, #tpu.memory_space<vmem>>, vector<1x96xf32>
    %c0_3 = arith.constant 0 : index
    %c0_4 = arith.constant 0 : index
    %c0_5 = arith.constant 0 : index
    %2 = vector.load %arg7[%c0_3, %c0_4, %c0_5] : memref<4x8x32xbf16, #tpu.memory_space<vmem>>, vector<4x8x32xbf16>
    %c0_6 = arith.constant 0 : index
    %c0_7 = arith.constant 0 : index
    %3 = vector.load %arg8[%c0_6, %c0_7] : memref<1x32xf32, #tpu.memory_space<vmem>>, vector<1x32xf32>
    %c0_8 = arith.constant 0 : index
    %c0_9 = arith.constant 0 : index
    %4 = vector.load %arg9[%c0_8, %c0_9] : memref<32x64xbf16, #tpu.memory_space<vmem>>, vector<32x64xbf16>
    %c0_10 = arith.constant 0 : index
    %c0_11 = arith.constant 0 : index
    %5 = vector.load %arg10[%c0_10, %c0_11] : memref<1x64xf32, #tpu.memory_space<vmem>>, vector<1x64xf32>
    %c0_12 = arith.constant 0 : index
    %c0_13 = arith.constant 0 : index
    %6 = vector.load %arg11[%c0_12, %c0_13] : memref<64x32xbf16, #tpu.memory_space<vmem>>, vector<64x32xbf16>
    %c0_14 = arith.constant 0 : index
    %c0_15 = arith.constant 0 : index
    %7 = vector.load %arg12[%c0_14, %c0_15] : memref<1x32xf32, #tpu.memory_space<vmem>>, vector<1x32xf32>
    %c0_16 = arith.constant 0 : index
    %c0_17 = arith.constant 0 : index
    %8 = vector.load %arg13[%c0_16, %c0_17] : memref<1x32xf32, #tpu.memory_space<vmem>>, vector<1x32xf32>
    %c0_18 = arith.constant 0 : index
    %c0_19 = arith.constant 0 : index
    %9 = vector.load %arg14[%c0_18, %c0_19] : memref<1x32xf32, #tpu.memory_space<vmem>>, vector<1x32xf32>
    %c0_20 = arith.constant 0 : index
    %c0_21 = arith.constant 0 : index
    %10 = vector.load %arg15[%c0_20, %c0_21] : memref<1x32xf32, #tpu.memory_space<vmem>>, vector<1x32xf32>
    %c0_22 = arith.constant 0 : index
    %c0_23 = arith.constant 0 : index
    %11 = vector.load %arg16[%c0_22, %c0_23] : memref<1x32xf32, #tpu.memory_space<vmem>>, vector<1x32xf32>
    %c0_24 = arith.constant 0 : index
    %c0_25 = arith.constant 0 : index
    %12 = vector.load %arg17[%c0_24, %c0_25] : memref<32x32xbf16, #tpu.memory_space<vmem>>, vector<32x32xbf16>
    %c0_26 = arith.constant 0 : index
    %c0_27 = arith.constant 0 : index
    %13 = vector.load %arg18[%c0_26, %c0_27] : memref<1x32xf32, #tpu.memory_space<vmem>>, vector<1x32xf32>
    %c0_28 = arith.constant 0 : index
    %c0_29 = arith.constant 0 : index
    %14 = vector.load %arg19[%c0_28, %c0_29] : memref<32x64xbf16, #tpu.memory_space<vmem>>, vector<32x64xbf16>
    %c0_30 = arith.constant 0 : index
    %c0_31 = arith.constant 0 : index
    %15 = vector.load %arg20[%c0_30, %c0_31] : memref<1x64xf32, #tpu.memory_space<vmem>>, vector<1x64xf32>
    %c0_32 = arith.constant 0 : index
    %c0_33 = arith.constant 0 : index
    %c0_34 = arith.constant 0 : index
    %16 = vector.load %arg21[%c0_32, %c0_33, %c0_34] : memref<4x8x32xbf16, #tpu.memory_space<vmem>>, vector<4x8x32xbf16>
    %c0_35 = arith.constant 0 : index
    %c0_36 = arith.constant 0 : index
    %17 = vector.load %arg22[%c0_35, %c0_36] : memref<1x32xf32, #tpu.memory_space<vmem>>, vector<1x32xf32>
    %c0_37 = arith.constant 0 : index
    %c0_38 = arith.constant 0 : index
    %18 = vector.load %arg23[%c0_37, %c0_38] : memref<32x64xbf16, #tpu.memory_space<vmem>>, vector<32x64xbf16>
    %c0_39 = arith.constant 0 : index
    %c0_40 = arith.constant 0 : index
    %19 = vector.load %arg24[%c0_39, %c0_40] : memref<1x64xf32, #tpu.memory_space<vmem>>, vector<1x64xf32>
    %c0_41 = arith.constant 0 : index
    %c0_42 = arith.constant 0 : index
    %20 = vector.load %arg25[%c0_41, %c0_42] : memref<64x32xbf16, #tpu.memory_space<vmem>>, vector<64x32xbf16>
    %c0_43 = arith.constant 0 : index
    %c0_44 = arith.constant 0 : index
    %21 = vector.load %arg26[%c0_43, %c0_44] : memref<1x32xf32, #tpu.memory_space<vmem>>, vector<1x32xf32>
    %c0_45 = arith.constant 0 : index
    %c0_46 = arith.constant 0 : index
    %22 = vector.load %arg27[%c0_45, %c0_46] : memref<1x32xf32, #tpu.memory_space<vmem>>, vector<1x32xf32>
    %c0_47 = arith.constant 0 : index
    %c0_48 = arith.constant 0 : index
    %23 = vector.load %arg28[%c0_47, %c0_48] : memref<1x32xf32, #tpu.memory_space<vmem>>, vector<1x32xf32>
    %c0_49 = arith.constant 0 : index
    %c0_50 = arith.constant 0 : index
    %24 = vector.load %arg29[%c0_49, %c0_50] : memref<1x32xf32, #tpu.memory_space<vmem>>, vector<1x32xf32>
    %c0_51 = arith.constant 0 : index
    %c0_52 = arith.constant 0 : index
    %25 = vector.load %arg30[%c0_51, %c0_52] : memref<1x32xf32, #tpu.memory_space<vmem>>, vector<1x32xf32>
    %c0_53 = arith.constant 0 : index
    %c0_54 = arith.constant 0 : index
    %c0_55 = arith.constant 0 : index
    %26 = vector.load %arg1[%c0_53, %c0_54, %c0_55] : memref<16x8x32xf32, #tpu.memory_space<vmem>>, vector<16x8x32xf32>
    %27 = vector.shape_cast %26 : vector<16x8x32xf32> to vector<128x32xf32>
    %c0_56 = arith.constant 0 : index
    %c0_57 = arith.constant 0 : index
    %c0_58 = arith.constant 0 : index
    %28 = vector.load %arg2[%c0_56, %c0_57, %c0_58] : memref<16x8x32xf32, #tpu.memory_space<vmem>>, vector<16x8x32xf32>
    %29 = vector.shape_cast %28 : vector<16x8x32xf32> to vector<128x32xf32>
    %c0_59 = arith.constant 0 : index
    %c0_60 = arith.constant 0 : index
    %30 = vector.load %arg3[%c0_59, %c0_60] : memref<128x128xf32, #tpu.memory_space<vmem>>, vector<128x128xf32>
    %c0_61 = arith.constant 0 : index
    %c0_62 = arith.constant 0 : index
    %31 = vector.load %arg4[%c0_61, %c0_62] : memref<128x128xf32, #tpu.memory_space<vmem>>, vector<128x128xf32>
    %32 = arith.truncf %27 : vector<128x32xf32> to vector<128x32xbf16>
    %cst = arith.constant dense<0.000000e+00> : vector<128x96xf32>
    %33 = tpu.matmul %32, %0, %cst {dimension_numbers = #tpu.dot_dimension_numbers<[1], [0], [0], [1], [0, 0, 1, 1], [], []>} : vector<128x32xbf16>, vector<32x96xbf16>, vector<128x96xf32> -> vector<128x96xf32>
    %34 = vector.broadcast %1 : vector<1x96xf32> to vector<128x96xf32>
    %35 = arith.addf %33, %34 : vector<128x96xf32>
    %36 = vector.extract_strided_slice %35 {offsets = [0, 0], sizes = [128, 32], strides = [1, 1]} : vector<128x96xf32> to vector<128x32xf32>
    %37 = vector.extract_strided_slice %35 {offsets = [0, 32], sizes = [128, 32], strides = [1, 1]} : vector<128x96xf32> to vector<128x32xf32>
    %38 = vector.extract_strided_slice %35 {offsets = [0, 64], sizes = [128, 32], strides = [1, 1]} : vector<128x96xf32> to vector<128x32xf32>
    %cst_63 = arith.constant 0.353553385 : f32
    %39 = vector.broadcast %cst_63 : f32 to vector<128x32xf32>
    %40 = arith.mulf %36, %39 : vector<128x32xf32>
    %41 = arith.truncf %40 : vector<128x32xf32> to vector<128x32xbf16>
    %42 = arith.truncf %37 : vector<128x32xf32> to vector<128x32xbf16>
    %43 = arith.truncf %38 : vector<128x32xf32> to vector<128x32xbf16>
    %cst_64 = arith.constant 0.000000e+00 : f32
    %44 = vector.broadcast %cst_64 : f32 to vector<128x32xf32>
    %45 = vector.extract_strided_slice %41 {offsets = [0, 0], sizes = [128, 8], strides = [1, 1]} : vector<128x32xbf16> to vector<128x8xbf16>
    %46 = vector.extract_strided_slice %42 {offsets = [0, 0], sizes = [128, 8], strides = [1, 1]} : vector<128x32xbf16> to vector<128x8xbf16>
    %cst_65 = arith.constant dense<0.000000e+00> : vector<128x128xf32>
    %47 = tpu.matmul %45, %46, %cst_65 {dimension_numbers = #tpu.dot_dimension_numbers<[1], [1], [0], [0], [0, 0, 1, 0], [], []>} : vector<128x8xbf16>, vector<128x8xbf16>, vector<128x128xf32> -> vector<128x128xf32>
    %48 = arith.addf %47, %30 : vector<128x128xf32>
    %cst_66 = arith.constant dense<0xFF800000> : vector<128xf32>
    %49 = vector.multi_reduction <maximumf>, %48, %cst_66 [1] : vector<128x128xf32> to vector<128xf32>
    %50 = vector.shape_cast %49 : vector<128xf32> to vector<128x1xf32>
    %51 = vector.broadcast %50 : vector<128x1xf32> to vector<128x128xf32>
    %52 = arith.subf %48, %51 : vector<128x128xf32>
    %53 = math.exp %52 : vector<128x128xf32>
    %cst_67 = arith.constant dense<0.000000e+00> : vector<128xf32>
    %54 = vector.multi_reduction <add>, %53, %cst_67 [1] : vector<128x128xf32> to vector<128xf32>
    %55 = vector.shape_cast %54 : vector<128xf32> to vector<128x1xf32>
    %56 = tpu.reciprocal %55 {approx = true} : vector<128x1xf32> -> vector<128x1xf32>
    %57 = vector.broadcast %56 : vector<128x1xf32> to vector<128x128xf32>
    %58 = arith.mulf %53, %57 : vector<128x128xf32>
    %59 = arith.truncf %58 : vector<128x128xf32> to vector<128x128xbf16>
    %60 = vector.extract_strided_slice %43 {offsets = [0, 0], sizes = [128, 8], strides = [1, 1]} : vector<128x32xbf16> to vector<128x8xbf16>
    %cst_68 = arith.constant dense<0.000000e+00> : vector<128x8xf32>
    %61 = tpu.matmul %59, %60, %cst_68 {dimension_numbers = #tpu.dot_dimension_numbers<[1], [0], [0], [1], [0, 0, 1, 1], [], []>} : vector<128x128xbf16>, vector<128x8xbf16>, vector<128x8xf32> -> vector<128x8xf32>
    %62 = arith.truncf %61 : vector<128x8xf32> to vector<128x8xbf16>
    %63 = vector.extract_strided_slice %2 {offsets = [0, 0, 0], sizes = [1, 8, 32], strides = [1, 1, 1]} : vector<4x8x32xbf16> to vector<1x8x32xbf16>
    %64 = vector.shape_cast %63 : vector<1x8x32xbf16> to vector<8x32xbf16>
    %cst_69 = arith.constant dense<0.000000e+00> : vector<128x32xf32>
    %65 = tpu.matmul %62, %64, %cst_69 {dimension_numbers = #tpu.dot_dimension_numbers<[1], [0], [0], [1], [0, 0, 1, 1], [], []>} : vector<128x8xbf16>, vector<8x32xbf16>, vector<128x32xf32> -> vector<128x32xf32>
    %66 = arith.addf %44, %65 : vector<128x32xf32>
    %67 = vector.extract_strided_slice %41 {offsets = [0, 8], sizes = [128, 8], strides = [1, 1]} : vector<128x32xbf16> to vector<128x8xbf16>
    %68 = vector.extract_strided_slice %42 {offsets = [0, 8], sizes = [128, 8], strides = [1, 1]} : vector<128x32xbf16> to vector<128x8xbf16>
    %cst_70 = arith.constant dense<0.000000e+00> : vector<128x128xf32>
    %69 = tpu.matmul %67, %68, %cst_70 {dimension_numbers = #tpu.dot_dimension_numbers<[1], [1], [0], [0], [0, 0, 1, 0], [], []>} : vector<128x8xbf16>, vector<128x8xbf16>, vector<128x128xf32> -> vector<128x128xf32>
    %70 = arith.addf %69, %30 : vector<128x128xf32>
    %cst_71 = arith.constant dense<0xFF800000> : vector<128xf32>
    %71 = vector.multi_reduction <maximumf>, %70, %cst_71 [1] : vector<128x128xf32> to vector<128xf32>
    %72 = vector.shape_cast %71 : vector<128xf32> to vector<128x1xf32>
    %73 = vector.broadcast %72 : vector<128x1xf32> to vector<128x128xf32>
    %74 = arith.subf %70, %73 : vector<128x128xf32>
    %75 = math.exp %74 : vector<128x128xf32>
    %cst_72 = arith.constant dense<0.000000e+00> : vector<128xf32>
    %76 = vector.multi_reduction <add>, %75, %cst_72 [1] : vector<128x128xf32> to vector<128xf32>
    %77 = vector.shape_cast %76 : vector<128xf32> to vector<128x1xf32>
    %78 = tpu.reciprocal %77 {approx = true} : vector<128x1xf32> -> vector<128x1xf32>
    %79 = vector.broadcast %78 : vector<128x1xf32> to vector<128x128xf32>
    %80 = arith.mulf %75, %79 : vector<128x128xf32>
    %81 = arith.truncf %80 : vector<128x128xf32> to vector<128x128xbf16>
    %82 = vector.extract_strided_slice %43 {offsets = [0, 8], sizes = [128, 8], strides = [1, 1]} : vector<128x32xbf16> to vector<128x8xbf16>
    %cst_73 = arith.constant dense<0.000000e+00> : vector<128x8xf32>
    %83 = tpu.matmul %81, %82, %cst_73 {dimension_numbers = #tpu.dot_dimension_numbers<[1], [0], [0], [1], [0, 0, 1, 1], [], []>} : vector<128x128xbf16>, vector<128x8xbf16>, vector<128x8xf32> -> vector<128x8xf32>
    %84 = arith.truncf %83 : vector<128x8xf32> to vector<128x8xbf16>
    %85 = vector.extract_strided_slice %2 {offsets = [1, 0, 0], sizes = [1, 8, 32], strides = [1, 1, 1]} : vector<4x8x32xbf16> to vector<1x8x32xbf16>
    %86 = vector.shape_cast %85 : vector<1x8x32xbf16> to vector<8x32xbf16>
    %cst_74 = arith.constant dense<0.000000e+00> : vector<128x32xf32>
    %87 = tpu.matmul %84, %86, %cst_74 {dimension_numbers = #tpu.dot_dimension_numbers<[1], [0], [0], [1], [0, 0, 1, 1], [], []>} : vector<128x8xbf16>, vector<8x32xbf16>, vector<128x32xf32> -> vector<128x32xf32>
    %88 = arith.addf %66, %87 : vector<128x32xf32>
    %89 = vector.extract_strided_slice %41 {offsets = [0, 16], sizes = [128, 8], strides = [1, 1]} : vector<128x32xbf16> to vector<128x8xbf16>
    %90 = vector.extract_strided_slice %42 {offsets = [0, 16], sizes = [128, 8], strides = [1, 1]} : vector<128x32xbf16> to vector<128x8xbf16>
    %cst_75 = arith.constant dense<0.000000e+00> : vector<128x128xf32>
    %91 = tpu.matmul %89, %90, %cst_75 {dimension_numbers = #tpu.dot_dimension_numbers<[1], [1], [0], [0], [0, 0, 1, 0], [], []>} : vector<128x8xbf16>, vector<128x8xbf16>, vector<128x128xf32> -> vector<128x128xf32>
    %92 = arith.addf %91, %30 : vector<128x128xf32>
    %cst_76 = arith.constant dense<0xFF800000> : vector<128xf32>
    %93 = vector.multi_reduction <maximumf>, %92, %cst_76 [1] : vector<128x128xf32> to vector<128xf32>
    %94 = vector.shape_cast %93 : vector<128xf32> to vector<128x1xf32>
    %95 = vector.broadcast %94 : vector<128x1xf32> to vector<128x128xf32>
    %96 = arith.subf %92, %95 : vector<128x128xf32>
    %97 = math.exp %96 : vector<128x128xf32>
    %cst_77 = arith.constant dense<0.000000e+00> : vector<128xf32>
    %98 = vector.multi_reduction <add>, %97, %cst_77 [1] : vector<128x128xf32> to vector<128xf32>
    %99 = vector.shape_cast %98 : vector<128xf32> to vector<128x1xf32>
    %100 = tpu.reciprocal %99 {approx = true} : vector<128x1xf32> -> vector<128x1xf32>
    %101 = vector.broadcast %100 : vector<128x1xf32> to vector<128x128xf32>
    %102 = arith.mulf %97, %101 : vector<128x128xf32>
    %103 = arith.truncf %102 : vector<128x128xf32> to vector<128x128xbf16>
    %104 = vector.extract_strided_slice %43 {offsets = [0, 16], sizes = [128, 8], strides = [1, 1]} : vector<128x32xbf16> to vector<128x8xbf16>
    %cst_78 = arith.constant dense<0.000000e+00> : vector<128x8xf32>
    %105 = tpu.matmul %103, %104, %cst_78 {dimension_numbers = #tpu.dot_dimension_numbers<[1], [0], [0], [1], [0, 0, 1, 1], [], []>} : vector<128x128xbf16>, vector<128x8xbf16>, vector<128x8xf32> -> vector<128x8xf32>
    %106 = arith.truncf %105 : vector<128x8xf32> to vector<128x8xbf16>
    %107 = vector.extract_strided_slice %2 {offsets = [2, 0, 0], sizes = [1, 8, 32], strides = [1, 1, 1]} : vector<4x8x32xbf16> to vector<1x8x32xbf16>
    %108 = vector.shape_cast %107 : vector<1x8x32xbf16> to vector<8x32xbf16>
    %cst_79 = arith.constant dense<0.000000e+00> : vector<128x32xf32>
    %109 = tpu.matmul %106, %108, %cst_79 {dimension_numbers = #tpu.dot_dimension_numbers<[1], [0], [0], [1], [0, 0, 1, 1], [], []>} : vector<128x8xbf16>, vector<8x32xbf16>, vector<128x32xf32> -> vector<128x32xf32>
    %110 = arith.addf %88, %109 : vector<128x32xf32>
    %111 = vector.extract_strided_slice %41 {offsets = [0, 24], sizes = [128, 8], strides = [1, 1]} : vector<128x32xbf16> to vector<128x8xbf16>
    %112 = vector.extract_strided_slice %42 {offsets = [0, 24], sizes = [128, 8], strides = [1, 1]} : vector<128x32xbf16> to vector<128x8xbf16>
    %cst_80 = arith.constant dense<0.000000e+00> : vector<128x128xf32>
    %113 = tpu.matmul %111, %112, %cst_80 {dimension_numbers = #tpu.dot_dimension_numbers<[1], [1], [0], [0], [0, 0, 1, 0], [], []>} : vector<128x8xbf16>, vector<128x8xbf16>, vector<128x128xf32> -> vector<128x128xf32>
    %114 = arith.addf %113, %30 : vector<128x128xf32>
    %cst_81 = arith.constant dense<0xFF800000> : vector<128xf32>
    %115 = vector.multi_reduction <maximumf>, %114, %cst_81 [1] : vector<128x128xf32> to vector<128xf32>
    %116 = vector.shape_cast %115 : vector<128xf32> to vector<128x1xf32>
    %117 = vector.broadcast %116 : vector<128x1xf32> to vector<128x128xf32>
    %118 = arith.subf %114, %117 : vector<128x128xf32>
    %119 = math.exp %118 : vector<128x128xf32>
    %cst_82 = arith.constant dense<0.000000e+00> : vector<128xf32>
    %120 = vector.multi_reduction <add>, %119, %cst_82 [1] : vector<128x128xf32> to vector<128xf32>
    %121 = vector.shape_cast %120 : vector<128xf32> to vector<128x1xf32>
    %122 = tpu.reciprocal %121 {approx = true} : vector<128x1xf32> -> vector<128x1xf32>
    %123 = vector.broadcast %122 : vector<128x1xf32> to vector<128x128xf32>
    %124 = arith.mulf %119, %123 : vector<128x128xf32>
    %125 = arith.truncf %124 : vector<128x128xf32> to vector<128x128xbf16>
    %126 = vector.extract_strided_slice %43 {offsets = [0, 24], sizes = [128, 8], strides = [1, 1]} : vector<128x32xbf16> to vector<128x8xbf16>
    %cst_83 = arith.constant dense<0.000000e+00> : vector<128x8xf32>
    %127 = tpu.matmul %125, %126, %cst_83 {dimension_numbers = #tpu.dot_dimension_numbers<[1], [0], [0], [1], [0, 0, 1, 1], [], []>} : vector<128x128xbf16>, vector<128x8xbf16>, vector<128x8xf32> -> vector<128x8xf32>
    %128 = arith.truncf %127 : vector<128x8xf32> to vector<128x8xbf16>
    %129 = vector.extract_strided_slice %2 {offsets = [3, 0, 0], sizes = [1, 8, 32], strides = [1, 1, 1]} : vector<4x8x32xbf16> to vector<1x8x32xbf16>
    %130 = vector.shape_cast %129 : vector<1x8x32xbf16> to vector<8x32xbf16>
    %cst_84 = arith.constant dense<0.000000e+00> : vector<128x32xf32>
    %131 = tpu.matmul %128, %130, %cst_84 {dimension_numbers = #tpu.dot_dimension_numbers<[1], [0], [0], [1], [0, 0, 1, 1], [], []>} : vector<128x8xbf16>, vector<8x32xbf16>, vector<128x32xf32> -> vector<128x32xf32>
    %132 = arith.addf %110, %131 : vector<128x32xf32>
    %133 = vector.broadcast %3 : vector<1x32xf32> to vector<128x32xf32>
    %134 = arith.addf %132, %133 : vector<128x32xf32>
    %135 = arith.addf %27, %134 : vector<128x32xf32>
    %cst_85 = arith.constant dense<0.000000e+00> : vector<128xf32>
    %136 = vector.multi_reduction <add>, %135, %cst_85 [1] : vector<128x32xf32> to vector<128xf32>
    %137 = vector.shape_cast %136 : vector<128xf32> to vector<128x1xf32>
    %cst_86 = arith.constant 3.200000e+01 : f32
    %138 = vector.broadcast %cst_86 : f32 to vector<128x1xf32>
    %139 = arith.divf %137, %138 : vector<128x1xf32>
    %140 = vector.broadcast %139 : vector<128x1xf32> to vector<128x32xf32>
    %141 = arith.subf %135, %140 : vector<128x32xf32>
    %142 = arith.mulf %141, %141 : vector<128x32xf32>
    %cst_87 = arith.constant dense<0.000000e+00> : vector<128xf32>
    %143 = vector.multi_reduction <add>, %142, %cst_87 [1] : vector<128x32xf32> to vector<128xf32>
    %144 = vector.shape_cast %143 : vector<128xf32> to vector<128x1xf32>
    %cst_88 = arith.constant 3.200000e+01 : f32
    %145 = vector.broadcast %cst_88 : f32 to vector<128x1xf32>
    %146 = arith.divf %144, %145 : vector<128x1xf32>
    %147 = vector.broadcast %139 : vector<128x1xf32> to vector<128x32xf32>
    %148 = arith.subf %135, %147 : vector<128x32xf32>
    %cst_89 = arith.constant 9.99999974E-6 : f32
    %149 = vector.broadcast %cst_89 : f32 to vector<128x1xf32>
    %150 = arith.addf %146, %149 : vector<128x1xf32>
    %151 = math.rsqrt %150 : vector<128x1xf32>
    %152 = vector.broadcast %151 : vector<128x1xf32> to vector<128x32xf32>
    %153 = arith.mulf %148, %152 : vector<128x32xf32>
    %154 = vector.broadcast %8 : vector<1x32xf32> to vector<128x32xf32>
    %155 = arith.mulf %153, %154 : vector<128x32xf32>
    %156 = vector.broadcast %9 : vector<1x32xf32> to vector<128x32xf32>
    %157 = arith.addf %155, %156 : vector<128x32xf32>
    %158 = arith.truncf %157 : vector<128x32xf32> to vector<128x32xbf16>
    %cst_90 = arith.constant dense<0.000000e+00> : vector<128x64xf32>
    %159 = tpu.matmul %158, %4, %cst_90 {dimension_numbers = #tpu.dot_dimension_numbers<[1], [0], [0], [1], [0, 0, 1, 1], [], []>} : vector<128x32xbf16>, vector<32x64xbf16>, vector<128x64xf32> -> vector<128x64xf32>
    %160 = vector.broadcast %5 : vector<1x64xf32> to vector<128x64xf32>
    %161 = arith.addf %159, %160 : vector<128x64xf32>
    %cst_91 = arith.constant 0.000000e+00 : f32
    %162 = vector.broadcast %cst_91 : f32 to vector<128x64xf32>
    %163 = arith.maximumf %161, %162 : vector<128x64xf32>
    %164 = arith.truncf %163 : vector<128x64xf32> to vector<128x64xbf16>
    %cst_92 = arith.constant dense<0.000000e+00> : vector<128x32xf32>
    %165 = tpu.matmul %164, %6, %cst_92 {dimension_numbers = #tpu.dot_dimension_numbers<[1], [0], [0], [1], [0, 0, 1, 1], [], []>} : vector<128x64xbf16>, vector<64x32xbf16>, vector<128x32xf32> -> vector<128x32xf32>
    %166 = vector.broadcast %7 : vector<1x32xf32> to vector<128x32xf32>
    %167 = arith.addf %165, %166 : vector<128x32xf32>
    %168 = arith.addf %157, %167 : vector<128x32xf32>
    %cst_93 = arith.constant dense<0.000000e+00> : vector<128xf32>
    %169 = vector.multi_reduction <add>, %168, %cst_93 [1] : vector<128x32xf32> to vector<128xf32>
    %170 = vector.shape_cast %169 : vector<128xf32> to vector<128x1xf32>
    %cst_94 = arith.constant 3.200000e+01 : f32
    %171 = vector.broadcast %cst_94 : f32 to vector<128x1xf32>
    %172 = arith.divf %170, %171 : vector<128x1xf32>
    %173 = vector.broadcast %172 : vector<128x1xf32> to vector<128x32xf32>
    %174 = arith.subf %168, %173 : vector<128x32xf32>
    %175 = arith.mulf %174, %174 : vector<128x32xf32>
    %cst_95 = arith.constant dense<0.000000e+00> : vector<128xf32>
    %176 = vector.multi_reduction <add>, %175, %cst_95 [1] : vector<128x32xf32> to vector<128xf32>
    %177 = vector.shape_cast %176 : vector<128xf32> to vector<128x1xf32>
    %cst_96 = arith.constant 3.200000e+01 : f32
    %178 = vector.broadcast %cst_96 : f32 to vector<128x1xf32>
    %179 = arith.divf %177, %178 : vector<128x1xf32>
    %180 = vector.broadcast %172 : vector<128x1xf32> to vector<128x32xf32>
    %181 = arith.subf %168, %180 : vector<128x32xf32>
    %cst_97 = arith.constant 9.99999974E-6 : f32
    %182 = vector.broadcast %cst_97 : f32 to vector<128x1xf32>
    %183 = arith.addf %179, %182 : vector<128x1xf32>
    %184 = math.rsqrt %183 : vector<128x1xf32>
    %185 = vector.broadcast %184 : vector<128x1xf32> to vector<128x32xf32>
    %186 = arith.mulf %181, %185 : vector<128x32xf32>
    %187 = vector.broadcast %10 : vector<1x32xf32> to vector<128x32xf32>
    %188 = arith.mulf %186, %187 : vector<128x32xf32>
    %189 = vector.broadcast %11 : vector<1x32xf32> to vector<128x32xf32>
    %190 = arith.addf %188, %189 : vector<128x32xf32>
    %191 = arith.truncf %190 : vector<128x32xf32> to vector<128x32xbf16>
    %cst_98 = arith.constant dense<0.000000e+00> : vector<128x32xf32>
    %192 = tpu.matmul %191, %12, %cst_98 {dimension_numbers = #tpu.dot_dimension_numbers<[1], [0], [0], [1], [0, 0, 1, 1], [], []>} : vector<128x32xbf16>, vector<32x32xbf16>, vector<128x32xf32> -> vector<128x32xf32>
    %193 = vector.broadcast %13 : vector<1x32xf32> to vector<128x32xf32>
    %194 = arith.addf %192, %193 : vector<128x32xf32>
    %195 = arith.truncf %29 : vector<128x32xf32> to vector<128x32xbf16>
    %cst_99 = arith.constant dense<0.000000e+00> : vector<128x64xf32>
    %196 = tpu.matmul %195, %14, %cst_99 {dimension_numbers = #tpu.dot_dimension_numbers<[1], [0], [0], [1], [0, 0, 1, 1], [], []>} : vector<128x32xbf16>, vector<32x64xbf16>, vector<128x64xf32> -> vector<128x64xf32>
    %197 = vector.broadcast %15 : vector<1x64xf32> to vector<128x64xf32>
    %198 = arith.addf %196, %197 : vector<128x64xf32>
    %199 = vector.extract_strided_slice %198 {offsets = [0, 0], sizes = [128, 32], strides = [1, 1]} : vector<128x64xf32> to vector<128x32xf32>
    %200 = vector.extract_strided_slice %198 {offsets = [0, 32], sizes = [128, 32], strides = [1, 1]} : vector<128x64xf32> to vector<128x32xf32>
    %cst_100 = arith.constant 0.353553385 : f32
    %201 = vector.broadcast %cst_100 : f32 to vector<128x32xf32>
    %202 = arith.mulf %194, %201 : vector<128x32xf32>
    %203 = arith.truncf %202 : vector<128x32xf32> to vector<128x32xbf16>
    %204 = arith.truncf %199 : vector<128x32xf32> to vector<128x32xbf16>
    %205 = arith.truncf %200 : vector<128x32xf32> to vector<128x32xbf16>
    %cst_101 = arith.constant 0.000000e+00 : f32
    %206 = vector.broadcast %cst_101 : f32 to vector<128x32xf32>
    %207 = vector.extract_strided_slice %203 {offsets = [0, 0], sizes = [128, 8], strides = [1, 1]} : vector<128x32xbf16> to vector<128x8xbf16>
    %208 = vector.extract_strided_slice %204 {offsets = [0, 0], sizes = [128, 8], strides = [1, 1]} : vector<128x32xbf16> to vector<128x8xbf16>
    %cst_102 = arith.constant dense<0.000000e+00> : vector<128x128xf32>
    %209 = tpu.matmul %207, %208, %cst_102 {dimension_numbers = #tpu.dot_dimension_numbers<[1], [1], [0], [0], [0, 0, 1, 0], [], []>} : vector<128x8xbf16>, vector<128x8xbf16>, vector<128x128xf32> -> vector<128x128xf32>
    %210 = arith.addf %209, %31 : vector<128x128xf32>
    %cst_103 = arith.constant dense<0xFF800000> : vector<128xf32>
    %211 = vector.multi_reduction <maximumf>, %210, %cst_103 [1] : vector<128x128xf32> to vector<128xf32>
    %212 = vector.shape_cast %211 : vector<128xf32> to vector<128x1xf32>
    %213 = vector.broadcast %212 : vector<128x1xf32> to vector<128x128xf32>
    %214 = arith.subf %210, %213 : vector<128x128xf32>
    %215 = math.exp %214 : vector<128x128xf32>
    %cst_104 = arith.constant dense<0.000000e+00> : vector<128xf32>
    %216 = vector.multi_reduction <add>, %215, %cst_104 [1] : vector<128x128xf32> to vector<128xf32>
    %217 = vector.shape_cast %216 : vector<128xf32> to vector<128x1xf32>
    %218 = tpu.reciprocal %217 {approx = true} : vector<128x1xf32> -> vector<128x1xf32>
    %219 = vector.broadcast %218 : vector<128x1xf32> to vector<128x128xf32>
    %220 = arith.mulf %215, %219 : vector<128x128xf32>
    %221 = arith.truncf %220 : vector<128x128xf32> to vector<128x128xbf16>
    %222 = vector.extract_strided_slice %205 {offsets = [0, 0], sizes = [128, 8], strides = [1, 1]} : vector<128x32xbf16> to vector<128x8xbf16>
    %cst_105 = arith.constant dense<0.000000e+00> : vector<128x8xf32>
    %223 = tpu.matmul %221, %222, %cst_105 {dimension_numbers = #tpu.dot_dimension_numbers<[1], [0], [0], [1], [0, 0, 1, 1], [], []>} : vector<128x128xbf16>, vector<128x8xbf16>, vector<128x8xf32> -> vector<128x8xf32>
    %224 = arith.truncf %223 : vector<128x8xf32> to vector<128x8xbf16>
    %225 = vector.extract_strided_slice %16 {offsets = [0, 0, 0], sizes = [1, 8, 32], strides = [1, 1, 1]} : vector<4x8x32xbf16> to vector<1x8x32xbf16>
    %226 = vector.shape_cast %225 : vector<1x8x32xbf16> to vector<8x32xbf16>
    %cst_106 = arith.constant dense<0.000000e+00> : vector<128x32xf32>
    %227 = tpu.matmul %224, %226, %cst_106 {dimension_numbers = #tpu.dot_dimension_numbers<[1], [0], [0], [1], [0, 0, 1, 1], [], []>} : vector<128x8xbf16>, vector<8x32xbf16>, vector<128x32xf32> -> vector<128x32xf32>
    %228 = arith.addf %206, %227 : vector<128x32xf32>
    %229 = vector.extract_strided_slice %203 {offsets = [0, 8], sizes = [128, 8], strides = [1, 1]} : vector<128x32xbf16> to vector<128x8xbf16>
    %230 = vector.extract_strided_slice %204 {offsets = [0, 8], sizes = [128, 8], strides = [1, 1]} : vector<128x32xbf16> to vector<128x8xbf16>
    %cst_107 = arith.constant dense<0.000000e+00> : vector<128x128xf32>
    %231 = tpu.matmul %229, %230, %cst_107 {dimension_numbers = #tpu.dot_dimension_numbers<[1], [1], [0], [0], [0, 0, 1, 0], [], []>} : vector<128x8xbf16>, vector<128x8xbf16>, vector<128x128xf32> -> vector<128x128xf32>
    %232 = arith.addf %231, %31 : vector<128x128xf32>
    %cst_108 = arith.constant dense<0xFF800000> : vector<128xf32>
    %233 = vector.multi_reduction <maximumf>, %232, %cst_108 [1] : vector<128x128xf32> to vector<128xf32>
    %234 = vector.shape_cast %233 : vector<128xf32> to vector<128x1xf32>
    %235 = vector.broadcast %234 : vector<128x1xf32> to vector<128x128xf32>
    %236 = arith.subf %232, %235 : vector<128x128xf32>
    %237 = math.exp %236 : vector<128x128xf32>
    %cst_109 = arith.constant dense<0.000000e+00> : vector<128xf32>
    %238 = vector.multi_reduction <add>, %237, %cst_109 [1] : vector<128x128xf32> to vector<128xf32>
    %239 = vector.shape_cast %238 : vector<128xf32> to vector<128x1xf32>
    %240 = tpu.reciprocal %239 {approx = true} : vector<128x1xf32> -> vector<128x1xf32>
    %241 = vector.broadcast %240 : vector<128x1xf32> to vector<128x128xf32>
    %242 = arith.mulf %237, %241 : vector<128x128xf32>
    %243 = arith.truncf %242 : vector<128x128xf32> to vector<128x128xbf16>
    %244 = vector.extract_strided_slice %205 {offsets = [0, 8], sizes = [128, 8], strides = [1, 1]} : vector<128x32xbf16> to vector<128x8xbf16>
    %cst_110 = arith.constant dense<0.000000e+00> : vector<128x8xf32>
    %245 = tpu.matmul %243, %244, %cst_110 {dimension_numbers = #tpu.dot_dimension_numbers<[1], [0], [0], [1], [0, 0, 1, 1], [], []>} : vector<128x128xbf16>, vector<128x8xbf16>, vector<128x8xf32> -> vector<128x8xf32>
    %246 = arith.truncf %245 : vector<128x8xf32> to vector<128x8xbf16>
    %247 = vector.extract_strided_slice %16 {offsets = [1, 0, 0], sizes = [1, 8, 32], strides = [1, 1, 1]} : vector<4x8x32xbf16> to vector<1x8x32xbf16>
    %248 = vector.shape_cast %247 : vector<1x8x32xbf16> to vector<8x32xbf16>
    %cst_111 = arith.constant dense<0.000000e+00> : vector<128x32xf32>
    %249 = tpu.matmul %246, %248, %cst_111 {dimension_numbers = #tpu.dot_dimension_numbers<[1], [0], [0], [1], [0, 0, 1, 1], [], []>} : vector<128x8xbf16>, vector<8x32xbf16>, vector<128x32xf32> -> vector<128x32xf32>
    %250 = arith.addf %228, %249 : vector<128x32xf32>
    %251 = vector.extract_strided_slice %203 {offsets = [0, 16], sizes = [128, 8], strides = [1, 1]} : vector<128x32xbf16> to vector<128x8xbf16>
    %252 = vector.extract_strided_slice %204 {offsets = [0, 16], sizes = [128, 8], strides = [1, 1]} : vector<128x32xbf16> to vector<128x8xbf16>
    %cst_112 = arith.constant dense<0.000000e+00> : vector<128x128xf32>
    %253 = tpu.matmul %251, %252, %cst_112 {dimension_numbers = #tpu.dot_dimension_numbers<[1], [1], [0], [0], [0, 0, 1, 0], [], []>} : vector<128x8xbf16>, vector<128x8xbf16>, vector<128x128xf32> -> vector<128x128xf32>
    %254 = arith.addf %253, %31 : vector<128x128xf32>
    %cst_113 = arith.constant dense<0xFF800000> : vector<128xf32>
    %255 = vector.multi_reduction <maximumf>, %254, %cst_113 [1] : vector<128x128xf32> to vector<128xf32>
    %256 = vector.shape_cast %255 : vector<128xf32> to vector<128x1xf32>
    %257 = vector.broadcast %256 : vector<128x1xf32> to vector<128x128xf32>
    %258 = arith.subf %254, %257 : vector<128x128xf32>
    %259 = math.exp %258 : vector<128x128xf32>
    %cst_114 = arith.constant dense<0.000000e+00> : vector<128xf32>
    %260 = vector.multi_reduction <add>, %259, %cst_114 [1] : vector<128x128xf32> to vector<128xf32>
    %261 = vector.shape_cast %260 : vector<128xf32> to vector<128x1xf32>
    %262 = tpu.reciprocal %261 {approx = true} : vector<128x1xf32> -> vector<128x1xf32>
    %263 = vector.broadcast %262 : vector<128x1xf32> to vector<128x128xf32>
    %264 = arith.mulf %259, %263 : vector<128x128xf32>
    %265 = arith.truncf %264 : vector<128x128xf32> to vector<128x128xbf16>
    %266 = vector.extract_strided_slice %205 {offsets = [0, 16], sizes = [128, 8], strides = [1, 1]} : vector<128x32xbf16> to vector<128x8xbf16>
    %cst_115 = arith.constant dense<0.000000e+00> : vector<128x8xf32>
    %267 = tpu.matmul %265, %266, %cst_115 {dimension_numbers = #tpu.dot_dimension_numbers<[1], [0], [0], [1], [0, 0, 1, 1], [], []>} : vector<128x128xbf16>, vector<128x8xbf16>, vector<128x8xf32> -> vector<128x8xf32>
    %268 = arith.truncf %267 : vector<128x8xf32> to vector<128x8xbf16>
    %269 = vector.extract_strided_slice %16 {offsets = [2, 0, 0], sizes = [1, 8, 32], strides = [1, 1, 1]} : vector<4x8x32xbf16> to vector<1x8x32xbf16>
    %270 = vector.shape_cast %269 : vector<1x8x32xbf16> to vector<8x32xbf16>
    %cst_116 = arith.constant dense<0.000000e+00> : vector<128x32xf32>
    %271 = tpu.matmul %268, %270, %cst_116 {dimension_numbers = #tpu.dot_dimension_numbers<[1], [0], [0], [1], [0, 0, 1, 1], [], []>} : vector<128x8xbf16>, vector<8x32xbf16>, vector<128x32xf32> -> vector<128x32xf32>
    %272 = arith.addf %250, %271 : vector<128x32xf32>
    %273 = vector.extract_strided_slice %203 {offsets = [0, 24], sizes = [128, 8], strides = [1, 1]} : vector<128x32xbf16> to vector<128x8xbf16>
    %274 = vector.extract_strided_slice %204 {offsets = [0, 24], sizes = [128, 8], strides = [1, 1]} : vector<128x32xbf16> to vector<128x8xbf16>
    %cst_117 = arith.constant dense<0.000000e+00> : vector<128x128xf32>
    %275 = tpu.matmul %273, %274, %cst_117 {dimension_numbers = #tpu.dot_dimension_numbers<[1], [1], [0], [0], [0, 0, 1, 0], [], []>} : vector<128x8xbf16>, vector<128x8xbf16>, vector<128x128xf32> -> vector<128x128xf32>
    %276 = arith.addf %275, %31 : vector<128x128xf32>
    %cst_118 = arith.constant dense<0xFF800000> : vector<128xf32>
    %277 = vector.multi_reduction <maximumf>, %276, %cst_118 [1] : vector<128x128xf32> to vector<128xf32>
    %278 = vector.shape_cast %277 : vector<128xf32> to vector<128x1xf32>
    %279 = vector.broadcast %278 : vector<128x1xf32> to vector<128x128xf32>
    %280 = arith.subf %276, %279 : vector<128x128xf32>
    %281 = math.exp %280 : vector<128x128xf32>
    %cst_119 = arith.constant dense<0.000000e+00> : vector<128xf32>
    %282 = vector.multi_reduction <add>, %281, %cst_119 [1] : vector<128x128xf32> to vector<128xf32>
    %283 = vector.shape_cast %282 : vector<128xf32> to vector<128x1xf32>
    %284 = tpu.reciprocal %283 {approx = true} : vector<128x1xf32> -> vector<128x1xf32>
    %285 = vector.broadcast %284 : vector<128x1xf32> to vector<128x128xf32>
    %286 = arith.mulf %281, %285 : vector<128x128xf32>
    %287 = arith.truncf %286 : vector<128x128xf32> to vector<128x128xbf16>
    %288 = vector.extract_strided_slice %205 {offsets = [0, 24], sizes = [128, 8], strides = [1, 1]} : vector<128x32xbf16> to vector<128x8xbf16>
    %cst_120 = arith.constant dense<0.000000e+00> : vector<128x8xf32>
    %289 = tpu.matmul %287, %288, %cst_120 {dimension_numbers = #tpu.dot_dimension_numbers<[1], [0], [0], [1], [0, 0, 1, 1], [], []>} : vector<128x128xbf16>, vector<128x8xbf16>, vector<128x8xf32> -> vector<128x8xf32>
    %290 = arith.truncf %289 : vector<128x8xf32> to vector<128x8xbf16>
    %291 = vector.extract_strided_slice %16 {offsets = [3, 0, 0], sizes = [1, 8, 32], strides = [1, 1, 1]} : vector<4x8x32xbf16> to vector<1x8x32xbf16>
    %292 = vector.shape_cast %291 : vector<1x8x32xbf16> to vector<8x32xbf16>
    %cst_121 = arith.constant dense<0.000000e+00> : vector<128x32xf32>
    %293 = tpu.matmul %290, %292, %cst_121 {dimension_numbers = #tpu.dot_dimension_numbers<[1], [0], [0], [1], [0, 0, 1, 1], [], []>} : vector<128x8xbf16>, vector<8x32xbf16>, vector<128x32xf32> -> vector<128x32xf32>
    %294 = arith.addf %272, %293 : vector<128x32xf32>
    %295 = vector.broadcast %17 : vector<1x32xf32> to vector<128x32xf32>
    %296 = arith.addf %294, %295 : vector<128x32xf32>
    %297 = arith.addf %190, %296 : vector<128x32xf32>
    %cst_122 = arith.constant dense<0.000000e+00> : vector<128xf32>
    %298 = vector.multi_reduction <add>, %297, %cst_122 [1] : vector<128x32xf32> to vector<128xf32>
    %299 = vector.shape_cast %298 : vector<128xf32> to vector<128x1xf32>
    %cst_123 = arith.constant 3.200000e+01 : f32
    %300 = vector.broadcast %cst_123 : f32 to vector<128x1xf32>
    %301 = arith.divf %299, %300 : vector<128x1xf32>
    %302 = vector.broadcast %301 : vector<128x1xf32> to vector<128x32xf32>
    %303 = arith.subf %297, %302 : vector<128x32xf32>
    %304 = arith.mulf %303, %303 : vector<128x32xf32>
    %cst_124 = arith.constant dense<0.000000e+00> : vector<128xf32>
    %305 = vector.multi_reduction <add>, %304, %cst_124 [1] : vector<128x32xf32> to vector<128xf32>
    %306 = vector.shape_cast %305 : vector<128xf32> to vector<128x1xf32>
    %cst_125 = arith.constant 3.200000e+01 : f32
    %307 = vector.broadcast %cst_125 : f32 to vector<128x1xf32>
    %308 = arith.divf %306, %307 : vector<128x1xf32>
    %309 = vector.broadcast %301 : vector<128x1xf32> to vector<128x32xf32>
    %310 = arith.subf %297, %309 : vector<128x32xf32>
    %cst_126 = arith.constant 9.99999974E-6 : f32
    %311 = vector.broadcast %cst_126 : f32 to vector<128x1xf32>
    %312 = arith.addf %308, %311 : vector<128x1xf32>
    %313 = math.rsqrt %312 : vector<128x1xf32>
    %314 = vector.broadcast %313 : vector<128x1xf32> to vector<128x32xf32>
    %315 = arith.mulf %310, %314 : vector<128x32xf32>
    %316 = vector.broadcast %22 : vector<1x32xf32> to vector<128x32xf32>
    %317 = arith.mulf %315, %316 : vector<128x32xf32>
    %318 = vector.broadcast %23 : vector<1x32xf32> to vector<128x32xf32>
    %319 = arith.addf %317, %318 : vector<128x32xf32>
    %320 = arith.truncf %319 : vector<128x32xf32> to vector<128x32xbf16>
    %cst_127 = arith.constant dense<0.000000e+00> : vector<128x64xf32>
    %321 = tpu.matmul %320, %18, %cst_127 {dimension_numbers = #tpu.dot_dimension_numbers<[1], [0], [0], [1], [0, 0, 1, 1], [], []>} : vector<128x32xbf16>, vector<32x64xbf16>, vector<128x64xf32> -> vector<128x64xf32>
    %322 = vector.broadcast %19 : vector<1x64xf32> to vector<128x64xf32>
    %323 = arith.addf %321, %322 : vector<128x64xf32>
    %cst_128 = arith.constant 0.000000e+00 : f32
    %324 = vector.broadcast %cst_128 : f32 to vector<128x64xf32>
    %325 = arith.maximumf %323, %324 : vector<128x64xf32>
    %326 = arith.truncf %325 : vector<128x64xf32> to vector<128x64xbf16>
    %cst_129 = arith.constant dense<0.000000e+00> : vector<128x32xf32>
    %327 = tpu.matmul %326, %20, %cst_129 {dimension_numbers = #tpu.dot_dimension_numbers<[1], [0], [0], [1], [0, 0, 1, 1], [], []>} : vector<128x64xbf16>, vector<64x32xbf16>, vector<128x32xf32> -> vector<128x32xf32>
    %328 = vector.broadcast %21 : vector<1x32xf32> to vector<128x32xf32>
    %329 = arith.addf %327, %328 : vector<128x32xf32>
    %330 = arith.addf %319, %329 : vector<128x32xf32>
    %cst_130 = arith.constant dense<0.000000e+00> : vector<128xf32>
    %331 = vector.multi_reduction <add>, %330, %cst_130 [1] : vector<128x32xf32> to vector<128xf32>
    %332 = vector.shape_cast %331 : vector<128xf32> to vector<128x1xf32>
    %cst_131 = arith.constant 3.200000e+01 : f32
    %333 = vector.broadcast %cst_131 : f32 to vector<128x1xf32>
    %334 = arith.divf %332, %333 : vector<128x1xf32>
    %335 = vector.broadcast %334 : vector<128x1xf32> to vector<128x32xf32>
    %336 = arith.subf %330, %335 : vector<128x32xf32>
    %337 = arith.mulf %336, %336 : vector<128x32xf32>
    %cst_132 = arith.constant dense<0.000000e+00> : vector<128xf32>
    %338 = vector.multi_reduction <add>, %337, %cst_132 [1] : vector<128x32xf32> to vector<128xf32>
    %339 = vector.shape_cast %338 : vector<128xf32> to vector<128x1xf32>
    %cst_133 = arith.constant 3.200000e+01 : f32
    %340 = vector.broadcast %cst_133 : f32 to vector<128x1xf32>
    %341 = arith.divf %339, %340 : vector<128x1xf32>
    %342 = vector.broadcast %334 : vector<128x1xf32> to vector<128x32xf32>
    %343 = arith.subf %330, %342 : vector<128x32xf32>
    %cst_134 = arith.constant 9.99999974E-6 : f32
    %344 = vector.broadcast %cst_134 : f32 to vector<128x1xf32>
    %345 = arith.addf %341, %344 : vector<128x1xf32>
    %346 = math.rsqrt %345 : vector<128x1xf32>
    %347 = vector.broadcast %346 : vector<128x1xf32> to vector<128x32xf32>
    %348 = arith.mulf %343, %347 : vector<128x32xf32>
    %349 = vector.broadcast %24 : vector<1x32xf32> to vector<128x32xf32>
    %350 = arith.mulf %348, %349 : vector<128x32xf32>
    %351 = vector.broadcast %25 : vector<1x32xf32> to vector<128x32xf32>
    %352 = arith.addf %350, %351 : vector<128x32xf32>
    %353 = vector.shape_cast %190 : vector<128x32xf32> to vector<16x8x32xf32>
    %cst_135 = arith.constant dense<0.000000e+00> : vector<16x8xf32>
    %354 = vector.multi_reduction <add>, %353, %cst_135 [2] : vector<16x8x32xf32> to vector<16x8xf32>
    %cst_136 = arith.constant 3.125000e-02 : f32
    %355 = vector.broadcast %cst_136 : f32 to vector<16x8xf32>
    %356 = arith.mulf %354, %355 : vector<16x8xf32>
    %357 = vector.shape_cast %352 : vector<128x32xf32> to vector<16x8x32xf32>
    %cst_137 = arith.constant dense<0.000000e+00> : vector<16x8xf32>
    %358 = vector.multi_reduction <add>, %357, %cst_137 [2] : vector<16x8x32xf32> to vector<16x8xf32>
    %cst_138 = arith.constant 3.125000e-02 : f32
    %359 = vector.broadcast %cst_138 : f32 to vector<16x8xf32>
    %360 = arith.mulf %358, %359 : vector<16x8xf32>
    %361 = tpu.concatenate %356, %360 in 1 : vector<16x8xf32>, vector<16x8xf32> -> vector<16x16xf32>
    %c0_139 = arith.constant 0 : index
    %c0_140 = arith.constant 0 : index
    %362 = vector.load %arg31[%c0_139, %c0_140] : memref<16x16xf32, #tpu.memory_space<vmem>>, vector<16x16xf32>
    tpu.vector_store %arg31[%c0_139, %c0_140], %361 {strides = array<i32>} : memref<16x16xf32, #tpu.memory_space<vmem>>, vector<16x16xf32>,
    return
  }
  func.func @transform_0(%arg0: i32) -> (i32, i32, i32) {
    %c0_i32 = arith.constant 0 : i32
    %c0_i32_0 = arith.constant 0 : i32
    %c0_i32_1 = arith.constant 0 : i32
    return %arg0, %c0_i32, %c0_i32_0 : i32, i32, i32
  }
  func.func @transform_1(%arg0: i32) -> (i32, i32, i32) {
    %c0_i32 = arith.constant 0 : i32
    %c0_i32_0 = arith.constant 0 : i32
    %c0_i32_1 = arith.constant 0 : i32
    return %arg0, %c0_i32, %c0_i32_0 : i32, i32, i32
  }
  func.func @transform_2(%arg0: i32) -> (i32, i32) {
    %c0_i32 = arith.constant 0 : i32
    %c0_i32_0 = arith.constant 0 : i32
    %c0_i32_1 = arith.constant 0 : i32
    return %c0_i32, %c0_i32_0 : i32, i32
  }
  func.func @transform_3(%arg0: i32) -> (i32, i32) {
    %c0_i32 = arith.constant 0 : i32
    %c0_i32_0 = arith.constant 0 : i32
    %c0_i32_1 = arith.constant 0 : i32
    return %c0_i32, %c0_i32_0 : i32, i32
  }
  func.func @transform_4(%arg0: i32) -> (i32, i32) {
    %c0_i32 = arith.constant 0 : i32
    %c0_i32_0 = arith.constant 0 : i32
    %c0_i32_1 = arith.constant 0 : i32
    return %c0_i32, %c0_i32_0 : i32, i32
  }
  func.func @transform_5(%arg0: i32) -> (i32, i32) {
    %c0_i32 = arith.constant 0 : i32
    %c0_i32_0 = arith.constant 0 : i32
    %c0_i32_1 = arith.constant 0 : i32
    return %c0_i32, %c0_i32_0 : i32, i32
  }
  func.func @transform_6(%arg0: i32) -> (i32, i32, i32) {
    %c0_i32 = arith.constant 0 : i32
    %c0_i32_0 = arith.constant 0 : i32
    %c0_i32_1 = arith.constant 0 : i32
    %c0_i32_2 = arith.constant 0 : i32
    return %c0_i32, %c0_i32_0, %c0_i32_1 : i32, i32, i32
  }
  func.func @transform_7(%arg0: i32) -> (i32, i32) {
    %c0_i32 = arith.constant 0 : i32
    %c0_i32_0 = arith.constant 0 : i32
    %c0_i32_1 = arith.constant 0 : i32
    return %c0_i32, %c0_i32_0 : i32, i32
  }
  func.func @transform_8(%arg0: i32) -> (i32, i32) {
    %c0_i32 = arith.constant 0 : i32
    %c0_i32_0 = arith.constant 0 : i32
    %c0_i32_1 = arith.constant 0 : i32
    return %c0_i32, %c0_i32_0 : i32, i32
  }
  func.func @transform_9(%arg0: i32) -> (i32, i32) {
    %c0_i32 = arith.constant 0 : i32
    %c0_i32_0 = arith.constant 0 : i32
    %c0_i32_1 = arith.constant 0 : i32
    return %c0_i32, %c0_i32_0 : i32, i32
  }
  func.func @transform_10(%arg0: i32) -> (i32, i32) {
    %c0_i32 = arith.constant 0 : i32
    %c0_i32_0 = arith.constant 0 : i32
    %c0_i32_1 = arith.constant 0 : i32
    return %c0_i32, %c0_i32_0 : i32, i32
  }
  func.func @transform_11(%arg0: i32) -> (i32, i32) {
    %c0_i32 = arith.constant 0 : i32
    %c0_i32_0 = arith.constant 0 : i32
    %c0_i32_1 = arith.constant 0 : i32
    return %c0_i32, %c0_i32_0 : i32, i32
  }
  func.func @transform_12(%arg0: i32) -> (i32, i32) {
    %c0_i32 = arith.constant 0 : i32
    %c0_i32_0 = arith.constant 0 : i32
    %c0_i32_1 = arith.constant 0 : i32
    return %c0_i32, %c0_i32_0 : i32, i32
  }
  func.func @transform_13(%arg0: i32) -> (i32, i32) {
    %c0_i32 = arith.constant 0 : i32
    %c0_i32_0 = arith.constant 0 : i32
    %c0_i32_1 = arith.constant 0 : i32
    return %c0_i32, %c0_i32_0 : i32, i32
  }
  func.func @transform_14(%arg0: i32) -> (i32, i32) {
    %c0_i32 = arith.constant 0 : i32
    %c0_i32_0 = arith.constant 0 : i32
    %c0_i32_1 = arith.constant 0 : i32
    return %c0_i32, %c0_i32_0 : i32, i32
  }
  func.func @transform_15(%arg0: i32) -> (i32, i32) {
    %c0_i32 = arith.constant 0 : i32
    %c0_i32_0 = arith.constant 0 : i32
    %c0_i32_1 = arith.constant 0 : i32
    return %c0_i32, %c0_i32_0 : i32, i32
  }
  func.func @transform_16(%arg0: i32) -> (i32, i32) {
    %c0_i32 = arith.constant 0 : i32
    %c0_i32_0 = arith.constant 0 : i32
    %c0_i32_1 = arith.constant 0 : i32
    return %c0_i32, %c0_i32_0 : i32, i32
  }
  func.func @transform_17(%arg0: i32) -> (i32, i32) {
    %c0_i32 = arith.constant 0 : i32
    %c0_i32_0 = arith.constant 0 : i32
    %c0_i32_1 = arith.constant 0 : i32
    return %c0_i32, %c0_i32_0 : i32, i32
  }
  func.func @transform_18(%arg0: i32) -> (i32, i32) {
    %c0_i32 = arith.constant 0 : i32
    %c0_i32_0 = arith.constant 0 : i32
    %c0_i32_1 = arith.constant 0 : i32
    return %c0_i32, %c0_i32_0 : i32, i32
  }
  func.func @transform_19(%arg0: i32) -> (i32, i32) {
    %c0_i32 = arith.constant 0 : i32
    %c0_i32_0 = arith.constant 0 : i32
    %c0_i32_1 = arith.constant 0 : i32
    return %c0_i32, %c0_i32_0 : i32, i32
  }
  func.func @transform_20(%arg0: i32) -> (i32, i32, i32) {
    %c0_i32 = arith.constant 0 : i32
    %c0_i32_0 = arith.constant 0 : i32
    %c0_i32_1 = arith.constant 0 : i32
    %c0_i32_2 = arith.constant 0 : i32
    return %c0_i32, %c0_i32_0, %c0_i32_1 : i32, i32, i32
  }
  func.func @transform_21(%arg0: i32) -> (i32, i32) {
    %c0_i32 = arith.constant 0 : i32
    %c0_i32_0 = arith.constant 0 : i32
    %c0_i32_1 = arith.constant 0 : i32
    return %c0_i32, %c0_i32_0 : i32, i32
  }
  func.func @transform_22(%arg0: i32) -> (i32, i32) {
    %c0_i32 = arith.constant 0 : i32
    %c0_i32_0 = arith.constant 0 : i32
    %c0_i32_1 = arith.constant 0 : i32
    return %c0_i32, %c0_i32_0 : i32, i32
  }
  func.func @transform_23(%arg0: i32) -> (i32, i32) {
    %c0_i32 = arith.constant 0 : i32
    %c0_i32_0 = arith.constant 0 : i32
    %c0_i32_1 = arith.constant 0 : i32
    return %c0_i32, %c0_i32_0 : i32, i32
  }
  func.func @transform_24(%arg0: i32) -> (i32, i32) {
    %c0_i32 = arith.constant 0 : i32
    %c0_i32_0 = arith.constant 0 : i32
    %c0_i32_1 = arith.constant 0 : i32
    return %c0_i32, %c0_i32_0 : i32, i32
  }
  func.func @transform_25(%arg0: i32) -> (i32, i32) {
    %c0_i32 = arith.constant 0 : i32
    %c0_i32_0 = arith.constant 0 : i32
    %c0_i32_1 = arith.constant 0 : i32
    return %c0_i32, %c0_i32_0 : i32, i32
  }
  func.func @transform_26(%arg0: i32) -> (i32, i32) {
    %c0_i32 = arith.constant 0 : i32
    %c0_i32_0 = arith.constant 0 : i32
    %c0_i32_1 = arith.constant 0 : i32
    return %c0_i32, %c0_i32_0 : i32, i32
  }
  func.func @transform_27(%arg0: i32) -> (i32, i32) {
    %c0_i32 = arith.constant 0 : i32
    %c0_i32_0 = arith.constant 0 : i32
    %c0_i32_1 = arith.constant 0 : i32
    return %c0_i32, %c0_i32_0 : i32, i32
  }
  func.func @transform_28(%arg0: i32) -> (i32, i32) {
    %c0_i32 = arith.constant 0 : i32
    %c0_i32_0 = arith.constant 0 : i32
    %c0_i32_1 = arith.constant 0 : i32
    return %c0_i32, %c0_i32_0 : i32, i32
  }
  func.func @transform_29(%arg0: i32) -> (i32, i32) {
    %c0_i32 = arith.constant 0 : i32
    %c0_i32_0 = arith.constant 0 : i32
    %c0_i32_1 = arith.constant 0 : i32
    return %c0_i32, %c0_i32_0 : i32, i32
  }
  func.func @transform_30(%arg0: i32) -> (i32, i32) {
    %c0_i32 = arith.constant 0 : i32
    %c0_i32_0 = arith.constant 0 : i32
    return %arg0, %c0_i32 : i32, i32
  }
}

</mosaic_0001>

<bundles_post_ra>
// kernel: tpu_custom_call.1
= control target key start
LH: loop header
LB: loop body
LE: loop exit
PB: predicated region body
PF: predicated region fallthrough
CT: control target
= control target key end

     0   :  { %s10368_s6 = smov 1   ;;  %s10369_s10 = smov 2   ;;  %s14453_s0 = inlined_call_operand.smem [shape: u32[31], index: -1, kind: input, shape index: {}] }
   0x1   :  { %s10435_s5 = sld [smem:[%s14453_s0]]   ;;  %s10370_s14 = smov 3  }
   0x2   :  { %s10440_s9 = sld [smem:[%s14453_s0 + %s10368_s6]]   ;;  %s10371_s18 = smov 4  }
   0x3   :  { %s10445_s13 = sld [smem:[%s14453_s0 + %s10369_s10]]   ;;  %s10372_s22 = smov 5  }
   0x4   :  { %s10450_s17 = sld [smem:[%s14453_s0 + %s10370_s14]]   ;;  %s10373_s26 = smov 6  }
   0x5   :  { %s10455_s21 = sld [smem:[%s14453_s0 + %s10371_s18]]   ;;  %s10374_s30 = smov 7  }
   0x6   :  { %s10460_s25 = sld [smem:[%s14453_s0 + %s10372_s22]]   ;;  %s10375_s4 = smov 8  }
   0x7   :  { %s10465_s29 = sld [smem:[%s14453_s0 + %s10373_s26]]   ;;  %s10376_s10 = smov 9  }
   0x8   :  { %s10470_s3 = sld [smem:[%s14453_s0 + %s10374_s30]]   ;;  %s10377_s15 = smov 10  }
   0x9   :  { %s10475_s8 = sld [smem:[%s14453_s0 + %s10375_s4]]   ;;  %s10378_s20 = smov 11  }
   0xa   :  { %s10480_s14 = sld [smem:[%s14453_s0 + %s10376_s10]]   ;;  %s10379_s26 = smov 12  }
   0xb   :  { %14500 = sst [smem:[#allocation35_spill]] %s10455_s21  ;;  %s10380_s1 = smov 13  }
   0xc   :  { %s10485_s19 = sld [smem:[%s14453_s0 + %s10377_s15]]   ;;  %s10381_s7 = smov 14  }
   0xd   :  { %14501 = sst [smem:[#allocation36_spill]] %s10465_s29  ;;  %s10382_s15 = smov 15  }
   0xe   :  { %s10490_s24 = sld [smem:[%s14453_s0 + %s10378_s20]]   ;;  %s10383_s22 = smov 16  }
   0xf   :  { %14502 = sst [smem:[#allocation37_spill]] %s10475_s8  ;;  %s10384_s28 = smov 17  }
  0x10   :  { %s10495_s30 = sld [smem:[%s14453_s0 + %s10379_s26]]  }
  0x11   :  { %s10500_s6 = sld [smem:[%s14453_s0 + %s10380_s1]]  }
  0x12   :  { %14503 = sst [smem:[#allocation38_spill]] %s10485_s19 }
  0x13   :  { %s10505_s12 = sld [smem:[%s14453_s0 + %s10381_s7]]   ;;  %s10385_s7 = smov 18  }
  0x14   :  { %s10510_s20 = sld [smem:[%s14453_s0 + %s10382_s15]]   ;;  %s10386_s15 = smov 19  }
  0x15   :  { %s10515_s27 = sld [smem:[%s14453_s0 + %s10383_s22]]   ;;  %s10387_s22 = smov 20  }
  0x16   :  { %s10520_s4 = sld [smem:[%s14453_s0 + %s10384_s28]]   ;;  %s10388_s28 = smov 21  }
  0x17   :  { %s10525_s19 = sld [smem:[%s14453_s0 + %s10385_s7]]   ;;  %s10389_s7 = smov 22  }
  0x18   :  { %s10530_s8 = sld [smem:[%s14453_s0 + %s10386_s15]]   ;;  %s10390_s15 = smov 23  }
  0x19   :  { %s10540_s29 = sld [smem:[%s14453_s0 + %s10388_s28]]   ;;  %s10392_s28 = smov 25  }
  0x1b   :  { %14504 = sst [smem:[#allocation39_spill]] %s10515_s27 }
  0x1c   :  { %s10535_s27 = sld [smem:[%s14453_s0 + %s10387_s22]]   ;;  %s10391_s22 = smov 24  }
  0x1d   :  { %14505 = sst [smem:[#allocation40_spill]] %s10525_s19 }
  0x1e   :  { %14506 = sst [smem:[#allocation41_spill]] %s10530_s8 }
  0x1f   :  { %14508 = sst [smem:[#allocation43_spill]] %s10540_s29 }
  0x20   :  { %s10545_s19 = sld [smem:[%s14453_s0 + %s10389_s7]]   ;;  %s10393_s7 = smov 26  }
  0x21   :  { %s10550_s8 = sld [smem:[%s14453_s0 + %s10390_s15]]   ;;  %s10394_s15 = smov 27  }
  0x22   :  { %14507 = sst [smem:[#allocation42_spill]] %s10535_s27 }
  0x23   :  { %s10555_s27 = sld [smem:[%s14453_s0 + %s10391_s22]]   ;;  %s10395_s22 = smov 28  }
  0x24   :  { %s10560_s29 = sld [smem:[%s14453_s0 + %s10392_s28]]   ;;  %s10396_s28 = smov 29  }
  0x25   :  { %s10565_s21 = sld [smem:[%s14453_s0 + %s10393_s7]]   ;;  %s10397_s7 = smov 30  }
  0x27   :  { %14509 = sst [smem:[#allocation44_spill]] %s10550_s8 }
  0x28   :  { %s10570_s8 = sld [smem:[%s14453_s0 + %s10394_s15]]  }
  0x29   :  { %14510 = sst [smem:[#allocation45_spill]] %s10555_s27 }
  0x2a   :  { %14511 = sst [smem:[#allocation46_spill]] %s10560_s29 }
  0x2b   :  { %14512 = sst [smem:[#allocation47_spill]] %s10565_s21 }
  0x2c   :  { %s10575_s27 = sld [smem:[%s14453_s0 + %s10395_s22]]  }
  0x2d   :  { %s10580_s29 = sld [smem:[%s14453_s0 + %s10396_s28]]  }
  0x2e   :  { %s10585_s21 = sld [smem:[%s14453_s0 + %s10397_s7]]  }
  0x2f   :  { %66 = vsyncpa [#allocation3], 0 }
  0x30   :  { %67 = vsyncpa [#allocation6], 0 }
  0x31   :  { %68 = vsyncpa [#allocation9], 0 }
  0x32   :  { %69 = vsyncpa [#allocation12], 0 }
  0x33   :  { %70 = vsyncpa [#allocation15], 0 }
  0x34   :  { %71 = vsyncpa [#allocation18], 0 }
  0x35   :  { %72 = vsyncpa [#allocation21], 0 }
  0x36   :  { %73 = vsyncpa [#allocation24], 0 }
  0x37   :  { %74 = vsyncpa [#allocation4], 0  ;;  %s10398_s15 = smov [#allocation5]   ;;  %s10399_s18 = smov [#allocation8]  }
  0x38   :  { %s92_s16 = sshll.u32 %s10398_s15, 4  ;;  %s116_s22 = sshll.u32 %s10399_s18, 4  ;;  %s93_s16 = int_to_ptr.vmem [resolvable:$true] %s92_s16  ;;  %s117_s22 = int_to_ptr.vmem [resolvable:$true] %s116_s22 }
  0x39   :  { %s10058_s23 = scalar_lea.vmem %s93_s16, 2048  ;;  %p10063_p1 = scmp.lt.s32.totalorder %s93_s16, %s93_s16 }
  0x3a   :  { %p10059_p0 = scmp.ne.s32.totalorder %s93_s16, %s10058_s23  ;;  %p10064_p2 = scmp.lt.s32.totalorder %s10058_s23, %s10058_s23 }
  0x3c   :  { %p10065_p3 = por %p10064_p2, %p10063_p1 }
  0x3e   :  { %p10066_p4 = pnand %p10065_p3, %p10059_p0 }
  0x40   :  { %10069 = shalt.err (!%p10066_p4)
}
  0x41   :  { %s10400_s0 = smov 128   ;;  %s10401_s26 = smov 8  }
  0x42   :  { %98 = dma.hbm_to_vmem [thread:$0]  %s10440_s9, 2048, %s93_s16, [#allocation6], %s10400_s0, %s10400_s0, %s10401_s26  }
  0x43   :  { %s10078_s28 = scalar_lea.vmem %s117_s22, 2048  ;;  %p10083_p6 = scmp.lt.s32.totalorder %s117_s22, %s117_s22 }
  0x44   :  { %p10079_p5 = scmp.ne.s32.totalorder %s117_s22, %s10078_s28  ;;  %p10084_p7 = scmp.lt.s32.totalorder %s10078_s28, %s10078_s28 }
  0x46   :  { %p10085_p8 = por %p10084_p7, %p10083_p6 }
  0x48   :  { %p10086_p9 = pnand %p10085_p8, %p10079_p5 }
  0x4a   :  { %10089 = shalt.err (!%p10086_p9)
}
  0x4b   :  { %122 = dma.hbm_to_vmem [thread:$0]  %s10450_s17, 2048, %s117_s22, [#allocation9], %s10400_s0, %s10400_s0, %s10401_s26  }
  0x4c   :  { %s10402_s1 = smov [#allocation11]   ;;  %s10403_s7 = smov [#allocation14]  }
  0x4d   :  { %s143_s2 = sshll.u32 %s10402_s1, 4  ;;  %s167_s10 = sshll.u32 %s10403_s7, 4  ;;  %s144_s2 = int_to_ptr.vmem [resolvable:$true] %s143_s2  ;;  %s168_s10 = int_to_ptr.vmem [resolvable:$true] %s167_s10 }
  0x4e   :  { %s10098_s11 = scalar_lea.vmem %s144_s2, 16  ;;  %s10102_s9 = scalar_lea.vmem %s144_s2, 32 }
  0x4f   :  { %p10099_p10 = scmp.ne.s32.totalorder %s144_s2, %s10098_s11  ;;  %p10103_p11 = scmp.lt.s32.totalorder %s144_s2, %s144_s2 }
  0x50   :  { %p10104_p12 = scmp.lt.s32.totalorder %s10102_s9, %s10098_s11 }
  0x52   :  { %p10105_p13 = por %p10104_p12, %p10103_p11 }
  0x54   :  { %p10106_p0 = pnand %p10105_p13, %p10099_p10 }
  0x56   :  { %10109 = shalt.err (!%p10106_p0)
}
  0x57   :  { %146 = dma.hbm_to_vmem [thread:$0]  %s10470_s3, 16, %s144_s2, [#allocation12]  }
  0x58   :  { %s10118_s15 = scalar_lea.vmem %s168_s10, 16  ;;  %s10122_s16 = scalar_lea.vmem %s168_s10, 32 }
  0x59   :  { %p10119_p1 = scmp.ne.s32.totalorder %s168_s10, %s10118_s15  ;;  %p10123_p2 = scmp.lt.s32.totalorder %s168_s10, %s168_s10 }
  0x5a   :  { %p10124_p3 = scmp.lt.s32.totalorder %s10122_s16, %s10118_s15 }
  0x5c   :  { %p10125_p4 = por %p10124_p3, %p10123_p2 }
  0x5e   :  { %p10126_p5 = pnand %p10125_p4, %p10119_p1 }
  0x60   :  { %10129 = shalt.err (!%p10126_p5)
}
  0x61   :  { %170 = dma.hbm_to_vmem [thread:$0]  %s10490_s24, 16, %s168_s10, [#allocation15]  }
  0x62   :  { %s10404_s17 = smov [#allocation17]   ;;  %s10405_s22 = smov [#allocation20]  }
  0x63   :  { %s187_s18 = sshll.u32 %s10404_s17, 4  ;;  %s207_s23 = sshll.u32 %s10405_s22, 4  ;;  %s188_s18 = int_to_ptr.vmem [resolvable:$true] %s187_s18  ;;  %s208_s23 = int_to_ptr.vmem [resolvable:$true] %s207_s23 }
  0x64   :  { %s10138_s28 = scalar_lea.vmem %s188_s18, 16  ;;  %s10142_s1 = scalar_lea.vmem %s188_s18, 32 }
  0x65   :  { %p10139_p6 = scmp.ne.s32.totalorder %s188_s18, %s10138_s28  ;;  %p10143_p7 = scmp.lt.s32.totalorder %s188_s18, %s188_s18 }
  0x66   :  { %p10144_p8 = scmp.lt.s32.totalorder %s10142_s1, %s10138_s28 }
  0x68   :  { %p10145_p9 = por %p10144_p8, %p10143_p7 }
  0x6a   :  { %p10146_p10 = pnand %p10145_p9, %p10139_p6 }
  0x6c   :  { %10149 = shalt.err (!%p10146_p10)
}
  0x6d   :  { %190 = dma.hbm_to_vmem [thread:$0]  %s10500_s6, 16, %s188_s18, [#allocation18]  }
  0x6e   :  { %s10158_s3 = scalar_lea.vmem %s208_s23, 16  ;;  %s10162_s2 = scalar_lea.vmem %s208_s23, 32 }
  0x6f   :  { %p10159_p11 = scmp.ne.s32.totalorder %s208_s23, %s10158_s3  ;;  %p10163_p12 = scmp.lt.s32.totalorder %s208_s23, %s208_s23 }
  0x70   :  { %p10164_p13 = scmp.lt.s32.totalorder %s10162_s2, %s10158_s3 }
  0x72   :  { %p10165_p0 = por %p10164_p13, %p10163_p12 }
  0x74   :  { %p10166_p1 = pnand %p10165_p0, %p10159_p11 }
  0x76   :  { %10169 = shalt.err (!%p10166_p1)
}
  0x77   :  { %210 = dma.hbm_to_vmem [thread:$0]  %s10510_s20, 16, %s208_s23, [#allocation21]  }
  0x78   :  { %s10406_s24 = smov [#allocation2]   ;;  %s10407_s10 = smov [#allocation7]  }
  0x79   :  { %s80_s7 = sshll.u32 %s10406_s24, 4  ;;  %s104_s11 = sshll.u32 %s10407_s10, 4  ;;  %s81_s7 = int_to_ptr.vmem [resolvable:$true] %s80_s7  ;;  %s105_s11 = int_to_ptr.vmem [resolvable:$true] %s104_s11 }
  0x7a   :  { %s10178_s9 = scalar_lea.vmem %s81_s7, 2048  ;;  %p10183_p3 = scmp.lt.s32.totalorder %s81_s7, %s81_s7 }
  0x7b   :  { %p10179_p2 = scmp.ne.s32.totalorder %s81_s7, %s10178_s9  ;;  %p10184_p4 = scmp.lt.s32.totalorder %s10178_s9, %s10178_s9 }
  0x7d   :  { %p10185_p5 = por %p10184_p4, %p10183_p3 }
  0x7f   :  { %p10186_p6 = pnand %p10185_p5, %p10179_p2 }
  0x81   :  { %10189 = shalt.err (!%p10186_p6)
}
  0x82   :  { %86 = dma.hbm_to_vmem [thread:$0]  %s10435_s5, 2048, %s81_s7, [#allocation3], %s10400_s0, %s10400_s0, %s10401_s26  }
  0x83   :  { %s10198_s6 = scalar_lea.vmem %s105_s11, 2048  ;;  %p10203_p8 = scmp.lt.s32.totalorder %s105_s11, %s105_s11 }
  0x84   :  { %p10199_p7 = scmp.ne.s32.totalorder %s105_s11, %s10198_s6  ;;  %p10204_p9 = scmp.lt.s32.totalorder %s10198_s6, %s10198_s6 }
  0x86   :  { %p10205_p10 = por %p10204_p9, %p10203_p8 }
  0x88   :  { %p10206_p11 = pnand %p10205_p10, %p10199_p7 }
  0x8a   :  { %10209 = shalt.err (!%p10206_p11)
}
  0x8b   :  { %110 = dma.hbm_to_vmem [thread:$0]  %s10445_s13, 2048, %s105_s11, [#allocation6], %s10400_s0, %s10400_s0, %s10401_s26  }
  0x8c   :  { %s10408_s20 = smov [#allocation10]   ;;  %s10409_s16 = smov [#allocation13]  }
  0x8d   :  { %s131_s15 = sshll.u32 %s10408_s20, 4  ;;  %s155_s17 = sshll.u32 %s10409_s16, 4  ;;  %s132_s15 = int_to_ptr.vmem [resolvable:$true] %s131_s15  ;;  %s156_s17 = int_to_ptr.vmem [resolvable:$true] %s155_s17 }
  0x8e   :  { %s10218_s18 = scalar_lea.vmem %s132_s15, 16  ;;  %s10222_s5 = scalar_lea.vmem %s132_s15, 32 }
  0x8f   :  { %p10219_p12 = scmp.ne.s32.totalorder %s132_s15, %s10218_s18  ;;  %p10223_p13 = scmp.lt.s32.totalorder %s132_s15, %s132_s15 }
  0x90   :  { %p10224_p0 = scmp.lt.s32.totalorder %s10222_s5, %s10218_s18 }
  0x92   :  { %p10225_p1 = por %p10224_p0, %p10223_p13 }
  0x94   :  { %p10226_p2 = pnand %p10225_p1, %p10219_p12 }
  0x96   :  { %10229 = shalt.err (!%p10226_p2)
}
  0x97   :  { %134 = dma.hbm_to_vmem [thread:$0]  %s10460_s25, 16, %s132_s15, [#allocation9]  }
  0x98   :  { %s10238_s22 = scalar_lea.vmem %s156_s17, 16  ;;  %s10242_s23 = scalar_lea.vmem %s156_s17, 32 }
  0x99   :  { %p10239_p3 = scmp.ne.s32.totalorder %s156_s17, %s10238_s22  ;;  %p10243_p4 = scmp.lt.s32.totalorder %s156_s17, %s156_s17 }
  0x9a   :  { %p10244_p5 = scmp.lt.s32.totalorder %s10242_s23, %s10238_s22 }
  0x9c   :  { %p10245_p6 = por %p10244_p5, %p10243_p4 }
  0x9e   :  { %p10246_p7 = pnand %p10245_p6, %p10239_p3 }
  0xa0   :  { %10249 = shalt.err (!%p10246_p7)
}
  0xa1   :  { %158 = dma.hbm_to_vmem [thread:$0]  %s10480_s14, 16, %s156_s17, [#allocation12]  }
  0xa2   :  { %s10410_s13 = smov [#allocation16]   ;;  %s10411_s1 = smov [#allocation19]  }
  0xa3   :  { %s177_s28 = sshll.u32 %s10410_s13, 4  ;;  %s197_s3 = sshll.u32 %s10411_s1, 4  ;;  %s178_s28 = int_to_ptr.vmem [resolvable:$true] %s177_s28  ;;  %s198_s3 = int_to_ptr.vmem [resolvable:$true] %s197_s3 }
  0xa4   :  { %s10258_s2 = scalar_lea.vmem %s178_s28, 16  ;;  %s10262_s24 = scalar_lea.vmem %s178_s28, 32 }
  0xa5   :  { %p10259_p8 = scmp.ne.s32.totalorder %s178_s28, %s10258_s2  ;;  %p10263_p9 = scmp.lt.s32.totalorder %s178_s28, %s178_s28 }
  0xa6   :  { %p10264_p10 = scmp.lt.s32.totalorder %s10262_s24, %s10258_s2 }
  0xa8   :  { %p10265_p11 = por %p10264_p10, %p10263_p9 }
  0xaa   :  { %p10266_p12 = pnand %p10265_p11, %p10259_p8 }
  0xac   :  { %10269 = shalt.err (!%p10266_p12)
}
  0xad   :  { %180 = dma.hbm_to_vmem [thread:$0]  %s10495_s30, 16, %s178_s28, [#allocation15]  }
  0xae   :  { %s10278_s25 = scalar_lea.vmem %s198_s3, 16  ;;  %s10282_s7 = scalar_lea.vmem %s198_s3, 32 }
  0xaf   :  { %p10279_p13 = scmp.ne.s32.totalorder %s198_s3, %s10278_s25  ;;  %p10283_p0 = scmp.lt.s32.totalorder %s198_s3, %s198_s3 }
  0xb0   :  { %p10284_p1 = scmp.lt.s32.totalorder %s10282_s7, %s10278_s25 }
  0xb2   :  { %p10285_p2 = por %p10284_p1, %p10283_p0 }
  0xb4   :  { %p10286_p3 = pnand %p10285_p2, %p10279_p13 }
  0xb6   :  { %10289 = shalt.err (!%p10286_p3)
}
  0xb7   :  { %200 = dma.hbm_to_vmem [thread:$0]  %s10505_s12, 16, %s198_s3, [#allocation18]  }
  0xb8   :  { %s10412_s14 = smov [#allocation22]   ;;  %s10413_s11 = smov [#allocation23]  }
  0xb9   :  { %s219_s10 = sshll.u32 %s10412_s14, 4  ;;  %s236_s9 = sshll.u32 %s10413_s11, 4  ;;  %s220_s10 = int_to_ptr.vmem [resolvable:$true] %s219_s10  ;;  %s237_s9 = int_to_ptr.vmem [resolvable:$true] %s236_s9 }
  0xba   :  { %s10298_s6 = scalar_lea.vmem %s220_s10, 16  ;;  %s10302_s20 = scalar_lea.vmem %s220_s10, 32 }
  0xbb   :  { %p10299_p4 = scmp.ne.s32.totalorder %s220_s10, %s10298_s6  ;;  %p10303_p5 = scmp.lt.s32.totalorder %s220_s10, %s220_s10 }
  0xbc   :  { %p10304_p6 = scmp.lt.s32.totalorder %s10302_s20, %s10298_s6 }
  0xbe   :  { %p10305_p7 = por %p10304_p6, %p10303_p5 }
  0xc0   :  { %p10306_p8 = pnand %p10305_p7, %p10299_p4 }
  0xc2   :  { %10309 = shalt.err (!%p10306_p8)
}
  0xc3   :  { %222 = dma.hbm_to_vmem [thread:$0]  %s10520_s4, 16, %s220_s10, [#allocation21]  }
  0xc4   :  { %s10318_s30 = scalar_lea.vmem %s237_s9, 256  ;;  %p10323_p10 = scmp.lt.s32.totalorder %s237_s9, %s237_s9 }
  0xc5   :  { %p10319_p9 = scmp.ne.s32.totalorder %s237_s9, %s10318_s30  ;;  %p10324_p11 = scmp.lt.s32.totalorder %s10318_s30, %s10318_s30 }
  0xc7   :  { %p10325_p12 = por %p10324_p11, %p10323_p10 }
  0xc9   :  { %p10326_p13 = pnand %p10325_p12, %p10319_p9 }
  0xcb   :  { %10329 = shalt.err (!%p10326_p13)
}
  0xcc   :  { %s10414_s12 = smov 64   ;;  %s10415_s15 = smov 4  }
  0xcd   :  { %242 = dma.hbm_to_vmem [thread:$0]  %s10545_s19, 256, %s237_s9, [#allocation24], %s10414_s12, %s10414_s12, %s10415_s15  }
  0xce   :  { %10350 = dma.done.wait [#allocation3], 2048  }
  0xcf   :  { %10351 = vsyncadd [#allocation3], 4294965248 }
  0xd0   :  { %10352 = dma.done.wait [#allocation6], 4096  }
  0xd1   :  { %10353 = vsyncadd [#allocation6], 4294963200 }
  0xd2   :  { %10354 = dma.done.wait [#allocation9], 2064  }
  0xd3   :  { %10355 = vsyncadd [#allocation9], 4294965232 }
  0xd4   :  { %10356 = dma.done.wait [#allocation12], 32  }
  0xd5   :  { %10357 = vsyncadd [#allocation12], 4294967264 }
  0xd6   :  { %10358 = dma.done.wait [#allocation15], 32  }
  0xd7   :  { %10359 = vsyncadd [#allocation15], 4294967264 }
  0xd8   :  { %10360 = dma.done.wait [#allocation18], 32  }
  0xd9   :  { %10361 = vsyncadd [#allocation18], 4294967264 }
  0xda   :  { %10362 = dma.done.wait [#allocation21], 32  }
  0xdb   :  { %10363 = vsyncadd [#allocation21], 4294967264 }
  0xdc   :  { %10364 = dma.done.wait [#allocation24], 256  }
  0xdd   :  { %10365 = vsyncadd [#allocation24], 4294967040  ;;  %s14513_s4 = sld [smem:[#allocation35_spill]]  ;;  %v361_v2 = vld [vmem:[#allocation2] sm:$0xff]  ;;  %v362_v3 = vld [vmem:[#allocation2 + $0x8] sm:$0xff]  ;;  %vm451_vm0 = vcmask 261120  }
  0xde   :  { %v425_v4 = vpack.c.bf16 %v362_v3, %v361_v2  ;;  %v363_v5 = vld [vmem:[#allocation2 + $0x10] sm:$0xff]  ;;  %v364_v6 = vld [vmem:[#allocation2 + $0x18] sm:$0xff]  ;;  %v365_v7 = vld [vmem:[#allocation2 + $0x20] sm:$0xff]  ;;  %vm629_vm1 = vcmask 64512   ;;  %s10416_s19 = smov 96   ;;  %s10417_s16 = smov 88  }
  0xdf   :  { %v366_v8 = vld [vmem:[#allocation2 + $0x28] sm:$0xff]  ;;  %v426_v9 = vpack.c.bf16 %v364_v6, %v363_v5  ;;  %v367_v11 = vld [vmem:[#allocation2 + $0x30] sm:$0xff]  ;;  %v368_v12 = vld [vmem:[#allocation2 + $0x38] sm:$0xff]  ;;  %s10418_s17 = smov 120   ;;  %s14517_s18 = sld [smem:[#allocation36_spill]]  ;;  %vm1546_vm2 = vcmask 1043456  }
  0xe0   :  { %8413 = vmatprep.mubr.msk.bf16.mxu0 %vm451_vm0, %v425_v4  ;;  %v427_v10 = vpack.c.bf16 %v366_v8, %v365_v7  ;;  %v369_v13 = vld [vmem:[#allocation2 + $0x40] sm:$0xff]  ;;  %v370_v14 = vld [vmem:[#allocation2 + $0x48] sm:$0xff]  ;;  %v428_v15 = vpack.c.bf16 %v368_v12, %v367_v11  ;;  %v371_v17 = vld [vmem:[#allocation2 + $0x50] sm:$0xff]  ;;  %s10419_s5 = smov 56   ;;  %s10420_s22 = smov 80   ;;  %vm3459_vm3 = vcmask 523264  }
  0xe1   :  { %v429_v16 = vpack.c.bf16 %v370_v14, %v369_v13  ;;  %v372_v18 = vld [vmem:[#allocation2 + $0x58] sm:$0xff]  ;;  %v373_v19 = vld [vmem:[#allocation2 + $0x60] sm:$0xff]  ;;  %v374_v20 = vld [vmem:[#allocation2 + $0x68] sm:$0xff]  ;;  %s10421_s23 = smov 112   ;;  %s10422_s13 = smov 72   ;;  %vm7609_vm4 = vcmask 1041409  }
  0xe2   :  { %v430_v21 = vpack.c.bf16 %v372_v18, %v371_v17  ;;  %v431_v22 = vpack.c.bf16 %v374_v20, %v373_v19  ;;  %v375_v23 = vld [vmem:[#allocation2 + $0x70] sm:$0xff]  ;;  %v376_v24 = vld [vmem:[#allocation2 + $0x78] sm:$0xff]  ;;  %v7788_v27 = vld [vmem:[#allocation10] ss:$0 sm:$0xff]  ;;  %s10423_s28 = smov 104   ;;  %s10424_s1 = smov 48  }
  0xe3   :  { %v9344_v0 = vld [vmem:[%s14513_s4 + $0x8] sm:$0xff]   ;;  %v9345_v1 = vld [vmem:[%s14513_s4] sm:$0xff]   ;;  %v432_v25 = vpack.c.bf16 %v376_v24, %v375_v23  ;;  %s10425_s3 = smov 40   ;;  %s14547_s2 = sld [smem:[#allocation37_spill]]  ;;  %vm7611_vm5 = vcmask 1042434   ;;  %vm7613_vm6 = vcmask 1043459  }
  0xe4   :  { %8409 = vmatprep.subr.bf16.mxu0 %v9344_v0  ;;  %s14548_s24 = sld [smem:[#allocation38_spill]]  ;;  %vm7615_vm7 = vcmask 1044484   ;;  %vm7617_vm8 = vcmask 1045509   ;;  %vm7619_vm9 = vcmask 1046534   ;;  %vm7621_vm10 = vcmask 1047559  }
  0xe5   :  { %8410 = vmatpush3.bf16.msra.mxu0 %v9344_v0  ;;  %s14549_s25 = sld [smem:[#allocation40_spill]]  ;;  %vm7731_vm11 = vcmask 130048  }
  0xe6   :  { %8411 = vmatprep.subr.bf16.mxu0 %v9345_v1  ;;  %s14550_s7 = sld [smem:[#allocation39_spill]] }
  0xe7   :  { %s14551_s14 = sld [smem:[#allocation41_spill]] }
  0xe8   :  { %s14568_s10 = sld [smem:[#allocation42_spill]] }
  0xe9   :  { %8412 = vmatpush3.bf16.msra.mxu0 %v9345_v1  ;;  %s14591_s11 = sld [smem:[#allocation43_spill]] }
  0xea   :  { %s14608_s9 = sld [smem:[#allocation45_spill]] }
  0xeb   :  { %s14609_s6 = sld [smem:[#allocation47_spill]] }
  0xec   :  { %8414 = vmatmul.mubr.msk.bf16.vlgmr.msra.gmra.mxu0 %vm451_vm0, %v426_v9  ;;  %s14611_s20 = sld [smem:[#allocation46_spill]] }
  0xed   :  { %8417 = vmatprep.mubr.msk.bf16.mxu0 %vm451_vm0, %v427_v10 }
  0xf4   :  { %8418 = vmatmul.mubr.msk.bf16.gmra.mxu0 %vm451_vm0, %v428_v15 }
  0xf5   :  { %8421 = vmatprep.mubr.msk.bf16.mxu0 %vm451_vm0, %v429_v16 }
  0xfc   :  { %8422 = vmatmul.mubr.msk.bf16.gmra.mxu0 %vm451_vm0, %v430_v21 }
  0xfd   :  { %8425 = vmatprep.mubr.msk.bf16.mxu0 %vm451_vm0, %v431_v22 }
 0x104   :  { %8426 = vmatmul.mubr.msk.bf16.gmra.mxu0 %vm451_vm0, %v432_v25 }
 0x1ac   :  { %v8415_v26 = vpop.f32.mrf.mxu0 }
 0x1ad   :  { %v10625_v29 = vadd.f32 %v8415_v26, %v7788_v27 }
 0x1ae   :  { %v510_v28 = vpop.f32.mrf.mxu0 }
 0x1af   :  { %v511_v31 = vadd.f32 %v7788_v27, %v510_v28  ;;  %v575_v34 = vmul.f32 0.35355338, %v10625_v29 }
 0x1b0   :  { %v8416_v30 = vpop.f32.mrf.mxu0 }
 0x1b1   :  { %v10627_v32 = vadd.f32 %v8416_v30, %v7788_v27  ;;  %v573_v38 = vmul.f32 0.35355338, %v511_v31 }
 0x1b2   :  { %v513_v33 = vpop.f32.mrf.mxu0 }
 0x1b3   :  { %v576_v35 = vmul.f32 0.35355338, %v10627_v32  ;;  %v514_v36 = vadd.f32 %v7788_v27, %v513_v33  ;;  %v10681_v26 = vpack.c.bf16 %v10627_v32, %v10625_v29 }
 0x1b4   :  { %v8419_v37 = vpop.f32.mrf.mxu0 }
 0x1b5   :  { %v10631_v39 = vpack.c.bf16 %v576_v35, %v575_v34  ;;  %v574_v40 = vmul.f32 0.35355338, %v514_v36  ;;  %v535_v43 = vadd.f32 %v8419_v37, %v7788_v27  ;;  %v10663_v22 = vpack.c.bf16 %v514_v36, %v511_v31 }
 0x1b6   :  { %v526_v41 = vpop.f32.mrf.mxu0 }
 0x1b7   :  { %v10633_v42 = vpack.c.bf16 %v574_v40, %v573_v38  ;;  %v527_v45 = vadd.f32 %v7788_v27, %v526_v41  ;;  %v579_v48 = vmul.f32 0.35355338, %v535_v43 }
 0x1b8   :  { %v8420_v44 = vpop.f32.mrf.mxu0 }
 0x1b9   :  { %v538_v46 = vadd.f32 %v8420_v44, %v7788_v27  ;;  %8445 = vmatprep.mubr.msk.bf16.mxu1 %vm629_vm1, %v10633_v42  ;;  %v577_v52 = vmul.f32 0.35355338, %v527_v45 }
 0x1ba   :  { %v529_v47 = vpop.f32.mrf.mxu0 }
 0x1bb   :  { %v580_v49 = vmul.f32 0.35355338, %v538_v46  ;;  %v530_v50 = vadd.f32 %v7788_v27, %v529_v47  ;;  %v10673_v25 = vpack.c.bf16 %v538_v46, %v535_v43 }
 0x1bc   :  { %v8423_v51 = vpop.f32.mrf.mxu0 }
 0x1bd   :  { %v10637_v53 = vpack.c.bf16 %v580_v49, %v579_v48  ;;  %v578_v54 = vmul.f32 0.35355338, %v530_v50  ;;  %v551_v57 = vadd.f32 %v8423_v51, %v7788_v27  ;;  %v10653_v13 = vpack.c.bf16 %v530_v50, %v527_v45  ;;  %14516 = vst [vmem:[#allocation50_spill] sm:$0xff] %v10673_v25 }
 0x1be   :  { %v542_v55 = vpop.f32.mrf.mxu0 }
 0x1bf   :  { %v10639_v56 = vpack.c.bf16 %v578_v54, %v577_v52  ;;  %v543_v59 = vadd.f32 %v7788_v27, %v542_v55  ;;  %v583_v62 = vmul.f32 0.35355338, %v551_v57  ;;  %14515 = vst [vmem:[#allocation49_spill] sm:$0xff] %v10653_v13  ;;  %v10729_v54 = vld [vmem:[#allocation7 + $0x10] sm:$0xff] }
 0x1c0   :  { %v8424_v58 = vpop.f32.mrf.mxu0 }
 0x1c1   :  { %v554_v60 = vadd.f32 %v8424_v58, %v7788_v27  ;;  %v581_v3 = vmul.f32 0.35355338, %v543_v59 }
 0x1c2   :  { %v545_v61 = vpop.f32.mrf.mxu0 }
 0x1c3   :  { %v584_v63 = vmul.f32 0.35355338, %v554_v60  ;;  %v10641_v0 = vpack.c.bf16 %v554_v60, %v551_v57  ;;  %v546_v1 = vadd.f32 %v7788_v27, %v545_v61  ;;  %v10737_v61 = vld [vmem:[#allocation7 + $0x8] sm:$0xff] }
 0x1c4   :  { %v8427_v2 = vpop.f32.mrf.mxu0 }
 0x1c5   :  { %v10643_v4 = vpack.c.bf16 %v584_v63, %v583_v62  ;;  %v582_v5 = vmul.f32 0.35355338, %v546_v1  ;;  %623 = vrot.lane.b32.xlu1 %v10641_v0, %s10416_s19  ;;  %v10649_v8 = vpack.c.bf16 %v546_v1, %v543_v59  ;;  %v567_v9 = vadd.f32 %v8427_v2, %v7788_v27  ;;  %v10734_v59 = vld [vmem:[#allocation7] sm:$0xff]  ;;  %v10742_v63 = vld [vmem:[#allocation7 + $0x18] sm:$0xff] }
 0x1c6   :  { %v558_v6 = vpop.f32.mrf.mxu0 }
 0x1c7   :  { %v10647_v7 = vpack.c.bf16 %v582_v5, %v581_v3  ;;  %14514 = vst [vmem:[#allocation48_spill] sm:$0xff] %v10649_v8  ;;  %v559_v11 = vadd.f32 %v7788_v27, %v558_v6  ;;  %v587_v15 = vmul.f32 0.35355338, %v567_v9 }
 0x1c8   :  { %v8428_v10 = vpop.f32.mrf.mxu0 }
 0x1c9   :  { %v570_v12 = vadd.f32 %v8428_v10, %v7788_v27  ;;  %621 = vrot.lane.b32.xlu1 %v10649_v8, %s10416_s19  ;;  %v585_v19 = vmul.f32 0.35355338, %v559_v11 }
 0x1ca   :  { %v561_v14 = vpop.f32.mrf.mxu0 }
 0x1cb   :  { %v588_v16 = vmul.f32 0.35355338, %v570_v12  ;;  %v10655_v17 = vpack.c.bf16 %v570_v12, %v567_v9  ;;  %v562_v18 = vadd.f32 %v7788_v27, %v561_v14  ;;  %v10757_v14 = vld [vmem:[#allocation7 + $0x30] sm:$0xff] }
 0x1cd   :  { %v10657_v20 = vpack.c.bf16 %v588_v16, %v587_v15  ;;  %v586_v21 = vmul.f32 0.35355338, %v562_v18  ;;  %627 = vrot.lane.b32.xlu0 %v10655_v17, %s10416_s19  ;;  %617 = vrot.lane.b32.xlu1 %v10653_v13, %s10416_s19  ;;  %v10667_v24 = vpack.c.bf16 %v562_v18, %v559_v11  ;;  %v10759_v15 = vld [vmem:[#allocation7 + $0x38] sm:$0xff] }
 0x1cf   :  { %v10665_v23 = vpack.c.bf16 %v586_v21, %v585_v19  ;;  %v10764_v19 = vld [vmem:[#allocation7 + $0x20] sm:$0xff] }
 0x1d1   :  { %625 = vrot.lane.b32.xlu0 %v10667_v24, %s10416_s19  ;;  %613 = vrot.lane.b32.xlu1 %v10663_v22, %s10416_s19 }
 0x1d5   :  { %619 = vrot.lane.b32.xlu0 %v10673_v25, %s10416_s19  ;;  %941 = vrot.lane.b32.xlu1 %v10655_v17, %s10414_s12 }
 0x1d9   :  { %615 = vrot.lane.b32.xlu0 %v10681_v26, %s10416_s19  ;;  %935 = vrot.lane.b32.xlu1 %v10649_v8, %s10414_s12 }
 0x1dd   :  { %937 = vrot.lane.b32.xlu0 %v10641_v0, %s10414_s12  ;;  %933 = vrot.lane.b32.xlu1 %v10673_v25, %s10414_s12 }
 0x1e1   :  { %931 = vrot.lane.b32.xlu1 %v10653_v13, %s10414_s12 }
 0x1e5   :  { %929 = vrot.lane.b32.xlu1 %v10681_v26, %s10414_s12 }
 0x1e9   :  { %927 = vrot.lane.b32.xlu1 %v10663_v22, %s10414_s12 }
 0x1ed   :  { %939 = vrot.lane.b32.xlu1 %v10667_v24, %s10414_s12 }
 0x237   :  { %v624_v27 = vpop.permute.xlu1 %623 }
 0x238   :  { %v670_v38 = vsel %vm629_vm1, %v624_v27, 0 }
 0x23b   :  { %v622_v28 = vpop.permute.xlu1 %621 }
 0x23c   :  { %v667_v44 = vsel %vm629_vm1, %v622_v28, 0 }
 0x23f   :  { %v628_v29 = vpop.permute.xlu0 %627  ;;  %v618_v30 = vpop.permute.xlu1 %617 }
 0x240   :  { %9213 = vmatprep.subr.msk.bf16.mxu1 %vm629_vm1, %v628_v29  ;;  %v676_v31 = vsel %vm629_vm1, %v628_v29, 0  ;;  %v661_v50 = vsel %vm629_vm1, %v618_v30, 0 }
 0x241   :  { %8430 = vmatpush3.bf16.xpose.msra.mxu1 %v676_v31 }
 0x243   :  { %v626_v32 = vpop.permute.xlu0 %625  ;;  %v614_v33 = vpop.permute.xlu1 %613 }
 0x244   :  { %9214 = vmatprep.subr.msk.bf16.mxu1 %vm629_vm1, %v626_v32  ;;  %v673_v35 = vsel %vm629_vm1, %v626_v32, 0  ;;  %v655_v52 = vsel %vm629_vm1, %v614_v33, 0  ;;  %v10782_v32 = vld [vmem:[#allocation7 + $0x58] sm:$0xff] }
 0x247   :  { %v942_v34 = vpop.permute.xlu1 %941  ;;  %v620_v41 = vpop.permute.xlu0 %619 }
 0x248   :  { %8461 = vmatprep.subr.bf16.mxu0 %v942_v34  ;;  %v664_v48 = vsel %vm629_vm1, %v620_v41, 0 }
 0x249   :  { %8432 = vmatpush3.bf16.xpose.msra.mxu1 %v673_v35  ;;  %8462 = vmatpush3.bf16.msra.mxu0 %v942_v34  ;;  %v10788_v35 = vld [vmem:[#allocation7 + $0x40] sm:$0xff] }
 0x24a   :  { %9215 = vmatprep.subr.msk.bf16.mxu1 %vm629_vm1, %v624_v27 }
 0x24b   :  { %v936_v36 = vpop.permute.xlu1 %935  ;;  %v616_v45 = vpop.permute.xlu0 %615 }
 0x24c   :  { %v658_v51 = vsel %vm629_vm1, %v616_v45, 0 }
 0x24f   :  { %v934_v37 = vpop.permute.xlu1 %933  ;;  %v938_v49 = vpop.permute.xlu0 %937 }
 0x251   :  { %8434 = vmatpush3.bf16.xpose.msra.mxu1 %v670_v38  ;;  %v10794_v38 = vld [vmem:[#allocation7 + $0x48] sm:$0xff] }
 0x252   :  { %9216 = vmatprep.subr.msk.bf16.mxu1 %vm629_vm1, %v622_v28  ;;  %v10770_v28 = vld [vmem:[#allocation7 + $0x28] sm:$0xff] }
 0x253   :  { %v932_v40 = vpop.permute.xlu1 %931 }
 0x257   :  { %v930_v43 = vpop.permute.xlu1 %929 }
 0x259   :  { %8436 = vmatpush3.bf16.xpose.msra.mxu1 %v667_v44  ;;  %v10806_v44 = vld [vmem:[#allocation7 + $0x78] sm:$0xff] }
 0x25a   :  { %9217 = vmatprep.subr.msk.bf16.mxu1 %vm629_vm1, %v620_v41  ;;  %v10800_v41 = vld [vmem:[#allocation7 + $0x70] sm:$0xff] }
 0x25b   :  { %v928_v46 = vpop.permute.xlu1 %927 }
 0x25f   :  { %v940_v47 = vpop.permute.xlu1 %939 }
 0x260   :  { %8463 = vmatprep.subr.bf16.mxu0 %v940_v47 }
 0x261   :  { %8438 = vmatpush3.bf16.xpose.msra.mxu1 %v664_v48  ;;  %8464 = vmatpush3.bf16.msra.mxu0 %v940_v47  ;;  %v10812_v47 = vld [vmem:[#allocation7 + $0x60] sm:$0xff] }
 0x262   :  { %9218 = vmatprep.subr.msk.bf16.mxu1 %vm629_vm1, %v618_v30  ;;  %8465 = vmatprep.subr.bf16.mxu0 %v938_v49  ;;  %v10776_v30 = vld [vmem:[#allocation7 + $0x50] sm:$0xff] }
 0x265   :  { %8466 = vmatpush3.bf16.msra.mxu0 %v938_v49 }
 0x266   :  { %8467 = vmatprep.subr.bf16.mxu0 %v936_v36 }
 0x269   :  { %8440 = vmatpush3.bf16.xpose.msra.mxu1 %v661_v50  ;;  %8468 = vmatpush3.bf16.msra.mxu0 %v936_v36  ;;  %v10818_v50 = vld [vmem:[#allocation7 + $0x68] sm:$0xff] }
 0x26a   :  { %9219 = vmatprep.subr.msk.bf16.mxu1 %vm629_vm1, %v616_v45  ;;  %8469 = vmatprep.subr.bf16.mxu0 %v934_v37 }
 0x26d   :  { %8470 = vmatpush3.bf16.msra.mxu0 %v934_v37 }
 0x26e   :  { %8471 = vmatprep.subr.bf16.mxu0 %v932_v40 }
 0x271   :  { %8442 = vmatpush3.bf16.xpose.msra.mxu1 %v658_v51  ;;  %8472 = vmatpush3.bf16.msra.mxu0 %v932_v40 }
 0x272   :  { %9220 = vmatprep.subr.msk.bf16.mxu1 %vm629_vm1, %v614_v33  ;;  %8473 = vmatprep.subr.bf16.mxu0 %v930_v43 }
 0x275   :  { %8474 = vmatpush3.bf16.msra.mxu0 %v930_v43 }
 0x276   :  { %8475 = vmatprep.subr.bf16.mxu0 %v928_v46 }
 0x279   :  { %8444 = vmatpush3.bf16.xpose.msra.mxu1 %v655_v52  ;;  %8476 = vmatpush3.bf16.msra.mxu0 %v928_v46 }
 0x280   :  { %8446 = vmatmul.mubr.msk.bf16.vlgmr.msra.gmra.mxu1 %vm629_vm1, %v10631_v39 }
 0x281   :  { %8449 = vmatprep.mubr.msk.bf16.mxu1 %vm629_vm1, %v10639_v56 }
 0x288   :  { %8450 = vmatmul.mubr.msk.bf16.gmra.mxu1 %vm629_vm1, %v10637_v53 }
 0x289   :  { %8453 = vmatprep.mubr.msk.bf16.mxu1 %vm629_vm1, %v10647_v7 }
 0x290   :  { %8454 = vmatmul.mubr.msk.bf16.gmra.mxu1 %vm629_vm1, %v10643_v4 }
 0x291   :  { %8457 = vmatprep.mubr.msk.bf16.mxu1 %vm629_vm1, %v10665_v23 }
 0x298   :  { %8458 = vmatmul.mubr.msk.bf16.gmra.mxu1 %vm629_vm1, %v10657_v20 }
 0x340   :  { %v8447_v55 = vpop.f32.mrf.mxu1 }
 0x341   :  { %v10732_v57 = vadd.f32 %v8447_v55, %v10729_v54 }
 0x342   :  { %v712_v58 = vpop.f32.mrf.mxu1 }
 0x343   :  { %779 = vmax.xlane.f32.xlu0 %v10732_v57  ;;  %v10740_v62 = vadd.f32 %v712_v58, %v10734_v59 }
 0x344   :  { %v8448_v60 = vpop.f32.mrf.mxu1 }
 0x345   :  { %v10749_v3 = vadd.f32 %v8448_v60, %v10742_v63 }
 0x346   :  { %v715_v1 = vpop.f32.mrf.mxu1 }
 0x347   :  { %775 = vmax.xlane.f32.xlu0 %v10740_v62  ;;  %v10746_v2 = vadd.f32 %v715_v1, %v10737_v61 }
 0x348   :  { %v8451_v5 = vpop.f32.mrf.mxu1 }
 0x349   :  { %777 = vmax.xlane.f32.xlu1 %v10746_v2  ;;  %v10762_v18 = vadd.f32 %v8451_v5, %v10757_v14 }
 0x34a   :  { %v728_v6 = vpop.f32.mrf.mxu1 }
 0x34b   :  { %781 = vmax.xlane.f32.xlu0 %v10749_v3  ;;  %v10773_v29 = vadd.f32 %v728_v6, %v10764_v19 }
 0x34c   :  { %v8452_v9 = vpop.f32.mrf.mxu1 }
 0x34d   :  { %v10767_v21 = vadd.f32 %v8452_v9, %v10759_v15 }
 0x34e   :  { %v731_v10 = vpop.f32.mrf.mxu1 }
 0x34f   :  { %v10780_v31 = vadd.f32 %v731_v10, %v10770_v28 }
 0x350   :  { %v8455_v11 = vpop.f32.mrf.mxu1 }
 0x351   :  { %v10785_v34 = vadd.f32 %v8455_v11, %v10776_v30 }
 0x352   :  { %v744_v12 = vpop.f32.mrf.mxu1 }
 0x353   :  { %v10797_v40 = vadd.f32 %v744_v12, %v10788_v35 }
 0x354   :  { %v8456_v16 = vpop.f32.mrf.mxu1 }
 0x355   :  { %v10791_v36 = vadd.f32 %v8456_v16, %v10782_v32 }
 0x356   :  { %v747_v27 = vpop.f32.mrf.mxu1 }
 0x357   :  { %v10804_v43 = vadd.f32 %v747_v27, %v10794_v38 }
 0x358   :  { %v8459_v33 = vpop.f32.mrf.mxu1 }
 0x359   :  { %v10809_v46 = vadd.f32 %v8459_v33, %v10800_v41 }
 0x35a   :  { %1092 = vrot.lane.b32.xlu1 %v10667_v24, %s10417_s16  ;;  %v760_v37 = vpop.f32.mrf.mxu1 }
 0x35b   :  { %v10821_v51 = vadd.f32 %v760_v37, %v10812_v47 }
 0x35c   :  { %v8460_v45 = vpop.f32.mrf.mxu1 }
 0x35d   :  { %v10815_v48 = vadd.f32 %v8460_v45, %v10806_v44 }
 0x35e   :  { %v763_v49 = vpop.f32.mrf.mxu1 }
 0x35f   :  { %v10826_v52 = vadd.f32 %v763_v49, %v10818_v50 }
 0x361   :  { %1094 = vrot.lane.b32.xlu0 %v10655_v17, %s10417_s16 }
 0x37e   :  { %787 = vmax.xlane.f32.xlu1 %v10762_v18 }
 0x380   :  { %789 = vmax.xlane.f32.xlu0 %v10767_v21 }
 0x382   :  { %783 = vmax.xlane.f32.xlu1 %v10773_v29 }
 0x384   :  { %785 = vmax.xlane.f32.xlu0 %v10780_v31 }
 0x386   :  { %795 = vmax.xlane.f32.xlu1 %v10785_v34 }
 0x388   :  { %797 = vmax.xlane.f32.xlu0 %v10791_v36 }
 0x38a   :  { %791 = vmax.xlane.f32.xlu1 %v10797_v40 }
 0x38c   :  { %793 = vmax.xlane.f32.xlu0 %v10804_v43 }
 0x38e   :  { %803 = vmax.xlane.f32.xlu1 %v10809_v46 }
 0x390   :  { %805 = vmax.xlane.f32.xlu0 %v10815_v48 }
 0x392   :  { %799 = vmax.xlane.f32.xlu1 %v10821_v51 }
 0x394   :  { %801 = vmax.xlane.f32.xlu0 %v10826_v52 }
 0x3a3   :  { %1090 = vrot.lane.b32.xlu1 %v10641_v0, %s10417_s16 }
 0x3cc   :  { %v780_v55 = vpop.xlane.xlu0 %779 }
 0x3cd   :  { %v809_v58 = vsub.f32 %v10732_v57, %v780_v55 }
 0x3cf   :  { %v827_v60 = vmul.f32 1.442695, %v809_v58 }
 0x3d0   :  { %v776_v1 = vpop.xlane.xlu0 %775 }
 0x3d1   :  { %9362 = vpow2.f32 %v827_v60  ;;  %v807_v5 = vsub.f32 %v10740_v62, %v776_v1 }
 0x3d2   :  { %v778_v6 = vpop.xlane.xlu1 %777 }
 0x3d3   :  { %v823_v9 = vmul.f32 1.442695, %v807_v5  ;;  %v808_v11 = vsub.f32 %v10746_v2, %v778_v6 }
 0x3d4   :  { %v782_v10 = vpop.xlane.xlu0 %781 }
 0x3d5   :  { %9364 = vpow2.f32 %v823_v9  ;;  %v810_v12 = vsub.f32 %v10749_v3, %v782_v10  ;;  %v825_v33 = vmul.f32 1.442695, %v808_v11 }
 0x3d6   :  { %v10851_v37 = vpop.permute.xlu1 %1092 }
 0x3d7   :  { %v829_v16 = vmul.f32 1.442695, %v810_v12 }
 0x3d8   :  { %v10835_v27 = vpop.permute.xlu0 %1094 }
 0x3d9   :  { %9366 = vpow2.f32 %v829_v16  ;;  %9221 = vmatprep.subr.msk.bf16.mxu0 %vm629_vm1, %v10835_v27 }
 0x3da   :  { %9368 = vpow2.f32 %v825_v33 }
 0x3de   :  { %v10839_v57 = vpop.eup %9362 }
 0x3df   :  { %859 = vadd.xlane.f32.xlu0 %v10839_v57 }
 0x3e2   :  { %v10842_v62 = vpop.eup %9364 }
 0x3e3   :  { %855 = vadd.xlane.f32.xlu0 %v10842_v62 }
 0x3e6   :  { %v10845_v2 = vpop.eup %9366 }
 0x3e7   :  { %861 = vadd.xlane.f32.xlu0 %v10845_v2  ;;  %v10848_v3 = vpop.eup %9368 }
 0x3eb   :  { %857 = vadd.xlane.f32.xlu0 %v10848_v3 }
 0x407   :  { %v788_v45 = vpop.xlane.xlu1 %787 }
 0x408   :  { %v813_v49 = vsub.f32 %v10762_v18, %v788_v45 }
 0x409   :  { %v790_v55 = vpop.xlane.xlu0 %789 }
 0x40a   :  { %v835_v58 = vmul.f32 1.442695, %v813_v49  ;;  %v814_v1 = vsub.f32 %v10767_v21, %v790_v55 }
 0x40b   :  { %v784_v60 = vpop.xlane.xlu1 %783 }
 0x40c   :  { %9370 = vpow2.f32 %v835_v58  ;;  %v811_v5 = vsub.f32 %v10773_v29, %v784_v60  ;;  %v837_v11 = vmul.f32 1.442695, %v814_v1 }
 0x40d   :  { %v786_v6 = vpop.xlane.xlu0 %785 }
 0x40e   :  { %v831_v9 = vmul.f32 1.442695, %v811_v5  ;;  %v812_v10 = vsub.f32 %v10780_v31, %v786_v6 }
 0x40f   :  { %v796_v58 = vpop.xlane.xlu1 %795 }
 0x410   :  { %9372 = vpow2.f32 %v831_v9  ;;  %v833_v12 = vmul.f32 1.442695, %v812_v10  ;;  %v817_v1 = vsub.f32 %v10785_v34, %v796_v58 }
 0x411   :  { %v798_v31 = vpop.xlane.xlu0 %797 }
 0x412   :  { %9374 = vpow2.f32 %v833_v12  ;;  %v843_v6 = vmul.f32 1.442695, %v817_v1  ;;  %v818_v10 = vsub.f32 %v10791_v36, %v798_v31 }
 0x413   :  { %9376 = vpow2.f32 %v837_v11  ;;  %v792_v5 = vpop.xlane.xlu1 %791 }
 0x414   :  { %v815_v9 = vsub.f32 %v10797_v40, %v792_v5 }
 0x415   :  { %v794_v33 = vpop.xlane.xlu0 %793 }
 0x416   :  { %v839_v11 = vmul.f32 1.442695, %v815_v9 }
 0x417   :  { %v804_v12 = vpop.xlane.xlu1 %803 }
 0x418   :  { %v821_v34 = vsub.f32 %v10809_v46, %v804_v12 }
 0x419   :  { %v10857_v16 = vpop.eup %9370  ;;  %v806_v45 = vpop.xlane.xlu0 %805 }
 0x41a   :  { %867 = vadd.xlane.f32.xlu0 %v10857_v16  ;;  %v851_v40 = vmul.f32 1.442695, %v821_v34 }
 0x41d   :  { %v10860_v18 = vpop.eup %9372  ;;  %v802_v49 = vpop.xlane.xlu0 %801 }
 0x41e   :  { %863 = vadd.xlane.f32.xlu0 %v10860_v18  ;;  %v820_v55 = vsub.f32 %v10826_v52, %v802_v49  ;;  %v800_v49 = vpop.xlane.xlu1 %799 }
 0x41f   :  { %v10863_v21 = vpop.eup %9374 }
 0x420   :  { %865 = vadd.xlane.f32.xlu1 %v10863_v21  ;;  %v10866_v29 = vpop.eup %9376  ;;  %v849_v60 = vmul.f32 1.442695, %v820_v55  ;;  %v819_v55 = vsub.f32 %v10821_v51, %v800_v49 }
 0x422   :  { %869 = vadd.xlane.f32.xlu0 %v10866_v29  ;;  %9378 = vpow2.f32 %v849_v60  ;;  %v847_v31 = vmul.f32 1.442695, %v819_v55 }
 0x423   :  { %9380 = vpow2.f32 %v843_v6 }
 0x424   :  { %9382 = vpow2.f32 %v839_v11 }
 0x431   :  { %1088 = vrot.lane.b32.xlu1 %v10649_v8, %s10417_s16  ;;  %v10880_v8 = vpop.eup %9378 }
 0x432   :  { %v10885_v36 = vpop.eup %9380 }
 0x438   :  { %1086 = vrot.lane.b32.xlu0 %v10673_v25, %s10417_s16  ;;  %v845_v25 = vmul.f32 1.442695, %v818_v10 }
 0x43a   :  { %9384 = vpow2.f32 %v845_v25 }
 0x43c   :  { %1084 = vrot.lane.b32.xlu0 %v10653_v13, %s10417_s16  ;;  %v816_v13 = vsub.f32 %v10804_v43, %v794_v33  ;;  %v822_v43 = vsub.f32 %v10815_v48, %v806_v45  ;;  %v10889_v33 = vpop.eup %9382 }
 0x43e   :  { %v841_v52 = vmul.f32 1.442695, %v816_v13  ;;  %v853_v13 = vmul.f32 1.442695, %v822_v43  ;;  %v1142_v43 = vsel %vm629_vm1, %v10835_v27, 0 }
 0x440   :  { %9386 = vpow2.f32 %v841_v52 }
 0x441   :  { %9388 = vpow2.f32 %v851_v40 }
 0x442   :  { %9390 = vpow2.f32 %v847_v31 }
 0x443   :  { %9392 = vpow2.f32 %v853_v13 }
 0x447   :  { %v10892_v25 = vpop.eup %9384 }
 0x44d   :  { %v10895_v46 = vpop.eup %9386 }
 0x44e   :  { %v10900_v51 = vpop.eup %9388 }
 0x44f   :  { %v10905_v58 = vpop.eup %9390 }
 0x450   :  { %v10910_v1 = vpop.eup %9392 }
 0x455   :  { %881 = vadd.xlane.f32.xlu1 %v10880_v8 }
 0x45b   :  { %875 = vadd.xlane.f32.xlu0 %v10885_v36 }
 0x45f   :  { %871 = vadd.xlane.f32.xlu0 %v10889_v33 }
 0x463   :  { %877 = vadd.xlane.f32.xlu0 %v10892_v25 }
 0x466   :  { %1080 = vrot.lane.b32.xlu1 %v10663_v22, %s10417_s16 }
 0x467   :  { %873 = vadd.xlane.f32.xlu0 %v10895_v46 }
 0x468   :  { %v860_v48 = vpop.xlane.xlu0 %859 }
 0x46a   :  { %1072 = vrot.lane.b32.xlu1 %v10647_v7, %s10418_s17 }
 0x46b   :  { %883 = vadd.xlane.f32.xlu0 %v10900_v51 }
 0x46c   :  { %v856_v45 = vpop.xlane.xlu0 %855 }
 0x46e   :  { %1076 = vrot.lane.b32.xlu1 %v10665_v23, %s10418_s17 }
 0x46f   :  { %879 = vadd.xlane.f32.xlu0 %v10905_v58 }
 0x470   :  { %v862_v60 = vpop.xlane.xlu0 %861 }
 0x471   :  { %9394 = vrcp.f32 %v862_v60 }
 0x472   :  { %9396 = vrcp.f32 %v856_v45 }
 0x473   :  { %885 = vadd.xlane.f32.xlu0 %v10910_v1  ;;  %9398 = vrcp.f32 %v860_v48 }
 0x474   :  { %v858_v5 = vpop.xlane.xlu0 %857 }
 0x475   :  { %9400 = vrcp.f32 %v858_v5 }
 0x47e   :  { %v9395_v6 = vpop.eup %9394 }
 0x47f   :  { %v9397_v9 = vpop.eup %9396  ;;  %v906_v12 = vmul.f32 %v9395_v6, %v10845_v2 }
 0x480   :  { %v9399_v10 = vpop.eup %9398  ;;  %v903_v52 = vmul.f32 %v9397_v9, %v10842_v62  ;;  %v1091_v62 = vpop.permute.xlu1 %1090 }
 0x481   :  { %v905_v49 = vmul.f32 %v9399_v10, %v10839_v57  ;;  %v1139_v57 = vsel %vm629_vm1, %v10851_v37, 0  ;;  %v1136_v27 = vsel %vm629_vm1, %v1091_v62, 0 }
 0x482   :  { %v9401_v11 = vpop.eup %9400 }
 0x483   :  { %v904_v34 = vmul.f32 %v9401_v11, %v10848_v3  ;;  %v920_v55 = vpack.c.bf16 %v906_v12, %v905_v49 }
 0x485   :  { %v919_v40 = vpack.c.bf16 %v904_v34, %v903_v52 }
 0x487   :  { %8477 = vmatprep.mubr.bf16.mxu0 %v919_v40 }
 0x488   :  { %8478 = vmatmul.mubr.bf16.vlgmr.msra.gmra.mxu0 %v920_v55 }
 0x489   :  { %8494 = vmatpush3.bf16.xpose.msra.mxu0 %v1142_v43  ;;  %1082 = vrot.lane.b32.xlu0 %v10681_v26, %s10417_s16 }
 0x48a   :  { %9222 = vmatprep.subr.msk.bf16.mxu0 %vm629_vm1, %v10851_v37 }
 0x48d   :  { %1064 = vrot.lane.b32.xlu0 %v10633_v42, %s10418_s17 }
 0x491   :  { %8496 = vmatpush3.bf16.xpose.msra.mxu0 %v1139_v57  ;;  %1066 = vrot.lane.b32.xlu0 %v10631_v39, %s10418_s17 }
 0x492   :  { %9223 = vmatprep.subr.msk.bf16.mxu0 %vm629_vm1, %v1091_v62 }
 0x495   :  { %1068 = vrot.lane.b32.xlu0 %v10639_v56, %s10418_s17 }
 0x499   :  { %8498 = vmatpush3.bf16.xpose.msra.mxu0 %v1136_v27  ;;  %1070 = vrot.lane.b32.xlu0 %v10637_v53, %s10418_s17 }
 0x49d   :  { %1074 = vrot.lane.b32.xlu0 %v10643_v4, %s10418_s17 }
 0x4a1   :  { %1078 = vrot.lane.b32.xlu0 %v10657_v20, %s10418_s17 }
 0x4a3   :  { %v868_v2 = vpop.xlane.xlu0 %867 }
 0x4a7   :  { %v864_v3 = vpop.xlane.xlu0 %863 }
 0x4a8   :  { %9402 = vrcp.f32 %v864_v3 }
 0x4a9   :  { %9404 = vrcp.f32 %v868_v2  ;;  %v866_v37 = vpop.xlane.xlu1 %865 }
 0x4aa   :  { %9406 = vrcp.f32 %v866_v37 }
 0x4ab   :  { %v870_v31 = vpop.xlane.xlu0 %869 }
 0x4ac   :  { %9408 = vrcp.f32 %v870_v31 }
 0x4ad   :  { %v1089_v13 = vpop.permute.xlu1 %1088 }
 0x4ae   :  { %9224 = vmatprep.subr.msk.bf16.mxu0 %vm629_vm1, %v1089_v13  ;;  %v1133_v48 = vsel %vm629_vm1, %v1089_v13, 0 }
 0x4af   :  { %8500 = vmatpush3.bf16.xpose.msra.mxu0 %v1133_v48  ;;  %v1087_v45 = vpop.permute.xlu0 %1086 }
 0x4b0   :  { %9225 = vmatprep.subr.msk.bf16.mxu0 %vm629_vm1, %v1087_v45  ;;  %v1130_v6 = vsel %vm629_vm1, %v1087_v45, 0 }
 0x4b3   :  { %v1085_v10 = vpop.permute.xlu0 %1084 }
 0x4b4   :  { %v1127_v43 = vsel %vm629_vm1, %v1085_v10, 0 }
 0x4b5   :  { %v9403_v60 = vpop.eup %9402 }
 0x4b6   :  { %v9405_v5 = vpop.eup %9404  ;;  %v907_v11 = vmul.f32 %v9403_v60, %v10860_v18 }
 0x4b7   :  { %v9407_v9 = vpop.eup %9406  ;;  %8502 = vmatpush3.bf16.xpose.msra.mxu0 %v1130_v6  ;;  %v909_v49 = vmul.f32 %v9405_v5, %v10857_v16 }
 0x4b8   :  { %9226 = vmatprep.subr.msk.bf16.mxu0 %vm629_vm1, %v1085_v10  ;;  %v908_v12 = vmul.f32 %v9407_v9, %v10863_v21 }
 0x4b9   :  { %v9409_v52 = vpop.eup %9408 }
 0x4ba   :  { %v921_v34 = vpack.c.bf16 %v908_v12, %v907_v11  ;;  %v910_v40 = vmul.f32 %v9409_v52, %v10866_v29 }
 0x4bc   :  { %8481 = vmatprep.mubr.bf16.mxu0 %v921_v34  ;;  %v922_v55 = vpack.c.bf16 %v910_v40, %v909_v49 }
 0x4be   :  { %8482 = vmatmul.mubr.bf16.gmra.mxu0 %v922_v55 }
 0x4bf   :  { %8504 = vmatpush3.bf16.xpose.msra.mxu0 %v1127_v43 }
 0x4de   :  { %v882_v21 = vpop.xlane.xlu1 %881 }
 0x4e2   :  { %v1081_v11 = vpop.permute.xlu1 %1080 }
 0x4e3   :  { %v1121_v49 = vsel %vm629_vm1, %v1081_v11, 0 }
 0x4e4   :  { %v876_v57 = vpop.xlane.xlu0 %875 }
 0x4e8   :  { %v872_v62 = vpop.xlane.xlu0 %871 }
 0x4ec   :  { %v878_v27 = vpop.xlane.xlu0 %877 }
 0x4ed   :  { %9410 = vrcp.f32 %v878_v27 }
 0x4ee   :  { %9412 = vrcp.f32 %v872_v62 }
 0x4ef   :  { %9414 = vrcp.f32 %v876_v57 }
 0x4f0   :  { %v874_v18 = vpop.xlane.xlu0 %873 }
 0x4f1   :  { %9416 = vrcp.f32 %v874_v18 }
 0x4f2   :  { %9418 = vrcp.f32 %v882_v21 }
 0x4f4   :  { %v884_v2 = vpop.xlane.xlu0 %883 }
 0x4f8   :  { %v880_v16 = vpop.xlane.xlu0 %879 }
 0x4f9   :  { %9420 = vrcp.f32 %v880_v16 }
 0x4fa   :  { %v9411_v29 = vpop.eup %9410  ;;  %9422 = vrcp.f32 %v884_v2  ;;  %v1073_v2 = vpop.permute.xlu1 %1072 }
 0x4fb   :  { %v9413_v3 = vpop.eup %9412  ;;  %v914_v48 = vmul.f32 %v9411_v29, %v10892_v25 }
 0x4fc   :  { %v886_v37 = vpop.xlane.xlu0 %885  ;;  %v9415_v31 = vpop.eup %9414  ;;  %v911_v45 = vmul.f32 %v9413_v3, %v10889_v33 }
 0x4fd   :  { %9424 = vrcp.f32 %v886_v37  ;;  %v913_v6 = vmul.f32 %v9415_v31, %v10885_v36  ;;  %v305_v36 = vld [vmem:[%s14517_s18] sm:$0xf] }
 0x4fe   :  { %v9417_v13 = vpop.eup %9416 }
 0x4ff   :  { %v912_v60 = vmul.f32 %v9417_v13, %v10895_v46  ;;  %v924_v12 = vpack.c.bf16 %v914_v48, %v913_v6  ;;  %v9419_v25 = vpop.eup %9418 }
 0x500   :  { %v1083_v5 = vpop.permute.xlu0 %1082  ;;  %v916_v52 = vmul.f32 %v9419_v25, %v10880_v8 }
 0x501   :  { %9227 = vmatprep.subr.msk.bf16.mxu0 %vm629_vm1, %v1083_v5  ;;  %v1124_v9 = vsel %vm629_vm1, %v1083_v5, 0  ;;  %v923_v10 = vpack.c.bf16 %v912_v60, %v911_v45 }
 0x502   :  { %8506 = vmatpush3.bf16.xpose.msra.mxu0 %v1124_v9 }
 0x503   :  { %8485 = vmatprep.mubr.bf16.mxu0 %v923_v10  ;;  %9228 = vmatprep.subr.msk.bf16.mxu0 %vm629_vm1, %v1081_v11 }
 0x504   :  { %8486 = vmatmul.mubr.bf16.gmra.mxu0 %v924_v12  ;;  %v1065_v43 = vpop.permute.xlu0 %1064 }
 0x506   :  { %v9421_v33 = vpop.eup %9420 }
 0x507   :  { %v915_v46 = vmul.f32 %v9421_v33, %v10905_v58  ;;  %v9423_v34 = vpop.eup %9422  ;;  %v1672_v58 = vsel %vm1546_vm2, %v305_v36, 0 }
 0x508   :  { %v917_v57 = vmul.f32 %v9423_v34, %v10900_v51  ;;  %v1067_v8 = vpop.permute.xlu0 %1066 }
 0x509   :  { %v925_v40 = vpack.c.bf16 %v916_v52, %v915_v46 }
 0x50a   :  { %v9425_v55 = vpop.eup %9424  ;;  %8508 = vmatpush3.bf16.xpose.msra.mxu0 %v1121_v49 }
 0x50b   :  { %8489 = vmatprep.mubr.bf16.mxu0 %v925_v40  ;;  %v918_v62 = vmul.f32 %v9425_v55, %v10910_v1  ;;  %9230 = vmatprep.subr.msk.bf16.mxu0 %vm1546_vm2, %v305_v36  ;;  %v1077_v1 = vpop.permute.xlu1 %1076 }
 0x50c   :  { %v1069_v18 = vpop.permute.xlu0 %1068 }
 0x50d   :  { %v926_v27 = vpack.c.bf16 %v918_v62, %v917_v57 }
 0x50f   :  { %8490 = vmatmul.mubr.bf16.gmra.mxu0 %v926_v27 }
 0x510   :  { %8509 = vmatprep.mubr.msk.bf16.mxu0 %vm629_vm1, %v1065_v43  ;;  %v1071_v21 = vpop.permute.xlu0 %1070 }
 0x514   :  { %v1075_v51 = vpop.permute.xlu0 %1074 }
 0x517   :  { %8510 = vmatmul.mubr.msk.bf16.vlgmr.msra.gmra.mxu0 %vm629_vm1, %v1067_v8 }
 0x518   :  { %8513 = vmatprep.mubr.msk.bf16.mxu0 %vm629_vm1, %v1069_v18  ;;  %8576 = vmatpush3.bf16.msra.mxu0 %v1672_v58  ;;  %v1079_v16 = vpop.permute.xlu0 %1078 }
 0x51f   :  { %8514 = vmatmul.mubr.msk.bf16.gmra.mxu0 %vm629_vm1, %v1071_v21 }
 0x520   :  { %8517 = vmatprep.mubr.msk.bf16.mxu0 %vm629_vm1, %v1073_v2 }
 0x527   :  { %8518 = vmatmul.mubr.msk.bf16.gmra.mxu0 %vm629_vm1, %v1075_v51 }
 0x528   :  { %8521 = vmatprep.mubr.msk.bf16.mxu0 %vm629_vm1, %v1077_v1 }
 0x52f   :  { %8522 = vmatmul.mubr.msk.bf16.gmra.mxu0 %vm629_vm1, %v1079_v16 }
 0x548   :  { %v8479_v29 = vpop.f32.mrf.mxu0 }
 0x54a   :  { %v985_v3 = vpop.f32.mrf.mxu0 }
 0x54c   :  { %v8480_v37 = vpop.f32.mrf.mxu0 }
 0x54d   :  { %v1049_v48 = vpack.c.bf16 %v8480_v37, %v8479_v29 }
 0x54e   :  { %v988_v31 = vpop.f32.mrf.mxu0 }
 0x54f   :  { %v1048_v13 = vpack.c.bf16 %v988_v31, %v985_v3 }
 0x551   :  { %8577 = vmatprep.mubr.msk.bf16.mxu0 %vm629_vm1, %v1048_v13 }
 0x552   :  { %8578 = vmatmul.mubr.msk.bf16.vlgmr.msra.gmra.mxu0 %vm629_vm1, %v1049_v48 }
 0x57e   :  { %v8483_v45 = vpop.f32.mrf.mxu0 }
 0x580   :  { %v1001_v60 = vpop.f32.mrf.mxu0 }
 0x582   :  { %v8484_v5 = vpop.f32.mrf.mxu0 }
 0x583   :  { %v1051_v10 = vpack.c.bf16 %v8484_v5, %v8483_v45 }
 0x584   :  { %v1004_v6 = vpop.f32.mrf.mxu0 }
 0x585   :  { %v1050_v9 = vpack.c.bf16 %v1004_v6, %v1001_v60  ;;  %v14520_v6 = vld [vmem:[#allocation49_spill] sm:$0xff] }
 0x587   :  { %8581 = vmatprep.mubr.msk.bf16.mxu0 %vm629_vm1, %v1050_v9 }
 0x588   :  { %8582 = vmatmul.mubr.msk.bf16.gmra.mxu0 %vm629_vm1, %v1051_v10 }
 0x5c4   :  { %v8487_v11 = vpop.f32.mrf.mxu0 }
 0x5c6   :  { %v1017_v12 = vpop.f32.mrf.mxu0 }
 0x5c8   :  { %v8488_v25 = vpop.f32.mrf.mxu0 }
 0x5c9   :  { %v1053_v52 = vpack.c.bf16 %v8488_v25, %v8487_v11 }
 0x5ca   :  { %v1020_v33 = vpop.f32.mrf.mxu0 }
 0x5cb   :  { %v1052_v46 = vpack.c.bf16 %v1020_v33, %v1017_v12 }
 0x5cd   :  { %8585 = vmatprep.mubr.msk.bf16.mxu0 %vm629_vm1, %v1052_v46 }
 0x5ce   :  { %8586 = vmatmul.mubr.msk.bf16.gmra.mxu0 %vm629_vm1, %v1053_v52 }
 0x5cf   :  { %v8491_v34 = vpop.f32.mrf.mxu0 }
 0x5d1   :  { %v1033_v36 = vpop.f32.mrf.mxu0 }
 0x5d3   :  { %v8492_v49 = vpop.f32.mrf.mxu0 }
 0x5d4   :  { %v1055_v43 = vpack.c.bf16 %v8492_v49, %v8491_v34 }
 0x5d5   :  { %v1036_v40 = vpop.f32.mrf.mxu0 }
 0x5d6   :  { %v1054_v55 = vpack.c.bf16 %v1036_v40, %v1033_v36 }
 0x5d7   :  { %v8511_v57 = vpop.f32.mrf.mxu0 }
 0x5d8   :  { %v1187_v62 = vadd.f32 %v8511_v57, %v10729_v54  ;;  %8589 = vmatprep.mubr.msk.bf16.mxu0 %vm629_vm1, %v1054_v55 }
 0x5d9   :  { %v1178_v27 = vpop.f32.mrf.mxu0  ;;  %8590 = vmatmul.mubr.msk.bf16.gmra.mxu0 %vm629_vm1, %v1055_v43 }
 0x5da   :  { %v1179_v8 = vadd.f32 %v1178_v27, %v10734_v59  ;;  %1245 = vmax.xlane.f32.xlu0 %v1187_v62 }
 0x5db   :  { %v8512_v58 = vpop.f32.mrf.mxu0 }
 0x5dc   :  { %1241 = vmax.xlane.f32.xlu1 %v1179_v8  ;;  %v1190_v21 = vadd.f32 %v8512_v58, %v10742_v63 }
 0x5dd   :  { %v1181_v18 = vpop.f32.mrf.mxu0 }
 0x5de   :  { %v10984_v2 = vadd.f32 %v1181_v18, %v10737_v61 }
 0x5df   :  { %v8515_v54 = vpop.f32.mrf.mxu0 }
 0x5e0   :  { %1243 = vmax.xlane.f32.xlu0 %v10984_v2  ;;  %1247 = vmax.xlane.f32.xlu1 %v1190_v21  ;;  %v10992_v61 = vadd.f32 %v8515_v54, %v10757_v14 }
 0x5e1   :  { %v1194_v59 = vpop.f32.mrf.mxu0 }
 0x5e2   :  { %v11000_v31 = vadd.f32 %v1194_v59, %v10764_v19 }
 0x5e3   :  { %v8516_v51 = vpop.f32.mrf.mxu0 }
 0x5e4   :  { %v10995_v3 = vadd.f32 %v8516_v51, %v10759_v15 }
 0x5e5   :  { %v1197_v1 = vpop.f32.mrf.mxu0 }
 0x5e6   :  { %v11003_v13 = vadd.f32 %v1197_v1, %v10770_v28 }
 0x5e7   :  { %v8519_v16 = vpop.f32.mrf.mxu0 }
 0x5e8   :  { %v11008_v14 = vadd.f32 %v8519_v16, %v10776_v30 }
 0x5e9   :  { %v1210_v29 = vpop.f32.mrf.mxu0 }
 0x5ea   :  { %v11016_v19 = vadd.f32 %v1210_v29, %v10788_v35 }
 0x5eb   :  { %v8520_v63 = vpop.f32.mrf.mxu0 }
 0x5ec   :  { %v11011_v15 = vadd.f32 %v8520_v63, %v10782_v32 }
 0x5ed   :  { %v1213_v37 = vpop.f32.mrf.mxu0 }
 0x5ee   :  { %v11019_v28 = vadd.f32 %v1213_v37, %v10794_v38 }
 0x5ef   :  { %v8523_v48 = vpop.f32.mrf.mxu0 }
 0x5f0   :  { %v11024_v30 = vadd.f32 %v8523_v48, %v10800_v41  ;;  %v14518_v41 = vld [vmem:[#allocation48_spill] sm:$0xff] }
 0x5f1   :  { %1405 = vrot.lane.b32.xlu1 %v10667_v24, %s10419_s5  ;;  %v1226_v45 = vpop.f32.mrf.mxu0 }
 0x5f2   :  { %v11032_v35 = vadd.f32 %v1226_v45, %v10812_v47 }
 0x5f3   :  { %v8524_v60 = vpop.f32.mrf.mxu0 }
 0x5f4   :  { %v11027_v32 = vadd.f32 %v8524_v60, %v10806_v44  ;;  %v14519_v44 = vld [vmem:[#allocation50_spill] sm:$0xff] }
 0x5f5   :  { %v1229_v5 = vpop.f32.mrf.mxu0 }
 0x5f6   :  { %1407 = vrot.lane.b32.xlu0 %v10655_v17, %s10419_s5  ;;  %v11035_v38 = vadd.f32 %v1229_v5, %v10818_v50 }
 0x615   :  { %1253 = vmax.xlane.f32.xlu0 %v10992_v61  ;;  %1255 = vmax.xlane.f32.xlu1 %v10995_v3 }
 0x619   :  { %1251 = vmax.xlane.f32.xlu1 %v11003_v13  ;;  %1249 = vmax.xlane.f32.xlu0 %v11000_v31 }
 0x61d   :  { %1261 = vmax.xlane.f32.xlu0 %v11008_v14  ;;  %1263 = vmax.xlane.f32.xlu1 %v11011_v15 }
 0x621   :  { %1259 = vmax.xlane.f32.xlu1 %v11019_v28  ;;  %1257 = vmax.xlane.f32.xlu0 %v11016_v19 }
 0x625   :  { %1269 = vmax.xlane.f32.xlu0 %v11024_v30  ;;  %1271 = vmax.xlane.f32.xlu1 %v11027_v32 }
 0x629   :  { %1267 = vmax.xlane.f32.xlu1 %v11035_v38  ;;  %1265 = vmax.xlane.f32.xlu0 %v11032_v35 }
 0x63f   :  { %1403 = vrot.lane.b32.xlu0 %v10641_v0, %s10419_s5 }
 0x643   :  { %1401 = vrot.lane.b32.xlu0 %v14518_v41, %s10419_s5 }
 0x647   :  { %1399 = vrot.lane.b32.xlu0 %v14519_v44, %s10419_s5 }
 0x64b   :  { %1397 = vrot.lane.b32.xlu0 %v14520_v6, %s10419_s5 }
 0x64f   :  { %1393 = vrot.lane.b32.xlu0 %v10663_v22, %s10419_s5 }
 0x663   :  { %v1246_v47 = vpop.xlane.xlu0 %1245 }
 0x664   :  { %v1275_v50 = vsub.f32 %v1187_v62, %v1246_v47 }
 0x665   :  { %v1242_v9 = vpop.xlane.xlu1 %1241 }
 0x666   :  { %v1293_v10 = vmul.f32 1.442695, %v1275_v50  ;;  %v1273_v11 = vsub.f32 %v1179_v8, %v1242_v9 }
 0x668   :  { %9426 = vpow2.f32 %v1293_v10  ;;  %v1289_v12 = vmul.f32 1.442695, %v1273_v11 }
 0x669   :  { %v1248_v25 = vpop.xlane.xlu1 %1247  ;;  %v1244_v33 = vpop.xlane.xlu0 %1243 }
 0x66a   :  { %v1276_v46 = vsub.f32 %v1190_v21, %v1248_v25  ;;  %9428 = vpow2.f32 %v1289_v12  ;;  %v1274_v34 = vsub.f32 %v10984_v2, %v1244_v33 }
 0x66c   :  { %v1295_v52 = vmul.f32 1.442695, %v1276_v46  ;;  %v1291_v40 = vmul.f32 1.442695, %v1274_v34 }
 0x66d   :  { %v1408_v36 = vpop.permute.xlu0 %1407  ;;  %v1406_v49 = vpop.permute.xlu1 %1405 }
 0x66e   :  { %8525 = vmatprep.subr.bf16.mxu1 %v1408_v36  ;;  %9430 = vpow2.f32 %v1295_v52 }
 0x66f   :  { %8526 = vmatpush3.bf16.msra.mxu1 %v1408_v36  ;;  %9432 = vpow2.f32 %v1291_v40 }
 0x670   :  { %8527 = vmatprep.subr.bf16.mxu1 %v1406_v49 }
 0x673   :  { %8528 = vmatpush3.bf16.msra.mxu1 %v1406_v49 }
 0x675   :  { %v11050_v55 = vpop.eup %9426 }
 0x676   :  { %1325 = vadd.xlane.f32.xlu1 %v11050_v55 }
 0x677   :  { %v11053_v43 = vpop.eup %9428 }
 0x67a   :  { %1321 = vadd.xlane.f32.xlu1 %v11053_v43 }
 0x67b   :  { %v11056_v57 = vpop.eup %9430 }
 0x67c   :  { %v11059_v62 = vpop.eup %9432 }
 0x67e   :  { %1327 = vadd.xlane.f32.xlu1 %v11056_v57 }
 0x682   :  { %1323 = vadd.xlane.f32.xlu1 %v11059_v62 }
 0x693   :  { %1395 = vrot.lane.b32.xlu1 %v10681_v26, %s10419_s5 }
 0x69e   :  { %v1256_v27 = vpop.xlane.xlu1 %1255  ;;  %v1254_v8 = vpop.xlane.xlu0 %1253 }
 0x69f   :  { %v1279_v21 = vsub.f32 %v10992_v61, %v1254_v8  ;;  %v1280_v59 = vsub.f32 %v10995_v3, %v1256_v27 }
 0x6a1   :  { %v1301_v63 = vmul.f32 1.442695, %v1279_v21  ;;  %v1303_v37 = vmul.f32 1.442695, %v1280_v59 }
 0x6a2   :  { %v1252_v58 = vpop.xlane.xlu1 %1251  ;;  %v1250_v18 = vpop.xlane.xlu0 %1249 }
 0x6a3   :  { %v1278_v2 = vsub.f32 %v11003_v13, %v1252_v58  ;;  %v1277_v54 = vsub.f32 %v11000_v31, %v1250_v18 }
 0x6a5   :  { %v1299_v51 = vmul.f32 1.442695, %v1278_v2  ;;  %v1297_v1 = vmul.f32 1.442695, %v1277_v54 }
 0x6a6   :  { %v1264_v16 = vpop.xlane.xlu1 %1263  ;;  %v1262_v29 = vpop.xlane.xlu0 %1261 }
 0x6a7   :  { %9434 = vpow2.f32 %v1299_v51  ;;  %v1283_v13 = vsub.f32 %v11008_v14, %v1262_v29  ;;  %v1284_v3 = vsub.f32 %v11011_v15, %v1264_v16 }
 0x6a8   :  { %9436 = vpow2.f32 %v1297_v1 }
 0x6a9   :  { %9438 = vpow2.f32 %v1301_v63  ;;  %v1309_v9 = vmul.f32 1.442695, %v1283_v13  ;;  %v1311_v10 = vmul.f32 1.442695, %v1284_v3 }
 0x6aa   :  { %v1260_v48 = vpop.xlane.xlu1 %1259  ;;  %v1258_v45 = vpop.xlane.xlu0 %1257  ;;  %9440 = vpow2.f32 %v1303_v37 }
 0x6ab   :  { %v1282_v60 = vsub.f32 %v11019_v28, %v1260_v48  ;;  %v1281_v61 = vsub.f32 %v11016_v19, %v1258_v45  ;;  %v306_v48 = vld [vmem:[%s14517_s18 + $0x4] sm:$0xf] }
 0x6ad   :  { %v1307_v31 = vmul.f32 1.442695, %v1282_v60  ;;  %v1305_v5 = vmul.f32 1.442695, %v1281_v61 }
 0x6ae   :  { %v1272_v47 = vpop.xlane.xlu1 %1271  ;;  %v1270_v50 = vpop.xlane.xlu0 %1269 }
 0x6af   :  { %9442 = vpow2.f32 %v1305_v5  ;;  %v1287_v14 = vsub.f32 %v11024_v30, %v1270_v50  ;;  %v1288_v15 = vsub.f32 %v11027_v32, %v1272_v47 }
 0x6b0   :  { %9444 = vpow2.f32 %v1307_v31 }
 0x6b1   :  { %9446 = vpow2.f32 %v1309_v9  ;;  %v1319_v36 = vmul.f32 1.442695, %v1288_v15 }
 0x6b2   :  { %v1268_v11 = vpop.xlane.xlu1 %1267  ;;  %v1266_v12 = vpop.xlane.xlu0 %1265  ;;  %9448 = vpow2.f32 %v1311_v10 }
 0x6b3   :  { %v1286_v25 = vsub.f32 %v11035_v38, %v1268_v11  ;;  %v1285_v28 = vsub.f32 %v11032_v35, %v1266_v12  ;;  %v1317_v35 = vmul.f32 1.442695, %v1287_v14 }
 0x6b4   :  { %v11074_v19 = vpop.eup %9434 }
 0x6b5   :  { %v1315_v33 = vmul.f32 1.442695, %v1286_v25  ;;  %v1313_v46 = vmul.f32 1.442695, %v1285_v28  ;;  %1331 = vadd.xlane.f32.xlu0 %v11074_v19  ;;  %v11079_v52 = vpop.eup %9436 }
 0x6b6   :  { %v1404_v34 = vpop.permute.xlu0 %1403  ;;  %v11082_v38 = vpop.eup %9438 }
 0x6b7   :  { %1329 = vadd.xlane.f32.xlu1 %v11079_v52  ;;  %8529 = vmatprep.subr.bf16.mxu1 %v1404_v34  ;;  %9450 = vpow2.f32 %v1313_v46  ;;  %v11085_v30 = vpop.eup %9440 }
 0x6b8   :  { %8530 = vmatpush3.bf16.msra.mxu1 %v1404_v34  ;;  %9452 = vpow2.f32 %v1315_v33 }
 0x6b9   :  { %1333 = vadd.xlane.f32.xlu0 %v11082_v38  ;;  %9454 = vpow2.f32 %v1317_v35 }
 0x6ba   :  { %v1402_v32 = vpop.permute.xlu0 %1401  ;;  %9456 = vpow2.f32 %v1319_v36 }
 0x6bb   :  { %1335 = vadd.xlane.f32.xlu1 %v11085_v30  ;;  %8531 = vmatprep.subr.bf16.mxu1 %v1402_v32 }
 0x6bc   :  { %8532 = vmatpush3.bf16.msra.mxu1 %v1402_v32  ;;  %v11088_v49 = vpop.eup %9442 }
 0x6bd   :  { %v11090_v40 = vpop.eup %9444  ;;  %1337 = vadd.xlane.f32.xlu0 %v11088_v49 }
 0x6be   :  { %v1400_v27 = vpop.permute.xlu0 %1399  ;;  %v11094_v8 = vpop.eup %9446 }
 0x6bf   :  { %1339 = vadd.xlane.f32.xlu1 %v11090_v40  ;;  %8533 = vmatprep.subr.bf16.mxu1 %v1400_v27  ;;  %v11096_v58 = vpop.eup %9448 }
 0x6c0   :  { %8534 = vmatpush3.bf16.msra.mxu1 %v1400_v27 }
 0x6c1   :  { %1341 = vadd.xlane.f32.xlu0 %v11094_v8 }
 0x6c2   :  { %v1398_v18 = vpop.permute.xlu0 %1397 }
 0x6c3   :  { %1343 = vadd.xlane.f32.xlu1 %v11096_v58  ;;  %8535 = vmatprep.subr.bf16.mxu1 %v1398_v18 }
 0x6c4   :  { %8536 = vmatpush3.bf16.msra.mxu1 %v1398_v18  ;;  %v11100_v21 = vpop.eup %9450 }
 0x6c5   :  { %v11102_v2 = vpop.eup %9452  ;;  %1345 = vadd.xlane.f32.xlu0 %v11100_v21 }
 0x6c6   :  { %v11106_v54 = vpop.eup %9454  ;;  %v1394_v37 = vpop.permute.xlu0 %1393 }
 0x6c7   :  { %1347 = vadd.xlane.f32.xlu1 %v11102_v2  ;;  %v11108_v59 = vpop.eup %9456 }
 0x6c9   :  { %1349 = vadd.xlane.f32.xlu0 %v11106_v54 }
 0x6cb   :  { %1351 = vadd.xlane.f32.xlu1 %v11108_v59 }
 0x6dc   :  { %1799 = vrot.lane.b32.xlu1 %v10667_v24, %s10420_s22 }
 0x6df   :  { %1801 = vrot.lane.b32.xlu0 %v10655_v17, %s10420_s22 }
 0x6e0   :  { %1797 = vrot.lane.b32.xlu1 %v10641_v0, %s10420_s22 }
 0x6e3   :  { %1795 = vrot.lane.b32.xlu0 %v14518_v41, %s10420_s22 }
 0x6e4   :  { %1793 = vrot.lane.b32.xlu1 %v14519_v44, %s10420_s22 }
 0x6e7   :  { %1791 = vrot.lane.b32.xlu0 %v14520_v6, %s10420_s22 }
 0x6e8   :  { %1789 = vrot.lane.b32.xlu1 %v10681_v26, %s10420_s22 }
 0x6eb   :  { %1787 = vrot.lane.b32.xlu0 %v10663_v22, %s10420_s22 }
 0x6ec   :  { %1771 = vrot.lane.b32.xlu1 %v10633_v42, %s10421_s23 }
 0x6ef   :  { %1773 = vrot.lane.b32.xlu0 %v10631_v39, %s10421_s23 }
 0x6f0   :  { %1775 = vrot.lane.b32.xlu1 %v10639_v56, %s10421_s23 }
 0x6f3   :  { %1777 = vrot.lane.b32.xlu0 %v10637_v53, %s10421_s23 }
 0x6f4   :  { %1779 = vrot.lane.b32.xlu1 %v10647_v7, %s10421_s23 }
 0x6f7   :  { %1781 = vrot.lane.b32.xlu0 %v10643_v4, %s10421_s23 }
 0x6f8   :  { %1783 = vrot.lane.b32.xlu1 %v10665_v23, %s10421_s23 }
 0x6fb   :  { %1785 = vrot.lane.b32.xlu0 %v10657_v20, %s10421_s23 }
 0x6fc   :  { %2399 = vrot.lane.b32.xlu1 %v10655_v17, %s10422_s13 }
 0x6ff   :  { %v1326_v51 = vpop.xlane.xlu1 %1325  ;;  %2397 = vrot.lane.b32.xlu0 %v10667_v24, %s10422_s13 }
 0x700   :  { %2395 = vrot.lane.b32.xlu1 %v10641_v0, %s10422_s13 }
 0x703   :  { %v1322_v1 = vpop.xlane.xlu1 %1321  ;;  %2393 = vrot.lane.b32.xlu0 %v14518_v41, %s10422_s13 }
 0x704   :  { %2391 = vrot.lane.b32.xlu1 %v14519_v44, %s10422_s13 }
 0x707   :  { %v1328_v16 = vpop.xlane.xlu1 %1327  ;;  %2389 = vrot.lane.b32.xlu0 %v14520_v6, %s10422_s13 }
 0x708   :  { %2387 = vrot.lane.b32.xlu1 %v10681_v26, %s10422_s13  ;;  %9458 = vrcp.f32 %v1328_v16 }
 0x709   :  { %9460 = vrcp.f32 %v1322_v1 }
 0x70a   :  { %9462 = vrcp.f32 %v1326_v51 }
 0x70b   :  { %v1324_v29 = vpop.xlane.xlu1 %1323  ;;  %2385 = vrot.lane.b32.xlu0 %v10663_v22, %s10422_s13 }
 0x70c   :  { %9464 = vrcp.f32 %v1324_v29  ;;  %2369 = vrot.lane.b32.xlu1 %v10633_v42, %s10423_s28 }
 0x70f   :  { %v1396_v63 = vpop.permute.xlu1 %1395  ;;  %2371 = vrot.lane.b32.xlu0 %v10631_v39, %s10423_s28 }
 0x710   :  { %2375 = vrot.lane.b32.xlu1 %v10637_v53, %s10423_s28  ;;  %8537 = vmatprep.subr.bf16.mxu1 %v1396_v63 }
 0x711   :  { %8538 = vmatpush3.bf16.msra.mxu1 %v1396_v63 }
 0x712   :  { %8539 = vmatprep.subr.bf16.mxu1 %v1394_v37 }
 0x713   :  { %2373 = vrot.lane.b32.xlu0 %v10639_v56, %s10423_s28 }
 0x714   :  { %2379 = vrot.lane.b32.xlu1 %v10643_v4, %s10423_s28 }
 0x715   :  { %v9459_v45 = vpop.eup %9458  ;;  %8540 = vmatpush3.bf16.msra.mxu1 %v1394_v37 }
 0x716   :  { %v9461_v42 = vpop.eup %9460  ;;  %9229 = vmatprep.subr.msk.bf16.mxu1 %vm1546_vm2, %v306_v48  ;;  %v1372_v60 = vmul.f32 %v9459_v45, %v11056_v57 }
 0x717   :  { %v9463_v39 = vpop.eup %9462  ;;  %2377 = vrot.lane.b32.xlu0 %v10647_v7, %s10423_s28  ;;  %v1369_v56 = vmul.f32 %v9461_v42, %v11053_v43 }
 0x718   :  { %2383 = vrot.lane.b32.xlu1 %v10657_v20, %s10423_s28  ;;  %v1371_v61 = vmul.f32 %v9463_v39, %v11050_v55  ;;  %v1548_v20 = vsel %vm1546_vm2, %v306_v48, 0 }
 0x719   :  { %v9465_v53 = vpop.eup %9464 }
 0x71a   :  { %v1370_v4 = vmul.f32 %v9465_v53, %v11059_v62  ;;  %v1386_v13 = vpack.c.bf16 %v1372_v60, %v1371_v61 }
 0x71b   :  { %2381 = vrot.lane.b32.xlu0 %v10665_v23, %s10423_s28 }
 0x71c   :  { %2114 = vrot.lane.b32.xlu1 %v10655_v17, %s10424_s1  ;;  %v1385_v7 = vpack.c.bf16 %v1370_v4, %v1369_v56 }
 0x71e   :  { %8541 = vmatprep.mubr.bf16.mxu1 %v1385_v7 }
 0x71f   :  { %8542 = vmatmul.mubr.bf16.vlgmr.msra.gmra.mxu1 %v1386_v13  ;;  %2110 = vrot.lane.b32.xlu0 %v10641_v0, %s10424_s1 }
 0x720   :  { %2112 = vrot.lane.b32.xlu1 %v10667_v24, %s10424_s1  ;;  %8558 = vmatpush3.bf16.msra.mxu1 %v1548_v20 }
 0x724   :  { %2108 = vrot.lane.b32.xlu1 %v14518_v41, %s10424_s1 }
 0x73e   :  { %v1332_v23 = vpop.xlane.xlu0 %1331 }
 0x73f   :  { %9466 = vrcp.f32 %v1332_v23 }
 0x740   :  { %v1330_v55 = vpop.xlane.xlu1 %1329 }
 0x741   :  { %9468 = vrcp.f32 %v1330_v55 }
 0x742   :  { %v1334_v43 = vpop.xlane.xlu0 %1333 }
 0x743   :  { %9470 = vrcp.f32 %v1334_v43 }
 0x744   :  { %v1336_v57 = vpop.xlane.xlu1 %1335 }
 0x745   :  { %9472 = vrcp.f32 %v1336_v57 }
 0x746   :  { %v1338_v62 = vpop.xlane.xlu0 %1337 }
 0x747   :  { %9474 = vrcp.f32 %v1338_v62 }
 0x748   :  { %v1340_v3 = vpop.xlane.xlu1 %1339 }
 0x749   :  { %9476 = vrcp.f32 %v1340_v3 }
 0x74a   :  { %v1342_v31 = vpop.xlane.xlu0 %1341 }
 0x74b   :  { %9478 = vrcp.f32 %v1342_v31 }
 0x74c   :  { %v9467_v5 = vpop.eup %9466  ;;  %v1344_v47 = vpop.xlane.xlu1 %1343 }
 0x74d   :  { %9480 = vrcp.f32 %v1344_v47  ;;  %v1374_v11 = vmul.f32 %v9467_v5, %v11074_v19 }
 0x74e   :  { %v9469_v50 = vpop.eup %9468  ;;  %v1346_v9 = vpop.xlane.xlu0 %1345 }
 0x74f   :  { %v1373_v10 = vmul.f32 %v9469_v50, %v11079_v52  ;;  %9482 = vrcp.f32 %v1346_v9 }
 0x750   :  { %v9471_v12 = vpop.eup %9470  ;;  %v1348_v25 = vpop.xlane.xlu1 %1347 }
 0x751   :  { %9484 = vrcp.f32 %v1348_v25  ;;  %v1387_v28 = vpack.c.bf16 %v1374_v11, %v1373_v10  ;;  %v1375_v33 = vmul.f32 %v9471_v12, %v11082_v38 }
 0x752   :  { %v9473_v14 = vpop.eup %9472  ;;  %v1350_v15 = vpop.xlane.xlu0 %1349 }
 0x753   :  { %8545 = vmatprep.mubr.bf16.mxu1 %v1387_v28  ;;  %v1376_v46 = vmul.f32 %v9473_v14, %v11085_v30  ;;  %9486 = vrcp.f32 %v1350_v15 }
 0x754   :  { %v1352_v34 = vpop.xlane.xlu1 %1351  ;;  %v9475_v35 = vpop.eup %9474 }
 0x755   :  { %9488 = vrcp.f32 %v1352_v34  ;;  %v1388_v36 = vpack.c.bf16 %v1376_v46, %v1375_v33  ;;  %v1377_v19 = vmul.f32 %v9475_v35, %v11088_v49 }
 0x756   :  { %v9477_v52 = vpop.eup %9476  ;;  %v11195_v32 = vpop.permute.xlu0 %1801 }
 0x757   :  { %8546 = vmatmul.mubr.bf16.gmra.mxu1 %v1388_v36  ;;  %v1378_v27 = vmul.f32 %v9477_v52, %v11090_v40  ;;  %9231 = vmatprep.subr.msk.bf16.mxu1 %vm629_vm1, %v11195_v32 }
 0x758   :  { %v11201_v18 = vpop.permute.xlu1 %1799  ;;  %v9479_v38 = vpop.eup %9478 }
 0x759   :  { %v1389_v30 = vpack.c.bf16 %v1378_v27, %v1377_v19  ;;  %v1379_v16 = vmul.f32 %v9479_v38, %v11094_v8 }
 0x75a   :  { %v9481_v51 = vpop.eup %9480  ;;  %v11203_v1 = vpop.permute.xlu0 %1795 }
 0x75b   :  { %8549 = vmatprep.mubr.bf16.mxu1 %v1389_v30  ;;  %v1380_v29 = vmul.f32 %v9481_v51, %v11096_v58  ;;  %v1849_v51 = vsel %vm629_vm1, %v11195_v32, 0  ;;  %v1840_v32 = vsel %vm629_vm1, %v11203_v1, 0 }
 0x75c   :  { %v11207_v63 = vpop.permute.xlu1 %1797  ;;  %v9483_v49 = vpop.eup %9482 }
 0x75d   :  { %v1390_v37 = vpack.c.bf16 %v1380_v29, %v1379_v16  ;;  %v1381_v45 = vmul.f32 %v9483_v49, %v11100_v21  ;;  %v1846_v16 = vsel %vm629_vm1, %v11201_v18, 0  ;;  %v1843_v29 = vsel %vm629_vm1, %v11207_v63, 0 }
 0x75e   :  { %v9485_v40 = vpop.eup %9484  ;;  %v11209_v48 = vpop.permute.xlu0 %1791 }
 0x75f   :  { %8550 = vmatmul.mubr.bf16.gmra.mxu1 %v1390_v37  ;;  %v1382_v42 = vmul.f32 %v9485_v40, %v11102_v2 }
 0x760   :  { %v11213_v39 = vpop.permute.xlu1 %1793  ;;  %v9487_v53 = vpop.eup %9486 }
 0x761   :  { %v1391_v60 = vpack.c.bf16 %v1382_v42, %v1381_v45  ;;  %v1383_v58 = vmul.f32 %v9487_v53, %v11106_v54 }
 0x762   :  { %v9489_v56 = vpop.eup %9488  ;;  %v11215_v8 = vpop.permute.xlu0 %1787 }
 0x763   :  { %8553 = vmatprep.mubr.bf16.mxu1 %v1391_v60  ;;  %v1384_v4 = vmul.f32 %v9489_v56, %v11108_v59  ;;  %v1828_v60 = vsel %vm629_vm1, %v11215_v8, 0 }
 0x764   :  { %v11219_v61 = vpop.permute.xlu1 %1789 }
 0x765   :  { %v1392_v7 = vpack.c.bf16 %v1384_v4, %v1383_v58  ;;  %v1831_v37 = vsel %vm629_vm1, %v11219_v61, 0 }
 0x766   :  { %v11221_v13 = vpop.permute.xlu0 %1773 }
 0x767   :  { %8554 = vmatmul.mubr.bf16.gmra.mxu1 %v1392_v7 }
 0x768   :  { %v11223_v21 = vpop.permute.xlu1 %1771 }
 0x76a   :  { %v11225_v2 = vpop.permute.xlu0 %1777 }
 0x76c   :  { %v11227_v20 = vpop.permute.xlu1 %1775 }
 0x76e   :  { %v11229_v23 = vpop.permute.xlu0 %1781 }
 0x770   :  { %v11231_v55 = vpop.permute.xlu1 %1779 }
 0x772   :  { %v11233_v43 = vpop.permute.xlu0 %1785 }
 0x774   :  { %v11235_v54 = vpop.permute.xlu1 %1783 }
 0x776   :  { %v11237_v59 = vpop.permute.xlu0 %2397 }
 0x778   :  { %v11239_v57 = vpop.permute.xlu1 %2399 }
 0x77a   :  { %v11241_v62 = vpop.permute.xlu0 %2393 }
 0x77c   :  { %v11243_v3 = vpop.permute.xlu1 %2395 }
 0x77e   :  { %v11245_v31 = vpop.permute.xlu0 %2389 }
 0x780   :  { %v11247_v5 = vpop.permute.xlu1 %2391 }
 0x782   :  { %v11249_v47 = vpop.permute.xlu0 %2385 }
 0x784   :  { %v11251_v50 = vpop.permute.xlu1 %2387 }
 0x786   :  { %v11253_v9 = vpop.permute.xlu0 %2371 }
 0x788   :  { %v11255_v10 = vpop.permute.xlu1 %2369 }
 0x78a   :  { %v11257_v11 = vpop.permute.xlu0 %2373 }
 0x78c   :  { %v11259_v12 = vpop.permute.xlu1 %2375 }
 0x78e   :  { %v11263_v28 = vpop.permute.xlu0 %2377 }
 0x790   :  { %v11261_v25 = vpop.permute.xlu1 %2379 }
 0x792   :  { %v11267_v15 = vpop.permute.xlu0 %2381 }
 0x794   :  { %v11265_v14 = vpop.permute.xlu1 %2383 }
 0x796   :  { %v2111_v34 = vpop.permute.xlu0 %2110 }
 0x798   :  { %v2115_v33 = vpop.permute.xlu1 %2114 }
 0x799   :  { %8625 = vmatprep.subr.bf16.mxu0 %v2115_v33 }
 0x79a   :  { %8626 = vmatpush3.bf16.msra.mxu0 %v2115_v33 }
 0x79c   :  { %v2113_v46 = vpop.permute.xlu1 %2112 }
 0x79d   :  { %8627 = vmatprep.subr.bf16.mxu0 %v2113_v46 }
 0x79e   :  { %8628 = vmatpush3.bf16.msra.mxu0 %v2113_v46 }
 0x79f   :  { %8629 = vmatprep.subr.bf16.mxu0 %v2111_v34 }
 0x7a0   :  { %v2109_v35 = vpop.permute.xlu1 %2108 }
 0x7a2   :  { %8630 = vmatpush3.bf16.msra.mxu0 %v2111_v34 }
 0x7a3   :  { %8631 = vmatprep.subr.bf16.mxu0 %v2109_v35 }
 0x7a6   :  { %8632 = vmatpush3.bf16.msra.mxu0 %v2109_v35 }
 0x7df   :  { %v8543_v36 = vpop.f32.mrf.mxu1 }
 0x7e1   :  { %v1451_v52 = vpop.f32.mrf.mxu1 }
 0x7e3   :  { %v8544_v19 = vpop.f32.mrf.mxu1 }
 0x7e4   :  { %v1515_v30 = vpack.c.bf16 %v8544_v19, %v8543_v36 }
 0x7e5   :  { %v1454_v27 = vpop.f32.mrf.mxu1 }
 0x7e6   :  { %v1514_v38 = vpack.c.bf16 %v1454_v27, %v1451_v52  ;;  %v2444_v52 = vsel %vm629_vm1, %v11237_v59, 0 }
 0x7e8   :  { %8559 = vmatprep.mubr.msk.bf16.mxu1 %vm629_vm1, %v1514_v38  ;;  %v11408_v38 = vld [vmem:[#allocation7] sm:$0xff] }
 0x7e9   :  { %8560 = vmatmul.mubr.msk.bf16.vlgmr.msra.gmra.mxu1 %vm629_vm1, %v1515_v30 }
 0x7ea   :  { %8594 = vmatpush3.bf16.xpose.msra.mxu1 %v1849_v51 }
 0x7eb   :  { %9232 = vmatprep.subr.msk.bf16.mxu1 %vm629_vm1, %v11201_v18  ;;  %v1837_v18 = vsel %vm629_vm1, %v11213_v39, 0 }
 0x7f2   :  { %8596 = vmatpush3.bf16.xpose.msra.mxu1 %v1846_v16 }
 0x7f3   :  { %9233 = vmatprep.subr.msk.bf16.mxu1 %vm629_vm1, %v11207_v63  ;;  %v1834_v63 = vsel %vm629_vm1, %v11209_v48, 0 }
 0x7fa   :  { %8598 = vmatpush3.bf16.xpose.msra.mxu1 %v1843_v29  ;;  %v11415_v29 = vld [vmem:[#allocation7 + $0x18] sm:$0xff] }
 0x7fb   :  { %9234 = vmatprep.subr.msk.bf16.mxu1 %vm629_vm1, %v11203_v1 }
 0x802   :  { %8600 = vmatpush3.bf16.xpose.msra.mxu1 %v1840_v32 }
 0x803   :  { %9235 = vmatprep.subr.msk.bf16.mxu1 %vm629_vm1, %v11213_v39 }
 0x80a   :  { %8602 = vmatpush3.bf16.xpose.msra.mxu1 %v1837_v18  ;;  %v11420_v18 = vld [vmem:[#allocation7 + $0x8] sm:$0xff] }
 0x80b   :  { %9236 = vmatprep.subr.msk.bf16.mxu1 %vm629_vm1, %v11209_v48 }
 0x812   :  { %8604 = vmatpush3.bf16.xpose.msra.mxu1 %v1834_v63 }
 0x813   :  { %9237 = vmatprep.subr.msk.bf16.mxu1 %vm629_vm1, %v11219_v61 }
 0x817   :  { %v8547_v49 = vpop.f32.mrf.mxu1 }
 0x819   :  { %v1467_v1 = vpop.f32.mrf.mxu1 }
 0x81a   :  { %8606 = vmatpush3.bf16.xpose.msra.mxu1 %v1831_v37  ;;  %v11427_v37 = vld [vmem:[#allocation7 + $0x30] sm:$0xff] }
 0x81b   :  { %9238 = vmatprep.subr.msk.bf16.mxu1 %vm629_vm1, %v11215_v8  ;;  %v8548_v40 = vpop.f32.mrf.mxu1  ;;  %v2447_v8 = vsel %vm629_vm1, %v11239_v57, 0 }
 0x81c   :  { %v1517_v39 = vpack.c.bf16 %v8548_v40, %v8547_v49 }
 0x81d   :  { %v1470_v45 = vpop.f32.mrf.mxu1 }
 0x81e   :  { %v1516_v42 = vpack.c.bf16 %v1470_v45, %v1467_v1 }
 0x81f   :  { %v8551_v53 = vpop.f32.mrf.mxu1 }
 0x820   :  { %8563 = vmatprep.mubr.msk.bf16.mxu1 %vm629_vm1, %v1516_v42  ;;  %v11432_v42 = vld [vmem:[#allocation7 + $0x38] sm:$0xff] }
 0x821   :  { %v1483_v48 = vpop.f32.mrf.mxu1  ;;  %8564 = vmatmul.mubr.msk.bf16.gmra.mxu1 %vm629_vm1, %v1517_v39 }
 0x822   :  { %8608 = vmatpush3.bf16.xpose.msra.mxu1 %v1828_v60 }
 0x823   :  { %9240 = vmatprep.subr.msk.bf16.mxu1 %vm629_vm1, %v11239_v57  ;;  %v8552_v56 = vpop.f32.mrf.mxu1 }
 0x824   :  { %v1519_v61 = vpack.c.bf16 %v8552_v56, %v8551_v53 }
 0x825   :  { %v1486_v58 = vpop.f32.mrf.mxu1 }
 0x826   :  { %v1518_v4 = vpack.c.bf16 %v1486_v58, %v1483_v48  ;;  %v11438_v48 = vld [vmem:[#allocation7 + $0x20] sm:$0xff]  ;;  %v11444_v58 = vld [vmem:[#allocation7 + $0x28] sm:$0xff] }
 0x827   :  { %v8555_v7 = vpop.f32.mrf.mxu1 }
 0x828   :  { %8567 = vmatprep.mubr.msk.bf16.mxu1 %vm629_vm1, %v1518_v4 }
 0x829   :  { %v1499_v33 = vpop.f32.mrf.mxu1  ;;  %8568 = vmatmul.mubr.msk.bf16.gmra.mxu1 %vm629_vm1, %v1519_v61 }
 0x82b   :  { %v8556_v46 = vpop.f32.mrf.mxu1 }
 0x82c   :  { %v1521_v36 = vpack.c.bf16 %v8556_v46, %v8555_v7  ;;  %v11450_v7 = vld [vmem:[#allocation7 + $0x50] sm:$0xff] }
 0x82d   :  { %v1502_v34 = vpop.f32.mrf.mxu1 }
 0x82e   :  { %v1520_v35 = vpack.c.bf16 %v1502_v34, %v1499_v33  ;;  %v11456_v34 = vld [vmem:[#allocation7 + $0x40] sm:$0xff] }
 0x830   :  { %8571 = vmatprep.mubr.msk.bf16.mxu1 %vm629_vm1, %v1520_v35 }
 0x831   :  { %8572 = vmatmul.mubr.msk.bf16.gmra.mxu1 %vm629_vm1, %v1521_v36 }
 0x832   :  { %8609 = vmatprep.mubr.msk.bf16.mxu1 %vm629_vm1, %v11223_v21  ;;  %v2438_v21 = vsel %vm629_vm1, %v11241_v62, 0 }
 0x839   :  { %8610 = vmatmul.mubr.msk.bf16.vlgmr.msra.gmra.mxu1 %vm629_vm1, %v11221_v13  ;;  %v2441_v13 = vsel %vm629_vm1, %v11243_v3, 0 }
 0x83a   :  { %8676 = vmatpush3.bf16.xpose.msra.mxu1 %v2447_v8  ;;  %8613 = vmatprep.mubr.msk.bf16.mxu1 %vm629_vm1, %v11227_v20  ;;  %v2432_v20 = vsel %vm629_vm1, %v11245_v31, 0  ;;  %v11462_v8 = vld [vmem:[#allocation7 + $0x48] sm:$0xff] }
 0x83b   :  { %9241 = vmatprep.subr.msk.bf16.mxu1 %vm629_vm1, %v11237_v59 }
 0x841   :  { %8614 = vmatmul.mubr.msk.bf16.gmra.mxu1 %vm629_vm1, %v11225_v2  ;;  %v2435_v2 = vsel %vm629_vm1, %v11247_v5, 0 }
 0x842   :  { %8678 = vmatpush3.bf16.xpose.msra.mxu1 %v2444_v52  ;;  %8617 = vmatprep.mubr.msk.bf16.mxu1 %vm629_vm1, %v11231_v55  ;;  %v2426_v55 = vsel %vm629_vm1, %v11249_v47, 0 }
 0x843   :  { %9242 = vmatprep.subr.msk.bf16.mxu1 %vm629_vm1, %v11243_v3 }
 0x849   :  { %8618 = vmatmul.mubr.msk.bf16.gmra.mxu1 %vm629_vm1, %v11229_v23  ;;  %v2429_v23 = vsel %vm629_vm1, %v11251_v50, 0 }
 0x84a   :  { %8680 = vmatpush3.bf16.xpose.msra.mxu1 %v2441_v13  ;;  %8621 = vmatprep.mubr.msk.bf16.mxu1 %vm629_vm1, %v11235_v54 }
 0x84b   :  { %9243 = vmatprep.subr.msk.bf16.mxu1 %vm629_vm1, %v11241_v62 }
 0x851   :  { %8622 = vmatmul.mubr.msk.bf16.gmra.mxu1 %vm629_vm1, %v11233_v43 }
 0x852   :  { %8682 = vmatpush3.bf16.xpose.msra.mxu1 %v2438_v21  ;;  %8691 = vmatprep.mubr.msk.bf16.mxu1 %vm629_vm1, %v11255_v10  ;;  %v11468_v21 = vld [vmem:[#allocation7 + $0x58] sm:$0xff] }
 0x853   :  { %9244 = vmatprep.subr.msk.bf16.mxu1 %vm629_vm1, %v11247_v5 }
 0x85a   :  { %8684 = vmatpush3.bf16.xpose.msra.mxu1 %v2435_v2 }
 0x85b   :  { %9245 = vmatprep.subr.msk.bf16.mxu1 %vm629_vm1, %v11245_v31 }
 0x862   :  { %8686 = vmatpush3.bf16.xpose.msra.mxu1 %v2432_v20 }
 0x863   :  { %9246 = vmatprep.subr.msk.bf16.mxu1 %vm629_vm1, %v11251_v50 }
 0x86a   :  { %8688 = vmatpush3.bf16.xpose.msra.mxu1 %v2429_v23  ;;  %v11474_v23 = vld [vmem:[#allocation7 + $0x70] sm:$0xff] }
 0x86b   :  { %9247 = vmatprep.subr.msk.bf16.mxu1 %vm629_vm1, %v11249_v47 }
 0x872   :  { %8690 = vmatpush3.bf16.xpose.msra.mxu1 %v2426_v55 }
 0x879   :  { %8692 = vmatmul.mubr.msk.bf16.vlgmr.msra.gmra.mxu1 %vm629_vm1, %v11253_v9 }
 0x87a   :  { %8695 = vmatprep.mubr.msk.bf16.mxu1 %vm629_vm1, %v11257_v11 }
 0x881   :  { %8696 = vmatmul.mubr.msk.bf16.gmra.mxu1 %vm629_vm1, %v11259_v12 }
 0x882   :  { %8699 = vmatprep.mubr.msk.bf16.mxu1 %vm629_vm1, %v11263_v28 }
 0x889   :  { %8700 = vmatmul.mubr.msk.bf16.gmra.mxu1 %vm629_vm1, %v11261_v25 }
 0x88a   :  { %8703 = vmatprep.mubr.msk.bf16.mxu1 %vm629_vm1, %v11267_v15  ;;  %v11403_v15 = vld [vmem:[#allocation7 + $0x10] sm:$0xff] }
 0x891   :  { %8704 = vmatmul.mubr.msk.bf16.gmra.mxu1 %vm629_vm1, %v11265_v14 }
 0x8a9   :  { %v11371_v43 = vpop.f32.mrf.mxu1 }
 0x8ab   :  { %v11373_v54 = vpop.f32.mrf.mxu1 }
 0x8ad   :  { %v11375_v59 = vpop.f32.mrf.mxu1 }
 0x8af   :  { %v11377_v57 = vpop.f32.mrf.mxu1 }
 0x8b0   :  { %14521 = vst [vmem:[#allocation48_spill] sm:$0xff] %v11377_v57 }
 0x8e1   :  { %v11379_v62 = vpop.f32.mrf.mxu1 }
 0x8e2   :  { %14522 = vst [vmem:[#allocation50_spill] sm:$0xff] %v11379_v62 }
 0x8e3   :  { %v11381_v3 = vpop.f32.mrf.mxu1 }
 0x8e4   :  { %14523 = vst [vmem:[#allocation49_spill] sm:$0xff] %v11381_v3 }
 0x8e5   :  { %v11383_v31 = vpop.f32.mrf.mxu1 }
 0x8e6   :  { %14524 = vst [vmem:[#allocation51_spill] sm:$0xff] %v11383_v31 }
 0x8e7   :  { %v11385_v5 = vpop.f32.mrf.mxu1 }
 0x8e8   :  { %14525 = vst [vmem:[#allocation52_spill] sm:$0xff] %v11385_v5 }
 0x8e9   :  { %v11387_v47 = vpop.f32.mrf.mxu1 }
 0x8ea   :  { %14526 = vst [vmem:[#allocation53_spill] sm:$0xff] %v11387_v47 }
 0x8eb   :  { %v11389_v50 = vpop.f32.mrf.mxu1 }
 0x8ec   :  { %14527 = vst [vmem:[#allocation54_spill] sm:$0xff] %v11389_v50 }
 0x8ed   :  { %v11391_v9 = vpop.f32.mrf.mxu1 }
 0x8ee   :  { %14528 = vst [vmem:[#allocation55_spill] sm:$0xff] %v11391_v9 }
 0x8ef   :  { %v11393_v10 = vpop.f32.mrf.mxu1 }
 0x8f0   :  { %14529 = vst [vmem:[#allocation56_spill] sm:$0xff] %v11393_v10 }
 0x8f1   :  { %v11395_v11 = vpop.f32.mrf.mxu1 }
 0x8f2   :  { %14530 = vst [vmem:[#allocation57_spill] sm:$0xff] %v11395_v11 }
 0x8f3   :  { %v11397_v12 = vpop.f32.mrf.mxu1 }
 0x8f4   :  { %14531 = vst [vmem:[#allocation58_spill] sm:$0xff] %v11397_v12 }
 0x8f5   :  { %v11399_v25 = vpop.f32.mrf.mxu1 }
 0x8f6   :  { %14532 = vst [vmem:[#allocation59_spill] sm:$0xff] %v11399_v25 }
 0x8f7   :  { %v11401_v28 = vpop.f32.mrf.mxu1 }
 0x8f8   :  { %14533 = vst [vmem:[#allocation60_spill] sm:$0xff] %v11401_v28 }
 0x8f9   :  { %v8611_v14 = vpop.f32.mrf.mxu1 }
 0x8fa   :  { %v11406_v19 = vadd.f32 %v11403_v15, %v8611_v14 }
 0x8fb   :  { %v1885_v27 = vpop.f32.mrf.mxu1 }
 0x8fc   :  { %v11411_v30 = vadd.f32 %v11408_v38, %v1885_v27  ;;  %1952 = vmax.xlane.f32.xlu0 %v11406_v19  ;;  %v11480_v27 = vld [vmem:[#allocation7 + $0x60] sm:$0xff] }
 0x8fd   :  { %v8612_v51 = vpop.f32.mrf.mxu1 }
 0x8fe   :  { %1948 = vmax.xlane.f32.xlu1 %v11411_v30  ;;  %v11418_v32 = vadd.f32 %v11415_v29, %v8612_v51 }
 0x8ff   :  { %v1888_v16 = vpop.f32.mrf.mxu1 }
 0x900   :  { %v11423_v63 = vadd.f32 %v11420_v18, %v1888_v16 }
 0x901   :  { %v8615_v49 = vpop.f32.mrf.mxu1 }
 0x902   :  { %1950 = vmax.xlane.f32.xlu0 %v11423_v63  ;;  %1954 = vmax.xlane.f32.xlu1 %v11418_v32  ;;  %v11430_v40 = vadd.f32 %v11427_v37, %v8615_v49  ;;  %v11486_v49 = vld [vmem:[#allocation7 + $0x68] sm:$0xff] }
 0x903   :  { %v1901_v1 = vpop.f32.mrf.mxu1 }
 0x904   :  { %v11441_v60 = vadd.f32 %v11438_v48, %v1901_v1 }
 0x905   :  { %v8616_v45 = vpop.f32.mrf.mxu1 }
 0x906   :  { %v11435_v39 = vadd.f32 %v11432_v42, %v8616_v45  ;;  %1960 = vmax.xlane.f32.xlu0 %v11430_v40  ;;  %v11492_v45 = vld [vmem:[#allocation7 + $0x78] sm:$0xff] }
 0x907   :  { %v1904_v53 = vpop.f32.mrf.mxu1 }
 0x908   :  { %1962 = vmax.xlane.f32.xlu1 %v11435_v39  ;;  %v11447_v4 = vadd.f32 %v11444_v58, %v1904_v53 }
 0x909   :  { %v8619_v56 = vpop.f32.mrf.mxu1 }
 0x90a   :  { %1956 = vmax.xlane.f32.xlu0 %v11441_v60  ;;  %v11453_v33 = vadd.f32 %v11450_v7, %v8619_v56 }
 0x90b   :  { %v1917_v61 = vpop.f32.mrf.mxu1 }
 0x90c   :  { %1958 = vmax.xlane.f32.xlu1 %v11447_v4  ;;  %v11459_v35 = vadd.f32 %v11456_v34, %v1917_v61 }
 0x90d   :  { %v8620_v46 = vpop.f32.mrf.mxu1 }
 0x90e   :  { %1968 = vmax.xlane.f32.xlu0 %v11453_v33  ;;  %v11471_v2 = vadd.f32 %v11468_v21, %v8620_v46 }
 0x90f   :  { %v1920_v36 = vpop.f32.mrf.mxu1 }
 0x910   :  { %v11465_v52 = vadd.f32 %v11462_v8, %v1920_v36  ;;  %1964 = vmax.xlane.f32.xlu1 %v11459_v35 }
 0x911   :  { %v8623_v13 = vpop.f32.mrf.mxu1 }
 0x912   :  { %1966 = vmax.xlane.f32.xlu0 %v11465_v52  ;;  %v11477_v55 = vadd.f32 %v11474_v23, %v8623_v13 }
 0x913   :  { %v1933_v20 = vpop.f32.mrf.mxu1 }
 0x914   :  { %1970 = vmax.xlane.f32.xlu1 %v11471_v2  ;;  %v11483_v51 = vadd.f32 %v11480_v27, %v1933_v20 }
 0x915   :  { %v8624_v14 = vpop.f32.mrf.mxu1 }
 0x916   :  { %1976 = vmax.xlane.f32.xlu0 %v11477_v55  ;;  %v11495_v53 = vadd.f32 %v11492_v45, %v8624_v14 }
 0x917   :  { %v1936_v16 = vpop.f32.mrf.mxu1 }
 0x918   :  { %v11489_v1 = vadd.f32 %v11486_v49, %v1936_v16  ;;  %1972 = vmax.xlane.f32.xlu1 %v11483_v51 }
 0x91a   :  { %1974 = vmax.xlane.f32.xlu0 %v11489_v1 }
 0x91c   :  { %1978 = vmax.xlane.f32.xlu1 %v11495_v53 }
 0x92d   :  { %2104 = vrot.lane.b32.xlu1 %v14520_v6, %s10424_s1 }
 0x930   :  { %2106 = vrot.lane.b32.xlu0 %v14519_v44, %s10424_s1 }
 0x985   :  { %v1953_v56 = vpop.xlane.xlu0 %1952 }
 0x986   :  { %v1982_v61 = vsub.f32 %v11406_v19, %v1953_v56 }
 0x987   :  { %v1949_v46 = vpop.xlane.xlu1 %1948 }
 0x988   :  { %v2000_v36 = vmul.f32 1.442695, %v1982_v61  ;;  %v1980_v13 = vsub.f32 %v11411_v30, %v1949_v46 }
 0x98a   :  { %9490 = vpow2.f32 %v2000_v36  ;;  %v1996_v20 = vmul.f32 1.442695, %v1980_v13 }
 0x98b   :  { %v1955_v14 = vpop.xlane.xlu1 %1954  ;;  %v1951_v16 = vpop.xlane.xlu0 %1950 }
 0x98c   :  { %v1983_v28 = vsub.f32 %v11418_v32, %v1955_v14  ;;  %v1981_v10 = vsub.f32 %v11423_v63, %v1951_v16  ;;  %9492 = vpow2.f32 %v1996_v20 }
 0x98e   :  { %v2002_v5 = vmul.f32 1.442695, %v1983_v28  ;;  %v1998_v57 = vmul.f32 1.442695, %v1981_v10 }
 0x98f   :  { %v1961_v25 = vpop.xlane.xlu0 %1960 }
 0x990   :  { %v1986_v12 = vsub.f32 %v11430_v40, %v1961_v25  ;;  %9494 = vpow2.f32 %v1998_v57 }
 0x991   :  { %v1963_v19 = vpop.xlane.xlu1 %1962  ;;  %9496 = vpow2.f32 %v2002_v5 }
 0x992   :  { %v2008_v56 = vmul.f32 1.442695, %v1986_v12  ;;  %v1987_v30 = vsub.f32 %v11435_v39, %v1963_v19 }
 0x993   :  { %v1957_v61 = vpop.xlane.xlu0 %1956 }
 0x994   :  { %9498 = vpow2.f32 %v2008_v56  ;;  %v2010_v46 = vmul.f32 1.442695, %v1987_v30  ;;  %v1984_v36 = vsub.f32 %v11441_v60, %v1957_v61 }
 0x995   :  { %v1959_v32 = vpop.xlane.xlu1 %1958 }
 0x996   :  { %9500 = vpow2.f32 %v2010_v46  ;;  %v2004_v63 = vmul.f32 1.442695, %v1984_v36  ;;  %v1985_v28 = vsub.f32 %v11447_v4, %v1959_v32 }
 0x997   :  { %v11511_v10 = vpop.eup %9490  ;;  %v1969_v13 = vpop.xlane.xlu0 %1968 }
 0x998   :  { %9502 = vpow2.f32 %v2004_v63  ;;  %v2006_v57 = vmul.f32 1.442695, %v1985_v28  ;;  %v1990_v5 = vsub.f32 %v11453_v33, %v1969_v13  ;;  %2032 = vadd.xlane.f32.xlu0 %v11511_v10 }
 0x999   :  { %v1965_v12 = vpop.xlane.xlu1 %1964  ;;  %v11516_v39 = vpop.eup %9492 }
 0x99a   :  { %9504 = vpow2.f32 %v2006_v57  ;;  %v2016_v25 = vmul.f32 1.442695, %v1990_v5  ;;  %v1988_v40 = vsub.f32 %v11459_v35, %v1965_v12 }
 0x99b   :  { %v1967_v60 = vpop.xlane.xlu0 %1966 }
 0x99c   :  { %9506 = vpow2.f32 %v2016_v25  ;;  %2028 = vadd.xlane.f32.xlu0 %v11516_v39  ;;  %v2012_v4 = vmul.f32 1.442695, %v1988_v40  ;;  %v1989_v16 = vsub.f32 %v11465_v52, %v1967_v60 }
 0x99d   :  { %v1971_v20 = vpop.xlane.xlu1 %1970  ;;  %v11519_v14 = vpop.eup %9494 }
 0x99e   :  { %v1991_v33 = vsub.f32 %v11471_v2, %v1971_v20  ;;  %v11523_v19 = vpop.eup %9496  ;;  %2030 = vadd.xlane.f32.xlu1 %v11519_v14  ;;  %9508 = vpow2.f32 %v2012_v4  ;;  %v2014_v36 = vmul.f32 1.442695, %v1989_v16  ;;  %v8693_v16 = vpop.f32.mrf.mxu1 }
 0x99f   :  { %v1977_v56 = vpop.xlane.xlu0 %1976 }
 0x9a0   :  { %v2018_v35 = vmul.f32 1.442695, %v1991_v33  ;;  %v1994_v30 = vsub.f32 %v11477_v55, %v1977_v56  ;;  %2034 = vadd.xlane.f32.xlu0 %v11523_v19  ;;  %v2483_v33 = vpop.f32.mrf.mxu1 }
 0x9a1   :  { %v11528_v61 = vpop.eup %9498  ;;  %v1973_v46 = vpop.xlane.xlu1 %1972 }
 0x9a2   :  { %9510 = vpow2.f32 %v2018_v35  ;;  %v2024_v32 = vmul.f32 1.442695, %v1994_v30  ;;  %v1992_v52 = vsub.f32 %v11483_v51, %v1973_v46  ;;  %2040 = vadd.xlane.f32.xlu1 %v11528_v61  ;;  %v8694_v56 = vpop.f32.mrf.mxu1 }
 0x9a3   :  { %v11531_v2 = vpop.eup %9500  ;;  %v1975_v63 = vpop.xlane.xlu0 %1974 }
 0x9a4   :  { %9512 = vpow2.f32 %v2024_v32  ;;  %2042 = vadd.xlane.f32.xlu0 %v11531_v2  ;;  %v2020_v28 = vmul.f32 1.442695, %v1992_v52  ;;  %v2486_v35 = vpop.f32.mrf.mxu1  ;;  %v1993_v32 = vsub.f32 %v11489_v1, %v1975_v63  ;;  %v11588_v63 = vadd.f32 %v11403_v15, %v8693_v16 }
 0x9a5   :  { %v11535_v55 = vpop.eup %9502  ;;  %v1979_v13 = vpop.xlane.xlu1 %1978  ;;  %9514 = vpow2.f32 %v2014_v36 }
 0x9a6   :  { %2036 = vadd.xlane.f32.xlu1 %v11535_v55  ;;  %9516 = vpow2.f32 %v2020_v28  ;;  %v8697_v30 = vpop.f32.mrf.mxu1  ;;  %v2022_v28 = vmul.f32 1.442695, %v1993_v32 }
 0x9a7   :  { %v11537_v57 = vpop.eup %9504  ;;  %v2107_v5 = vpop.permute.xlu0 %2106 }
 0x9a8   :  { %2038 = vadd.xlane.f32.xlu0 %v11537_v57  ;;  %8633 = vmatprep.subr.bf16.mxu0 %v2107_v5  ;;  %v2499_v46 = vpop.f32.mrf.mxu1  ;;  %9518 = vpow2.f32 %v2022_v28 }
 0x9a9   :  { %v11541_v51 = vpop.eup %9506  ;;  %v2105_v12 = vpop.permute.xlu1 %2104  ;;  %8634 = vmatpush3.bf16.msra.mxu0 %v2107_v5  ;;  %v1995_v5 = vsub.f32 %v11495_v53, %v1979_v13  ;;  %v11569_v3 = vadd.f32 %v11438_v48, %v2499_v46  ;;  %v11584_v48 = vadd.f32 %v11420_v18, %v2486_v35  ;;  %v11602_v18 = vadd.f32 %v11427_v37, %v8697_v30 }
 0x9aa   :  { %8635 = vmatprep.subr.bf16.mxu0 %v2105_v12  ;;  %2048 = vadd.xlane.f32.xlu1 %v11541_v51  ;;  %v8698_v36 = vpop.f32.mrf.mxu1 }
 0x9ab   :  { %v11544_v25 = vpop.eup %9508  ;;  %v2026_v11 = vmul.f32 1.442695, %v1995_v5  ;;  %v11608_v15 = vadd.f32 %v11432_v42, %v8698_v36 }
 0x9ac   :  { %v2502_v52 = vpop.f32.mrf.mxu1 }
 0x9ad   :  { %8636 = vmatpush3.bf16.msra.mxu0 %v2105_v12  ;;  %9520 = vpow2.f32 %v2026_v11  ;;  %v11579_v11 = vadd.f32 %v11408_v38, %v2483_v33  ;;  %v11596_v38 = vadd.f32 %v11444_v58, %v2502_v52 }
 0x9ae   :  { %2044 = vadd.xlane.f32.xlu1 %v11544_v25  ;;  %v8701_v12 = vpop.f32.mrf.mxu1 }
 0x9af   :  { %v11546_v40 = vpop.eup %9510 }
 0x9b0   :  { %2050 = vadd.xlane.f32.xlu0 %v11546_v40  ;;  %v2515_v9 = vpop.f32.mrf.mxu1 }
 0x9b1   :  { %v11550_v60 = vpop.eup %9512 }
 0x9b2   :  { %v11552_v4 = vpop.eup %9514  ;;  %2056 = vadd.xlane.f32.xlu1 %v11550_v60  ;;  %v8702_v50 = vpop.f32.mrf.mxu1 }
 0x9b3   :  { %v11556_v20 = vpop.eup %9516 }
 0x9b4   :  { %2046 = vadd.xlane.f32.xlu0 %v11552_v4  ;;  %v2518_v47 = vpop.f32.mrf.mxu1 }
 0x9b5   :  { %v11565_v31 = vpop.eup %9518 }
 0x9b6   :  { %2052 = vadd.xlane.f32.xlu1 %v11556_v20  ;;  %v8705_v62 = vpop.f32.mrf.mxu1 }
 0x9b7   :  { %v11576_v53 = vadd.f32 %v11474_v23, %v8705_v62  ;;  %v11592_v62 = vadd.f32 %v11415_v29, %v8694_v56 }
 0x9b8   :  { %v2531_v29 = vpop.f32.mrf.mxu1 }
 0x9ba   :  { %v11571_v1 = vpop.eup %9520 }
 0x9c7   :  { %2100 = vrot.lane.b32.xlu1 %v10663_v22, %s10424_s1 }
 0x9ca   :  { %2102 = vrot.lane.b32.xlu0 %v10681_v26, %s10424_s1 }
 0x9e9   :  { %2054 = vadd.xlane.f32.xlu0 %v11565_v31 }
 0x9eb   :  { %2554 = vmax.xlane.f32.xlu1 %v11569_v3 }
 0x9ed   :  { %2058 = vadd.xlane.f32.xlu0 %v11571_v1 }
 0x9ef   :  { %2574 = vmax.xlane.f32.xlu1 %v11576_v53 }
 0x9f1   :  { %2546 = vmax.xlane.f32.xlu0 %v11579_v11 }
 0x9f5   :  { %2548 = vmax.xlane.f32.xlu0 %v11584_v48 }
 0x9f9   :  { %2550 = vmax.xlane.f32.xlu0 %v11588_v63 }
 0x9fd   :  { %2552 = vmax.xlane.f32.xlu0 %v11592_v62 }
 0xa00   :  { %2712 = vrot.lane.b32.xlu1 %v10655_v17, %s10425_s3  ;;  %v11614_v17 = vadd.f32 %v11456_v34, %v2515_v9  ;;  %v8706_v9 = vpop.f32.mrf.mxu1 }
 0xa01   :  { %2556 = vmax.xlane.f32.xlu0 %v11596_v38 }
 0xa04   :  { %2708 = vrot.lane.b32.xlu1 %v10641_v0, %s10425_s3  ;;  %v11620_v0 = vadd.f32 %v11462_v8, %v2518_v47  ;;  %v2534_v47 = vpop.f32.mrf.mxu1 }
 0xa05   :  { %2558 = vmax.xlane.f32.xlu0 %v11602_v18  ;;  %v11642_v37 = vadd.f32 %v11486_v49, %v2534_v47 }
 0xa08   :  { %2706 = vrot.lane.b32.xlu1 %v14518_v41, %s10425_s3  ;;  %v11626_v41 = vadd.f32 %v11450_v7, %v8701_v12 }
 0xa09   :  { %2560 = vmax.xlane.f32.xlu0 %v11608_v15 }
 0xa0c   :  { %2704 = vrot.lane.b32.xlu1 %v14519_v44, %s10425_s3  ;;  %v11632_v44 = vadd.f32 %v11468_v21, %v8702_v50  ;;  %v11646_v50 = vadd.f32 %v11492_v45, %v8706_v9 }
 0xa0d   :  { %2562 = vmax.xlane.f32.xlu0 %v11614_v17 }
 0xa10   :  { %2702 = vrot.lane.b32.xlu1 %v14520_v6, %s10425_s3  ;;  %v11638_v6 = vadd.f32 %v11480_v27, %v2531_v29  ;;  %v307_v29 = vld [vmem:[%s14517_s18 + $0x8] sm:$0xf] }
 0xa11   :  { %2564 = vmax.xlane.f32.xlu0 %v11620_v0 }
 0xa14   :  { %2700 = vrot.lane.b32.xlu1 %v10681_v26, %s10425_s3 }
 0xa15   :  { %2566 = vmax.xlane.f32.xlu0 %v11626_v41 }
 0xa18   :  { %2698 = vrot.lane.b32.xlu1 %v10663_v22, %s10425_s3 }
 0xa19   :  { %2568 = vmax.xlane.f32.xlu0 %v11632_v44 }
 0xa1d   :  { %2570 = vmax.xlane.f32.xlu0 %v11638_v6 }
 0xa21   :  { %2572 = vmax.xlane.f32.xlu0 %v11642_v37  ;;  %v2033_v26 = vpop.xlane.xlu0 %2032 }
 0xa25   :  { %2576 = vmax.xlane.f32.xlu0 %v11646_v50  ;;  %v2029_v22 = vpop.xlane.xlu0 %2028 }
 0xa26   :  { %9522 = vrcp.f32 %v2029_v22  ;;  %v2254_v22 = vsel %vm1546_vm2, %v307_v29, 0 }
 0xa27   :  { %v2031_v42 = vpop.xlane.xlu1 %2030 }
 0xa28   :  { %9524 = vrcp.f32 %v2031_v42 }
 0xa29   :  { %v2035_v58 = vpop.xlane.xlu0 %2034 }
 0xa2a   :  { %9526 = vrcp.f32 %v2035_v58 }
 0xa2b   :  { %v2041_v7 = vpop.xlane.xlu1 %2040 }
 0xa2d   :  { %v2043_v34 = vpop.xlane.xlu0 %2042 }
 0xa2f   :  { %v2037_v8 = vpop.xlane.xlu1 %2036 }
 0xa31   :  { %v2039_v21 = vpop.xlane.xlu0 %2038 }
 0xa32   :  { %9528 = vrcp.f32 %v2039_v21 }
 0xa33   :  { %v9523_v23 = vpop.eup %9522  ;;  %v2049_v27 = vpop.xlane.xlu1 %2048  ;;  %9530 = vrcp.f32 %v2033_v26 }
 0xa34   :  { %9532 = vrcp.f32 %v2037_v8  ;;  %v2076_v45 = vmul.f32 %v9523_v23, %v11516_v39 }
 0xa35   :  { %v9525_v49 = vpop.eup %9524  ;;  %9534 = vrcp.f32 %v2043_v34 }
 0xa36   :  { %v2077_v13 = vmul.f32 %v9525_v49, %v11519_v14  ;;  %9536 = vrcp.f32 %v2041_v7 }
 0xa37   :  { %v2045_v16 = vpop.xlane.xlu1 %2044  ;;  %v9527_v36 = vpop.eup %9526 }
 0xa38   :  { %v2092_v56 = vpack.c.bf16 %v2077_v13, %v2076_v45  ;;  %v2079_v5 = vmul.f32 %v9527_v36, %v11523_v19 }
 0xa39   :  { %v2051_v33 = vpop.xlane.xlu0 %2050 }
 0xa3a   :  { %8641 = vmatprep.mubr.bf16.mxu0 %v2092_v56 }
 0xa3b   :  { %v2057_v35 = vpop.xlane.xlu1 %2056 }
 0xa3d   :  { %v2047_v30 = vpop.xlane.xlu0 %2046 }
 0xa3e   :  { %9538 = vrcp.f32 %v2047_v30 }
 0xa3f   :  { %9540 = vrcp.f32 %v2045_v16  ;;  %v2053_v46 = vpop.xlane.xlu1 %2052  ;;  %v9529_v52 = vpop.eup %9528 }
 0xa40   :  { %v9531_v28 = vpop.eup %9530  ;;  %9542 = vrcp.f32 %v2051_v33  ;;  %v2081_v12 = vmul.f32 %v9529_v52, %v11537_v57 }
 0xa41   :  { %v2103_v32 = vpop.permute.xlu0 %2102  ;;  %v9533_v39 = vpop.eup %9532  ;;  %9544 = vrcp.f32 %v2049_v27  ;;  %v2078_v9 = vmul.f32 %v9531_v28, %v11511_v10 }
 0xa42   :  { %8637 = vmatprep.subr.bf16.mxu0 %v2103_v32  ;;  %v2080_v47 = vmul.f32 %v9533_v39, %v11535_v55  ;;  %v9535_v42 = vpop.eup %9534  ;;  %9546 = vrcp.f32 %v2053_v46 }
 0xa43   :  { %8638 = vmatpush3.bf16.msra.mxu0 %v2103_v32  ;;  %v2101_v14 = vpop.permute.xlu1 %2100  ;;  %v2093_v26 = vpack.c.bf16 %v2079_v5, %v2078_v9  ;;  %v9537_v7 = vpop.eup %9536  ;;  %v2083_v34 = vmul.f32 %v9535_v42, %v11531_v2 }
 0xa44   :  { %8639 = vmatprep.subr.bf16.mxu0 %v2101_v14  ;;  %v2094_v58 = vpack.c.bf16 %v2081_v12, %v2080_v47  ;;  %v2082_v8 = vmul.f32 %v9537_v7, %v11528_v61 }
 0xa46   :  { %v2095_v21 = vpack.c.bf16 %v2083_v34, %v2082_v8 }
 0xa47   :  { %8640 = vmatpush3.bf16.msra.mxu0 %v2101_v14 }
 0xa48   :  { %9239 = vmatprep.subr.msk.bf16.mxu0 %vm1546_vm2, %v307_v29 }
 0xa4a   :  { %8642 = vmatmul.mubr.bf16.vlgmr.msra.gmra.mxu0 %v2093_v26 }
 0xa4b   :  { %v9539_v19 = vpop.eup %9538  ;;  %8645 = vmatprep.mubr.bf16.mxu0 %v2094_v58  ;;  %8658 = vmatpush3.bf16.msra.mxu0 %v2254_v22 }
 0xa4c   :  { %v9541_v57 = vpop.eup %9540  ;;  %v2085_v10 = vmul.f32 %v9539_v19, %v11552_v4 }
 0xa4d   :  { %v2084_v55 = vmul.f32 %v9541_v57, %v11544_v25  ;;  %v9543_v23 = vpop.eup %9542 }
 0xa4e   :  { %v9545_v49 = vpop.eup %9544  ;;  %v2087_v45 = vmul.f32 %v9543_v23, %v11546_v40 }
 0xa4f   :  { %v2096_v27 = vpack.c.bf16 %v2085_v10, %v2084_v55  ;;  %v2086_v13 = vmul.f32 %v9545_v49, %v11541_v51  ;;  %v9547_v30 = vpop.eup %9546 }
 0xa50   :  { %v2088_v36 = vmul.f32 %v9547_v30, %v11556_v20 }
 0xa51   :  { %v2097_v16 = vpack.c.bf16 %v2087_v45, %v2086_v13 }
 0xa52   :  { %8646 = vmatmul.mubr.bf16.gmra.mxu0 %v2095_v21 }
 0xa53   :  { %8649 = vmatprep.mubr.bf16.mxu0 %v2096_v27 }
 0xa5a   :  { %8650 = vmatmul.mubr.bf16.gmra.mxu0 %v2097_v16 }
 0xa72   :  { %v2055_v2 = vpop.xlane.xlu0 %2054 }
 0xa73   :  { %9548 = vrcp.f32 %v2055_v2 }
 0xa74   :  { %9550 = vrcp.f32 %v2057_v35  ;;  %v11664_v4 = vpop.xlane.xlu1 %2554 }
 0xa76   :  { %v2059_v61 = vpop.xlane.xlu0 %2058 }
 0xa77   :  { %9552 = vrcp.f32 %v2059_v61 }
 0xa78   :  { %v11666_v25 = vpop.xlane.xlu1 %2574 }
 0xa79   :  { %v2592_v49 = vsub.f32 %v11576_v53, %v11666_v25 }
 0xa7a   :  { %v2547_v33 = vpop.xlane.xlu0 %2546 }
 0xa7b   :  { %v2578_v52 = vsub.f32 %v11579_v11, %v2547_v33  ;;  %v2622_v2 = vmul.f32 1.442695, %v2592_v49 }
 0xa7c   :  { %v11668_v56 = vpop.permute.xlu1 %2712 }
 0xa7d   :  { %8707 = vmatprep.subr.bf16.mxu0 %v11668_v56  ;;  %v2594_v47 = vmul.f32 1.442695, %v2578_v52 }
 0xa7e   :  { %v2549_v40 = vpop.xlane.xlu0 %2548 }
 0xa7f   :  { %v2579_v11 = vsub.f32 %v11584_v48, %v2549_v40 }
 0xa80   :  { %v9549_v51 = vpop.eup %9548 }
 0xa81   :  { %v2089_v46 = vmul.f32 %v9549_v51, %v11565_v31  ;;  %v9551_v32 = vpop.eup %9550 }
 0xa82   :  { %v2551_v35 = vpop.xlane.xlu0 %2550  ;;  %v2090_v12 = vmul.f32 %v9551_v32, %v11550_v60  ;;  %v2596_v60 = vmul.f32 1.442695, %v2579_v11 }
 0xa83   :  { %v2580_v28 = vsub.f32 %v11588_v63, %v2551_v35  ;;  %v2098_v39 = vpack.c.bf16 %v2089_v46, %v2088_v36  ;;  %v11720_v35 = vpop.f32.mrf.mxu0 }
 0xa84   :  { %v9553_v14 = vpop.eup %9552 }
 0xa85   :  { %v2598_v5 = vmul.f32 1.442695, %v2580_v28  ;;  %8653 = vmatprep.mubr.bf16.mxu0 %v2098_v39  ;;  %v2091_v29 = vmul.f32 %v9553_v14, %v11571_v1  ;;  %v11725_v28 = vpop.f32.mrf.mxu0 }
 0xa86   :  { %v2553_v9 = vpop.xlane.xlu0 %2552 }
 0xa87   :  { %9554 = vpow2.f32 %v2598_v5  ;;  %v2581_v20 = vsub.f32 %v11592_v62, %v2553_v9  ;;  %v2099_v31 = vpack.c.bf16 %v2091_v29, %v2090_v12 }
 0xa88   :  { %9556 = vpow2.f32 %v2594_v47 }
 0xa89   :  { %8654 = vmatmul.mubr.bf16.gmra.mxu0 %v2099_v31  ;;  %v2600_v26 = vmul.f32 1.442695, %v2581_v20 }
 0xa8a   :  { %v2557_v22 = vpop.xlane.xlu0 %2556 }
 0xa8b   :  { %v2583_v63 = vsub.f32 %v11596_v38, %v2557_v22  ;;  %9558 = vpow2.f32 %v2600_v26 }
 0xa8d   :  { %v2604_v42 = vmul.f32 1.442695, %v2583_v63 }
 0xa8e   :  { %v2559_v58 = vpop.xlane.xlu0 %2558 }
 0xa8f   :  { %9560 = vpow2.f32 %v2604_v42  ;;  %v2584_v33 = vsub.f32 %v11602_v18, %v2559_v58 }
 0xa90   :  { %9562 = vpow2.f32 %v2596_v60 }
 0xa91   :  { %v2606_v30 = vmul.f32 1.442695, %v2584_v33 }
 0xa92   :  { %v2561_v1 = vpop.xlane.xlu0 %2560 }
 0xa93   :  { %v2585_v40 = vsub.f32 %v11608_v15, %v2561_v1 }
 0xa94   :  { %v11680_v7 = vpop.eup %9554 }
 0xa95   :  { %2630 = vadd.xlane.f32.xlu0 %v11680_v7  ;;  %v11684_v57 = vpop.eup %9556 }
 0xa96   :  { %v2563_v62 = vpop.xlane.xlu0 %2562 }
 0xa97   :  { %v2586_v19 = vsub.f32 %v11614_v17, %v2563_v62 }
 0xa98   :  { %v11687_v38 = vpop.eup %9558 }
 0xa99   :  { %v2610_v34 = vmul.f32 1.442695, %v2586_v19  ;;  %2626 = vadd.xlane.f32.xlu0 %v11684_v57 }
 0xa9a   :  { %v2565_v48 = vpop.xlane.xlu0 %2564 }
 0xa9b   :  { %9564 = vpow2.f32 %v2610_v34  ;;  %v2587_v51 = vsub.f32 %v11620_v0, %v2565_v48 }
 0xa9c   :  { %v11689_v10 = vpop.eup %9560 }
 0xa9d   :  { %2632 = vadd.xlane.f32.xlu0 %v11687_v38  ;;  %2636 = vadd.xlane.f32.xlu1 %v11689_v10  ;;  %v11694_v21 = vpop.eup %9562  ;;  %v2612_v46 = vmul.f32 1.442695, %v2587_v51 }
 0xa9e   :  { %v2567_v8 = vpop.xlane.xlu0 %2566 }
 0xa9f   :  { %v2588_v55 = vsub.f32 %v11626_v41, %v2567_v8 }
 0xaa1   :  { %v2614_v17 = vmul.f32 1.442695, %v2588_v55  ;;  %2628 = vadd.xlane.f32.xlu0 %v11694_v21 }
 0xaa2   :  { %v2569_v23 = vpop.xlane.xlu0 %2568 }
 0xaa3   :  { %9566 = vpow2.f32 %v2614_v17  ;;  %v2589_v32 = vsub.f32 %v11632_v44, %v2569_v23  ;;  %v11731_v44 = vpop.f32.mrf.mxu0 }
 0xaa5   :  { %v11736_v5 = vpop.f32.mrf.mxu0 }
 0xaa6   :  { %v2571_v27 = vpop.xlane.xlu0 %2570 }
 0xaa7   :  { %v2590_v45 = vsub.f32 %v11638_v6, %v2571_v27  ;;  %v2582_v6 = vsub.f32 %v11569_v3, %v11664_v4  ;;  %v2616_v3 = vmul.f32 1.442695, %v2589_v32  ;;  %v11739_v12 = vpop.f32.mrf.mxu0 }
 0xaa8   :  { %v11700_v13 = vpop.eup %9564 }
 0xaa9   :  { %v2618_v16 = vmul.f32 1.442695, %v2590_v45  ;;  %2642 = vadd.xlane.f32.xlu1 %v11700_v13  ;;  %v2602_v25 = vmul.f32 1.442695, %v2582_v6 }
 0xaaa   :  { %v2573_v36 = vpop.xlane.xlu0 %2572 }
 0xaab   :  { %9568 = vpow2.f32 %v2618_v16  ;;  %v2591_v4 = vsub.f32 %v11642_v37, %v2573_v36 }
 0xaac   :  { %9570 = vpow2.f32 %v2622_v2 }
 0xaad   :  { %9572 = vpow2.f32 %v2602_v25  ;;  %v2620_v15 = vmul.f32 1.442695, %v2591_v4 }
 0xaae   :  { %9574 = vpow2.f32 %v2606_v30  ;;  %v2577_v52 = vpop.xlane.xlu0 %2576 }
 0xaaf   :  { %v2593_v0 = vsub.f32 %v11646_v50, %v2577_v52  ;;  %v11744_v50 = vpop.f32.mrf.mxu0 }
 0xab0   :  { %v11703_v41 = vpop.eup %9566 }
 0xab1   :  { %2646 = vadd.xlane.f32.xlu1 %v11703_v41  ;;  %v2624_v14 = vmul.f32 1.442695, %v2593_v0  ;;  %v11749_v47 = vpop.f32.mrf.mxu0 }
 0xab3   :  { %v11754_v31 = vpop.f32.mrf.mxu0 }
 0xab5   :  { %v11758_v22 = vpop.f32.mrf.mxu0 }
 0xab7   :  { %2710 = vrot.lane.b32.xlu0 %v10667_v24, %s10425_s3  ;;  %v2608_v24 = vmul.f32 1.442695, %v2585_v40  ;;  %v11761_v11 = vpop.f32.mrf.mxu0 }
 0xab8   :  { %v11708_v61 = vpop.eup %9568 }
 0xab9   :  { %2650 = vadd.xlane.f32.xlu1 %v11708_v61  ;;  %v11711_v53 = vpop.eup %9570  ;;  %9576 = vpow2.f32 %v2608_v24  ;;  %v11763_v63 = vpop.f32.mrf.mxu0 }
 0xaba   :  { %9578 = vpow2.f32 %v2612_v46  ;;  %v11723_v18 = vpop.eup %9572 }
 0xabb   :  { %9580 = vpow2.f32 %v2616_v3  ;;  %v11729_v39 = vpop.eup %9574  ;;  %v11765_v42 = vpop.f32.mrf.mxu0 }
 0xabc   :  { %9582 = vpow2.f32 %v2620_v15 }
 0xabd   :  { %2654 = vadd.xlane.f32.xlu1 %v11711_v53  ;;  %9584 = vpow2.f32 %v2624_v14  ;;  %v11767_v58 = vpop.f32.mrf.mxu0 }
 0xabf   :  { %v11769_v60 = vpop.f32.mrf.mxu0 }
 0xac1   :  { %v11771_v1 = vpop.f32.mrf.mxu0 }
 0xac3   :  { %v11773_v62 = vpop.f32.mrf.mxu0 }
 0xac6   :  { %v11734_v37 = vpop.eup %9576 }
 0xac7   :  { %v11741_v29 = vpop.eup %9578 }
 0xac8   :  { %v11746_v9 = vpop.eup %9580 }
 0xac9   :  { %v11751_v20 = vpop.eup %9582 }
 0xaca   :  { %v11756_v26 = vpop.eup %9584 }
 0xad6   :  { %2634 = vadd.xlane.f32.xlu0 %v11723_v18 }
 0xada   :  { %2638 = vadd.xlane.f32.xlu0 %v11729_v39 }
 0xade   :  { %2640 = vadd.xlane.f32.xlu0 %v11734_v37 }
 0xae2   :  { %2644 = vadd.xlane.f32.xlu0 %v11741_v29 }
 0xae6   :  { %2648 = vadd.xlane.f32.xlu0 %v11746_v9 }
 0xaea   :  { %2652 = vadd.xlane.f32.xlu0 %v11751_v20 }
 0xaee   :  { %2656 = vadd.xlane.f32.xlu0 %v11756_v26 }
 0xb0a   :  { %v8643_v19 = vpop.f32.mrf.mxu0 }
 0xb0c   :  { %v2158_v34 = vpop.f32.mrf.mxu0 }
 0xb0e   :  { %v8644_v48 = vpop.f32.mrf.mxu0 }
 0xb0f   :  { %v2222_v17 = vpack.c.bf16 %v8644_v48, %v8643_v19 }
 0xb10   :  { %v2161_v8 = vpop.f32.mrf.mxu0 }
 0xb11   :  { %v2221_v55 = vpack.c.bf16 %v2161_v8, %v2158_v34 }
 0xb12   :  { %v8647_v23 = vpop.f32.mrf.mxu0 }
 0xb13   :  { %8659 = vmatprep.mubr.msk.bf16.mxu0 %vm629_vm1, %v2221_v55 }
 0xb14   :  { %v2174_v27 = vpop.f32.mrf.mxu0  ;;  %8660 = vmatmul.mubr.msk.bf16.vlgmr.msra.gmra.mxu0 %vm629_vm1, %v2222_v17 }
 0xb15   :  { %8708 = vmatpush3.bf16.msra.mxu0 %v11668_v56  ;;  %v2709_v56 = vpop.permute.xlu1 %2708 }
 0xb16   :  { %v8648_v49 = vpop.f32.mrf.mxu0 }
 0xb17   :  { %v2224_v2 = vpack.c.bf16 %v8648_v49, %v8647_v23 }
 0xb18   :  { %v2177_v45 = vpop.f32.mrf.mxu0 }
 0xb19   :  { %v2223_v16 = vpack.c.bf16 %v2177_v45, %v2174_v27  ;;  %v2707_v3 = vpop.permute.xlu1 %2706 }
 0xb1a   :  { %v8651_v6 = vpop.f32.mrf.mxu0 }
 0xb1b   :  { %8663 = vmatprep.mubr.msk.bf16.mxu0 %vm629_vm1, %v2223_v16 }
 0xb1c   :  { %v2190_v25 = vpop.f32.mrf.mxu0  ;;  %8664 = vmatmul.mubr.msk.bf16.gmra.mxu0 %vm629_vm1, %v2224_v2 }
 0xb1d   :  { %v2705_v52 = vpop.permute.xlu1 %2704 }
 0xb1e   :  { %v8652_v33 = vpop.f32.mrf.mxu0  ;;  %v2631_v30 = vpop.xlane.xlu0 %2630 }
 0xb1f   :  { %v2226_v51 = vpack.c.bf16 %v8652_v33, %v8651_v6 }
 0xb20   :  { %v2193_v40 = vpop.f32.mrf.mxu0 }
 0xb21   :  { %v2225_v24 = vpack.c.bf16 %v2193_v40, %v2190_v25  ;;  %v2703_v15 = vpop.permute.xlu1 %2702 }
 0xb22   :  { %v2627_v36 = vpop.xlane.xlu0 %2626 }
 0xb23   :  { %8667 = vmatprep.mubr.msk.bf16.mxu0 %vm629_vm1, %v2225_v24 }
 0xb24   :  { %8668 = vmatmul.mubr.msk.bf16.gmra.mxu0 %vm629_vm1, %v2226_v51 }
 0xb25   :  { %v2701_v0 = vpop.permute.xlu1 %2700 }
 0xb26   :  { %v2633_v46 = vpop.xlane.xlu0 %2632 }
 0xb29   :  { %v2699_v14 = vpop.permute.xlu1 %2698 }
 0xb2a   :  { %v2629_v32 = vpop.xlane.xlu0 %2628 }
 0xb2b   :  { %9586 = vrcp.f32 %v2629_v32  ;;  %v308_v32 = vld [vmem:[%s14517_s18 + $0xc] sm:$0xf] }
 0xb2c   :  { %9588 = vrcp.f32 %v2627_v36 }
 0xb2d   :  { %9590 = vrcp.f32 %v2633_v46 }
 0xb2e   :  { %v2711_v4 = vpop.permute.xlu0 %2710  ;;  %9592 = vrcp.f32 %v2631_v30 }
 0xb2f   :  { %8709 = vmatprep.subr.bf16.mxu0 %v2711_v4 }
 0xb30   :  { %8710 = vmatpush3.bf16.msra.mxu0 %v2711_v4 }
 0xb31   :  { %8711 = vmatprep.subr.bf16.mxu0 %v2709_v56 }
 0xb34   :  { %8712 = vmatpush3.bf16.msra.mxu0 %v2709_v56 }
 0xb35   :  { %8713 = vmatprep.subr.bf16.mxu0 %v2707_v3 }
 0xb38   :  { %8714 = vmatpush3.bf16.msra.mxu0 %v2707_v3  ;;  %v9587_v34 = vpop.eup %9586 }
 0xb39   :  { %8715 = vmatprep.subr.bf16.mxu0 %v2705_v52  ;;  %v9589_v8 = vpop.eup %9588  ;;  %v2675_v17 = vmul.f32 %v9587_v34, %v11694_v21  ;;  %v2637_v21 = vpop.xlane.xlu1 %2636 }
 0xb3a   :  { %v2674_v49 = vmul.f32 %v9589_v8, %v11684_v57  ;;  %v9591_v16 = vpop.eup %9590  ;;  %9594 = vrcp.f32 %v2637_v21 }
 0xb3b   :  { %v9593_v6 = vpop.eup %9592  ;;  %v2677_v25 = vmul.f32 %v9591_v16, %v11687_v38 }
 0xb3c   :  { %8716 = vmatpush3.bf16.msra.mxu0 %v2705_v52  ;;  %v2690_v2 = vpack.c.bf16 %v2675_v17, %v2674_v49  ;;  %v2676_v33 = vmul.f32 %v9593_v6, %v11680_v7  ;;  %v2852_v7 = vsel %vm1546_vm2, %v308_v32, 0 }
 0xb3d   :  { %8717 = vmatprep.subr.bf16.mxu0 %v2703_v15  ;;  %v2643_v24 = vpop.xlane.xlu1 %2642 }
 0xb3e   :  { %v2691_v30 = vpack.c.bf16 %v2677_v25, %v2676_v33 }
 0xb40   :  { %8718 = vmatpush3.bf16.msra.mxu0 %v2703_v15 }
 0xb41   :  { %8719 = vmatprep.subr.bf16.mxu0 %v2701_v0  ;;  %v2647_v36 = vpop.xlane.xlu1 %2646 }
 0xb44   :  { %8720 = vmatpush3.bf16.msra.mxu0 %v2701_v0 }
 0xb45   :  { %8721 = vmatprep.subr.bf16.mxu0 %v2699_v14  ;;  %v2651_v3 = vpop.xlane.xlu1 %2650 }
 0xb47   :  { %v9595_v56 = vpop.eup %9594 }
 0xb48   :  { %8722 = vmatpush3.bf16.msra.mxu0 %v2699_v14  ;;  %v2679_v52 = vmul.f32 %v9595_v56, %v11689_v10  ;;  %v1720_v56 = vadd.f32 %v11731_v44, %v11375_v59 }
 0xb49   :  { %v8655_v19 = vpop.f32.mrf.mxu0  ;;  %9248 = vmatprep.subr.msk.bf16.mxu0 %vm1546_vm2, %v308_v32 }
 0xb4b   :  { %v2206_v48 = vpop.f32.mrf.mxu0 }
 0xb4d   :  { %v8656_v55 = vpop.f32.mrf.mxu0 }
 0xb4e   :  { %v2228_v45 = vpack.c.bf16 %v8656_v55, %v8655_v19  ;;  %v2655_v19 = vpop.xlane.xlu1 %2654 }
 0xb4f   :  { %v2209_v23 = vpop.f32.mrf.mxu0 }
 0xb50   :  { %v2227_v27 = vpack.c.bf16 %v2209_v23, %v2206_v48 }
 0xb52   :  { %8671 = vmatprep.mubr.msk.bf16.mxu0 %vm629_vm1, %v2227_v27 }
 0xb53   :  { %8672 = vmatmul.mubr.msk.bf16.gmra.mxu0 %vm629_vm1, %v2228_v45 }
 0xb54   :  { %8723 = vmatprep.mubr.bf16.mxu0 %v2690_v2 }
 0xb5b   :  { %8724 = vmatmul.mubr.bf16.vlgmr.msra.gmra.mxu0 %v2691_v30 }
 0xb5c   :  { %8740 = vmatpush3.bf16.msra.mxu0 %v2852_v7  ;;  %v14534_v7 = vld [vmem:[#allocation50_spill] sm:$0xff] }
 0xb5f   :  { %v2635_v40 = vpop.xlane.xlu0 %2634 }
 0xb60   :  { %9596 = vrcp.f32 %v2635_v40 }
 0xb63   :  { %v2639_v57 = vpop.xlane.xlu0 %2638 }
 0xb64   :  { %9598 = vrcp.f32 %v2639_v57 }
 0xb67   :  { %v2641_v51 = vpop.xlane.xlu0 %2640 }
 0xb68   :  { %9600 = vrcp.f32 %v2641_v51 }
 0xb69   :  { %9602 = vrcp.f32 %v2643_v24 }
 0xb6b   :  { %v2645_v46 = vpop.xlane.xlu0 %2644 }
 0xb6c   :  { %9604 = vrcp.f32 %v2645_v46 }
 0xb6d   :  { %v9597_v38 = vpop.eup %9596  ;;  %9606 = vrcp.f32 %v2647_v36  ;;  %v1709_v36 = vadd.f32 %v11725_v28, %v11373_v54 }
 0xb6e   :  { %v2678_v4 = vmul.f32 %v9597_v38, %v11723_v18  ;;  %v14535_v38 = vld [vmem:[#allocation49_spill] sm:$0xff] }
 0xb6f   :  { %v2649_v15 = vpop.xlane.xlu0 %2648  ;;  %v1725_v54 = vadd.f32 %v11744_v50, %v14535_v38 }
 0xb70   :  { %9608 = vrcp.f32 %v2649_v15  ;;  %v2692_v0 = vpack.c.bf16 %v2679_v52, %v2678_v4  ;;  %v14536_v4 = vld [vmem:[#allocation51_spill] sm:$0xff] }
 0xb71   :  { %9610 = vrcp.f32 %v2651_v3  ;;  %v9599_v14 = vpop.eup %9598  ;;  %v1736_v59 = vadd.f32 %v11749_v47, %v14536_v4 }
 0xb72   :  { %8727 = vmatprep.mubr.bf16.mxu0 %v2692_v0  ;;  %v2680_v8 = vmul.f32 %v9599_v14, %v11729_v39  ;;  %v14537_v14 = vld [vmem:[#allocation53_spill] sm:$0xff] }
 0xb73   :  { %v2653_v34 = vpop.xlane.xlu0 %2652 }
 0xb74   :  { %9612 = vrcp.f32 %v2653_v34  ;;  %v14538_v34 = vld [vmem:[#allocation54_spill] sm:$0xff] }
 0xb75   :  { %v9601_v48 = vpop.eup %9600  ;;  %9614 = vrcp.f32 %v2655_v19  ;;  %v1741_v50 = vadd.f32 %v11761_v11, %v14538_v34 }
 0xb76   :  { %v2681_v55 = vmul.f32 %v9601_v48, %v11734_v37  ;;  %v9603_v17 = vpop.eup %9602 }
 0xb77   :  { %v2657_v23 = vpop.xlane.xlu0 %2656  ;;  %v2682_v27 = vmul.f32 %v9603_v17, %v11700_v13 }
 0xb78   :  { %9616 = vrcp.f32 %v2657_v23  ;;  %v2693_v18 = vpack.c.bf16 %v2681_v55, %v2680_v8  ;;  %v14539_v55 = vld [vmem:[#allocation55_spill] sm:$0xff] }
 0xb79   :  { %v9605_v10 = vpop.eup %9604  ;;  %v1752_v47 = vadd.f32 %v11763_v63, %v14539_v55 }
 0xb7a   :  { %8728 = vmatmul.mubr.bf16.gmra.mxu0 %v2693_v18  ;;  %v2683_v49 = vmul.f32 %v9605_v10, %v11741_v29  ;;  %v9607_v45 = vpop.eup %9606 }
 0xb7b   :  { %v2684_v6 = vmul.f32 %v9607_v45, %v11703_v41  ;;  %v1717_v41 = vadd.f32 %v11720_v35, %v11371_v43  ;;  %v1733_v43 = vadd.f32 %v11739_v12, %v14534_v7  ;;  %v1749_v12 = vadd.f32 %v11758_v22, %v14537_v14  ;;  %v14541_v45 = vld [vmem:[#allocation58_spill] sm:$0xff] }
 0xb7c   :  { %v2694_v16 = vpack.c.bf16 %v2683_v49, %v2682_v27  ;;  %v14540_v27 = vld [vmem:[#allocation57_spill] sm:$0xff]  ;;  %v1757_v11 = vadd.f32 %v11769_v60, %v14541_v45  ;;  %v11868_v14 = vld [vmem:[#allocation11] ss:$0 sm:$0xff] }
 0xb7d   :  { %v9609_v2 = vpop.eup %9608  ;;  %v1765_v22 = vadd.f32 %v11767_v58, %v14540_v27 }
 0xb7e   :  { %8731 = vmatprep.mubr.bf16.mxu0 %v2694_v16  ;;  %v2685_v39 = vmul.f32 %v9609_v2, %v11746_v9  ;;  %v9611_v25 = vpop.eup %9610 }
 0xb7f   :  { %v2686_v30 = vmul.f32 %v9611_v25, %v11708_v61 }
 0xb80   :  { %v2695_v37 = vpack.c.bf16 %v2685_v39, %v2684_v6  ;;  %v14542_v6 = vld [vmem:[#allocation59_spill] sm:$0xff] }
 0xb81   :  { %v9613_v33 = vpop.eup %9612  ;;  %v1768_v63 = vadd.f32 %v11771_v1, %v14542_v6  ;;  %v10020_v6 = vld [vmem:[#allocation2 + $0x8] sm:$0xff] }
 0xb82   :  { %8732 = vmatmul.mubr.bf16.gmra.mxu0 %v2695_v37  ;;  %v2687_v21 = vmul.f32 %v9613_v33, %v11751_v20  ;;  %v9615_v40 = vpop.eup %9614 }
 0xb83   :  { %v2688_v29 = vmul.f32 %v9615_v40, %v11711_v53 }
 0xb84   :  { %v2696_v13 = vpack.c.bf16 %v2687_v21, %v2686_v30 }
 0xb85   :  { %v9617_v57 = vpop.eup %9616 }
 0xb86   :  { %8735 = vmatprep.mubr.bf16.mxu0 %v2696_v13  ;;  %v2689_v24 = vmul.f32 %v9617_v57, %v11756_v26 }
 0xb88   :  { %v2697_v51 = vpack.c.bf16 %v2689_v24, %v2688_v29 }
 0xb8a   :  { %8736 = vmatmul.mubr.bf16.gmra.mxu0 %v2697_v51 }
 0xbd4   :  { %v8661_v9 = vpop.f32.mrf.mxu0 }
 0xbd5   :  { %v11807_v61 = vadd.f32 %v8661_v9, %v1717_v41 }
 0xbd6   :  { %v2290_v20 = vpop.f32.mrf.mxu0 }
 0xbd7   :  { %v11811_v46 = vadd.f32 %v2290_v20, %v1709_v36 }
 0xbd8   :  { %v8662_v53 = vpop.f32.mrf.mxu0 }
 0xbd9   :  { %v11813_v32 = vadd.f32 %v8662_v53, %v1720_v56 }
 0xbda   :  { %v11815_v26 = vpop.f32.mrf.mxu0 }
 0xbdc   :  { %v8665_v35 = vpop.f32.mrf.mxu0 }
 0xbdd   :  { %v11821_v28 = vadd.f32 %v8665_v35, %v1733_v43 }
 0xbde   :  { %v2306_v3 = vpop.f32.mrf.mxu0 }
 0xbdf   :  { %v11825_v44 = vadd.f32 %v2306_v3, %v1725_v54 }
 0xbe0   :  { %v8666_v52 = vpop.f32.mrf.mxu0 }
 0xbe1   :  { %v11827_v15 = vadd.f32 %v8666_v52, %v1736_v59 }
 0xbe2   :  { %v11829_v0 = vpop.f32.mrf.mxu0 }
 0xbe4   :  { %v8669_v19 = vpop.f32.mrf.mxu0 }
 0xbe5   :  { %v11835_v48 = vadd.f32 %v8669_v19, %v1749_v12  ;;  %v14543_v19 = vld [vmem:[#allocation48_spill] sm:$0xff] }
 0xbe6   :  { %v2322_v8 = vpop.f32.mrf.mxu0  ;;  %v1712_v34 = vadd.f32 %v11736_v5, %v14543_v19 }
 0xbe7   :  { %v11839_v17 = vadd.f32 %v2322_v8, %v1741_v50 }
 0xbe8   :  { %v8670_v23 = vpop.f32.mrf.mxu0  ;;  %v2354_v55 = vadd.f32 %v11815_v26, %v1712_v34 }
 0xbe9   :  { %v11841_v18 = vadd.f32 %v8670_v23, %v1752_v47 }
 0xbea   :  { %v11843_v10 = vpop.f32.mrf.mxu0 }
 0xc13   :  { %v8673_v49 = vpop.f32.mrf.mxu0 }
 0xc14   :  { %v11849_v16 = vadd.f32 %v8673_v49, %v1765_v22 }
 0xc15   :  { %v2338_v2 = vpop.f32.mrf.mxu0 }
 0xc16   :  { %v11853_v39 = vadd.f32 %v2338_v2, %v1757_v11  ;;  %v10019_v2 = vld [vmem:[#allocation2 + $0x10] sm:$0xff] }
 0xc17   :  { %v8674_v25 = vpop.f32.mrf.mxu0 }
 0xc18   :  { %v11855_v37 = vadd.f32 %v8674_v25, %v1768_v63 }
 0xc19   :  { %v11857_v33 = vpop.f32.mrf.mxu0 }
 0xc1b   :  { %v8725_v30 = vpop.f32.mrf.mxu0 }
 0xc1d   :  { %v2756_v21 = vpop.f32.mrf.mxu0 }
 0xc1f   :  { %v8726_v58 = vpop.f32.mrf.mxu0 }
 0xc20   :  { %v2820_v57 = vpack.c.bf16 %v8726_v58, %v8725_v30  ;;  %v10021_v30 = vld [vmem:[#allocation2 + $0x18] sm:$0xff] }
 0xc21   :  { %v2759_v40 = vpop.f32.mrf.mxu0 }
 0xc22   :  { %v2819_v13 = vpack.c.bf16 %v2759_v40, %v2756_v21 }
 0xc24   :  { %8741 = vmatprep.mubr.msk.bf16.mxu0 %vm629_vm1, %v2819_v13 }
 0xc25   :  { %8742 = vmatmul.mubr.msk.bf16.vlgmr.msra.gmra.mxu0 %vm629_vm1, %v2820_v57 }
 0xc3a   :  { %v8729_v60 = vpop.f32.mrf.mxu0 }
 0xc3c   :  { %v2772_v29 = vpop.f32.mrf.mxu0 }
 0xc3e   :  { %v8730_v1 = vpop.f32.mrf.mxu0 }
 0xc3f   :  { %v2822_v41 = vpack.c.bf16 %v8730_v1, %v8729_v60  ;;  %v14544_v60 = vld [vmem:[#allocation52_spill] sm:$0xff] }
 0xc40   :  { %v2775_v24 = vpop.f32.mrf.mxu0 }
 0xc41   :  { %v2821_v51 = vpack.c.bf16 %v2775_v24, %v2772_v29  ;;  %v1728_v29 = vadd.f32 %v11754_v31, %v14544_v60  ;;  %v10029_v60 = vld [vmem:[#allocation2 + $0x58] sm:$0xff] }
 0xc42   :  { %v8733_v9 = vpop.f32.mrf.mxu0 }
 0xc43   :  { %8745 = vmatprep.mubr.msk.bf16.mxu0 %vm629_vm1, %v2821_v51 }
 0xc44   :  { %v2788_v36 = vpop.f32.mrf.mxu0  ;;  %8746 = vmatmul.mubr.msk.bf16.gmra.mxu0 %vm629_vm1, %v2822_v41  ;;  %v2358_v41 = vadd.f32 %v11829_v0, %v1728_v29 }
 0xc46   :  { %v8734_v20 = vpop.f32.mrf.mxu0 }
 0xc47   :  { %v2824_v7 = vpack.c.bf16 %v8734_v20, %v8733_v9 }
 0xc48   :  { %v2791_v56 = vpop.f32.mrf.mxu0 }
 0xc49   :  { %v2823_v53 = vpack.c.bf16 %v2791_v56, %v2788_v36 }
 0xc4a   :  { %v8737_v43 = vpop.f32.mrf.mxu0 }
 0xc4b   :  { %8749 = vmatprep.mubr.msk.bf16.mxu0 %vm629_vm1, %v2823_v53  ;;  %v10022_v53 = vld [vmem:[#allocation2 + $0x20] sm:$0xff] }
 0xc4c   :  { %v2804_v35 = vpop.f32.mrf.mxu0  ;;  %8750 = vmatmul.mubr.msk.bf16.gmra.mxu0 %vm629_vm1, %v2824_v7 }
 0xc4e   :  { %v8738_v38 = vpop.f32.mrf.mxu0 }
 0xc4f   :  { %v2826_v4 = vpack.c.bf16 %v8738_v38, %v8737_v43  ;;  %v10023_v43 = vld [vmem:[#allocation2 + $0x30] sm:$0xff] }
 0xc50   :  { %v2807_v54 = vpop.f32.mrf.mxu0 }
 0xc51   :  { %v2825_v3 = vpack.c.bf16 %v2807_v54, %v2804_v35  ;;  %v14545_v54 = vld [vmem:[#allocation56_spill] sm:$0xff] }
 0xc53   :  { %8753 = vmatprep.mubr.msk.bf16.mxu0 %vm629_vm1, %v2825_v3 }
 0xc54   :  { %8754 = vmatmul.mubr.msk.bf16.gmra.mxu0 %vm629_vm1, %v2826_v4 }
 0xce5   :  { %v8743_v59 = vpop.f32.mrf.mxu0 }
 0xce6   :  { %v2953_v52 = vadd.f32 %v8743_v59, %v11807_v61  ;;  %v10018_v61 = vld [vmem:[#allocation2] sm:$0xff]  ;;  %v10024_v59 = vld [vmem:[#allocation2 + $0x28] sm:$0xff] }
 0xce7   :  { %v2888_v12 = vpop.f32.mrf.mxu0 }
 0xce8   :  { %v2951_v50 = vadd.f32 %v2888_v12, %v11811_v46  ;;  %v2975_v47 = vadd.f32 %v11868_v14, %v2953_v52 }
 0xce9   :  { %v8744_v8 = vpop.f32.mrf.mxu0 }
 0xcea   :  { %v2973_v23 = vadd.f32 %v11868_v14, %v2951_v50  ;;  %v2954_v27 = vadd.f32 %v8744_v8, %v11813_v32  ;;  %v11883_v26 = vadd.f32 %v10019_v2, %v2975_v47 }
 0xceb   :  { %v2891_v22 = vpop.f32.mrf.mxu0 }
 0xcec   :  { %v2952_v49 = vadd.f32 %v2891_v22, %v2354_v55  ;;  %v11877_v45 = vadd.f32 %v10018_v61, %v2973_v23  ;;  %v2976_v11 = vadd.f32 %v11868_v14, %v2954_v27  ;;  %v3011_v32 = vsel %vm451_vm0, %v11883_v26, 0.0  ;;  %v10025_v55 = vld [vmem:[#allocation2 + $0x38] sm:$0xff]  ;;  %v10026_v23 = vld [vmem:[#allocation2 + $0x40] sm:$0xff]  ;;  %v10027_v61 = vld [vmem:[#allocation2 + $0x50] sm:$0xff] }
 0xcee   :  { %v2974_v5 = vadd.f32 %v11868_v14, %v2952_v49  ;;  %v3005_v46 = vsel %vm451_vm0, %v11877_v45, 0.0  ;;  %v11891_v21 = vadd.f32 %v10021_v30, %v2976_v11 }
 0xcef   :  { %3006 = vadd.xlane.f32.xlu1 %v3005_v46 }
 0xcf0   :  { %v11885_v63 = vadd.f32 %v10020_v6, %v2974_v5  ;;  %v3014_v58 = vsel %vm451_vm0, %v11891_v21, 0.0  ;;  %v14546_v6 = vld [vmem:[#allocation60_spill] sm:$0xff] }
 0xcf2   :  { %v3008_v25 = vsel %vm451_vm0, %v11885_v63, 0.0 }
 0xcf3   :  { %3012 = vadd.xlane.f32.xlu1 %v3011_v32  ;;  %3009 = vadd.xlane.f32.xlu0 %v3008_v25  ;;  %v1760_v32 = vadd.f32 %v11773_v62, %v14546_v6 }
 0xcf7   :  { %3015 = vadd.xlane.f32.xlu0 %v3014_v58  ;;  %v10028_v58 = vld [vmem:[#allocation2 + $0x48] sm:$0xff] }
 0xd04   :  { %v8747_v40 = vpop.f32.mrf.mxu0 }
 0xd05   :  { %v2957_v13 = vadd.f32 %v8747_v40, %v11821_v28 }
 0xd06   :  { %v2904_v57 = vpop.f32.mrf.mxu0 }
 0xd07   :  { %v2955_v1 = vadd.f32 %v2904_v57, %v11825_v44  ;;  %v2979_v24 = vadd.f32 %v11868_v14, %v2957_v13  ;;  %v2366_v13 = vadd.f32 %v11857_v33, %v1760_v32 }
 0xd08   :  { %v8748_v51 = vpop.f32.mrf.mxu0 }
 0xd09   :  { %v2977_v9 = vadd.f32 %v11868_v14, %v2955_v1  ;;  %v2958_v36 = vadd.f32 %v8748_v51, %v11827_v15  ;;  %v11905_v35 = vadd.f32 %v10023_v43, %v2979_v24  ;;  %v1744_v15 = vadd.f32 %v11765_v42, %v14545_v54  ;;  %v10032_v43 = vld [vmem:[#allocation2 + $0x68] sm:$0xff] }
 0xd0a   :  { %v2907_v20 = vpop.f32.mrf.mxu0 }
 0xd0b   :  { %v2956_v56 = vadd.f32 %v2907_v20, %v2358_v41  ;;  %v11903_v7 = vadd.f32 %v10022_v53, %v2977_v9  ;;  %v2980_v31 = vadd.f32 %v11868_v14, %v2958_v36  ;;  %v2362_v12 = vadd.f32 %v11843_v10, %v1744_v15  ;;  %v10030_v41 = vld [vmem:[#allocation2 + $0x60] sm:$0xff]  ;;  %v10031_v53 = vld [vmem:[#allocation2 + $0x70] sm:$0xff] }
 0xd0c   :  { %v8751_v28 = vpop.f32.mrf.mxu0 }
 0xd0d   :  { %v2978_v44 = vadd.f32 %v11868_v14, %v2956_v56  ;;  %v2961_v38 = vadd.f32 %v8751_v28, %v11835_v48  ;;  %v3017_v0 = vsel %vm451_vm0, %v11903_v7, 0.0  ;;  %v3023_v48 = vsel %vm451_vm0, %v11905_v35, 0.0 }
 0xd0e   :  { %3018 = vadd.xlane.f32.xlu1 %v3017_v0  ;;  %v2920_v3 = vpop.f32.mrf.mxu0  ;;  %v10033_v0 = vld [vmem:[#allocation2 + $0x78] sm:$0xff] }
 0xd0f   :  { %v2959_v4 = vadd.f32 %v2920_v3, %v11839_v17  ;;  %v11915_v52 = vadd.f32 %v10024_v59, %v2978_v44  ;;  %v2983_v19 = vadd.f32 %v11868_v14, %v2961_v38  ;;  %v11925_v17 = vadd.f32 %v10025_v55, %v2980_v31 }
 0xd10   :  { %v8752_v34 = vpop.f32.mrf.mxu0 }
 0xd11   :  { %v2981_v50 = vadd.f32 %v11868_v14, %v2959_v4  ;;  %v2962_v8 = vadd.f32 %v8752_v34, %v11841_v18  ;;  %v3020_v42 = vsel %vm451_vm0, %v11915_v52, 0.0  ;;  %v11930_v11 = vadd.f32 %v10027_v61, %v2983_v19 }
 0xd12   :  { %3024 = vadd.xlane.f32.xlu1 %v3023_v48  ;;  %3021 = vadd.xlane.f32.xlu0 %v3020_v42  ;;  %v2923_v47 = vpop.f32.mrf.mxu0  ;;  %v3026_v46 = vsel %vm451_vm0, %v11925_v17, 0.0 }
 0xd13   :  { %v2960_v10 = vadd.f32 %v2923_v47, %v2362_v12  ;;  %v11927_v27 = vadd.f32 %v10026_v23, %v2981_v50  ;;  %v2984_v22 = vadd.f32 %v11868_v14, %v2962_v8  ;;  %v3035_v57 = vsel %vm451_vm0, %v11930_v11, 0.0 }
 0xd14   :  { %v8755_v49 = vpop.f32.mrf.mxu0 }
 0xd15   :  { %v2982_v18 = vadd.f32 %v11868_v14, %v2960_v10  ;;  %v2965_v5 = vadd.f32 %v8755_v49, %v11849_v16  ;;  %v3029_v2 = vsel %vm451_vm0, %v11927_v27, 0.0  ;;  %v11946_v29 = vadd.f32 %v10029_v60, %v2984_v22 }
 0xd16   :  { %3027 = vadd.xlane.f32.xlu0 %v3026_v46  ;;  %3030 = vadd.xlane.f32.xlu1 %v3029_v2  ;;  %v2936_v25 = vpop.f32.mrf.mxu0 }
 0xd17   :  { %v2963_v30 = vadd.f32 %v2936_v25, %v11853_v39  ;;  %v11941_v40 = vadd.f32 %v10028_v58, %v2982_v18  ;;  %v2987_v1 = vadd.f32 %v11868_v14, %v2965_v5  ;;  %v3038_v36 = vsel %vm451_vm0, %v11946_v29, 0.0 }
 0xd18   :  { %v8756_v16 = vpop.f32.mrf.mxu0 }
 0xd19   :  { %v2985_v62 = vadd.f32 %v11868_v14, %v2963_v30  ;;  %v2966_v24 = vadd.f32 %v8756_v16, %v11855_v37  ;;  %v3032_v39 = vsel %vm451_vm0, %v11941_v40, 0.0  ;;  %v11961_v28 = vadd.f32 %v10031_v53, %v2987_v1 }
 0xd1a   :  { %3036 = vadd.xlane.f32.xlu1 %v3035_v57  ;;  %3033 = vadd.xlane.f32.xlu0 %v3032_v39  ;;  %v2939_v51 = vpop.f32.mrf.mxu0 }
 0xd1b   :  { %v2964_v33 = vadd.f32 %v2939_v51, %v2366_v13  ;;  %v11953_v9 = vadd.f32 %v10030_v41, %v2985_v62  ;;  %v2988_v20 = vadd.f32 %v11868_v14, %v2966_v24  ;;  %v3047_v44 = vsel %vm451_vm0, %v11961_v28, 0.0 }
 0xd1d   :  { %v2986_v56 = vadd.f32 %v11868_v14, %v2964_v33  ;;  %v3041_v37 = vsel %vm451_vm0, %v11953_v9, 0.0  ;;  %v11969_v54 = vadd.f32 %v10033_v0, %v2988_v20  ;;  %v9346_v33 = vld [vmem:[%s14547_s2 + $0x8] sm:$0xff]  }
 0xd1e   :  { %3039 = vadd.xlane.f32.xlu0 %v3038_v36  ;;  %3042 = vadd.xlane.f32.xlu1 %v3041_v37 }
 0xd1f   :  { %v11963_v31 = vadd.f32 %v10032_v43, %v2986_v56  ;;  %v3050_v14 = vsel %vm451_vm0, %v11969_v54, 0.0  ;;  %8757 = vmatprep.subr.bf16.mxu1 %v9346_v33  ;;  %v9347_v43 = vld [vmem:[%s14547_s2] sm:$0xff]  }
 0xd20   :  { %8758 = vmatpush3.bf16.msra.mxu1 %v9346_v33  ;;  %v12074_v33 = vld [vmem:[#allocation16] ss:$0 sm:$0xff] }
 0xd21   :  { %v3044_v38 = vsel %vm451_vm0, %v11963_v31, 0.0  ;;  %8759 = vmatprep.subr.bf16.mxu1 %v9347_v43 }
 0xd22   :  { %3048 = vadd.xlane.f32.xlu1 %v3047_v44  ;;  %3045 = vadd.xlane.f32.xlu0 %v3044_v38 }
 0xd24   :  { %8760 = vmatpush3.bf16.msra.mxu1 %v9347_v43 }
 0xd26   :  { %3051 = vadd.xlane.f32.xlu0 %v3050_v14 }
 0xd78   :  { %v3007_v15 = vpop.xlane.xlu1 %3006 }
 0xd79   :  { %v3054_v3 = vmul.f32 0.03125, %v3007_v15 }
 0xd7b   :  { %v11974_v4 = vsub.f32 %v11877_v45, %v3054_v3 }
 0xd7c   :  { %v3013_v59 = vpop.xlane.xlu1 %3012  ;;  %v3010_v12 = vpop.xlane.xlu0 %3009 }
 0xd7d   :  { %v3056_v19 = vmul.f32 0.03125, %v3013_v59  ;;  %v3055_v34 = vmul.f32 0.03125, %v3010_v12  ;;  %v3086_v48 = vmul.f32 %v11974_v4, %v11974_v4 }
 0xd7f   :  { %v11979_v50 = vsub.f32 %v11883_v26, %v3056_v19  ;;  %v11982_v8 = vsub.f32 %v11885_v63, %v3055_v34  ;;  %v3102_v42 = vsel %vm451_vm0, %v3086_v48, 0.0 }
 0xd80   :  { %v3016_v55 = vpop.xlane.xlu0 %3015  ;;  %3103 = vadd.xlane.f32.xlu1 %v3102_v42 }
 0xd81   :  { %v3057_v47 = vmul.f32 0.03125, %v3016_v55  ;;  %v3088_v45 = vmul.f32 %v11979_v50, %v11979_v50  ;;  %v3087_v10 = vmul.f32 %v11982_v8, %v11982_v8 }
 0xd83   :  { %v11990_v23 = vsub.f32 %v11891_v21, %v3057_v47  ;;  %v3108_v26 = vsel %vm451_vm0, %v3088_v45, 0.0  ;;  %v3105_v22 = vsel %vm451_vm0, %v3087_v10, 0.0 }
 0xd84   :  { %3109 = vadd.xlane.f32.xlu1 %v3108_v26  ;;  %3106 = vadd.xlane.f32.xlu0 %v3105_v22 }
 0xd85   :  { %v3089_v63 = vmul.f32 %v11990_v23, %v11990_v23 }
 0xd87   :  { %v3111_v49 = vsel %vm451_vm0, %v3089_v63, 0.0 }
 0xd88   :  { %3112 = vadd.xlane.f32.xlu0 %v3111_v49 }
 0xd97   :  { %v3019_v61 = vpop.xlane.xlu1 %3018 }
 0xd98   :  { %v3058_v18 = vmul.f32 0.03125, %v3019_v61 }
 0xd9a   :  { %v11998_v5 = vsub.f32 %v11903_v7, %v3058_v18 }
 0xd9b   :  { %v3025_v46 = vpop.xlane.xlu1 %3024  ;;  %v3022_v21 = vpop.xlane.xlu0 %3021 }
 0xd9c   :  { %v3060_v2 = vmul.f32 0.03125, %v3025_v46  ;;  %v3059_v6 = vmul.f32 0.03125, %v3022_v21  ;;  %v3090_v32 = vmul.f32 %v11998_v5, %v11998_v5  ;;  %v9348_v21 = vld [vmem:[%s14548_s24 + $0x18] sm:$0xff]  }
 0xd9d   :  { %8777 = vmatprep.subr.bf16.mxu0 %v9348_v21 }
 0xd9e   :  { %v12003_v25 = vsub.f32 %v11905_v35, %v3060_v2  ;;  %v12006_v30 = vsub.f32 %v11915_v52, %v3059_v6  ;;  %v3114_v58 = vsel %vm451_vm0, %v3090_v32, 0.0  ;;  %v9349_v2 = vld [vmem:[%s14548_s24 + $0x10] sm:$0xff]   ;;  %8778 = vmatpush3.bf16.msra.mxu0 %v9348_v21 }
 0xd9f   :  { %v3028_v13 = vpop.xlane.xlu0 %3027  ;;  %v3031_v16 = vpop.xlane.xlu1 %3030  ;;  %3115 = vadd.xlane.f32.xlu1 %v3114_v58  ;;  %8779 = vmatprep.subr.bf16.mxu0 %v9349_v2 }
 0xda0   :  { %v3061_v7 = vmul.f32 0.03125, %v3028_v13  ;;  %v3062_v57 = vmul.f32 0.03125, %v3031_v16  ;;  %v3092_v60 = vmul.f32 %v12003_v25, %v12003_v25  ;;  %v3091_v1 = vmul.f32 %v12006_v30, %v12006_v30 }
 0xda2   :  { %v12014_v35 = vsub.f32 %v11925_v17, %v3061_v7  ;;  %v12017_v52 = vsub.f32 %v11927_v27, %v3062_v57  ;;  %v3120_v62 = vsel %vm451_vm0, %v3092_v60, 0.0  ;;  %v3117_v24 = vsel %vm451_vm0, %v3091_v1, 0.0  ;;  %8780 = vmatpush3.bf16.msra.mxu0 %v9349_v2 }
 0xda3   :  { %v3037_v39 = vpop.xlane.xlu1 %3036  ;;  %v3034_v51 = vpop.xlane.xlu0 %3033  ;;  %3121 = vadd.xlane.f32.xlu1 %v3120_v62  ;;  %3118 = vadd.xlane.f32.xlu0 %v3117_v24 }
 0xda4   :  { %v3064_v41 = vmul.f32 0.03125, %v3037_v39  ;;  %v3063_v36 = vmul.f32 0.03125, %v3034_v51  ;;  %v3094_v20 = vmul.f32 %v12017_v52, %v12017_v52  ;;  %v3093_v17 = vmul.f32 %v12014_v35, %v12014_v35 }
 0xda6   :  { %v12027_v27 = vsub.f32 %v11930_v11, %v3064_v41  ;;  %v12030_v56 = vsub.f32 %v11941_v40, %v3063_v36  ;;  %v3126_v37 = vsel %vm451_vm0, %v3094_v20, 0.0  ;;  %v3123_v53 = vsel %vm451_vm0, %v3093_v17, 0.0 }
 0xda7   :  { %v3040_v44 = vpop.xlane.xlu0 %3039  ;;  %3127 = vadd.xlane.f32.xlu1 %v3126_v37  ;;  %v3043_v38 = vpop.xlane.xlu1 %3042  ;;  %3124 = vadd.xlane.f32.xlu0 %v3123_v53  ;;  %v12079_v53 = vld [vmem:[#allocation17] ss:$0 sm:$0xff] }
 0xda8   :  { %v3065_v0 = vmul.f32 0.03125, %v3040_v44  ;;  %v3066_v14 = vmul.f32 0.03125, %v3043_v38  ;;  %v3096_v15 = vmul.f32 %v12027_v27, %v12027_v27  ;;  %v3095_v11 = vmul.f32 %v12030_v56, %v12030_v56 }
 0xdaa   :  { %v12040_v40 = vsub.f32 %v11946_v29, %v3065_v0  ;;  %v12043_v3 = vsub.f32 %v11953_v9, %v3066_v14  ;;  %v3132_v59 = vsel %vm451_vm0, %v3096_v15, 0.0  ;;  %v3129_v12 = vsel %vm451_vm0, %v3095_v11, 0.0 }
 0xdab   :  { %3133 = vadd.xlane.f32.xlu1 %v3132_v59  ;;  %v3049_v19 = vpop.xlane.xlu1 %3048  ;;  %3130 = vadd.xlane.f32.xlu0 %v3129_v12  ;;  %v3046_v34 = vpop.xlane.xlu0 %3045 }
 0xdac   :  { %v3068_v48 = vmul.f32 0.03125, %v3049_v19  ;;  %v3067_v42 = vmul.f32 0.03125, %v3046_v34  ;;  %v3098_v55 = vmul.f32 %v12043_v3, %v12043_v3  ;;  %v3097_v29 = vmul.f32 %v12040_v40, %v12040_v40 }
 0xdae   :  { %v12052_v9 = vsub.f32 %v11961_v28, %v3068_v48  ;;  %v12055_v47 = vsub.f32 %v11963_v31, %v3067_v42  ;;  %v3138_v45 = vsel %vm451_vm0, %v3098_v55, 0.0  ;;  %v3135_v10 = vsel %vm451_vm0, %v3097_v29, 0.0 }
 0xdaf   :  { %3139 = vadd.xlane.f32.xlu1 %v3138_v45  ;;  %3136 = vadd.xlane.f32.xlu0 %v3135_v10  ;;  %v3052_v26 = vpop.xlane.xlu0 %3051 }
 0xdb0   :  { %v3069_v22 = vmul.f32 0.03125, %v3052_v26  ;;  %v3100_v63 = vmul.f32 %v12052_v9, %v12052_v9  ;;  %v3099_v28 = vmul.f32 %v12055_v47, %v12055_v47 }
 0xdb2   :  { %v12064_v49 = vsub.f32 %v11969_v54, %v3069_v22  ;;  %v3144_v31 = vsel %vm451_vm0, %v3100_v63, 0.0  ;;  %v3141_v61 = vsel %vm451_vm0, %v3099_v28, 0.0 }
 0xdb3   :  { %3145 = vadd.xlane.f32.xlu1 %v3144_v31  ;;  %3142 = vadd.xlane.f32.xlu0 %v3141_v61 }
 0xdb4   :  { %v3101_v18 = vmul.f32 %v12064_v49, %v12064_v49 }
 0xdb6   :  { %v3147_v46 = vsel %vm451_vm0, %v3101_v18, 0.0 }
 0xdb7   :  { %3148 = vadd.xlane.f32.xlu0 %v3147_v46 }
 0xe09   :  { %v3104_v54 = vpop.xlane.xlu1 %3103 }
 0xe0a   :  { %v3150_v6 = vmul.f32 0.03125, %v3104_v54 }
 0xe0c   :  { %v3166_v32 = vadd.f32 1e-05, %v3150_v6 }
 0xe0d   :  { %v3110_v58 = vpop.xlane.xlu1 %3109  ;;  %v3107_v13 = vpop.xlane.xlu0 %3106 }
 0xe0e   :  { %9618 = vrsqrt.f32 %v3166_v32  ;;  %v3152_v16 = vmul.f32 0.03125, %v3110_v58  ;;  %v3151_v7 = vmul.f32 0.03125, %v3107_v13 }
 0xe10   :  { %v3168_v57 = vadd.f32 1e-05, %v3152_v16  ;;  %v3167_v60 = vadd.f32 1e-05, %v3151_v7 }
 0xe11   :  { %v3113_v1 = vpop.xlane.xlu0 %3112 }
 0xe12   :  { %9620 = vrsqrt.f32 %v3168_v57  ;;  %v3153_v62 = vmul.f32 0.03125, %v3113_v1 }
 0xe13   :  { %9622 = vrsqrt.f32 %v3167_v60 }
 0xe14   :  { %v3169_v24 = vadd.f32 1e-05, %v3153_v62 }
 0xe16   :  { %9624 = vrsqrt.f32 %v3169_v24 }
 0xe1b   :  { %v9619_v39 = vpop.eup %9618 }
 0xe1c   :  { %v3198_v51 = vmul.f32 %v9619_v39, %v11974_v4 }
 0xe1e   :  { %v3220_v37 = vmul.f32 %v12074_v33, %v3198_v51 }
 0xe1f   :  { %v9621_v41 = vpop.eup %9620 }
 0xe20   :  { %v9623_v36 = vpop.eup %9622  ;;  %v3200_v20 = vmul.f32 %v9621_v41, %v11979_v50  ;;  %v12085_v4 = vadd.f32 %v12079_v53, %v3220_v37 }
 0xe21   :  { %v3199_v17 = vmul.f32 %v9623_v36, %v11982_v8 }
 0xe22   :  { %v3222_v38 = vmul.f32 %v12074_v33, %v3200_v20 }
 0xe23   :  { %v9625_v43 = vpop.eup %9624  ;;  %v3221_v44 = vmul.f32 %v12074_v33, %v3199_v17 }
 0xe24   :  { %v3201_v0 = vmul.f32 %v9625_v43, %v11990_v23  ;;  %v12094_v11 = vadd.f32 %v12079_v53, %v3222_v38 }
 0xe25   :  { %v12088_v14 = vadd.f32 %v12079_v53, %v3221_v44 }
 0xe26   :  { %v3223_v50 = vmul.f32 %v12074_v33, %v3201_v0 }
 0xe27   :  { %v3258_v8 = vpack.c.bf16 %v12088_v14, %v12085_v4 }
 0xe28   :  { %v3116_v15 = vpop.xlane.xlu1 %3115  ;;  %v12097_v59 = vadd.f32 %v12079_v53, %v3223_v50 }
 0xe29   :  { %v3154_v12 = vmul.f32 0.03125, %v3116_v15  ;;  %8761 = vmatprep.mubr.msk.bf16.mxu1 %vm451_vm0, %v3258_v8 }
 0xe2a   :  { %v3259_v23 = vpack.c.bf16 %v12097_v59, %v12094_v11 }
 0xe2b   :  { %v3170_v19 = vadd.f32 1e-05, %v3154_v12 }
 0xe2c   :  { %v3122_v34 = vpop.xlane.xlu1 %3121  ;;  %8762 = vmatmul.mubr.msk.bf16.vlgmr.msra.gmra.mxu1 %vm451_vm0, %v3259_v23  ;;  %v3119_v48 = vpop.xlane.xlu0 %3118 }
 0xe2d   :  { %9626 = vrsqrt.f32 %v3170_v19  ;;  %v3156_v42 = vmul.f32 0.03125, %v3122_v34  ;;  %v3155_v55 = vmul.f32 0.03125, %v3119_v48 }
 0xe2f   :  { %v3172_v29 = vadd.f32 1e-05, %v3156_v42  ;;  %v3171_v45 = vadd.f32 1e-05, %v3155_v55 }
 0xe30   :  { %v3128_v10 = vpop.xlane.xlu1 %3127  ;;  %v3125_v26 = vpop.xlane.xlu0 %3124 }
 0xe31   :  { %9628 = vrsqrt.f32 %v3172_v29  ;;  %v3158_v22 = vmul.f32 0.03125, %v3128_v10  ;;  %v3157_v63 = vmul.f32 0.03125, %v3125_v26 }
 0xe32   :  { %9630 = vrsqrt.f32 %v3171_v45 }
 0xe33   :  { %v3174_v28 = vadd.f32 1e-05, %v3158_v22  ;;  %v3173_v31 = vadd.f32 1e-05, %v3157_v63 }
 0xe34   :  { %v3134_v61 = vpop.xlane.xlu1 %3133  ;;  %v3131_v18 = vpop.xlane.xlu0 %3130 }
 0xe35   :  { %9632 = vrsqrt.f32 %v3174_v28  ;;  %v3160_v46 = vmul.f32 0.03125, %v3134_v61  ;;  %v3159_v21 = vmul.f32 0.03125, %v3131_v18 }
 0xe36   :  { %9634 = vrsqrt.f32 %v3173_v31 }
 0xe37   :  { %v3176_v2 = vadd.f32 1e-05, %v3160_v46  ;;  %v3175_v54 = vadd.f32 1e-05, %v3159_v21 }
 0xe38   :  { %v3140_v6 = vpop.xlane.xlu1 %3139  ;;  %v3137_v32 = vpop.xlane.xlu0 %3136 }
 0xe39   :  { %9636 = vrsqrt.f32 %v3176_v2  ;;  %v3162_v58 = vmul.f32 0.03125, %v3140_v6  ;;  %v3161_v13 = vmul.f32 0.03125, %v3137_v32 }
 0xe3a   :  { %v9627_v16 = vpop.eup %9626  ;;  %9638 = vrsqrt.f32 %v3175_v54 }
 0xe3b   :  { %v3178_v7 = vadd.f32 1e-05, %v3162_v58  ;;  %v3177_v57 = vadd.f32 1e-05, %v3161_v13  ;;  %v3202_v62 = vmul.f32 %v9627_v16, %v11998_v5 }
 0xe3c   :  { %v3146_v60 = vpop.xlane.xlu1 %3145  ;;  %v3143_v1 = vpop.xlane.xlu0 %3142 }
 0xe3d   :  { %9640 = vrsqrt.f32 %v3178_v7  ;;  %v3164_v24 = vmul.f32 0.03125, %v3146_v60  ;;  %v3163_v39 = vmul.f32 0.03125, %v3143_v1  ;;  %v3224_v43 = vmul.f32 %v12074_v33, %v3202_v62 }
 0xe3e   :  { %v9629_v51 = vpop.eup %9628  ;;  %9642 = vrsqrt.f32 %v3177_v57 }
 0xe3f   :  { %v9631_v41 = vpop.eup %9630  ;;  %v3180_v36 = vadd.f32 1e-05, %v3164_v24  ;;  %v3179_v20 = vadd.f32 1e-05, %v3163_v39  ;;  %v3204_v44 = vmul.f32 %v9629_v51, %v12003_v25  ;;  %v12110_v12 = vadd.f32 %v12079_v53, %v3224_v43  ;;  %v9350_v39 = vld [vmem:[%s14548_s24 + $0x8] sm:$0xff]  }
 0xe40   :  { %v3149_v17 = vpop.xlane.xlu0 %3148  ;;  %v3203_v37 = vmul.f32 %v9631_v41, %v12006_v30  ;;  %8781 = vmatprep.subr.bf16.mxu0 %v9350_v39 }
 0xe41   :  { %9644 = vrsqrt.f32 %v3180_v36  ;;  %v3165_v38 = vmul.f32 0.03125, %v3149_v17  ;;  %v3226_v25 = vmul.f32 %v12074_v33, %v3204_v44  ;;  %8782 = vmatpush3.bf16.msra.mxu0 %v9350_v39  ;;  %v7866_v36 = vld [vmem:[#allocation13] ss:$0 sm:$0xff] }
 0xe42   :  { %v9633_v0 = vpop.eup %9632  ;;  %9646 = vrsqrt.f32 %v3179_v20  ;;  %v3225_v5 = vmul.f32 %v12074_v33, %v3203_v37 }
 0xe43   :  { %v9635_v50 = vpop.eup %9634  ;;  %v3181_v8 = vadd.f32 1e-05, %v3165_v38  ;;  %v3206_v15 = vmul.f32 %v9633_v0, %v12017_v52  ;;  %v12123_v55 = vadd.f32 %v12079_v53, %v3226_v25 }
 0xe44   :  { %v12113_v23 = vadd.f32 %v12079_v53, %v3225_v5  ;;  %v3205_v30 = vmul.f32 %v9635_v50, %v12014_v35 }
 0xe45   :  { %9648 = vrsqrt.f32 %v3181_v8  ;;  %v3228_v52 = vmul.f32 %v12074_v33, %v3206_v15 }
 0xe46   :  { %v9637_v19 = vpop.eup %9636  ;;  %v3260_v34 = vpack.c.bf16 %v12113_v23, %v12110_v12  ;;  %v3227_v48 = vmul.f32 %v12074_v33, %v3205_v30 }
 0xe47   :  { %v9639_v42 = vpop.eup %9638  ;;  %v3208_v45 = vmul.f32 %v9637_v19, %v12027_v27  ;;  %v12134_v28 = vadd.f32 %v12079_v53, %v3228_v52 }
 0xe48   :  { %8765 = vmatprep.mubr.msk.bf16.mxu1 %vm451_vm0, %v3260_v34  ;;  %v12126_v29 = vadd.f32 %v12079_v53, %v3227_v48  ;;  %v3207_v35 = vmul.f32 %v9639_v42, %v12030_v56 }
 0xe49   :  { %v3230_v56 = vmul.f32 %v12074_v33, %v3208_v45 }
 0xe4a   :  { %v9641_v10 = vpop.eup %9640  ;;  %v3261_v26 = vpack.c.bf16 %v12126_v29, %v12123_v55  ;;  %v3229_v22 = vmul.f32 %v12074_v33, %v3207_v35 }
 0xe4b   :  { %v9643_v63 = vpop.eup %9642  ;;  %v3210_v27 = vmul.f32 %v9641_v10, %v12043_v3  ;;  %v12149_v6 = vadd.f32 %v12079_v53, %v3230_v56 }
 0xe4c   :  { %8766 = vmatmul.mubr.msk.bf16.gmra.mxu1 %vm451_vm0, %v3261_v26  ;;  %v12138_v31 = vadd.f32 %v12079_v53, %v3229_v22  ;;  %v3209_v61 = vmul.f32 %v9643_v63, %v12040_v40 }
 0xe4d   :  { %v3232_v3 = vmul.f32 %v12074_v33, %v3210_v27 }
 0xe4e   :  { %v9645_v18 = vpop.eup %9644  ;;  %v3262_v46 = vpack.c.bf16 %v12138_v31, %v12134_v28  ;;  %v3231_v21 = vmul.f32 %v12074_v33, %v3209_v61 }
 0xe4f   :  { %v9647_v2 = vpop.eup %9646  ;;  %v3212_v54 = vmul.f32 %v9645_v18, %v12052_v9  ;;  %v12163_v57 = vadd.f32 %v12079_v53, %v3232_v3 }
 0xe50   :  { %8769 = vmatprep.mubr.msk.bf16.mxu1 %vm451_vm0, %v3262_v46  ;;  %v12152_v40 = vadd.f32 %v12079_v53, %v3231_v21  ;;  %v3211_v32 = vmul.f32 %v9647_v2, %v12055_v47 }
 0xe51   :  { %v3234_v7 = vmul.f32 %v12074_v33, %v3212_v54 }
 0xe52   :  { %v9649_v58 = vpop.eup %9648  ;;  %v3263_v13 = vpack.c.bf16 %v12152_v40, %v12149_v6  ;;  %v3233_v16 = vmul.f32 %v12074_v33, %v3211_v32 }
 0xe53   :  { %v3213_v9 = vmul.f32 %v9649_v58, %v12064_v49  ;;  %v12172_v62 = vadd.f32 %v12079_v53, %v3234_v7 }
 0xe54   :  { %8770 = vmatmul.mubr.msk.bf16.gmra.mxu1 %vm451_vm0, %v3263_v13  ;;  %v12166_v47 = vadd.f32 %v12079_v53, %v3233_v16 }
 0xe55   :  { %v3235_v60 = vmul.f32 %v12074_v33, %v3213_v9  ;;  %v9351_v33 = vld [vmem:[%s14548_s24] sm:$0xff]  }
 0xe56   :  { %v3264_v1 = vpack.c.bf16 %v12166_v47, %v12163_v57  ;;  %8783 = vmatprep.subr.bf16.mxu0 %v9351_v33 }
 0xe57   :  { %v12175_v49 = vadd.f32 %v12079_v53, %v3235_v60  ;;  %8784 = vmatpush3.bf16.msra.mxu0 %v9351_v33 }
 0xe58   :  { %8773 = vmatprep.mubr.msk.bf16.mxu1 %vm451_vm0, %v3264_v1 }
 0xe59   :  { %v3265_v24 = vpack.c.bf16 %v12175_v49, %v12172_v62 }
 0xe5c   :  { %8774 = vmatmul.mubr.msk.bf16.gmra.mxu1 %vm451_vm0, %v3265_v24 }
 0xeec   :  { %v8763_v51 = vpop.f32.mrf.mxu1 }
 0xeed   :  { %v3351_v37 = vadd.f32 %v8763_v51, %v7866_v36 }
 0xeee   :  { %v3342_v41 = vpop.f32.mrf.mxu1 }
 0xeef   :  { %v3343_v17 = vadd.f32 %v7866_v36, %v3342_v41  ;;  %v3407_v50 = vmax.f32 %v3351_v37, 0.0 }
 0xef0   :  { %v8764_v20 = vpop.f32.mrf.mxu1 }
 0xef1   :  { %v3354_v53 = vadd.f32 %v8764_v20, %v7866_v36  ;;  %v3405_v0 = vmax.f32 %v3343_v17, 0.0 }
 0xef2   :  { %v3345_v43 = vpop.f32.mrf.mxu1 }
 0xef3   :  { %v3346_v44 = vadd.f32 %v7866_v36, %v3345_v43  ;;  %v3408_v38 = vmax.f32 %v3354_v53, 0.0 }
 0xef5   :  { %v3406_v5 = vmax.f32 %v3346_v44, 0.0  ;;  %v3422_v15 = vpack.c.bf16 %v3408_v38, %v3407_v50 }
 0xef7   :  { %v3421_v8 = vpack.c.bf16 %v3406_v5, %v3405_v0  ;;  %v12191_v5 = vld [vmem:[#allocation14] ss:$0 sm:$0xff] }
 0xef9   :  { %8785 = vmatprep.mubr.msk.bf16.mxu0 %vm3459_vm3, %v3421_v8 }
 0xefa   :  { %8786 = vmatmul.mubr.msk.bf16.vlgmr.msra.gmra.mxu0 %vm3459_vm3, %v3422_v15 }
 0xf0c   :  { %v8767_v30 = vpop.f32.mrf.mxu1 }
 0xf0d   :  { %v3367_v42 = vadd.f32 %v8767_v30, %v7866_v36 }
 0xf0e   :  { %v3358_v25 = vpop.f32.mrf.mxu1 }
 0xf0f   :  { %v3359_v34 = vadd.f32 %v7866_v36, %v3358_v25  ;;  %v3411_v63 = vmax.f32 %v3367_v42, 0.0 }
 0xf10   :  { %v8768_v19 = vpop.f32.mrf.mxu1 }
 0xf11   :  { %v3370_v48 = vadd.f32 %v8768_v19, %v7866_v36  ;;  %v3409_v26 = vmax.f32 %v3359_v34, 0.0 }
 0xf12   :  { %v3361_v52 = vpop.f32.mrf.mxu1 }
 0xf13   :  { %v3362_v35 = vadd.f32 %v7866_v36, %v3361_v52  ;;  %v3412_v45 = vmax.f32 %v3370_v48, 0.0 }
 0xf14   :  { %v8771_v10 = vpop.f32.mrf.mxu1 }
 0xf15   :  { %v3410_v22 = vmax.f32 %v3362_v35, 0.0  ;;  %v3424_v27 = vpack.c.bf16 %v3412_v45, %v3411_v63  ;;  %v3383_v2 = vadd.f32 %v8771_v10, %v7866_v36  ;;  %v9352_v10 = vld [vmem:[%s14549_s25 + $0x8] sm:$0xff]  }
 0xf16   :  { %v3374_v61 = vpop.f32.mrf.mxu1  ;;  %8821 = vmatprep.subr.bf16.mxu0 %v9352_v10 }
 0xf17   :  { %v3423_v56 = vpack.c.bf16 %v3410_v22, %v3409_v26  ;;  %v3375_v46 = vadd.f32 %v7866_v36, %v3374_v61  ;;  %v3415_v9 = vmax.f32 %v3383_v2, 0.0  ;;  %8822 = vmatpush3.bf16.msra.mxu0 %v9352_v10  ;;  %v377_v22 = vld [vmem:[#allocation5] sm:$0xff] }
 0xf18   :  { %v8772_v18 = vpop.f32.mrf.mxu1 }
 0xf19   :  { %v3386_v21 = vadd.f32 %v8772_v18, %v7866_v36  ;;  %8789 = vmatprep.mubr.msk.bf16.mxu0 %vm3459_vm3, %v3423_v56  ;;  %v3413_v13 = vmax.f32 %v3375_v46, 0.0  ;;  %v380_v18 = vld [vmem:[#allocation5 + $0x18] sm:$0xff]  ;;  %v381_v46 = vld [vmem:[#allocation5 + $0x20] sm:$0xff] }
 0xf1a   :  { %v3377_v54 = vpop.f32.mrf.mxu1  ;;  %8790 = vmatmul.mubr.msk.bf16.gmra.mxu0 %vm3459_vm3, %v3424_v27  ;;  %v379_v27 = vld [vmem:[#allocation5 + $0x10] sm:$0xff] }
 0xf1b   :  { %v3378_v32 = vadd.f32 %v7866_v36, %v3377_v54  ;;  %v3416_v3 = vmax.f32 %v3386_v21, 0.0  ;;  %v3997_v2 = vpack.c.bf16 %v380_v18, %v379_v27  ;;  %v382_v54 = vld [vmem:[#allocation5 + $0x28] sm:$0xff] }
 0xf1c   :  { %v8775_v58 = vpop.f32.mrf.mxu1 }
 0xf1d   :  { %v3414_v16 = vmax.f32 %v3378_v32, 0.0  ;;  %v3426_v1 = vpack.c.bf16 %v3416_v3, %v3415_v9  ;;  %v3399_v51 = vadd.f32 %v8775_v58, %v7866_v36  ;;  %v3998_v3 = vpack.c.bf16 %v382_v54, %v381_v46  ;;  %v390_v46 = vld [vmem:[#allocation5 + $0x68] sm:$0xff]  ;;  %v392_v54 = vld [vmem:[#allocation5 + $0x78] sm:$0xff] }
 0xf1e   :  { %v3390_v7 = vpop.f32.mrf.mxu1 }
 0xf1f   :  { %v3425_v60 = vpack.c.bf16 %v3414_v16, %v3413_v13  ;;  %v3391_v39 = vadd.f32 %v7866_v36, %v3390_v7  ;;  %v3419_v43 = vmax.f32 %v3399_v51, 0.0 }
 0xf20   :  { %v8776_v24 = vpop.f32.mrf.mxu1 }
 0xf21   :  { %v3402_v33 = vadd.f32 %v8776_v24, %v7866_v36  ;;  %8793 = vmatprep.mubr.msk.bf16.mxu0 %vm3459_vm3, %v3425_v60  ;;  %v3417_v53 = vmax.f32 %v3391_v39, 0.0  ;;  %v384_v24 = vld [vmem:[#allocation5 + $0x38] sm:$0xff] }
 0xf22   :  { %v3393_v41 = vpop.f32.mrf.mxu1  ;;  %8794 = vmatmul.mubr.msk.bf16.gmra.mxu0 %vm3459_vm3, %v3426_v1  ;;  %v383_v1 = vld [vmem:[#allocation5 + $0x30] sm:$0xff] }
 0xf23   :  { %v3394_v20 = vadd.f32 %v7866_v36, %v3393_v41  ;;  %v3420_v17 = vmax.f32 %v3402_v33, 0.0  ;;  %v3999_v51 = vpack.c.bf16 %v384_v24, %v383_v1 }
 0xf25   :  { %v3418_v37 = vmax.f32 %v3394_v20, 0.0  ;;  %v3428_v38 = vpack.c.bf16 %v3420_v17, %v3419_v43 }
 0xf27   :  { %v3427_v44 = vpack.c.bf16 %v3418_v37, %v3417_v53 }
 0xf29   :  { %8797 = vmatprep.mubr.msk.bf16.mxu0 %vm3459_vm3, %v3427_v44 }
 0xf2a   :  { %8798 = vmatmul.mubr.msk.bf16.gmra.mxu0 %vm3459_vm3, %v3428_v38 }
 0xfba   :  { %v8787_v0 = vpop.f32.mrf.mxu0 }
 0xfbb   :  { %v3527_v8 = vadd.f32 %v8787_v0, %v12191_v5 }
 0xfbc   :  { %v3518_v50 = vpop.f32.mrf.mxu0 }
 0xfbd   :  { %v3519_v15 = vadd.f32 %v12191_v5, %v3518_v50  ;;  %v12199_v19 = vadd.f32 %v3527_v8, %v12094_v11 }
 0xfbe   :  { %v8788_v30 = vpop.f32.mrf.mxu0 }
 0xfbf   :  { %v12196_v36 = vadd.f32 %v3519_v15, %v12085_v4  ;;  %v3530_v34 = vadd.f32 %v8788_v30, %v12191_v5  ;;  %v3603_v11 = vsel %vm451_vm0, %v12199_v19, 0.0 }
 0xfc0   :  { %v3521_v25 = vpop.f32.mrf.mxu0 }
 0xfc1   :  { %v3522_v48 = vadd.f32 %v12191_v5, %v3521_v25  ;;  %v3597_v42 = vsel %vm451_vm0, %v12196_v36, 0.0  ;;  %v12209_v35 = vadd.f32 %v3530_v34, %v12097_v59  ;;  %v378_v59 = vld [vmem:[#allocation5 + $0x8] sm:$0xff] }
 0xfc2   :  { %3598 = vadd.xlane.f32.xlu1 %v3597_v42  ;;  %v3996_v56 = vpack.c.bf16 %v378_v59, %v377_v22  ;;  %v385_v42 = vld [vmem:[#allocation5 + $0x40] sm:$0xff] }
 0xfc3   :  { %v12206_v52 = vadd.f32 %v3522_v48, %v12088_v14  ;;  %v3606_v45 = vsel %vm451_vm0, %v12209_v35, 0.0  ;;  %v9353_v14 = vld [vmem:[%s14549_s25] sm:$0xff]  }
 0xfc4   :  { %8823 = vmatprep.subr.bf16.mxu0 %v9353_v14  ;;  %8825 = vmatprep.mubr.msk.bf16.mxu0 %vm451_vm0, %v3996_v56 }
 0xfc5   :  { %v3600_v4 = vsel %vm451_vm0, %v12206_v52, 0.0  ;;  %8824 = vmatpush3.bf16.msra.mxu0 %v9353_v14 }
 0xfc6   :  { %3601 = vadd.xlane.f32.xlu0 %v3600_v4  ;;  %3604 = vadd.xlane.f32.xlu1 %v3603_v11  ;;  %v386_v4 = vld [vmem:[#allocation5 + $0x48] sm:$0xff] }
 0xfc7   :  { %v4000_v11 = vpack.c.bf16 %v386_v4, %v385_v42 }
 0xfc8   :  { %8826 = vmatmul.mubr.msk.bf16.vlgmr.msra.gmra.mxu0 %vm451_vm0, %v3997_v2  ;;  %v391_v2 = vld [vmem:[#allocation5 + $0x70] sm:$0xff] }
 0xfc9   :  { %8829 = vmatprep.mubr.msk.bf16.mxu0 %vm451_vm0, %v3998_v3 }
 0xfca   :  { %3607 = vadd.xlane.f32.xlu0 %v3606_v45  ;;  %v387_v45 = vld [vmem:[#allocation5 + $0x50] sm:$0xff] }
 0xfd0   :  { %8830 = vmatmul.mubr.msk.bf16.gmra.mxu0 %vm451_vm0, %v3999_v51 }
 0xfd1   :  { %8833 = vmatprep.mubr.msk.bf16.mxu0 %vm451_vm0, %v4000_v11 }
 0xfda   :  { %v8791_v26 = vpop.f32.mrf.mxu0 }
 0xfdb   :  { %v3543_v63 = vadd.f32 %v8791_v26, %v12191_v5 }
 0xfdc   :  { %v3534_v61 = vpop.f32.mrf.mxu0 }
 0xfdd   :  { %v3535_v21 = vadd.f32 %v12191_v5, %v3534_v61  ;;  %v12226_v13 = vadd.f32 %v3543_v63, %v12123_v55 }
 0xfde   :  { %v8792_v32 = vpop.f32.mrf.mxu0 }
 0xfdf   :  { %v12223_v58 = vadd.f32 %v3535_v21, %v12110_v12  ;;  %v3546_v9 = vadd.f32 %v8792_v32, %v12191_v5  ;;  %v3615_v33 = vsel %vm451_vm0, %v12226_v13, 0.0  ;;  %v4003_v32 = vpack.c.bf16 %v392_v54, %v391_v2 }
 0xfe0   :  { %v3537_v16 = vpop.f32.mrf.mxu0 }
 0xfe1   :  { %v3538_v7 = vadd.f32 %v12191_v5, %v3537_v16  ;;  %v3609_v60 = vsel %vm451_vm0, %v12223_v58, 0.0  ;;  %v12240_v41 = vadd.f32 %v3546_v9, %v12126_v29 }
 0xfe2   :  { %3610 = vadd.xlane.f32.xlu1 %v3609_v60  ;;  %v8795_v39 = vpop.f32.mrf.mxu0 }
 0xfe3   :  { %v12235_v12 = vadd.f32 %v3538_v7, %v12113_v23  ;;  %v3559_v20 = vadd.f32 %v8795_v39, %v12191_v5  ;;  %v3618_v0 = vsel %vm451_vm0, %v12240_v41, 0.0 }
 0xfe4   :  { %v3550_v55 = vpop.f32.mrf.mxu0 }
 0xfe5   :  { %v3551_v17 = vadd.f32 %v12191_v5, %v3550_v55  ;;  %v3612_v53 = vsel %vm451_vm0, %v12235_v12, 0.0  ;;  %v12251_v38 = vadd.f32 %v3559_v20, %v12149_v6 }
 0xfe6   :  { %3613 = vadd.xlane.f32.xlu0 %v3612_v53  ;;  %3616 = vadd.xlane.f32.xlu1 %v3615_v33  ;;  %v8796_v37 = vpop.f32.mrf.mxu0 }
 0xfe7   :  { %v12247_v23 = vadd.f32 %v3551_v17, %v12134_v28  ;;  %v3562_v43 = vadd.f32 %v8796_v37, %v12191_v5  ;;  %v3627_v48 = vsel %vm451_vm0, %v12251_v38, 0.0 }
 0xfe8   :  { %v3553_v44 = vpop.f32.mrf.mxu0 }
 0xfe9   :  { %v3554_v29 = vadd.f32 %v12191_v5, %v3553_v44  ;;  %v3621_v50 = vsel %vm451_vm0, %v12247_v23, 0.0  ;;  %v12263_v15 = vadd.f32 %v3562_v43, %v12152_v40  ;;  %v388_v40 = vld [vmem:[#allocation5 + $0x58] sm:$0xff] }
 0xfea   :  { %3619 = vadd.xlane.f32.xlu0 %v3618_v0  ;;  %3622 = vadd.xlane.f32.xlu1 %v3621_v50  ;;  %v8799_v28 = vpop.f32.mrf.mxu0  ;;  %v4001_v26 = vpack.c.bf16 %v388_v40, %v387_v45 }
 0xfeb   :  { %v12260_v8 = vadd.f32 %v3554_v29, %v12138_v31  ;;  %v3575_v30 = vadd.f32 %v8799_v28, %v12191_v5  ;;  %v3630_v22 = vsel %vm451_vm0, %v12263_v15, 0.0 }
 0xfec   :  { %v3566_v6 = vpop.f32.mrf.mxu0  ;;  %8834 = vmatmul.mubr.msk.bf16.gmra.mxu0 %vm451_vm0, %v4001_v26 }
 0xfed   :  { %v3567_v25 = vadd.f32 %v12191_v5, %v3566_v6  ;;  %v3624_v34 = vsel %vm451_vm0, %v12260_v8, 0.0  ;;  %v12278_v59 = vadd.f32 %v3575_v30, %v12172_v62 }
 0xfee   :  { %3625 = vadd.xlane.f32.xlu0 %v3624_v34  ;;  %3628 = vadd.xlane.f32.xlu1 %v3627_v48  ;;  %v8800_v31 = vpop.f32.mrf.mxu0 }
 0xfef   :  { %v12272_v10 = vadd.f32 %v3567_v25, %v12163_v57  ;;  %v3578_v63 = vadd.f32 %v8800_v31, %v12191_v5  ;;  %v3639_v18 = vsel %vm451_vm0, %v12278_v59, 0.0 }
 0xff0   :  { %v3569_v14 = vpop.f32.mrf.mxu0 }
 0xff1   :  { %v3570_v61 = vadd.f32 %v12191_v5, %v3569_v14  ;;  %v3633_v56 = vsel %vm451_vm0, %v12272_v10, 0.0  ;;  %v12289_v27 = vadd.f32 %v3578_v63, %v12175_v49  ;;  %v389_v5 = vld [vmem:[#allocation5 + $0x60] sm:$0xff]  ;;  %v9354_v14 = vld [vmem:[%s14550_s7 + $0x8] sm:$0xff]  }
 0xff2   :  { %3631 = vadd.xlane.f32.xlu0 %v3630_v22  ;;  %3634 = vadd.xlane.f32.xlu1 %v3633_v56  ;;  %v4002_v21 = vpack.c.bf16 %v390_v46, %v389_v5 }
 0xff3   :  { %v12286_v57 = vadd.f32 %v3570_v61, %v12166_v47  ;;  %v3642_v47 = vsel %vm451_vm0, %v12289_v27, 0.0  ;;  %8801 = vmatprep.subr.bf16.mxu1 %v9354_v14 }
 0xff4   :  { %8837 = vmatprep.mubr.msk.bf16.mxu0 %vm451_vm0, %v4002_v21  ;;  %8802 = vmatpush3.bf16.msra.mxu1 %v9354_v14  ;;  %v9355_v21 = vld [vmem:[%s14550_s7] sm:$0xff]  }
 0xff5   :  { %v3636_v62 = vsel %vm451_vm0, %v12286_v57, 0.0  ;;  %8838 = vmatmul.mubr.msk.bf16.gmra.mxu0 %vm451_vm0, %v4003_v32  ;;  %8803 = vmatprep.subr.bf16.mxu1 %v9355_v21 }
 0xff6   :  { %3637 = vadd.xlane.f32.xlu0 %v3636_v62  ;;  %3640 = vadd.xlane.f32.xlu1 %v3639_v18 }
 0xff8   :  { %8804 = vmatpush3.bf16.msra.mxu1 %v9355_v21 }
 0xffa   :  { %3643 = vadd.xlane.f32.xlu0 %v3642_v47 }
0x104b   :  { %v3599_v49 = vpop.xlane.xlu1 %3598 }
0x104c   :  { %v3645_v3 = vmul.f32 0.03125, %v3599_v49 }
0x104e   :  { %v12300_v16 = vsub.f32 %v12196_v36, %v3645_v3 }
0x104f   :  { %v3605_v9 = vpop.xlane.xlu1 %3604  ;;  %v3602_v7 = vpop.xlane.xlu0 %3601 }
0x1050   :  { %v3647_v60 = vmul.f32 0.03125, %v3605_v9  ;;  %v3646_v1 = vmul.f32 0.03125, %v3602_v7  ;;  %v3677_v24 = vmul.f32 %v12300_v16, %v12300_v16 }
0x1052   :  { %v12305_v39 = vsub.f32 %v12199_v19, %v3647_v60  ;;  %v12308_v55 = vsub.f32 %v12206_v52, %v3646_v1  ;;  %v3693_v33 = vsel %vm451_vm0, %v3677_v24, 0.0 }
0x1053   :  { %3694 = vadd.xlane.f32.xlu1 %v3693_v33  ;;  %v3608_v51 = vpop.xlane.xlu0 %3607 }
0x1054   :  { %v3648_v20 = vmul.f32 0.03125, %v3608_v51  ;;  %v3679_v36 = vmul.f32 %v12305_v39, %v12305_v39  ;;  %v3678_v17 = vmul.f32 %v12308_v55, %v12308_v55 }
0x1056   :  { %v12316_v53 = vsub.f32 %v12209_v35, %v3648_v20  ;;  %v3699_v19 = vsel %vm451_vm0, %v3679_v36, 0.0  ;;  %v3696_v37 = vsel %vm451_vm0, %v3678_v17, 0.0 }
0x1057   :  { %3700 = vadd.xlane.f32.xlu1 %v3699_v19  ;;  %3697 = vadd.xlane.f32.xlu0 %v3696_v37 }
0x1058   :  { %v3680_v52 = vmul.f32 %v12316_v53, %v12316_v53 }
0x105a   :  { %v3702_v43 = vsel %vm451_vm0, %v3680_v52, 0.0 }
0x105b   :  { %3703 = vadd.xlane.f32.xlu0 %v3702_v43 }
0x106b   :  { %v3611_v44 = vpop.xlane.xlu1 %3610 }
0x106c   :  { %v3649_v29 = vmul.f32 0.03125, %v3611_v44 }
0x106e   :  { %v12324_v0 = vsub.f32 %v12223_v58, %v3649_v29 }
0x106f   :  { %v3617_v50 = vpop.xlane.xlu1 %3616  ;;  %v3614_v35 = vpop.xlane.xlu0 %3613 }
0x1070   :  { %v3651_v28 = vmul.f32 0.03125, %v3617_v50  ;;  %v3650_v6 = vmul.f32 0.03125, %v3614_v35  ;;  %v3681_v30 = vmul.f32 %v12324_v0, %v12324_v0 }
0x1072   :  { %v12329_v25 = vsub.f32 %v12226_v13, %v3651_v28  ;;  %v12332_v34 = vsub.f32 %v12235_v12, %v3650_v6  ;;  %v3705_v48 = vsel %vm451_vm0, %v3681_v30, 0.0  ;;  %v7903_v28 = vld [vmem:[%s14551_s14] ss:$0 sm:$0xff] }
0x1073   :  { %v3623_v42 = vpop.xlane.xlu1 %3622  ;;  %3706 = vadd.xlane.f32.xlu1 %v3705_v48  ;;  %v3620_v58 = vpop.xlane.xlu0 %3619 }
0x1074   :  { %v3653_v4 = vmul.f32 0.03125, %v3623_v42  ;;  %v3652_v31 = vmul.f32 0.03125, %v3620_v58  ;;  %v3683_v11 = vmul.f32 %v12329_v25, %v12329_v25  ;;  %v3682_v45 = vmul.f32 %v12332_v34, %v12332_v34 }
0x1076   :  { %v12340_v40 = vsub.f32 %v12247_v23, %v3653_v4  ;;  %v12343_v13 = vsub.f32 %v12240_v41, %v3652_v31  ;;  %v3711_v12 = vsel %vm451_vm0, %v3683_v11, 0.0  ;;  %v3708_v26 = vsel %vm451_vm0, %v3682_v45, 0.0 }
0x1077   :  { %v3629_v22 = vpop.xlane.xlu1 %3628  ;;  %3712 = vadd.xlane.f32.xlu1 %v3711_v12  ;;  %3709 = vadd.xlane.f32.xlu0 %v3708_v26  ;;  %v3626_v63 = vpop.xlane.xlu0 %3625 }
0x1078   :  { %v3655_v61 = vmul.f32 0.03125, %v3629_v22  ;;  %v3654_v56 = vmul.f32 0.03125, %v3626_v63  ;;  %v3685_v62 = vmul.f32 %v12340_v40, %v12340_v40  ;;  %v3684_v23 = vmul.f32 %v12343_v13, %v12343_v13 }
0x107a   :  { %v12353_v41 = vsub.f32 %v12251_v38, %v3655_v61  ;;  %v12356_v18 = vsub.f32 %v12260_v8, %v3654_v56  ;;  %v3717_v5 = vsel %vm451_vm0, %v3685_v62, 0.0  ;;  %v3714_v46 = vsel %vm451_vm0, %v3684_v23, 0.0 }
0x107b   :  { %3718 = vadd.xlane.f32.xlu1 %v3717_v5  ;;  %v3635_v2 = vpop.xlane.xlu1 %3634  ;;  %3715 = vadd.xlane.f32.xlu0 %v3714_v46  ;;  %v3632_v54 = vpop.xlane.xlu0 %3631 }
0x107c   :  { %v3657_v32 = vmul.f32 0.03125, %v3635_v2  ;;  %v3656_v47 = vmul.f32 0.03125, %v3632_v54  ;;  %v3687_v49 = vmul.f32 %v12353_v41, %v12353_v41  ;;  %v3686_v38 = vmul.f32 %v12356_v18, %v12356_v18 }
0x107e   :  { %v12366_v8 = vsub.f32 %v12272_v10, %v3657_v32  ;;  %v12369_v3 = vsub.f32 %v12263_v15, %v3656_v47  ;;  %v3723_v9 = vsel %vm451_vm0, %v3687_v49, 0.0  ;;  %v3720_v7 = vsel %vm451_vm0, %v3686_v38, 0.0 }
0x107f   :  { %3724 = vadd.xlane.f32.xlu1 %v3723_v9  ;;  %v3641_v60 = vpop.xlane.xlu1 %3640  ;;  %3721 = vadd.xlane.f32.xlu0 %v3720_v7  ;;  %v3638_v1 = vpop.xlane.xlu0 %3637 }
0x1080   :  { %v3659_v24 = vmul.f32 0.03125, %v3641_v60  ;;  %v3658_v33 = vmul.f32 0.03125, %v3638_v1  ;;  %v3689_v51 = vmul.f32 %v12366_v8, %v12366_v8  ;;  %v3688_v10 = vmul.f32 %v12369_v3, %v12369_v3 }
0x1082   :  { %v12378_v20 = vsub.f32 %v12278_v59, %v3659_v24  ;;  %v12381_v15 = vsub.f32 %v12286_v57, %v3658_v33  ;;  %v3729_v36 = vsel %vm451_vm0, %v3689_v51, 0.0  ;;  %v3726_v17 = vsel %vm451_vm0, %v3688_v10, 0.0 }
0x1083   :  { %3730 = vadd.xlane.f32.xlu1 %v3729_v36  ;;  %3727 = vadd.xlane.f32.xlu0 %v3726_v17  ;;  %v3644_v19 = vpop.xlane.xlu0 %3643 }
0x1084   :  { %v3660_v37 = vmul.f32 0.03125, %v3644_v19  ;;  %v3691_v52 = vmul.f32 %v12378_v20, %v12378_v20  ;;  %v3690_v43 = vmul.f32 %v12381_v15, %v12381_v15 }
0x1086   :  { %v12390_v59 = vsub.f32 %v12289_v27, %v3660_v37  ;;  %v3735_v57 = vsel %vm451_vm0, %v3691_v52, 0.0  ;;  %v3732_v44 = vsel %vm451_vm0, %v3690_v43, 0.0 }
0x1087   :  { %3736 = vadd.xlane.f32.xlu1 %v3735_v57  ;;  %3733 = vadd.xlane.f32.xlu0 %v3732_v44 }
0x1088   :  { %v3692_v29 = vmul.f32 %v12390_v59, %v12390_v59  ;;  %v8827_v35 = vpop.f32.mrf.mxu0 }
0x1089   :  { %v4089_v6 = vadd.f32 %v8827_v35, %v7903_v28 }
0x108a   :  { %v3738_v50 = vsel %vm451_vm0, %v3692_v29, 0.0  ;;  %v4080_v30 = vpop.f32.mrf.mxu0 }
0x108b   :  { %3739 = vadd.xlane.f32.xlu0 %v3738_v50  ;;  %v4081_v48 = vadd.f32 %v7903_v28, %v4080_v30 }
0x108c   :  { %v8828_v42 = vpop.f32.mrf.mxu0 }
0x108d   :  { %v4092_v27 = vadd.f32 %v8828_v42, %v7903_v28 }
0x108e   :  { %v4083_v58 = vpop.f32.mrf.mxu0 }
0x108f   :  { %v12398_v4 = vpack.c.bf16 %v4092_v27, %v4089_v6  ;;  %v4084_v31 = vadd.f32 %v7903_v28, %v4083_v58  ;;  %v12429_v58 = vld [vmem:[#allocation19] ss:$0 sm:$0xff] }
0x1090   :  { %v8831_v11 = vpop.f32.mrf.mxu0 }
0x1091   :  { %v12400_v45 = vpack.c.bf16 %v4084_v31, %v4081_v48  ;;  %v4105_v24 = vadd.f32 %v8831_v11, %v7903_v28 }
0x1092   :  { %v4096_v12 = vpop.f32.mrf.mxu0 }
0x1093   :  { %v4097_v10 = vadd.f32 %v7903_v28, %v4096_v12 }
0x1094   :  { %v8832_v26 = vpop.f32.mrf.mxu0 }
0x1095   :  { %v4108_v33 = vadd.f32 %v8832_v26, %v7903_v28 }
0x1096   :  { %v4099_v14 = vpop.f32.mrf.mxu0 }
0x1097   :  { %v12420_v36 = vpack.c.bf16 %v4108_v33, %v4105_v24  ;;  %v4100_v17 = vadd.f32 %v7903_v28, %v4099_v14 }
0x1099   :  { %v12424_v19 = vpack.c.bf16 %v4100_v17, %v4097_v10 }
0x10ac   :  { %v8835_v22 = vpop.f32.mrf.mxu0 }
0x10ad   :  { %v4121_v32 = vadd.f32 %v8835_v22, %v7903_v28  ;;  %v12434_v22 = vld [vmem:[#allocation20] ss:$0 sm:$0xff] }
0x10ae   :  { %v4112_v63 = vpop.f32.mrf.mxu0 }
0x10af   :  { %v4113_v7 = vadd.f32 %v7903_v28, %v4112_v63 }
0x10b0   :  { %v8836_v61 = vpop.f32.mrf.mxu0 }
0x10b1   :  { %v4124_v47 = vadd.f32 %v8836_v61, %v7903_v28 }
0x10b2   :  { %v4115_v56 = vpop.f32.mrf.mxu0 }
0x10b3   :  { %v12410_v60 = vpack.c.bf16 %v4124_v47, %v4121_v32  ;;  %v4116_v1 = vadd.f32 %v7903_v28, %v4115_v56 }
0x10b5   :  { %v8839_v62 = vpop.f32.mrf.mxu0  ;;  %v12416_v51 = vpack.c.bf16 %v4116_v1, %v4113_v7 }
0x10b6   :  { %v4137_v5 = vadd.f32 %v8839_v62, %v7903_v28 }
0x10b7   :  { %v4128_v23 = vpop.f32.mrf.mxu0 }
0x10b8   :  { %v4129_v21 = vadd.f32 %v7903_v28, %v4128_v23 }
0x10b9   :  { %v8840_v46 = vpop.f32.mrf.mxu0 }
0x10ba   :  { %v4140_v2 = vadd.f32 %v8840_v46, %v7903_v28 }
0x10bb   :  { %v4131_v54 = vpop.f32.mrf.mxu0 }
0x10bc   :  { %v12402_v49 = vpack.c.bf16 %v4140_v2, %v4137_v5  ;;  %v4132_v38 = vadd.f32 %v7903_v28, %v4131_v54 }
0x10be   :  { %9249 = vmatprep.subr.msk.bf16.mxu1 %vm629_vm1, %v12402_v49  ;;  %v12406_v9 = vpack.c.bf16 %v4132_v38, %v4129_v21  ;;  %4494 = vrot.lane.b32.xlu1 %v12402_v49, %s10416_s19  ;;  %v4221_v54 = vsel %vm629_vm1, %v12402_v49, 0 }
0x10c0   :  { %4492 = vrot.lane.b32.xlu0 %v12406_v9, %s10416_s19 }
0x10c2   :  { %4490 = vrot.lane.b32.xlu1 %v12410_v60, %s10416_s19 }
0x10c6   :  { %4488 = vrot.lane.b32.xlu1 %v12416_v51, %s10416_s19 }
0x10ca   :  { %4486 = vrot.lane.b32.xlu1 %v12420_v36, %s10416_s19 }
0x10ce   :  { %4484 = vrot.lane.b32.xlu1 %v12424_v19, %s10416_s19 }
0x10dc   :  { %v3695_v37 = vpop.xlane.xlu1 %3694 }
0x10dd   :  { %v3741_v52 = vmul.f32 0.03125, %v3695_v37 }
0x10df   :  { %v3757_v43 = vadd.f32 1e-05, %v3741_v52 }
0x10e0   :  { %v3701_v57 = vpop.xlane.xlu1 %3700  ;;  %v3698_v44 = vpop.xlane.xlu0 %3697 }
0x10e1   :  { %9650 = vrsqrt.f32 %v3757_v43  ;;  %v3743_v29 = vmul.f32 0.03125, %v3701_v57  ;;  %v3742_v50 = vmul.f32 0.03125, %v3698_v44  ;;  %v4218_v43 = vsel %vm629_vm1, %v12406_v9, 0 }
0x10e3   :  { %v3759_v35 = vadd.f32 1e-05, %v3743_v29  ;;  %v3758_v6 = vadd.f32 1e-05, %v3742_v50 }
0x10e4   :  { %v3704_v30 = vpop.xlane.xlu0 %3703 }
0x10e5   :  { %9652 = vrsqrt.f32 %v3759_v35  ;;  %v3744_v28 = vmul.f32 0.03125, %v3704_v30 }
0x10e6   :  { %9654 = vrsqrt.f32 %v3758_v6 }
0x10e7   :  { %v3760_v48 = vadd.f32 1e-05, %v3744_v28 }
0x10e9   :  { %9656 = vrsqrt.f32 %v3760_v48 }
0x10ee   :  { %v9651_v42 = vpop.eup %9650 }
0x10ef   :  { %v3789_v27 = vmul.f32 %v9651_v42, %v12300_v16 }
0x10f1   :  { %v3811_v14 = vmul.f32 %v12429_v58, %v3789_v27 }
0x10f2   :  { %v9653_v31 = vpop.eup %9652 }
0x10f3   :  { %v9655_v11 = vpop.eup %9654  ;;  %v3791_v12 = vmul.f32 %v9653_v31, %v12305_v39  ;;  %v12440_v16 = vadd.f32 %v12434_v22, %v3811_v14 }
0x10f4   :  { %v3790_v26 = vmul.f32 %v9655_v11, %v12308_v55  ;;  %v4215_v11 = vsel %vm629_vm1, %v12410_v60, 0 }
0x10f5   :  { %v3813_v56 = vmul.f32 %v12429_v58, %v3791_v12  ;;  %14552 = vst [vmem:[#allocation50_spill] sm:$0xff] %v12440_v16 }
0x10f6   :  { %v9657_v63 = vpop.eup %9656  ;;  %v3812_v61 = vmul.f32 %v12429_v58, %v3790_v26 }
0x10f7   :  { %v3792_v62 = vmul.f32 %v9657_v63, %v12316_v53  ;;  %v12449_v5 = vadd.f32 %v12434_v22, %v3813_v56 }
0x10f8   :  { %v12443_v23 = vadd.f32 %v12434_v22, %v3812_v61 }
0x10f9   :  { %v3814_v39 = vmul.f32 %v12429_v58, %v3792_v62  ;;  %14554 = vst [vmem:[#allocation51_spill] sm:$0xff] %v12449_v5 }
0x10fa   :  { %14553 = vst [vmem:[#allocation49_spill] sm:$0xff] %v12443_v23  ;;  %v3849_v55 = vpack.c.bf16 %v12443_v23, %v12440_v16 }
0x10fb   :  { %v12452_v46 = vadd.f32 %v12434_v22, %v3814_v39 }
0x10fc   :  { %v3707_v21 = vpop.xlane.xlu1 %3706  ;;  %8805 = vmatprep.mubr.msk.bf16.mxu1 %vm451_vm0, %v3849_v55 }
0x10fd   :  { %14555 = vst [vmem:[#allocation53_spill] sm:$0xff] %v12452_v46  ;;  %v3745_v53 = vmul.f32 0.03125, %v3707_v21  ;;  %v3850_v2 = vpack.c.bf16 %v12452_v46, %v12449_v5 }
0x10ff   :  { %v3761_v32 = vadd.f32 1e-05, %v3745_v53  ;;  %8806 = vmatmul.mubr.msk.bf16.vlgmr.msra.gmra.mxu1 %vm451_vm0, %v3850_v2 }
0x1100   :  { %v3713_v47 = vpop.xlane.xlu1 %3712  ;;  %v3710_v38 = vpop.xlane.xlu0 %3709  ;;  %8842 = vmatpush3.bf16.xpose.msra.mxu1 %v4221_v54 }
0x1101   :  { %9658 = vrsqrt.f32 %v3761_v32  ;;  %v3747_v7 = vmul.f32 0.03125, %v3713_v47  ;;  %v3746_v1 = vmul.f32 0.03125, %v3710_v38  ;;  %9250 = vmatprep.subr.msk.bf16.mxu1 %vm629_vm1, %v12406_v9 }
0x1103   :  { %v3763_v24 = vadd.f32 1e-05, %v3747_v7  ;;  %v3762_v33 = vadd.f32 1e-05, %v3746_v1  ;;  %v4212_v7 = vsel %vm629_vm1, %v12416_v51, 0 }
0x1104   :  { %v3719_v10 = vpop.xlane.xlu1 %3718  ;;  %v3716_v17 = vpop.xlane.xlu0 %3715 }
0x1105   :  { %9660 = vrsqrt.f32 %v3763_v24  ;;  %v3749_v37 = vmul.f32 0.03125, %v3719_v10  ;;  %v3748_v52 = vmul.f32 0.03125, %v3716_v17 }
0x1106   :  { %9662 = vrsqrt.f32 %v3762_v33 }
0x1107   :  { %v3765_v57 = vadd.f32 1e-05, %v3749_v37  ;;  %v3764_v44 = vadd.f32 1e-05, %v3748_v52 }
0x1108   :  { %v3725_v29 = vpop.xlane.xlu1 %3724  ;;  %v3722_v50 = vpop.xlane.xlu0 %3721  ;;  %8844 = vmatpush3.bf16.xpose.msra.mxu1 %v4218_v43 }
0x1109   :  { %9664 = vrsqrt.f32 %v3765_v57  ;;  %v3751_v35 = vmul.f32 0.03125, %v3725_v29  ;;  %v3750_v6 = vmul.f32 0.03125, %v3722_v50  ;;  %9251 = vmatprep.subr.msk.bf16.mxu1 %vm629_vm1, %v12410_v60 }
0x110a   :  { %9666 = vrsqrt.f32 %v3764_v44 }
0x110b   :  { %v3767_v30 = vadd.f32 1e-05, %v3751_v35  ;;  %v3766_v28 = vadd.f32 1e-05, %v3750_v6 }
0x110c   :  { %v3731_v48 = vpop.xlane.xlu1 %3730  ;;  %v3728_v42 = vpop.xlane.xlu0 %3727 }
0x110d   :  { %9668 = vrsqrt.f32 %v3767_v30  ;;  %v3753_v27 = vmul.f32 0.03125, %v3731_v48  ;;  %v3752_v31 = vmul.f32 0.03125, %v3728_v42  ;;  %v4209_v42 = vsel %vm629_vm1, %v12420_v36, 0 }
0x110e   :  { %v9659_v12 = vpop.eup %9658  ;;  %9670 = vrsqrt.f32 %v3766_v28 }
0x110f   :  { %v3769_v26 = vadd.f32 1e-05, %v3753_v27  ;;  %v3768_v14 = vadd.f32 1e-05, %v3752_v31  ;;  %v3793_v56 = vmul.f32 %v9659_v12, %v12324_v0 }
0x1110   :  { %v3737_v63 = vpop.xlane.xlu1 %3736  ;;  %v3734_v61 = vpop.xlane.xlu0 %3733  ;;  %8846 = vmatpush3.bf16.xpose.msra.mxu1 %v4215_v11 }
0x1111   :  { %9672 = vrsqrt.f32 %v3769_v26  ;;  %v3755_v62 = vmul.f32 0.03125, %v3737_v63  ;;  %v3754_v39 = vmul.f32 0.03125, %v3734_v61  ;;  %9252 = vmatprep.subr.msk.bf16.mxu1 %vm629_vm1, %v12416_v51  ;;  %v3815_v47 = vmul.f32 %v12429_v58, %v3793_v56 }
0x1112   :  { %v9661_v55 = vpop.eup %9660  ;;  %9674 = vrsqrt.f32 %v3768_v14 }
0x1113   :  { %v9663_v21 = vpop.eup %9662  ;;  %v3771_v53 = vadd.f32 1e-05, %v3755_v62  ;;  %v3770_v2 = vadd.f32 1e-05, %v3754_v39  ;;  %v3795_v38 = vmul.f32 %v9661_v55, %v12329_v25  ;;  %v12479_v37 = vadd.f32 %v12434_v22, %v3815_v47 }
0x1114   :  { %v3740_v54 = vpop.xlane.xlu0 %3739  ;;  %v3794_v32 = vmul.f32 %v9663_v21, %v12332_v34 }
0x1115   :  { %9676 = vrsqrt.f32 %v3771_v53  ;;  %v3756_v0 = vmul.f32 0.03125, %v3740_v54  ;;  %14556 = vst [vmem:[#allocation54_spill] sm:$0xff] %v12479_v37  ;;  %v3817_v52 = vmul.f32 %v12429_v58, %v3795_v38 }
0x1116   :  { %v9665_v1 = vpop.eup %9664  ;;  %9678 = vrsqrt.f32 %v3770_v2  ;;  %v3816_v24 = vmul.f32 %v12429_v58, %v3794_v32 }
0x1117   :  { %v9667_v33 = vpop.eup %9666  ;;  %v3772_v10 = vadd.f32 1e-05, %v3756_v0  ;;  %v3797_v17 = vmul.f32 %v9665_v1, %v12340_v40  ;;  %v4200_v1 = vsel %vm629_vm1, %v12400_v45, 0 }
0x1118   :  { %v12482_v34 = vadd.f32 %v12434_v22, %v3816_v24  ;;  %v3796_v25 = vmul.f32 %v9667_v33, %v12343_v13  ;;  %8848 = vmatpush3.bf16.xpose.msra.mxu1 %v4212_v7  ;;  %v12494_v13 = vadd.f32 %v12434_v22, %v3817_v52 }
0x1119   :  { %9680 = vrsqrt.f32 %v3772_v10  ;;  %9253 = vmatprep.subr.msk.bf16.mxu1 %vm629_vm1, %v12420_v36  ;;  %v3819_v29 = vmul.f32 %v12429_v58, %v3797_v17 }
0x111a   :  { %14557 = vst [vmem:[#allocation55_spill] sm:$0xff] %v12482_v34  ;;  %v9669_v43 = vpop.eup %9668  ;;  %v3851_v57 = vpack.c.bf16 %v12482_v34, %v12479_v37  ;;  %v3818_v40 = vmul.f32 %v12429_v58, %v3796_v25  ;;  %14558 = vst [vmem:[#allocation57_spill] sm:$0xff] %v12494_v13 }
0x111b   :  { %v9671_v44 = vpop.eup %9670  ;;  %v3799_v6 = vmul.f32 %v9669_v43, %v12353_v41  ;;  %v12507_v31 = vadd.f32 %v12434_v22, %v3819_v29 }
0x111c   :  { %8809 = vmatprep.mubr.msk.bf16.mxu1 %vm451_vm0, %v3851_v57  ;;  %v12497_v50 = vadd.f32 %v12434_v22, %v3818_v40  ;;  %v3798_v35 = vmul.f32 %v9671_v44, %v12356_v18  ;;  %v7892_v57 = vld [vmem:[#allocation22] ss:$0 sm:$0xff] }
0x111d   :  { %14560 = vst [vmem:[#allocation59_spill] sm:$0xff] %v12507_v31  ;;  %v3821_v18 = vmul.f32 %v12429_v58, %v3799_v6 }
0x111e   :  { %14559 = vst [vmem:[#allocation58_spill] sm:$0xff] %v12497_v50  ;;  %v9673_v30 = vpop.eup %9672  ;;  %v3852_v28 = vpack.c.bf16 %v12497_v50, %v12494_v13  ;;  %v3820_v48 = vmul.f32 %v12429_v58, %v3798_v35 }
0x111f   :  { %v9675_v27 = vpop.eup %9674  ;;  %v3801_v12 = vmul.f32 %v9673_v30, %v12366_v8 }
0x1120   :  { %8810 = vmatmul.mubr.msk.bf16.gmra.mxu1 %vm451_vm0, %v3852_v28  ;;  %v12511_v11 = vadd.f32 %v12434_v22, %v3820_v48  ;;  %v3800_v41 = vmul.f32 %v9675_v27, %v12369_v3  ;;  %v12524_v3 = vadd.f32 %v12434_v22, %v3821_v18 }
0x1121   :  { %8850 = vmatpush3.bf16.xpose.msra.mxu1 %v4209_v42  ;;  %v3823_v39 = vmul.f32 %v12429_v58, %v3801_v12 }
0x1122   :  { %14561 = vst [vmem:[#allocation48_spill] sm:$0xff] %v12511_v11  ;;  %v9677_v26 = vpop.eup %9676  ;;  %v3853_v14 = vpack.c.bf16 %v12511_v11, %v12507_v31  ;;  %v3822_v63 = vmul.f32 %v12429_v58, %v3800_v41  ;;  %9254 = vmatprep.subr.msk.bf16.mxu1 %vm629_vm1, %v12424_v19  ;;  %14562 = vst [vmem:[#allocation52_spill] sm:$0xff] %v12524_v3 }
0x1123   :  { %v9679_v61 = vpop.eup %9678  ;;  %v3803_v56 = vmul.f32 %v9677_v26, %v12378_v20  ;;  %v4206_v20 = vsel %vm629_vm1, %v12424_v19, 0  ;;  %v12540_v32 = vadd.f32 %v12434_v22, %v3823_v39 }
0x1124   :  { %8813 = vmatprep.mubr.msk.bf16.mxu1 %vm451_vm0, %v3853_v14  ;;  %v12527_v8 = vadd.f32 %v12434_v22, %v3822_v63  ;;  %v3802_v62 = vmul.f32 %v9679_v61, %v12381_v15 }
0x1125   :  { %v3825_v54 = vmul.f32 %v12429_v58, %v3803_v56  ;;  %14564 = vst [vmem:[#allocation60_spill] sm:$0xff] %v12540_v32 }
0x1126   :  { %14563 = vst [vmem:[#allocation56_spill] sm:$0xff] %v12527_v8  ;;  %v9681_v55 = vpop.eup %9680  ;;  %v3854_v21 = vpack.c.bf16 %v12527_v8, %v12524_v3  ;;  %v3824_v53 = vmul.f32 %v12429_v58, %v3802_v62 }
0x1127   :  { %v3804_v2 = vmul.f32 %v9681_v55, %v12390_v59  ;;  %v12551_v59 = vadd.f32 %v12434_v22, %v3825_v54 }
0x1128   :  { %8814 = vmatmul.mubr.msk.bf16.gmra.mxu1 %vm451_vm0, %v3854_v21  ;;  %v12543_v15 = vadd.f32 %v12434_v22, %v3824_v53 }
0x1129   :  { %v3826_v47 = vmul.f32 %v12429_v58, %v3804_v2  ;;  %8852 = vmatpush3.bf16.xpose.msra.mxu1 %v4206_v20  ;;  %14566 = vst [vmem:[#allocation62_spill] sm:$0xff] %v12551_v59  ;;  %v4203_v58 = vsel %vm629_vm1, %v12398_v4, 0 }
0x112a   :  { %14565 = vst [vmem:[#allocation61_spill] sm:$0xff] %v12543_v15  ;;  %v3855_v38 = vpack.c.bf16 %v12543_v15, %v12540_v32  ;;  %9255 = vmatprep.subr.msk.bf16.mxu1 %vm629_vm1, %v12398_v4  ;;  %v12695_v15 = vld [vmem:[#allocation8 + $0x68] sm:$0xff] }
0x112b   :  { %v12554_v0 = vadd.f32 %v12434_v22, %v3826_v47 }
0x112c   :  { %8817 = vmatprep.mubr.msk.bf16.mxu1 %vm451_vm0, %v3855_v38 }
0x112d   :  { %14567 = vst [vmem:[#allocation63_spill] sm:$0xff] %v12554_v0  ;;  %v3856_v7 = vpack.c.bf16 %v12554_v0, %v12551_v59 }
0x1130   :  { %8818 = vmatmul.mubr.msk.bf16.gmra.mxu1 %vm451_vm0, %v3856_v7  ;;  %v4495_v22 = vpop.permute.xlu1 %4494 }
0x1131   :  { %8854 = vmatpush3.bf16.xpose.msra.mxu1 %v4203_v58  ;;  %8873 = vmatprep.subr.bf16.mxu0 %v4495_v22 }
0x1132   :  { %9256 = vmatprep.subr.msk.bf16.mxu1 %vm629_vm1, %v12400_v45  ;;  %8874 = vmatpush3.bf16.msra.mxu0 %v4495_v22  ;;  %v4493_v24 = vpop.permute.xlu0 %4492 }
0x1133   :  { %8875 = vmatprep.subr.bf16.mxu0 %v4493_v24 }
0x1134   :  { %v4491_v33 = vpop.permute.xlu1 %4490 }
0x1136   :  { %8876 = vmatpush3.bf16.msra.mxu0 %v4493_v24 }
0x1137   :  { %8877 = vmatprep.subr.bf16.mxu0 %v4491_v33 }
0x1138   :  { %v4489_v10 = vpop.permute.xlu1 %4488 }
0x1139   :  { %8856 = vmatpush3.bf16.xpose.msra.mxu1 %v4200_v1 }
0x113a   :  { %8878 = vmatpush3.bf16.msra.mxu0 %v4491_v33 }
0x113b   :  { %8879 = vmatprep.subr.bf16.mxu0 %v4489_v10 }
0x113c   :  { %v4487_v17 = vpop.permute.xlu1 %4486 }
0x113e   :  { %8880 = vmatpush3.bf16.msra.mxu0 %v4489_v10 }
0x113f   :  { %8881 = vmatprep.subr.bf16.mxu0 %v4487_v17 }
0x1140   :  { %v4485_v25 = vpop.permute.xlu1 %4484 }
0x1142   :  { %8882 = vmatpush3.bf16.msra.mxu0 %v4487_v17 }
0x1143   :  { %8883 = vmatprep.subr.bf16.mxu0 %v4485_v25 }
0x1146   :  { %8884 = vmatpush3.bf16.msra.mxu0 %v4485_v25 }
0x11bf   :  { %v8807_v52 = vpop.f32.mrf.mxu1 }
0x11c0   :  { %v3942_v35 = vadd.f32 %v8807_v52, %v7892_v57 }
0x11c1   :  { %v3933_v43 = vpop.f32.mrf.mxu1 }
0x11c2   :  { %v3934_v44 = vadd.f32 %v7892_v57, %v3933_v43  ;;  %v4145_v27 = vmul.f32 0.35355338, %v3942_v35 }
0x11c3   :  { %v8808_v40 = vpop.f32.mrf.mxu1 }
0x11c4   :  { %v3945_v29 = vadd.f32 %v8808_v40, %v7892_v57  ;;  %v4143_v48 = vmul.f32 0.35355338, %v3934_v44 }
0x11c5   :  { %v3936_v6 = vpop.f32.mrf.mxu1 }
0x11c6   :  { %v3937_v30 = vadd.f32 %v7892_v57, %v3936_v6  ;;  %v4146_v28 = vmul.f32 0.35355338, %v3945_v29 }
0x11c8   :  { %v4144_v42 = vmul.f32 0.35355338, %v3937_v30  ;;  %v12568_v18 = vpack.c.bf16 %v4146_v28, %v4145_v27 }
0x11ca   :  { %v12566_v41 = vpack.c.bf16 %v4144_v42, %v4143_v48 }
0x11cc   :  { %8857 = vmatprep.mubr.msk.bf16.mxu1 %vm629_vm1, %v12566_v41 }
0x11cd   :  { %8858 = vmatmul.mubr.msk.bf16.vlgmr.msra.gmra.mxu1 %vm629_vm1, %v12568_v18 }
0x11e0   :  { %v8811_v12 = vpop.f32.mrf.mxu1 }
0x11e1   :  { %v3958_v56 = vadd.f32 %v8811_v12, %v7892_v57 }
0x11e2   :  { %v3949_v26 = vpop.f32.mrf.mxu1 }
0x11e3   :  { %v3950_v63 = vadd.f32 %v7892_v57, %v3949_v26  ;;  %v4149_v2 = vmul.f32 0.35355338, %v3958_v56  ;;  %v12598_v56 = vld [vmem:[#allocation8 + $0x10] sm:$0xff] }
0x11e4   :  { %v8812_v14 = vpop.f32.mrf.mxu1 }
0x11e5   :  { %v3961_v61 = vadd.f32 %v8812_v14, %v7892_v57  ;;  %v4147_v53 = vmul.f32 0.35355338, %v3950_v63 }
0x11e6   :  { %v3952_v62 = vpop.f32.mrf.mxu1 }
0x11e7   :  { %v3953_v39 = vadd.f32 %v7892_v57, %v3952_v62  ;;  %v4150_v55 = vmul.f32 0.35355338, %v3961_v61 }
0x11e8   :  { %v8815_v21 = vpop.f32.mrf.mxu1 }
0x11e9   :  { %v4148_v20 = vmul.f32 0.35355338, %v3953_v39  ;;  %v12576_v38 = vpack.c.bf16 %v4150_v55, %v4149_v2  ;;  %v3974_v22 = vadd.f32 %v8815_v21, %v7892_v57  ;;  %v12603_v55 = vld [vmem:[#allocation8] sm:$0xff]  ;;  %v12605_v21 = vld [vmem:[#allocation8 + $0x18] sm:$0xff] }
0x11ea   :  { %v3965_v54 = vpop.f32.mrf.mxu1 }
0x11eb   :  { %v12574_v47 = vpack.c.bf16 %v4148_v20, %v4147_v53  ;;  %v3966_v58 = vadd.f32 %v7892_v57, %v3965_v54  ;;  %v4153_v43 = vmul.f32 0.35355338, %v3974_v22 }
0x11ec   :  { %v8816_v7 = vpop.f32.mrf.mxu1 }
0x11ed   :  { %v3977_v1 = vadd.f32 %v8816_v7, %v7892_v57  ;;  %8861 = vmatprep.mubr.msk.bf16.mxu1 %vm629_vm1, %v12574_v47  ;;  %v4151_v25 = vmul.f32 0.35355338, %v3966_v58  ;;  %v12614_v7 = vld [vmem:[#allocation8 + $0x8] sm:$0xff] }
0x11ee   :  { %v3968_v24 = vpop.f32.mrf.mxu1  ;;  %8862 = vmatmul.mubr.msk.bf16.gmra.mxu1 %vm629_vm1, %v12576_v38 }
0x11ef   :  { %v3969_v33 = vadd.f32 %v7892_v57, %v3968_v24  ;;  %v4154_v10 = vmul.f32 0.35355338, %v3977_v1  ;;  %v12624_v24 = vld [vmem:[#allocation8 + $0x38] sm:$0xff] }
0x11f0   :  { %v8819_v17 = vpop.f32.mrf.mxu1 }
0x11f1   :  { %v4152_v52 = vmul.f32 0.35355338, %v3969_v33  ;;  %v12584_v29 = vpack.c.bf16 %v4154_v10, %v4153_v43  ;;  %v3990_v28 = vadd.f32 %v8819_v17, %v7892_v57 }
0x11f2   :  { %v3981_v40 = vpop.f32.mrf.mxu1 }
0x11f3   :  { %v12582_v44 = vpack.c.bf16 %v4152_v52, %v4151_v25  ;;  %v3982_v6 = vadd.f32 %v7892_v57, %v3981_v40  ;;  %v4157_v14 = vmul.f32 0.35355338, %v3990_v28  ;;  %v12629_v25 = vld [vmem:[#allocation8 + $0x28] sm:$0xff] }
0x11f4   :  { %v8820_v35 = vpop.f32.mrf.mxu1 }
0x11f5   :  { %v3993_v30 = vadd.f32 %v8820_v35, %v7892_v57  ;;  %8865 = vmatprep.mubr.msk.bf16.mxu1 %vm629_vm1, %v12582_v44  ;;  %v4155_v12 = vmul.f32 0.35355338, %v3982_v6  ;;  %v12635_v35 = vld [vmem:[#allocation8 + $0x58] sm:$0xff] }
0x11f6   :  { %v3984_v48 = vpop.f32.mrf.mxu1  ;;  %8866 = vmatmul.mubr.msk.bf16.gmra.mxu1 %vm629_vm1, %v12584_v29 }
0x11f7   :  { %v3985_v42 = vadd.f32 %v7892_v57, %v3984_v48  ;;  %v4158_v27 = vmul.f32 0.35355338, %v3993_v30  ;;  %v12641_v48 = vld [vmem:[#allocation8 + $0x48] sm:$0xff] }
0x11f9   :  { %v4156_v26 = vmul.f32 0.35355338, %v3985_v42  ;;  %v12592_v61 = vpack.c.bf16 %v4158_v27, %v4157_v14  ;;  %v12648_v27 = vld [vmem:[#allocation8 + $0x30] sm:$0xff] }
0x11fb   :  { %v12590_v63 = vpack.c.bf16 %v4156_v26, %v4155_v12  ;;  %v12653_v26 = vld [vmem:[#allocation8 + $0x20] sm:$0xff] }
0x11fd   :  { %8869 = vmatprep.mubr.msk.bf16.mxu1 %vm629_vm1, %v12590_v63 }
0x11fe   :  { %8870 = vmatmul.mubr.msk.bf16.gmra.mxu1 %vm629_vm1, %v12592_v61 }
0x128d   :  { %v8859_v62 = vpop.f32.mrf.mxu1 }
0x128e   :  { %v12601_v39 = vadd.f32 %v8859_v62, %v12598_v56  ;;  %v12659_v62 = vld [vmem:[#allocation8 + $0x50] sm:$0xff] }
0x128f   :  { %v4257_v57 = vpop.f32.mrf.mxu1 }
0x1290   :  { %4324 = vmax.xlane.f32.xlu1 %v12601_v39  ;;  %v12609_v20 = vadd.f32 %v4257_v57, %v12603_v55 }
0x1291   :  { %v8860_v53 = vpop.f32.mrf.mxu1 }
0x1292   :  { %v12612_v2 = vadd.f32 %v8860_v53, %v12605_v21  ;;  %v12665_v53 = vld [vmem:[#allocation8 + $0x40] sm:$0xff] }
0x1293   :  { %v4260_v54 = vpop.f32.mrf.mxu1 }
0x1294   :  { %4326 = vmax.xlane.f32.xlu0 %v12612_v2  ;;  %4320 = vmax.xlane.f32.xlu1 %v12609_v20  ;;  %v12619_v58 = vadd.f32 %v4260_v54, %v12614_v7 }
0x1298   :  { %4322 = vmax.xlane.f32.xlu0 %v12619_v58 }
0x12a5   :  { %4482 = vrot.lane.b32.xlu1 %v12398_v4, %s10416_s19 }
0x12ae   :  { %v8863_v1 = vpop.f32.mrf.mxu1 }
0x12af   :  { %v12651_v12 = vadd.f32 %v8863_v1, %v12648_v27  ;;  %v12671_v1 = vld [vmem:[#allocation8 + $0x70] sm:$0xff] }
0x12b0   :  { %v4273_v22 = vpop.f32.mrf.mxu1 }
0x12b1   :  { %v12657_v14 = vadd.f32 %v4273_v22, %v12653_v26 }
0x12b2   :  { %v8864_v33 = vpop.f32.mrf.mxu1 }
0x12b3   :  { %v12627_v10 = vadd.f32 %v8864_v33, %v12624_v24 }
0x12b4   :  { %v4276_v17 = vpop.f32.mrf.mxu1 }
0x12b5   :  { %4334 = vmax.xlane.f32.xlu0 %v12627_v10  ;;  %v12633_v43 = vadd.f32 %v4276_v17, %v12629_v25 }
0x12b6   :  { %v8867_v52 = vpop.f32.mrf.mxu1 }
0x12b7   :  { %v12663_v57 = vadd.f32 %v8867_v52, %v12659_v62  ;;  %v12679_v52 = vld [vmem:[#allocation8 + $0x60] sm:$0xff] }
0x12b8   :  { %v4289_v40 = vpop.f32.mrf.mxu1 }
0x12b9   :  { %4330 = vmax.xlane.f32.xlu0 %v12633_v43  ;;  %v12669_v54 = vadd.f32 %v4289_v40, %v12665_v53  ;;  %v12688_v40 = vld [vmem:[#allocation8 + $0x78] sm:$0xff] }
0x12ba   :  { %v8868_v6 = vpop.f32.mrf.mxu1 }
0x12bb   :  { %v12639_v30 = vadd.f32 %v8868_v6, %v12635_v35 }
0x12bc   :  { %v4292_v28 = vpop.f32.mrf.mxu1 }
0x12bd   :  { %4342 = vmax.xlane.f32.xlu0 %v12639_v30  ;;  %v12645_v42 = vadd.f32 %v4292_v28, %v12641_v48 }
0x12be   :  { %v8871_v33 = vpop.f32.mrf.mxu1 }
0x12bf   :  { %v12675_v22 = vadd.f32 %v8871_v33, %v12671_v1 }
0x12c0   :  { %v4305_v17 = vpop.f32.mrf.mxu1 }
0x12c1   :  { %4338 = vmax.xlane.f32.xlu0 %v12645_v42  ;;  %v12683_v6 = vadd.f32 %v4305_v17, %v12679_v52 }
0x12c2   :  { %v8872_v28 = vpop.f32.mrf.mxu1 }
0x12c3   :  { %v12693_v33 = vadd.f32 %v8872_v28, %v12688_v40 }
0x12c4   :  { %v4308_v0 = vpop.f32.mrf.mxu1 }
0x12c5   :  { %v12701_v17 = vadd.f32 %v4308_v0, %v12695_v15 }
0x12c9   :  { %4332 = vmax.xlane.f32.xlu1 %v12651_v12 }
0x12cd   :  { %4328 = vmax.xlane.f32.xlu1 %v12657_v14 }
0x12d1   :  { %4340 = vmax.xlane.f32.xlu1 %v12663_v57 }
0x12d5   :  { %4336 = vmax.xlane.f32.xlu1 %v12669_v54 }
0x12d7   :  { %4647 = vrot.lane.b32.xlu0 %v12402_v49, %s10418_s17 }
0x12d9   :  { %4348 = vmax.xlane.f32.xlu1 %v12675_v22 }
0x12dd   :  { %4344 = vmax.xlane.f32.xlu1 %v12683_v6 }
0x12ee   :  { %4480 = vrot.lane.b32.xlu1 %v12400_v45, %s10416_s19 }
0x12f2   :  { %4645 = vrot.lane.b32.xlu1 %v12406_v9, %s10418_s17 }
0x12f6   :  { %4350 = vmax.xlane.f32.xlu0 %v12693_v33  ;;  %4643 = vrot.lane.b32.xlu1 %v12410_v60, %s10418_s17 }
0x12fa   :  { %4346 = vmax.xlane.f32.xlu0 %v12701_v17  ;;  %4639 = vrot.lane.b32.xlu1 %v12420_v36, %s10418_s17 }
0x1319   :  { %v4325_v32 = vpop.xlane.xlu1 %4324 }
0x131a   :  { %v4354_v28 = vsub.f32 %v12601_v39, %v4325_v32 }
0x131c   :  { %v4372_v11 = vmul.f32 1.442695, %v4354_v28 }
0x131d   :  { %v4321_v8 = vpop.xlane.xlu1 %4320  ;;  %v4327_v31 = vpop.xlane.xlu0 %4326 }
0x131e   :  { %9682 = vpow2.f32 %v4372_v11  ;;  %v4352_v3 = vsub.f32 %v12609_v20, %v4321_v8  ;;  %v4355_v59 = vsub.f32 %v12612_v2, %v4327_v31 }
0x1320   :  { %v4368_v34 = vmul.f32 1.442695, %v4352_v3  ;;  %v4374_v13 = vmul.f32 1.442695, %v4355_v59 }
0x1321   :  { %v4483_v50 = vpop.permute.xlu1 %4482  ;;  %v4323_v0 = vpop.xlane.xlu0 %4322 }
0x1322   :  { %9684 = vpow2.f32 %v4368_v34  ;;  %v4353_v23 = vsub.f32 %v12619_v58, %v4323_v0  ;;  %8885 = vmatprep.subr.bf16.mxu0 %v4483_v50 }
0x1323   :  { %8886 = vmatpush3.bf16.msra.mxu0 %v4483_v50  ;;  %9686 = vpow2.f32 %v4374_v13 }
0x1324   :  { %v4370_v37 = vmul.f32 1.442695, %v4353_v23 }
0x1326   :  { %9688 = vpow2.f32 %v4370_v37 }
0x132b   :  { %v12710_v32 = vpop.eup %9682 }
0x132c   :  { %4404 = vadd.xlane.f32.xlu0 %v12710_v32 }
0x132f   :  { %v12713_v11 = vpop.eup %9684 }
0x1330   :  { %4400 = vadd.xlane.f32.xlu0 %v12713_v11  ;;  %v12716_v31 = vpop.eup %9686 }
0x1333   :  { %v12719_v34 = vpop.eup %9688 }
0x1334   :  { %4406 = vadd.xlane.f32.xlu0 %v12716_v31 }
0x1338   :  { %4402 = vadd.xlane.f32.xlu0 %v12719_v34 }
0x133e   :  { %v4335_v50 = vpop.xlane.xlu0 %4334 }
0x133f   :  { %v4359_v28 = vsub.f32 %v12627_v10, %v4335_v50 }
0x1342   :  { %v4331_v13 = vpop.xlane.xlu0 %4330 }
0x1343   :  { %v4357_v23 = vsub.f32 %v12633_v43, %v4331_v13 }
0x1345   :  { %v4378_v37 = vmul.f32 1.442695, %v4357_v23  ;;  %v4382_v23 = vmul.f32 1.442695, %v4359_v28 }
0x1346   :  { %v4343_v13 = vpop.xlane.xlu0 %4342 }
0x1347   :  { %9690 = vpow2.f32 %v4378_v37 }
0x134e   :  { %4641 = vrot.lane.b32.xlu0 %v12416_v51, %s10418_s17 }
0x1352   :  { %v4333_v3 = vpop.xlane.xlu1 %4332 }
0x1353   :  { %v4358_v39 = vsub.f32 %v12651_v12, %v4333_v3  ;;  %v4339_v12 = vpop.xlane.xlu0 %4338 }
0x1354   :  { %v12725_v8 = vpop.eup %9690 }
0x1355   :  { %4410 = vadd.xlane.f32.xlu1 %v12725_v8  ;;  %v4380_v2 = vmul.f32 1.442695, %v4358_v39 }
0x1356   :  { %v4329_v59 = vpop.xlane.xlu1 %4328 }
0x1357   :  { %v4356_v58 = vsub.f32 %v12657_v14, %v4329_v59  ;;  %9692 = vpow2.f32 %v4380_v2  ;;  %v4363_v2 = vsub.f32 %v12639_v30, %v4343_v13 }
0x1359   :  { %v4376_v0 = vmul.f32 1.442695, %v4356_v58 }
0x135a   :  { %v4341_v20 = vpop.xlane.xlu1 %4340 }
0x135b   :  { %v4362_v37 = vsub.f32 %v12663_v57, %v4341_v20  ;;  %9694 = vpow2.f32 %v4376_v0 }
0x135c   :  { %9696 = vpow2.f32 %v4382_v23 }
0x135d   :  { %v4388_v3 = vmul.f32 1.442695, %v4362_v37 }
0x135e   :  { %v4337_v43 = vpop.xlane.xlu1 %4336 }
0x135f   :  { %v4360_v14 = vsub.f32 %v12669_v54, %v4337_v43 }
0x1361   :  { %v4384_v57 = vmul.f32 1.442695, %v4360_v14 }
0x1362   :  { %v4349_v46 = vpop.xlane.xlu1 %4348 }
0x1363   :  { %v4366_v16 = vsub.f32 %v12675_v22, %v4349_v46  ;;  %v4361_v46 = vsub.f32 %v12645_v42, %v4339_v12 }
0x1364   :  { %v12736_v20 = vpop.eup %9692 }
0x1365   :  { %v4396_v5 = vmul.f32 1.442695, %v4366_v16  ;;  %v12738_v16 = vpop.permute.xlu0 %4647  ;;  %v4386_v22 = vmul.f32 1.442695, %v4361_v46 }
0x1366   :  { %v4345_v39 = vpop.xlane.xlu1 %4344 }
0x1367   :  { %9698 = vpow2.f32 %v4396_v5  ;;  %v4364_v10 = vsub.f32 %v12683_v6, %v4345_v39  ;;  %v4390_v5 = vmul.f32 1.442695, %v4363_v2 }
0x1368   :  { %9700 = vpow2.f32 %v4388_v3  ;;  %v12744_v54 = vpop.eup %9694 }
0x1369   :  { %v4392_v50 = vmul.f32 1.442695, %v4364_v10  ;;  %v12747_v30 = vpop.eup %9696 }
0x136a   :  { %v4481_v59 = vpop.permute.xlu1 %4480 }
0x136b   :  { %9702 = vpow2.f32 %v4392_v50  ;;  %8887 = vmatprep.subr.bf16.mxu0 %v4481_v59 }
0x136c   :  { %8888 = vmatpush3.bf16.msra.mxu0 %v4481_v59  ;;  %9704 = vpow2.f32 %v4384_v57 }
0x136d   :  { %4412 = vadd.xlane.f32.xlu0 %v12736_v20  ;;  %9257 = vmatprep.subr.msk.bf16.mxu0 %vm629_vm1, %v12738_v16  ;;  %9706 = vpow2.f32 %v4390_v5 }
0x136e   :  { %9708 = vpow2.f32 %v4386_v22 }
0x1371   :  { %4408 = vadd.xlane.f32.xlu0 %v12744_v54 }
0x1374   :  { %v12749_v6 = vpop.eup %9698 }
0x1375   :  { %4414 = vadd.xlane.f32.xlu0 %v12747_v30  ;;  %4428 = vadd.xlane.f32.xlu1 %v12749_v6  ;;  %v12753_v58 = vpop.eup %9700 }
0x1378   :  { %v12755_v28 = vpop.eup %9702 }
0x1379   :  { %4420 = vadd.xlane.f32.xlu0 %v12753_v58  ;;  %4424 = vadd.xlane.f32.xlu1 %v12755_v28  ;;  %v12759_v42 = vpop.eup %9704 }
0x137a   :  { %v12762_v0 = vpop.eup %9706 }
0x137b   :  { %v12766_v12 = vpop.eup %9708 }
0x137d   :  { %4416 = vadd.xlane.f32.xlu0 %v12759_v42 }
0x137f   :  { %v4351_v43 = vpop.xlane.xlu0 %4350 }
0x1380   :  { %v4367_v13 = vsub.f32 %v12693_v33, %v4351_v43 }
0x1381   :  { %4422 = vadd.xlane.f32.xlu0 %v12762_v0 }
0x1382   :  { %v4398_v23 = vmul.f32 1.442695, %v4367_v13 }
0x1383   :  { %v4347_v37 = vpop.xlane.xlu0 %4346 }
0x1384   :  { %9710 = vpow2.f32 %v4398_v23  ;;  %v4365_v3 = vsub.f32 %v12701_v17, %v4347_v37 }
0x1385   :  { %4418 = vadd.xlane.f32.xlu0 %v12766_v12 }
0x1386   :  { %v4394_v39 = vmul.f32 1.442695, %v4365_v3 }
0x1388   :  { %9712 = vpow2.f32 %v4394_v39  ;;  %v4695_v39 = vsel %vm629_vm1, %v12738_v16, 0 }
0x1391   :  { %v12770_v14 = vpop.eup %9710 }
0x1392   :  { %4430 = vadd.xlane.f32.xlu1 %v12770_v14 }
0x1395   :  { %v12773_v10 = vpop.eup %9712 }
0x1396   :  { %4426 = vadd.xlane.f32.xlu0 %v12773_v10 }
0x13a3   :  { %4635 = vrot.lane.b32.xlu1 %v12398_v4, %s10418_s17 }
0x13a7   :  { %4633 = vrot.lane.b32.xlu1 %v12400_v45, %s10418_s17 }
0x13ab   :  { %4617 = vrot.lane.b32.xlu1 %v12566_v41, %s10418_s17 }
0x13ac   :  { %4637 = vrot.lane.b32.xlu0 %v12424_v19, %s10418_s17 }
0x13af   :  { %4619 = vrot.lane.b32.xlu1 %v12568_v18, %s10418_s17 }
0x13b0   :  { %4621 = vrot.lane.b32.xlu0 %v12574_v47, %s10418_s17 }
0x13b3   :  { %4623 = vrot.lane.b32.xlu1 %v12576_v38, %s10418_s17 }
0x13b4   :  { %4625 = vrot.lane.b32.xlu0 %v12582_v44, %s10418_s17 }
0x13b5   :  { %v4405_v33 = vpop.xlane.xlu0 %4404 }
0x13b7   :  { %4627 = vrot.lane.b32.xlu1 %v12584_v29, %s10418_s17 }
0x13b8   :  { %4629 = vrot.lane.b32.xlu0 %v12590_v63, %s10418_s17 }
0x13b9   :  { %v4401_v17 = vpop.xlane.xlu0 %4400 }
0x13bb   :  { %4631 = vrot.lane.b32.xlu1 %v12592_v61, %s10418_s17 }
0x13bd   :  { %v4407_v50 = vpop.xlane.xlu0 %4406 }
0x13be   :  { %9714 = vrcp.f32 %v4407_v50 }
0x13bf   :  { %9716 = vrcp.f32 %v4401_v17 }
0x13c0   :  { %9718 = vrcp.f32 %v4405_v33  ;;  %v4646_v33 = vpop.permute.xlu1 %4645 }
0x13c1   :  { %v4403_v59 = vpop.xlane.xlu0 %4402  ;;  %v4692_v17 = vsel %vm629_vm1, %v4646_v33, 0 }
0x13c2   :  { %9720 = vrcp.f32 %v4403_v59 }
0x13cb   :  { %v9715_v2 = vpop.eup %9714 }
0x13cc   :  { %v9717_v57 = vpop.eup %9716  ;;  %v4451_v22 = vmul.f32 %v9715_v2, %v12716_v31  ;;  %v4644_v31 = vpop.permute.xlu1 %4643 }
0x13cd   :  { %v9719_v5 = vpop.eup %9718  ;;  %v4448_v43 = vmul.f32 %v9717_v57, %v12713_v11  ;;  %v4689_v11 = vsel %vm629_vm1, %v4644_v31, 0 }
0x13ce   :  { %v4450_v23 = vmul.f32 %v9719_v5, %v12710_v32  ;;  %v4642_v32 = vpop.permute.xlu0 %4641 }
0x13cf   :  { %v9721_v46 = vpop.eup %9720 }
0x13d0   :  { %v4449_v13 = vmul.f32 %v9721_v46, %v12719_v34  ;;  %v4465_v3 = vpack.c.bf16 %v4451_v22, %v4450_v23  ;;  %v4686_v34 = vsel %vm629_vm1, %v4642_v32, 0  ;;  %v4640_v50 = vpop.permute.xlu1 %4639 }
0x13d1   :  { %v4683_v16 = vsel %vm629_vm1, %v4640_v50, 0 }
0x13d2   :  { %v4464_v37 = vpack.c.bf16 %v4449_v13, %v4448_v43 }
0x13d4   :  { %8889 = vmatprep.mubr.bf16.mxu0 %v4464_v37 }
0x13d5   :  { %8890 = vmatmul.mubr.bf16.vlgmr.msra.gmra.mxu0 %v4465_v3 }
0x13d6   :  { %8906 = vmatpush3.bf16.xpose.msra.mxu0 %v4695_v39 }
0x13d7   :  { %9258 = vmatprep.subr.msk.bf16.mxu0 %vm629_vm1, %v4646_v33 }
0x13de   :  { %8908 = vmatpush3.bf16.xpose.msra.mxu0 %v4692_v17  ;;  %v4411_v59 = vpop.xlane.xlu1 %4410 }
0x13df   :  { %9259 = vmatprep.subr.msk.bf16.mxu0 %vm629_vm1, %v4644_v31  ;;  %9722 = vrcp.f32 %v4411_v59 }
0x13e6   :  { %8910 = vmatpush3.bf16.xpose.msra.mxu0 %v4689_v11 }
0x13e7   :  { %9260 = vmatprep.subr.msk.bf16.mxu0 %vm629_vm1, %v4642_v32 }
0x13ec   :  { %v9723_v22 = vpop.eup %9722 }
0x13ed   :  { %v4453_v37 = vmul.f32 %v9723_v22, %v12725_v8 }
0x13ee   :  { %8912 = vmatpush3.bf16.xpose.msra.mxu0 %v4686_v34 }
0x13ef   :  { %9261 = vmatprep.subr.msk.bf16.mxu0 %vm629_vm1, %v4640_v50 }
0x13f6   :  { %8914 = vmatpush3.bf16.xpose.msra.mxu0 %v4683_v16  ;;  %v4413_v2 = vpop.xlane.xlu0 %4412 }
0x13fa   :  { %v4409_v57 = vpop.xlane.xlu0 %4408 }
0x13fb   :  { %9724 = vrcp.f32 %v4409_v57 }
0x13fc   :  { %9726 = vrcp.f32 %v4413_v2 }
0x13fe   :  { %v4415_v5 = vpop.xlane.xlu0 %4414  ;;  %v4429_v50 = vpop.xlane.xlu1 %4428 }
0x13ff   :  { %9728 = vrcp.f32 %v4415_v5 }
0x1402   :  { %v4421_v46 = vpop.xlane.xlu0 %4420 }
0x1406   :  { %v4417_v43 = vpop.xlane.xlu0 %4416 }
0x1408   :  { %v9725_v13 = vpop.eup %9724 }
0x1409   :  { %v4452_v23 = vmul.f32 %v9725_v13, %v12744_v54  ;;  %v9727_v39 = vpop.eup %9726  ;;  %v4425_v54 = vpop.xlane.xlu1 %4424 }
0x140a   :  { %v4423_v3 = vpop.xlane.xlu0 %4422  ;;  %v4454_v11 = vmul.f32 %v9727_v39, %v12736_v20 }
0x140b   :  { %v4466_v33 = vpack.c.bf16 %v4453_v37, %v4452_v23  ;;  %9730 = vrcp.f32 %v4423_v3 }
0x140c   :  { %v9729_v17 = vpop.eup %9728  ;;  %9732 = vrcp.f32 %v4417_v43 }
0x140d   :  { %8893 = vmatprep.mubr.bf16.mxu0 %v4466_v33  ;;  %9734 = vrcp.f32 %v4421_v46  ;;  %v4455_v32 = vmul.f32 %v9729_v17, %v12747_v30 }
0x140e   :  { %v4419_v31 = vpop.xlane.xlu0 %4418 }
0x140f   :  { %9736 = vrcp.f32 %v4419_v31  ;;  %v4467_v34 = vpack.c.bf16 %v4455_v32, %v4454_v11 }
0x1411   :  { %8894 = vmatmul.mubr.bf16.gmra.mxu0 %v4467_v34 }
0x1418   :  { %v9731_v16 = vpop.eup %9730 }
0x1419   :  { %v9733_v8 = vpop.eup %9732  ;;  %v4459_v5 = vmul.f32 %v9731_v16, %v12762_v0  ;;  %v338_v16 = vld [vmem:[%s14568_s10] sm:$0xf] }
0x141a   :  { %v9735_v59 = vpop.eup %9734  ;;  %v4456_v46 = vmul.f32 %v9733_v8, %v12759_v42 }
0x141b   :  { %v4431_v2 = vpop.xlane.xlu1 %4430  ;;  %v4458_v20 = vmul.f32 %v9735_v59, %v12753_v58 }
0x141c   :  { %v9737_v57 = vpop.eup %9736  ;;  %9738 = vrcp.f32 %v4431_v2 }
0x141d   :  { %v4457_v22 = vmul.f32 %v9737_v57, %v12766_v12  ;;  %9740 = vrcp.f32 %v4425_v54  ;;  %v4469_v13 = vpack.c.bf16 %v4459_v5, %v4458_v20 }
0x141e   :  { %9742 = vrcp.f32 %v4429_v50 }
0x141f   :  { %v4427_v30 = vpop.xlane.xlu0 %4426  ;;  %v4468_v43 = vpack.c.bf16 %v4457_v22, %v4456_v46  ;;  %v4636_v37 = vpop.permute.xlu1 %4635 }
0x1420   :  { %9744 = vrcp.f32 %v4427_v30  ;;  %v4677_v3 = vsel %vm629_vm1, %v4636_v37, 0 }
0x1421   :  { %8897 = vmatprep.mubr.bf16.mxu0 %v4468_v43 }
0x1422   :  { %8898 = vmatmul.mubr.bf16.gmra.mxu0 %v4469_v13 }
0x1423   :  { %v4638_v23 = vpop.permute.xlu0 %4637  ;;  %v4634_v33 = vpop.permute.xlu1 %4633 }
0x1424   :  { %9262 = vmatprep.subr.msk.bf16.mxu0 %vm629_vm1, %v4638_v23  ;;  %v4680_v0 = vsel %vm629_vm1, %v4638_v23, 0  ;;  %v4674_v8 = vsel %vm629_vm1, %v4634_v33, 0 }
0x1425   :  { %8916 = vmatpush3.bf16.xpose.msra.mxu0 %v4680_v0 }
0x1426   :  { %9263 = vmatprep.subr.msk.bf16.mxu0 %vm629_vm1, %v4636_v37 }
0x1427   :  { %v4618_v54 = vpop.permute.xlu1 %4617  ;;  %v4622_v59 = vpop.permute.xlu0 %4621 }
0x1429   :  { %v9739_v42 = vpop.eup %9738 }
0x142a   :  { %v9741_v12 = vpop.eup %9740  ;;  %v4463_v17 = vmul.f32 %v9739_v42, %v12770_v14  ;;  %v5224_v14 = vsel %vm1546_vm2, %v338_v16, 0 }
0x142b   :  { %v9743_v58 = vpop.eup %9742  ;;  %v4460_v31 = vmul.f32 %v9741_v12, %v12755_v28  ;;  %v4620_v28 = vpop.permute.xlu1 %4619 }
0x142c   :  { %v4462_v32 = vmul.f32 %v9743_v58, %v12749_v6 }
0x142d   :  { %v9745_v39 = vpop.eup %9744  ;;  %8918 = vmatpush3.bf16.xpose.msra.mxu0 %v4677_v3 }
0x142e   :  { %9264 = vmatprep.subr.msk.bf16.mxu0 %vm629_vm1, %v4634_v33  ;;  %v4461_v11 = vmul.f32 %v9745_v39, %v12773_v10  ;;  %v4471_v50 = vpack.c.bf16 %v4463_v17, %v4462_v32  ;;  %v4626_v10 = vpop.permute.xlu0 %4625 }
0x142f   :  { %v4624_v6 = vpop.permute.xlu1 %4623 }
0x1430   :  { %v4470_v34 = vpack.c.bf16 %v4461_v11, %v4460_v31 }
0x1432   :  { %8901 = vmatprep.mubr.bf16.mxu0 %v4470_v34  ;;  %v4630_v57 = vpop.permute.xlu0 %4629 }
0x1433   :  { %8902 = vmatmul.mubr.bf16.gmra.mxu0 %v4471_v50  ;;  %v4628_v2 = vpop.permute.xlu1 %4627 }
0x1434   :  { %8921 = vmatprep.mubr.msk.bf16.mxu0 %vm629_vm1, %v4618_v54 }
0x1435   :  { %8920 = vmatpush3.bf16.xpose.msra.mxu0 %v4674_v8 }
0x1436   :  { %9266 = vmatprep.subr.msk.bf16.mxu0 %vm1546_vm2, %v338_v16 }
0x1437   :  { %v4632_v5 = vpop.permute.xlu1 %4631 }
0x143c   :  { %8922 = vmatmul.mubr.msk.bf16.vlgmr.msra.gmra.mxu0 %vm629_vm1, %v4620_v28 }
0x143d   :  { %8925 = vmatprep.mubr.msk.bf16.mxu0 %vm629_vm1, %v4622_v59  ;;  %8988 = vmatpush3.bf16.msra.mxu0 %v5224_v14 }
0x1444   :  { %8926 = vmatmul.mubr.msk.bf16.gmra.mxu0 %vm629_vm1, %v4624_v6 }
0x1445   :  { %8929 = vmatprep.mubr.msk.bf16.mxu0 %vm629_vm1, %v4626_v10 }
0x144c   :  { %8930 = vmatmul.mubr.msk.bf16.gmra.mxu0 %vm629_vm1, %v4628_v2 }
0x144d   :  { %8933 = vmatprep.mubr.msk.bf16.mxu0 %vm629_vm1, %v4630_v57 }
0x1454   :  { %8934 = vmatmul.mubr.msk.bf16.gmra.mxu0 %vm629_vm1, %v4632_v5 }
0x1495   :  { %v8891_v46 = vpop.f32.mrf.mxu0 }
0x1497   :  { %v4538_v22 = vpop.f32.mrf.mxu0 }
0x1499   :  { %v8892_v20 = vpop.f32.mrf.mxu0 }
0x149a   :  { %v4602_v13 = vpack.c.bf16 %v8892_v20, %v8891_v46 }
0x149b   :  { %v4541_v30 = vpop.f32.mrf.mxu0 }
0x149c   :  { %v4601_v43 = vpack.c.bf16 %v4541_v30, %v4538_v22 }
0x149e   :  { %8989 = vmatprep.mubr.msk.bf16.mxu0 %vm629_vm1, %v4601_v43 }
0x149f   :  { %8990 = vmatmul.mubr.msk.bf16.vlgmr.msra.gmra.mxu0 %vm629_vm1, %v4602_v13 }
0x14d1   :  { %v8895_v23 = vpop.f32.mrf.mxu0 }
0x14d3   :  { %v4554_v0 = vpop.f32.mrf.mxu0 }
0x14d5   :  { %v8896_v37 = vpop.f32.mrf.mxu0 }
0x14d6   :  { %v4604_v58 = vpack.c.bf16 %v8896_v37, %v8895_v23 }
0x14d7   :  { %v4557_v42 = vpop.f32.mrf.mxu0 }
0x14d8   :  { %v4603_v12 = vpack.c.bf16 %v4557_v42, %v4554_v0 }
0x14da   :  { %8993 = vmatprep.mubr.msk.bf16.mxu0 %vm629_vm1, %v4603_v12 }
0x14db   :  { %8994 = vmatmul.mubr.msk.bf16.gmra.mxu0 %vm629_vm1, %v4604_v58 }
0x14e2   :  { %v8899_v3 = vpop.f32.mrf.mxu0 }
0x14e4   :  { %v4570_v39 = vpop.f32.mrf.mxu0 }
0x14e6   :  { %v8900_v33 = vpop.f32.mrf.mxu0 }
0x14e7   :  { %v4606_v11 = vpack.c.bf16 %v8900_v33, %v8899_v3 }
0x14e8   :  { %v4573_v17 = vpop.f32.mrf.mxu0 }
0x14e9   :  { %v4605_v31 = vpack.c.bf16 %v4573_v17, %v4570_v39 }
0x14eb   :  { %8997 = vmatprep.mubr.msk.bf16.mxu0 %vm629_vm1, %v4605_v31 }
0x14ec   :  { %8998 = vmatmul.mubr.msk.bf16.gmra.mxu0 %vm629_vm1, %v4606_v11 }
0x14f3   :  { %v8903_v32 = vpop.f32.mrf.mxu0 }
0x14f5   :  { %v4586_v34 = vpop.f32.mrf.mxu0 }
0x14f7   :  { %v8904_v50 = vpop.f32.mrf.mxu0 }
0x14f8   :  { %v4608_v8 = vpack.c.bf16 %v8904_v50, %v8903_v32 }
0x14f9   :  { %v4589_v54 = vpop.f32.mrf.mxu0 }
0x14fa   :  { %v4607_v16 = vpack.c.bf16 %v4589_v54, %v4586_v34 }
0x14fc   :  { %v8923_v14 = vpop.f32.mrf.mxu0  ;;  %9001 = vmatprep.mubr.msk.bf16.mxu0 %vm629_vm1, %v4607_v16 }
0x14fd   :  { %v4740_v28 = vadd.f32 %v8923_v14, %v12598_v56  ;;  %9002 = vmatmul.mubr.msk.bf16.gmra.mxu0 %vm629_vm1, %v4608_v8 }
0x14fe   :  { %v4731_v59 = vpop.f32.mrf.mxu0 }
0x14ff   :  { %4798 = vmax.xlane.f32.xlu0 %v4740_v28  ;;  %v4732_v10 = vadd.f32 %v4731_v59, %v12603_v55 }
0x1500   :  { %v8924_v6 = vpop.f32.mrf.mxu0 }
0x1501   :  { %v4743_v46 = vadd.f32 %v8924_v6, %v12605_v21 }
0x1502   :  { %v4734_v2 = vpop.f32.mrf.mxu0 }
0x1503   :  { %v12852_v57 = vadd.f32 %v4734_v2, %v12614_v7  ;;  %4794 = vmax.xlane.f32.xlu0 %v4732_v10 }
0x1504   :  { %v8927_v5 = vpop.f32.mrf.mxu0 }
0x1505   :  { %4796 = vmax.xlane.f32.xlu1 %v12852_v57 }
0x1506   :  { %v4747_v22 = vpop.f32.mrf.mxu0 }
0x1507   :  { %4800 = vmax.xlane.f32.xlu0 %v4743_v46  ;;  %v4748_v58 = vadd.f32 %v4747_v22, %v12653_v26 }
0x1508   :  { %v8928_v56 = vpop.f32.mrf.mxu0 }
0x1509   :  { %v12857_v20 = vadd.f32 %v8928_v56, %v12624_v24 }
0x150a   :  { %v4750_v30 = vpop.f32.mrf.mxu0 }
0x150b   :  { %4808 = vmax.xlane.f32.xlu0 %v12857_v20  ;;  %v4751_v43 = vadd.f32 %v4750_v30, %v12629_v25 }
0x150c   :  { %v8931_v55 = vpop.f32.mrf.mxu0 }
0x150d   :  { %v12882_v3 = vadd.f32 %v8931_v55, %v12659_v62 }
0x150e   :  { %v4763_v7 = vpop.f32.mrf.mxu0 }
0x150f   :  { %4804 = vmax.xlane.f32.xlu0 %v4751_v43 }
0x1510   :  { %v8932_v13 = vpop.f32.mrf.mxu0 }
0x1511   :  { %v12862_v23 = vadd.f32 %v8932_v13, %v12635_v35 }
0x1512   :  { %v4766_v21 = vpop.f32.mrf.mxu0 }
0x1513   :  { %4816 = vmax.xlane.f32.xlu0 %v12862_v23  ;;  %v12866_v37 = vadd.f32 %v4766_v21, %v12641_v48  ;;  %v4756_v48 = vadd.f32 %v8927_v5, %v12648_v27 }
0x1514   :  { %v8935_v0 = vpop.f32.mrf.mxu0 }
0x1516   :  { %4960 = vrot.lane.b32.xlu1 %v12402_v49, %s10417_s16  ;;  %v4779_v24 = vpop.f32.mrf.mxu0 }
0x1517   :  { %4812 = vmax.xlane.f32.xlu0 %v12866_v37  ;;  %v12894_v27 = vadd.f32 %v4779_v24, %v12679_v52 }
0x1518   :  { %v8936_v25 = vpop.f32.mrf.mxu0 }
0x1519   :  { %v12872_v42 = vadd.f32 %v8936_v25, %v12688_v40  ;;  %v12886_v40 = vadd.f32 %v4763_v7, %v12665_v53 }
0x151a   :  { %v4782_v12 = vpop.f32.mrf.mxu0 }
0x151b   :  { %4824 = vmax.xlane.f32.xlu0 %v12872_v42  ;;  %v12876_v35 = vadd.f32 %v4782_v12, %v12695_v15  ;;  %v12890_v15 = vadd.f32 %v8935_v0, %v12671_v1 }
0x151f   :  { %4820 = vmax.xlane.f32.xlu0 %v12876_v35 }
0x153a   :  { %4806 = vmax.xlane.f32.xlu1 %v4756_v48 }
0x153e   :  { %4802 = vmax.xlane.f32.xlu1 %v4748_v58 }
0x1542   :  { %4814 = vmax.xlane.f32.xlu1 %v12882_v3 }
0x1546   :  { %4810 = vmax.xlane.f32.xlu1 %v12886_v40 }
0x154a   :  { %4822 = vmax.xlane.f32.xlu1 %v12890_v15 }
0x154e   :  { %4818 = vmax.xlane.f32.xlu1 %v12894_v27 }
0x155f   :  { %4956 = vrot.lane.b32.xlu1 %v12410_v60, %s10417_s16 }
0x1563   :  { %4954 = vrot.lane.b32.xlu1 %v12416_v51, %s10417_s16 }
0x1567   :  { %4952 = vrot.lane.b32.xlu1 %v12420_v36, %s10417_s16 }
0x156b   :  { %4950 = vrot.lane.b32.xlu1 %v12424_v19, %s10417_s16 }
0x156f   :  { %4948 = vrot.lane.b32.xlu1 %v12398_v4, %s10417_s16 }
0x1573   :  { %4946 = vrot.lane.b32.xlu1 %v12400_v45, %s10417_s16 }
0x1588   :  { %v4799_v26 = vpop.xlane.xlu0 %4798 }
0x1589   :  { %v4828_v62 = vsub.f32 %v4740_v28, %v4799_v26 }
0x158b   :  { %v4846_v53 = vmul.f32 1.442695, %v4828_v62 }
0x158c   :  { %v4795_v1 = vpop.xlane.xlu0 %4794 }
0x158d   :  { %9746 = vpow2.f32 %v4846_v53  ;;  %v4826_v52 = vsub.f32 %v4732_v10, %v4795_v1 }
0x158e   :  { %v4797_v39 = vpop.xlane.xlu1 %4796 }
0x158f   :  { %v4842_v33 = vmul.f32 1.442695, %v4826_v52  ;;  %v4827_v31 = vsub.f32 %v12852_v57, %v4797_v39 }
0x1590   :  { %v4801_v17 = vpop.xlane.xlu0 %4800 }
0x1591   :  { %9748 = vpow2.f32 %v4842_v33  ;;  %v4829_v11 = vsub.f32 %v4743_v46, %v4801_v17  ;;  %v4844_v54 = vmul.f32 1.442695, %v4827_v31 }
0x1592   :  { %v4961_v32 = vpop.permute.xlu1 %4960 }
0x1593   :  { %v4848_v34 = vmul.f32 1.442695, %v4829_v11  ;;  %8937 = vmatprep.subr.bf16.mxu1 %v4961_v32 }
0x1594   :  { %8938 = vmatpush3.bf16.msra.mxu1 %v4961_v32  ;;  %v4809_v50 = vpop.xlane.xlu0 %4808 }
0x1595   :  { %9750 = vpow2.f32 %v4848_v34  ;;  %v4833_v7 = vsub.f32 %v12857_v20, %v4809_v50 }
0x1596   :  { %9752 = vpow2.f32 %v4844_v54 }
0x1597   :  { %v4856_v12 = vmul.f32 1.442695, %v4833_v7 }
0x1598   :  { %v4805_v16 = vpop.xlane.xlu0 %4804 }
0x1599   :  { %v4831_v8 = vsub.f32 %v4751_v43, %v4805_v16 }
0x159a   :  { %v12910_v14 = vpop.eup %9746 }
0x159b   :  { %v4852_v28 = vmul.f32 1.442695, %v4831_v8  ;;  %4878 = vadd.xlane.f32.xlu0 %v12910_v14 }
0x159c   :  { %v4817_v5 = vpop.xlane.xlu0 %4816 }
0x159d   :  { %9754 = vpow2.f32 %v4852_v28  ;;  %v4837_v53 = vsub.f32 %v12862_v23, %v4817_v5 }
0x159e   :  { %v12913_v59 = vpop.eup %9748 }
0x159f   :  { %4874 = vadd.xlane.f32.xlu0 %v12913_v59  ;;  %v4864_v39 = vmul.f32 1.442695, %v4837_v53 }
0x15a0   :  { %v4813_v55 = vpop.xlane.xlu0 %4812 }
0x15a1   :  { %v4835_v26 = vsub.f32 %v12866_v37, %v4813_v55 }
0x15a2   :  { %v12916_v6 = vpop.eup %9750 }
0x15a3   :  { %4880 = vadd.xlane.f32.xlu0 %v12916_v6  ;;  %v12919_v10 = vpop.eup %9752  ;;  %v4860_v20 = vmul.f32 1.442695, %v4835_v26 }
0x15a4   :  { %v4825_v25 = vpop.xlane.xlu0 %4824 }
0x15a5   :  { %v4841_v23 = vsub.f32 %v12872_v42, %v4825_v25 }
0x15a7   :  { %4876 = vadd.xlane.f32.xlu0 %v12919_v10 }
0x15a8   :  { %v4821_v1 = vpop.xlane.xlu0 %4820 }
0x15a9   :  { %v4839_v37 = vsub.f32 %v12876_v35, %v4821_v1 }
0x15aa   :  { %v12922_v2 = vpop.eup %9754 }
0x15ab   :  { %4884 = vadd.xlane.f32.xlu1 %v12922_v2  ;;  %v4868_v11 = vmul.f32 1.442695, %v4839_v37 }
0x15bd   :  { %4958 = vrot.lane.b32.xlu0 %v12406_v9, %s10417_s16 }
0x15c3   :  { %v4807_v57 = vpop.xlane.xlu1 %4806 }
0x15c4   :  { %v4832_v56 = vsub.f32 %v4756_v48, %v4807_v57 }
0x15c6   :  { %v4854_v13 = vmul.f32 1.442695, %v4832_v56 }
0x15c7   :  { %v4803_v46 = vpop.xlane.xlu1 %4802 }
0x15c8   :  { %v4830_v22 = vsub.f32 %v4748_v58, %v4803_v46 }
0x15ca   :  { %v4850_v30 = vmul.f32 1.442695, %v4830_v22 }
0x15cb   :  { %v4815_v43 = vpop.xlane.xlu1 %4814 }
0x15cc   :  { %9756 = vpow2.f32 %v4850_v30  ;;  %v4836_v0 = vsub.f32 %v12882_v3, %v4815_v43 }
0x15cd   :  { %9758 = vpow2.f32 %v4854_v13 }
0x15ce   :  { %v4862_v48 = vmul.f32 1.442695, %v4836_v0 }
0x15cf   :  { %v4811_v21 = vpop.xlane.xlu1 %4810 }
0x15d0   :  { %v4834_v24 = vsub.f32 %v12886_v40, %v4811_v21 }
0x15d2   :  { %v4858_v62 = vmul.f32 1.442695, %v4834_v24 }
0x15d3   :  { %v4823_v58 = vpop.xlane.xlu1 %4822 }
0x15d4   :  { %9760 = vpow2.f32 %v4858_v62  ;;  %v4840_v3 = vsub.f32 %v12890_v15, %v4823_v58 }
0x15d5   :  { %9762 = vpow2.f32 %v4856_v12 }
0x15d6   :  { %9764 = vpow2.f32 %v4862_v48  ;;  %v4870_v31 = vmul.f32 1.442695, %v4840_v3 }
0x15d7   :  { %v4819_v52 = vpop.xlane.xlu1 %4818  ;;  %9766 = vpow2.f32 %v4860_v20 }
0x15d8   :  { %v4838_v40 = vsub.f32 %v12894_v27, %v4819_v52  ;;  %v4872_v27 = vmul.f32 1.442695, %v4841_v23 }
0x15d9   :  { %v12935_v17 = vpop.eup %9756 }
0x15da   :  { %v4866_v33 = vmul.f32 1.442695, %v4838_v40  ;;  %v12939_v32 = vpop.eup %9758 }
0x15db   :  { %v4957_v46 = vpop.permute.xlu1 %4956 }
0x15dc   :  { %9768 = vpow2.f32 %v4866_v33  ;;  %4882 = vadd.xlane.f32.xlu0 %v12935_v17 }
0x15dd   :  { %9770 = vpow2.f32 %v4864_v39 }
0x15de   :  { %9772 = vpow2.f32 %v4870_v31 }
0x15df   :  { %9774 = vpow2.f32 %v4868_v11  ;;  %v4955_v30 = vpop.permute.xlu1 %4954 }
0x15e0   :  { %4886 = vadd.xlane.f32.xlu0 %v12939_v32  ;;  %9776 = vpow2.f32 %v4872_v27 }
0x15e1   :  { %v12942_v15 = vpop.eup %9760 }
0x15e2   :  { %4890 = vadd.xlane.f32.xlu1 %v12942_v15  ;;  %v12945_v35 = vpop.eup %9762 }
0x15e3   :  { %v12948_v34 = vpop.eup %9764  ;;  %v4953_v43 = vpop.permute.xlu1 %4952 }
0x15e4   :  { %4888 = vadd.xlane.f32.xlu0 %v12945_v35  ;;  %v12951_v42 = vpop.eup %9766 }
0x15e6   :  { %4894 = vadd.xlane.f32.xlu1 %v12948_v34 }
0x15e7   :  { %v4951_v13 = vpop.permute.xlu1 %4950 }
0x15e8   :  { %4892 = vadd.xlane.f32.xlu0 %v12951_v42 }
0x15e9   :  { %v12954_v50 = vpop.eup %9768 }
0x15ea   :  { %4898 = vadd.xlane.f32.xlu1 %v12954_v50  ;;  %v12957_v54 = vpop.eup %9770 }
0x15eb   :  { %v12960_v16 = vpop.eup %9772 }
0x15ec   :  { %4896 = vadd.xlane.f32.xlu0 %v12957_v54  ;;  %v12963_v8 = vpop.eup %9774 }
0x15ed   :  { %v12966_v28 = vpop.eup %9776 }
0x15ee   :  { %4902 = vadd.xlane.f32.xlu1 %v12960_v16 }
0x15f0   :  { %4900 = vadd.xlane.f32.xlu0 %v12963_v8 }
0x15f4   :  { %4904 = vadd.xlane.f32.xlu0 %v12966_v28 }
0x15ff   :  { %5353 = vrot.lane.b32.xlu1 %v12402_v49, %s10421_s23 }
0x1603   :  { %5349 = vrot.lane.b32.xlu1 %v12410_v60, %s10421_s23 }
0x1607   :  { %5347 = vrot.lane.b32.xlu1 %v12416_v51, %s10421_s23 }
0x160a   :  { %5351 = vrot.lane.b32.xlu0 %v12406_v9, %s10421_s23 }
0x160b   :  { %5343 = vrot.lane.b32.xlu1 %v12424_v19, %s10421_s23 }
0x160e   :  { %5345 = vrot.lane.b32.xlu0 %v12420_v36, %s10421_s23 }
0x160f   :  { %5339 = vrot.lane.b32.xlu1 %v12400_v45, %s10421_s23 }
0x1612   :  { %5341 = vrot.lane.b32.xlu0 %v12398_v4, %s10421_s23 }
0x1613   :  { %5325 = vrot.lane.b32.xlu1 %v12568_v18, %s10421_s23 }
0x1616   :  { %5323 = vrot.lane.b32.xlu0 %v12566_v41, %s10421_s23 }
0x1617   :  { %5329 = vrot.lane.b32.xlu1 %v12576_v38, %s10421_s23 }
0x161a   :  { %5327 = vrot.lane.b32.xlu0 %v12574_v47, %s10421_s23 }
0x161b   :  { %5333 = vrot.lane.b32.xlu1 %v12584_v29, %s10421_s23 }
0x161e   :  { %5331 = vrot.lane.b32.xlu0 %v12582_v44, %s10421_s23 }
0x161f   :  { %5337 = vrot.lane.b32.xlu1 %v12592_v61, %s10421_s23 }
0x1622   :  { %5335 = vrot.lane.b32.xlu0 %v12590_v63, %s10421_s23 }
0x1623   :  { %5949 = vrot.lane.b32.xlu1 %v12406_v9, %s10423_s28 }
0x1624   :  { %v4879_v57 = vpop.xlane.xlu0 %4878 }
0x1626   :  { %5951 = vrot.lane.b32.xlu0 %v12402_v49, %s10423_s28 }
0x1627   :  { %5945 = vrot.lane.b32.xlu1 %v12416_v51, %s10423_s28 }
0x1628   :  { %v4875_v5 = vpop.xlane.xlu0 %4874 }
0x1629   :  { %9778 = vrcp.f32 %v4875_v5 }
0x162a   :  { %5947 = vrot.lane.b32.xlu0 %v12410_v60, %s10423_s28 }
0x162b   :  { %5941 = vrot.lane.b32.xlu1 %v12424_v19, %s10423_s28 }
0x162c   :  { %v4881_v22 = vpop.xlane.xlu0 %4880 }
0x162e   :  { %5943 = vrot.lane.b32.xlu0 %v12420_v36, %s10423_s28 }
0x162f   :  { %5937 = vrot.lane.b32.xlu1 %v12400_v45, %s10423_s28 }
0x1630   :  { %v4877_v56 = vpop.xlane.xlu0 %4876 }
0x1631   :  { %9780 = vrcp.f32 %v4877_v56 }
0x1632   :  { %5939 = vrot.lane.b32.xlu0 %v12398_v4, %s10423_s28  ;;  %9782 = vrcp.f32 %v4881_v22 }
0x1633   :  { %5923 = vrot.lane.b32.xlu1 %v12568_v18, %s10423_s28  ;;  %9784 = vrcp.f32 %v4879_v57 }
0x1634   :  { %v4959_v55 = vpop.permute.xlu0 %4958 }
0x1635   :  { %8939 = vmatprep.subr.bf16.mxu1 %v4959_v55 }
0x1636   :  { %5921 = vrot.lane.b32.xlu0 %v12566_v41, %s10423_s28  ;;  %8940 = vmatpush3.bf16.msra.mxu1 %v4959_v55  ;;  %v9779_v18 = vpop.eup %9778 }
0x1637   :  { %5927 = vrot.lane.b32.xlu1 %v12576_v38, %s10423_s28  ;;  %8941 = vmatprep.subr.bf16.mxu1 %v4957_v46  ;;  %v4922_v41 = vmul.f32 %v9779_v18, %v12913_v59 }
0x163a   :  { %5925 = vrot.lane.b32.xlu0 %v12574_v47, %s10423_s28  ;;  %8942 = vmatpush3.bf16.msra.mxu1 %v4957_v46 }
0x163b   :  { %5931 = vrot.lane.b32.xlu1 %v12584_v29, %s10423_s28  ;;  %8943 = vmatprep.subr.bf16.mxu1 %v4955_v30 }
0x163e   :  { %v9781_v7 = vpop.eup %9780  ;;  %5929 = vrot.lane.b32.xlu0 %v12582_v44, %s10423_s28  ;;  %8944 = vmatpush3.bf16.msra.mxu1 %v4955_v30  ;;  %v4949_v44 = vpop.permute.xlu1 %4948 }
0x163f   :  { %5935 = vrot.lane.b32.xlu1 %v12592_v61, %s10423_s28  ;;  %8945 = vmatprep.subr.bf16.mxu1 %v4953_v43  ;;  %v4923_v47 = vmul.f32 %v9781_v7, %v12919_v10  ;;  %v9783_v29 = vpop.eup %9782 }
0x1640   :  { %v9785_v61 = vpop.eup %9784  ;;  %v4925_v10 = vmul.f32 %v9783_v29, %v12916_v6 }
0x1641   :  { %v4938_v38 = vpack.c.bf16 %v4923_v47, %v4922_v41  ;;  %v4924_v21 = vmul.f32 %v9785_v61, %v12910_v14 }
0x1642   :  { %5933 = vrot.lane.b32.xlu0 %v12590_v63, %s10423_s28  ;;  %8946 = vmatpush3.bf16.msra.mxu1 %v4953_v43  ;;  %v4947_v59 = vpop.permute.xlu1 %4946  ;;  %v339_v63 = vld [vmem:[%s14568_s10 + $0x4] sm:$0xf] }
0x1643   :  { %5666 = vrot.lane.b32.xlu1 %v12402_v49, %s10420_s22  ;;  %8947 = vmatprep.subr.bf16.mxu1 %v4951_v13  ;;  %v4939_v0 = vpack.c.bf16 %v4925_v10, %v4924_v21  ;;  %v5100_v24 = vsel %vm1546_vm2, %v339_v63, 0 }
0x1644   :  { %8953 = vmatprep.mubr.bf16.mxu1 %v4938_v38 }
0x1646   :  { %5664 = vrot.lane.b32.xlu0 %v12406_v9, %s10420_s22  ;;  %8948 = vmatpush3.bf16.msra.mxu1 %v4951_v13  ;;  %v4885_v25 = vpop.xlane.xlu1 %4884 }
0x1647   :  { %8949 = vmatprep.subr.bf16.mxu1 %v4949_v44  ;;  %9786 = vrcp.f32 %v4885_v25 }
0x164a   :  { %8950 = vmatpush3.bf16.msra.mxu1 %v4949_v44 }
0x164b   :  { %8951 = vmatprep.subr.bf16.mxu1 %v4947_v59 }
0x164e   :  { %8952 = vmatpush3.bf16.msra.mxu1 %v4947_v59 }
0x164f   :  { %9265 = vmatprep.subr.msk.bf16.mxu1 %vm1546_vm2, %v339_v63 }
0x1651   :  { %8954 = vmatmul.mubr.bf16.vlgmr.msra.gmra.mxu1 %v4939_v0 }
0x1652   :  { %8970 = vmatpush3.bf16.msra.mxu1 %v5100_v24 }
0x1654   :  { %v9787_v14 = vpop.eup %9786 }
0x1655   :  { %v4927_v52 = vmul.f32 %v9787_v14, %v12922_v2 }
0x1665   :  { %v4883_v12 = vpop.xlane.xlu0 %4882 }
0x1666   :  { %9788 = vrcp.f32 %v4883_v12 }
0x1669   :  { %v4887_v26 = vpop.xlane.xlu0 %4886 }
0x166a   :  { %9790 = vrcp.f32 %v4887_v26 }
0x166b   :  { %v4891_v62 = vpop.xlane.xlu1 %4890 }
0x166d   :  { %v4889_v6 = vpop.xlane.xlu0 %4888 }
0x166e   :  { %9792 = vrcp.f32 %v4889_v6 }
0x166f   :  { %v4895_v58 = vpop.xlane.xlu1 %4894  ;;  %9794 = vrcp.f32 %v4891_v62 }
0x1671   :  { %v4893_v48 = vpop.xlane.xlu0 %4892 }
0x1672   :  { %9796 = vrcp.f32 %v4893_v48 }
0x1673   :  { %v9789_v53 = vpop.eup %9788  ;;  %v4899_v20 = vpop.xlane.xlu1 %4898  ;;  %9798 = vrcp.f32 %v4895_v58 }
0x1674   :  { %v4926_v1 = vmul.f32 %v9789_v53, %v12935_v17 }
0x1675   :  { %v4897_v3 = vpop.xlane.xlu0 %4896 }
0x1676   :  { %9800 = vrcp.f32 %v4897_v3  ;;  %v4940_v40 = vpack.c.bf16 %v4927_v52, %v4926_v1 }
0x1677   :  { %v4903_v39 = vpop.xlane.xlu1 %4902  ;;  %9802 = vrcp.f32 %v4899_v20  ;;  %v9791_v37 = vpop.eup %9790 }
0x1678   :  { %8957 = vmatprep.mubr.bf16.mxu1 %v4940_v40  ;;  %v4928_v17 = vmul.f32 %v9791_v37, %v12939_v32 }
0x1679   :  { %v4901_v33 = vpop.xlane.xlu0 %4900 }
0x167a   :  { %9804 = vrcp.f32 %v4901_v33 }
0x167b   :  { %v9793_v31 = vpop.eup %9792  ;;  %v13046_v23 = vpop.permute.xlu1 %5353  ;;  %9806 = vrcp.f32 %v4903_v39 }
0x167c   :  { %9267 = vmatprep.subr.msk.bf16.mxu1 %vm629_vm1, %v13046_v23  ;;  %v4929_v2 = vmul.f32 %v9793_v31, %v12945_v35  ;;  %v9795_v11 = vpop.eup %9794 }
0x167d   :  { %v4905_v27 = vpop.xlane.xlu0 %4904  ;;  %v4930_v22 = vmul.f32 %v9795_v11, %v12942_v15 }
0x167e   :  { %9808 = vrcp.f32 %v4905_v27  ;;  %v4941_v57 = vpack.c.bf16 %v4929_v2, %v4928_v17 }
0x167f   :  { %v9797_v5 = vpop.eup %9796  ;;  %v13052_v46 = vpop.permute.xlu1 %5349 }
0x1680   :  { %8958 = vmatmul.mubr.bf16.gmra.mxu1 %v4941_v57  ;;  %v4931_v56 = vmul.f32 %v9797_v5, %v12951_v42  ;;  %v9799_v30 = vpop.eup %9798 }
0x1681   :  { %v13056_v55 = vpop.permute.xlu0 %5351  ;;  %v4932_v35 = vmul.f32 %v9799_v30, %v12948_v34  ;;  %v5401_v30 = vsel %vm629_vm1, %v13046_v23, 0 }
0x1682   :  { %v4942_v43 = vpack.c.bf16 %v4931_v56, %v4930_v22 }
0x1683   :  { %v9801_v18 = vpop.eup %9800  ;;  %v13058_v32 = vpop.permute.xlu1 %5347 }
0x1684   :  { %8961 = vmatprep.mubr.bf16.mxu1 %v4942_v43  ;;  %v4933_v7 = vmul.f32 %v9801_v18, %v12957_v54  ;;  %v9803_v13 = vpop.eup %9802  ;;  %v5398_v43 = vsel %vm629_vm1, %v13056_v55, 0  ;;  %v5395_v18 = vsel %vm629_vm1, %v13052_v46, 0  ;;  %v5392_v23 = vsel %vm629_vm1, %v13058_v32, 0 }
0x1685   :  { %v13062_v41 = vpop.permute.xlu0 %5345  ;;  %v4934_v42 = vmul.f32 %v9803_v13, %v12954_v50 }
0x1686   :  { %v4943_v47 = vpack.c.bf16 %v4933_v7, %v4932_v35 }
0x1687   :  { %v9805_v38 = vpop.eup %9804  ;;  %v13064_v15 = vpop.permute.xlu1 %5343 }
0x1688   :  { %8962 = vmatmul.mubr.bf16.gmra.mxu1 %v4943_v47  ;;  %v4935_v44 = vmul.f32 %v9805_v38, %v12963_v8  ;;  %v9807_v29 = vpop.eup %9806  ;;  %v5386_v7 = vsel %vm629_vm1, %v13064_v15, 0 }
0x1689   :  { %v13068_v61 = vpop.permute.xlu0 %5341  ;;  %v4936_v54 = vmul.f32 %v9807_v29, %v12960_v16 }
0x168a   :  { %v4944_v59 = vpack.c.bf16 %v4935_v44, %v4934_v42  ;;  %v5383_v44 = vsel %vm629_vm1, %v13068_v61, 0 }
0x168b   :  { %v9809_v10 = vpop.eup %9808  ;;  %v13070_v34 = vpop.permute.xlu1 %5339 }
0x168c   :  { %8965 = vmatprep.mubr.bf16.mxu1 %v4944_v59  ;;  %v4937_v63 = vmul.f32 %v9809_v10, %v12966_v28 }
0x168d   :  { %v13074_v21 = vpop.permute.xlu0 %5323 }
0x168e   :  { %v4945_v0 = vpack.c.bf16 %v4937_v63, %v4936_v54 }
0x168f   :  { %v13076_v24 = vpop.permute.xlu1 %5325 }
0x1690   :  { %8966 = vmatmul.mubr.bf16.gmra.mxu1 %v4945_v0  ;;  %v5380_v0 = vsel %vm629_vm1, %v13070_v34, 0 }
0x1691   :  { %v13078_v50 = vpop.permute.xlu0 %5327 }
0x1693   :  { %v13080_v8 = vpop.permute.xlu1 %5329 }
0x1695   :  { %v13082_v25 = vpop.permute.xlu0 %5331 }
0x1697   :  { %v13084_v12 = vpop.permute.xlu1 %5333 }
0x1699   :  { %v13086_v26 = vpop.permute.xlu0 %5335 }
0x169b   :  { %v13088_v62 = vpop.permute.xlu1 %5337 }
0x169d   :  { %v13090_v16 = vpop.permute.xlu0 %5951 }
0x169f   :  { %v13092_v28 = vpop.permute.xlu1 %5949 }
0x16a1   :  { %v13094_v6 = vpop.permute.xlu0 %5947 }
0x16a3   :  { %v13096_v58 = vpop.permute.xlu1 %5945 }
0x16a5   :  { %v13098_v14 = vpop.permute.xlu0 %5943 }
0x16a7   :  { %v13100_v48 = vpop.permute.xlu1 %5941 }
0x16a9   :  { %v13102_v53 = vpop.permute.xlu0 %5939 }
0x16ab   :  { %v13104_v20 = vpop.permute.xlu1 %5937 }
0x16ad   :  { %v13106_v1 = vpop.permute.xlu0 %5921 }
0x16af   :  { %v13108_v52 = vpop.permute.xlu1 %5923 }
0x16b1   :  { %v13110_v3 = vpop.permute.xlu0 %5925 }
0x16b3   :  { %v13112_v40 = vpop.permute.xlu1 %5927 }
0x16b5   :  { %v13114_v39 = vpop.permute.xlu0 %5929 }
0x16b7   :  { %v13116_v37 = vpop.permute.xlu1 %5931 }
0x16b9   :  { %v13118_v33 = vpop.permute.xlu0 %5933 }
0x16bb   :  { %v13120_v31 = vpop.permute.xlu1 %5935 }
0x16bd   :  { %v5665_v2 = vpop.permute.xlu0 %5664 }
0x16bf   :  { %v5667_v17 = vpop.permute.xlu1 %5666 }
0x16c0   :  { %9037 = vmatprep.subr.bf16.mxu0 %v5667_v17 }
0x16c1   :  { %9038 = vmatpush3.bf16.msra.mxu0 %v5667_v17 }
0x16c2   :  { %9039 = vmatprep.subr.bf16.mxu0 %v5665_v2 }
0x16c5   :  { %9040 = vmatpush3.bf16.msra.mxu0 %v5665_v2 }
0x1711   :  { %v8955_v11 = vpop.f32.mrf.mxu1 }
0x1713   :  { %v5004_v27 = vpop.f32.mrf.mxu1 }
0x1715   :  { %v8956_v57 = vpop.f32.mrf.mxu1 }
0x1716   :  { %v5068_v56 = vpack.c.bf16 %v8956_v57, %v8955_v11 }
0x1717   :  { %v5007_v5 = vpop.f32.mrf.mxu1 }
0x1718   :  { %v5067_v22 = vpack.c.bf16 %v5007_v5, %v5004_v27  ;;  %v5996_v27 = vsel %vm629_vm1, %v13092_v28, 0 }
0x171a   :  { %8971 = vmatprep.mubr.msk.bf16.mxu1 %vm629_vm1, %v5067_v22 }
0x171b   :  { %8972 = vmatmul.mubr.msk.bf16.vlgmr.msra.gmra.mxu1 %vm629_vm1, %v5068_v56  ;;  %v13262_v56 = vld [vmem:[#allocation8] sm:$0xff] }
0x171c   :  { %9006 = vmatpush3.bf16.xpose.msra.mxu1 %v5401_v30 }
0x171d   :  { %9268 = vmatprep.subr.msk.bf16.mxu1 %vm629_vm1, %v13056_v55  ;;  %v5389_v55 = vsel %vm629_vm1, %v13062_v41, 0 }
0x1724   :  { %9008 = vmatpush3.bf16.xpose.msra.mxu1 %v5398_v43 }
0x1725   :  { %9269 = vmatprep.subr.msk.bf16.mxu1 %vm629_vm1, %v13052_v46 }
0x172c   :  { %9010 = vmatpush3.bf16.xpose.msra.mxu1 %v5395_v18  ;;  %v13267_v18 = vld [vmem:[#allocation8 + $0x8] sm:$0xff] }
0x172d   :  { %9270 = vmatprep.subr.msk.bf16.mxu1 %vm629_vm1, %v13058_v32 }
0x1734   :  { %9012 = vmatpush3.bf16.xpose.msra.mxu1 %v5392_v23 }
0x1735   :  { %9271 = vmatprep.subr.msk.bf16.mxu1 %vm629_vm1, %v13062_v41 }
0x173c   :  { %9014 = vmatpush3.bf16.xpose.msra.mxu1 %v5389_v55 }
0x173d   :  { %9272 = vmatprep.subr.msk.bf16.mxu1 %vm629_vm1, %v13064_v15 }
0x1740   :  { %v8959_v35 = vpop.f32.mrf.mxu1 }
0x1742   :  { %v5020_v46 = vpop.f32.mrf.mxu1 }
0x1744   :  { %9016 = vmatpush3.bf16.xpose.msra.mxu1 %v5386_v7  ;;  %v8960_v13 = vpop.f32.mrf.mxu1 }
0x1745   :  { %9273 = vmatprep.subr.msk.bf16.mxu1 %vm629_vm1, %v13068_v61  ;;  %v5070_v38 = vpack.c.bf16 %v8960_v13, %v8959_v35  ;;  %v13273_v35 = vld [vmem:[#allocation8 + $0x18] sm:$0xff]  ;;  %v13279_v13 = vld [vmem:[#allocation8 + $0x30] sm:$0xff] }
0x1746   :  { %v5023_v32 = vpop.f32.mrf.mxu1 }
0x1747   :  { %v5069_v47 = vpack.c.bf16 %v5023_v32, %v5020_v46 }
0x1748   :  { %v8963_v42 = vpop.f32.mrf.mxu1 }
0x1749   :  { %8975 = vmatprep.mubr.msk.bf16.mxu1 %vm629_vm1, %v5069_v47 }
0x174a   :  { %v5036_v41 = vpop.f32.mrf.mxu1  ;;  %8976 = vmatmul.mubr.msk.bf16.gmra.mxu1 %vm629_vm1, %v5070_v38  ;;  %v13285_v38 = vld [vmem:[#allocation8 + $0x38] sm:$0xff] }
0x174c   :  { %9018 = vmatpush3.bf16.xpose.msra.mxu1 %v5383_v44  ;;  %v8964_v29 = vpop.f32.mrf.mxu1  ;;  %v13291_v44 = vld [vmem:[#allocation8 + $0x20] sm:$0xff] }
0x174d   :  { %9274 = vmatprep.subr.msk.bf16.mxu1 %vm629_vm1, %v13070_v34  ;;  %v5072_v10 = vpack.c.bf16 %v8964_v29, %v8963_v42  ;;  %v5999_v34 = vsel %vm629_vm1, %v13090_v16, 0 }
0x174e   :  { %v5039_v15 = vpop.f32.mrf.mxu1 }
0x174f   :  { %v5071_v59 = vpack.c.bf16 %v5039_v15, %v5036_v41 }
0x1750   :  { %v8967_v54 = vpop.f32.mrf.mxu1 }
0x1751   :  { %8979 = vmatprep.mubr.msk.bf16.mxu1 %vm629_vm1, %v5071_v59  ;;  %v13297_v59 = vld [vmem:[#allocation8 + $0x28] sm:$0xff] }
0x1752   :  { %v5052_v63 = vpop.f32.mrf.mxu1  ;;  %8980 = vmatmul.mubr.msk.bf16.gmra.mxu1 %vm629_vm1, %v5072_v10 }
0x1754   :  { %9020 = vmatpush3.bf16.xpose.msra.mxu1 %v5380_v0  ;;  %v8968_v17 = vpop.f32.mrf.mxu1 }
0x1755   :  { %9276 = vmatprep.subr.msk.bf16.mxu1 %vm629_vm1, %v13090_v16  ;;  %v5074_v11 = vpack.c.bf16 %v8968_v17, %v8967_v54 }
0x1756   :  { %v5055_v61 = vpop.f32.mrf.mxu1 }
0x1757   :  { %v5073_v2 = vpack.c.bf16 %v5055_v61, %v5052_v63  ;;  %v13303_v63 = vld [vmem:[#allocation8 + $0x50] sm:$0xff]  ;;  %v13309_v61 = vld [vmem:[#allocation8 + $0x58] sm:$0xff] }
0x1759   :  { %8983 = vmatprep.mubr.msk.bf16.mxu1 %vm629_vm1, %v5073_v2 }
0x175a   :  { %8984 = vmatmul.mubr.msk.bf16.gmra.mxu1 %vm629_vm1, %v5074_v11 }
0x175b   :  { %9021 = vmatprep.mubr.msk.bf16.mxu1 %vm629_vm1, %v13074_v21  ;;  %v5993_v21 = vsel %vm629_vm1, %v13094_v6, 0 }
0x1762   :  { %9022 = vmatmul.mubr.msk.bf16.vlgmr.msra.gmra.mxu1 %vm629_vm1, %v13076_v24  ;;  %v5990_v24 = vsel %vm629_vm1, %v13096_v58, 0 }
0x1763   :  { %9088 = vmatpush3.bf16.xpose.msra.mxu1 %v5999_v34  ;;  %9025 = vmatprep.mubr.msk.bf16.mxu1 %vm629_vm1, %v13078_v50  ;;  %v5987_v50 = vsel %vm629_vm1, %v13098_v14, 0  ;;  %v13315_v34 = vld [vmem:[#allocation8 + $0x40] sm:$0xff] }
0x1764   :  { %9277 = vmatprep.subr.msk.bf16.mxu1 %vm629_vm1, %v13092_v28 }
0x176a   :  { %9026 = vmatmul.mubr.msk.bf16.gmra.mxu1 %vm629_vm1, %v13080_v8  ;;  %v5984_v8 = vsel %vm629_vm1, %v13100_v48, 0 }
0x176b   :  { %9090 = vmatpush3.bf16.xpose.msra.mxu1 %v5996_v27  ;;  %9029 = vmatprep.mubr.msk.bf16.mxu1 %vm629_vm1, %v13082_v25  ;;  %v5981_v25 = vsel %vm629_vm1, %v13102_v53, 0 }
0x176c   :  { %9278 = vmatprep.subr.msk.bf16.mxu1 %vm629_vm1, %v13094_v6 }
0x1772   :  { %9030 = vmatmul.mubr.msk.bf16.gmra.mxu1 %vm629_vm1, %v13084_v12  ;;  %v5978_v12 = vsel %vm629_vm1, %v13104_v20, 0 }
0x1773   :  { %9092 = vmatpush3.bf16.xpose.msra.mxu1 %v5993_v21  ;;  %9033 = vmatprep.mubr.msk.bf16.mxu1 %vm629_vm1, %v13086_v26 }
0x1774   :  { %9279 = vmatprep.subr.msk.bf16.mxu1 %vm629_vm1, %v13096_v58 }
0x177a   :  { %9034 = vmatmul.mubr.msk.bf16.gmra.mxu1 %vm629_vm1, %v13088_v62 }
0x177b   :  { %9094 = vmatpush3.bf16.xpose.msra.mxu1 %v5990_v24  ;;  %9103 = vmatprep.mubr.msk.bf16.mxu1 %vm629_vm1, %v13106_v1  ;;  %v13321_v24 = vld [vmem:[#allocation8 + $0x48] sm:$0xff] }
0x177c   :  { %9280 = vmatprep.subr.msk.bf16.mxu1 %vm629_vm1, %v13098_v14 }
0x1783   :  { %9096 = vmatpush3.bf16.xpose.msra.mxu1 %v5987_v50 }
0x1784   :  { %9281 = vmatprep.subr.msk.bf16.mxu1 %vm629_vm1, %v13100_v48 }
0x178b   :  { %9098 = vmatpush3.bf16.xpose.msra.mxu1 %v5984_v8  ;;  %v13327_v8 = vld [vmem:[#allocation8 + $0x70] sm:$0xff] }
0x178c   :  { %9282 = vmatprep.subr.msk.bf16.mxu1 %vm629_vm1, %v13102_v53 }
0x1793   :  { %9100 = vmatpush3.bf16.xpose.msra.mxu1 %v5981_v25 }
0x1794   :  { %9283 = vmatprep.subr.msk.bf16.mxu1 %vm629_vm1, %v13104_v20 }
0x179b   :  { %9102 = vmatpush3.bf16.xpose.msra.mxu1 %v5978_v12 }
0x17a2   :  { %9104 = vmatmul.mubr.msk.bf16.vlgmr.msra.gmra.mxu1 %vm629_vm1, %v13108_v52 }
0x17a3   :  { %9107 = vmatprep.mubr.msk.bf16.mxu1 %vm629_vm1, %v13110_v3 }
0x17aa   :  { %9108 = vmatmul.mubr.msk.bf16.gmra.mxu1 %vm629_vm1, %v13112_v40 }
0x17ab   :  { %9111 = vmatprep.mubr.msk.bf16.mxu1 %vm629_vm1, %v13114_v39 }
0x17b2   :  { %9112 = vmatmul.mubr.msk.bf16.gmra.mxu1 %vm629_vm1, %v13116_v37 }
0x17b3   :  { %9115 = vmatprep.mubr.msk.bf16.mxu1 %vm629_vm1, %v13118_v33 }
0x17ba   :  { %9116 = vmatmul.mubr.msk.bf16.gmra.mxu1 %vm629_vm1, %v13120_v31  ;;  %v13256_v31 = vld [vmem:[#allocation8 + $0x10] sm:$0xff] }
0x17db   :  { %v13224_v26 = vpop.f32.mrf.mxu1 }
0x17dd   :  { %v13226_v62 = vpop.f32.mrf.mxu1 }
0x17df   :  { %v13228_v16 = vpop.f32.mrf.mxu1 }
0x17e1   :  { %v13230_v28 = vpop.f32.mrf.mxu1 }
0x180a   :  { %v13232_v6 = vpop.f32.mrf.mxu1 }
0x180c   :  { %v13234_v58 = vpop.f32.mrf.mxu1 }
0x180e   :  { %v13236_v14 = vpop.f32.mrf.mxu1 }
0x1810   :  { %v13238_v48 = vpop.f32.mrf.mxu1 }
0x1812   :  { %v13240_v53 = vpop.f32.mrf.mxu1 }
0x1814   :  { %v13242_v20 = vpop.f32.mrf.mxu1 }
0x1815   :  { %14569 = vst [vmem:[#allocation64_spill] sm:$0xff] %v13242_v20 }
0x1816   :  { %v13244_v1 = vpop.f32.mrf.mxu1 }
0x1817   :  { %14570 = vst [vmem:[#allocation65_spill] sm:$0xff] %v13244_v1 }
0x1818   :  { %v13246_v52 = vpop.f32.mrf.mxu1 }
0x1819   :  { %14571 = vst [vmem:[#allocation66_spill] sm:$0xff] %v13246_v52 }
0x181a   :  { %v13248_v3 = vpop.f32.mrf.mxu1 }
0x181b   :  { %14572 = vst [vmem:[#allocation67_spill] sm:$0xff] %v13248_v3 }
0x181c   :  { %v13250_v40 = vpop.f32.mrf.mxu1 }
0x181d   :  { %14573 = vst [vmem:[#allocation68_spill] sm:$0xff] %v13250_v40 }
0x181e   :  { %v13252_v39 = vpop.f32.mrf.mxu1 }
0x181f   :  { %14574 = vst [vmem:[#allocation69_spill] sm:$0xff] %v13252_v39 }
0x1820   :  { %v13254_v37 = vpop.f32.mrf.mxu1 }
0x1821   :  { %14575 = vst [vmem:[#allocation70_spill] sm:$0xff] %v13254_v37 }
0x1822   :  { %v9023_v33 = vpop.f32.mrf.mxu1 }
0x1823   :  { %v13259_v57 = vadd.f32 %v13256_v31, %v9023_v33  ;;  %v13334_v33 = vld [vmem:[#allocation8 + $0x60] sm:$0xff] }
0x1824   :  { %v5437_v5 = vpop.f32.mrf.mxu1 }
0x1825   :  { %5504 = vmax.xlane.f32.xlu0 %v13259_v57  ;;  %v13265_v30 = vadd.f32 %v13262_v56, %v5437_v5 }
0x1826   :  { %v9024_v22 = vpop.f32.mrf.mxu1 }
0x1827   :  { %v13276_v46 = vadd.f32 %v13273_v35, %v9024_v22 }
0x1828   :  { %v5440_v43 = vpop.f32.mrf.mxu1 }
0x1829   :  { %v13270_v23 = vadd.f32 %v13267_v18, %v5440_v43  ;;  %5500 = vmax.xlane.f32.xlu0 %v13265_v30  ;;  %v13348_v43 = vld [vmem:[#allocation8 + $0x78] sm:$0xff] }
0x182a   :  { %v9027_v55 = vpop.f32.mrf.mxu1 }
0x182b   :  { %5502 = vmax.xlane.f32.xlu1 %v13270_v23  ;;  %v13282_v32 = vadd.f32 %v13279_v13, %v9027_v55 }
0x182c   :  { %v5453_v7 = vpop.f32.mrf.mxu1 }
0x182d   :  { %5506 = vmax.xlane.f32.xlu0 %v13276_v46  ;;  %v13294_v29 = vadd.f32 %v13291_v44, %v5453_v7 }
0x182e   :  { %v9028_v47 = vpop.f32.mrf.mxu1 }
0x182f   :  { %v13288_v42 = vadd.f32 %v13285_v38, %v9028_v47  ;;  %5512 = vmax.xlane.f32.xlu1 %v13282_v32  ;;  %v13354_v47 = vld [vmem:[#allocation8 + $0x68] sm:$0xff] }
0x1830   :  { %v5456_v41 = vpop.f32.mrf.mxu1 }
0x1831   :  { %5514 = vmax.xlane.f32.xlu0 %v13288_v42  ;;  %v13300_v10 = vadd.f32 %v13297_v59, %v5456_v41 }
0x1832   :  { %v9031_v15 = vpop.f32.mrf.mxu1 }
0x1833   :  { %5508 = vmax.xlane.f32.xlu1 %v13294_v29  ;;  %v13306_v0 = vadd.f32 %v13303_v63, %v9031_v15 }
0x1834   :  { %v5469_v54 = vpop.f32.mrf.mxu1 }
0x1835   :  { %5510 = vmax.xlane.f32.xlu0 %v13300_v10  ;;  %v13318_v27 = vadd.f32 %v13315_v34, %v5469_v54 }
0x1836   :  { %v9032_v17 = vpop.f32.mrf.mxu1 }
0x1837   :  { %v13312_v2 = vadd.f32 %v13309_v61, %v9032_v17  ;;  %5520 = vmax.xlane.f32.xlu1 %v13306_v0 }
0x1838   :  { %v5472_v11 = vpop.f32.mrf.mxu1 }
0x1839   :  { %5522 = vmax.xlane.f32.xlu0 %v13312_v2  ;;  %v13324_v50 = vadd.f32 %v13321_v24, %v5472_v11 }
0x183a   :  { %v9035_v21 = vpop.f32.mrf.mxu1 }
0x183b   :  { %5516 = vmax.xlane.f32.xlu1 %v13318_v27  ;;  %v13330_v25 = vadd.f32 %v13327_v8, %v9035_v21 }
0x183c   :  { %v5485_v12 = vpop.f32.mrf.mxu1 }
0x183d   :  { %5518 = vmax.xlane.f32.xlu0 %v13324_v50  ;;  %v13337_v5 = vadd.f32 %v13334_v33, %v5485_v12 }
0x183e   :  { %v9036_v22 = vpop.f32.mrf.mxu1 }
0x183f   :  { %5528 = vmax.xlane.f32.xlu1 %v13330_v25  ;;  %v13351_v55 = vadd.f32 %v13348_v43, %v9036_v22 }
0x1840   :  { %v5488_v7 = vpop.f32.mrf.mxu1 }
0x1841   :  { %v13357_v41 = vadd.f32 %v13354_v47, %v5488_v7 }
0x1843   :  { %5524 = vmax.xlane.f32.xlu1 %v13337_v5 }
0x1853   :  { %5658 = vrot.lane.b32.xlu0 %v12420_v36, %s10420_s22 }
0x1854   :  { %5662 = vrot.lane.b32.xlu1 %v12410_v60, %s10420_s22 }
0x1858   :  { %5660 = vrot.lane.b32.xlu1 %v12416_v51, %s10420_s22 }
0x185c   :  { %5654 = vrot.lane.b32.xlu1 %v12398_v4, %s10420_s22 }
0x1872   :  { %5530 = vmax.xlane.f32.xlu0 %v13351_v55 }
0x1876   :  { %5526 = vmax.xlane.f32.xlu0 %v13357_v41 }
0x188c   :  { %5656 = vrot.lane.b32.xlu0 %v12424_v19, %s10420_s22 }
0x18ae   :  { %v5505_v15 = vpop.xlane.xlu0 %5504 }
0x18af   :  { %v5534_v54 = vsub.f32 %v13259_v57, %v5505_v15 }
0x18b1   :  { %v5552_v17 = vmul.f32 1.442695, %v5534_v54 }
0x18b2   :  { %v5501_v11 = vpop.xlane.xlu0 %5500 }
0x18b3   :  { %9810 = vpow2.f32 %v5552_v17  ;;  %v5532_v21 = vsub.f32 %v13265_v30, %v5501_v11 }
0x18b4   :  { %v5503_v12 = vpop.xlane.xlu1 %5502 }
0x18b5   :  { %v5548_v22 = vmul.f32 1.442695, %v5532_v21  ;;  %v5533_v7 = vsub.f32 %v13270_v23, %v5503_v12 }
0x18b6   :  { %v5507_v37 = vpop.xlane.xlu0 %5506 }
0x18b7   :  { %9812 = vpow2.f32 %v5548_v22  ;;  %v5535_v39 = vsub.f32 %v13276_v46, %v5507_v37  ;;  %v5550_v20 = vmul.f32 1.442695, %v5533_v7 }
0x18b8   :  { %v5513_v40 = vpop.xlane.xlu1 %5512 }
0x18b9   :  { %v5554_v3 = vmul.f32 1.442695, %v5535_v39  ;;  %v5538_v52 = vsub.f32 %v13282_v32, %v5513_v40 }
0x18ba   :  { %v5515_v1 = vpop.xlane.xlu0 %5514 }
0x18bb   :  { %9814 = vpow2.f32 %v5554_v3  ;;  %v5560_v57 = vmul.f32 1.442695, %v5538_v52  ;;  %v5539_v30 = vsub.f32 %v13288_v42, %v5515_v1 }
0x18bc   :  { %v5509_v15 = vpop.xlane.xlu1 %5508 }
0x18bd   :  { %9816 = vpow2.f32 %v5560_v57  ;;  %v5536_v54 = vsub.f32 %v13294_v29, %v5509_v15  ;;  %v5562_v46 = vmul.f32 1.442695, %v5539_v30 }
0x18be   :  { %v5511_v17 = vpop.xlane.xlu0 %5510  ;;  %9818 = vpow2.f32 %v5550_v20 }
0x18bf   :  { %v5556_v11 = vmul.f32 1.442695, %v5536_v54  ;;  %v5537_v23 = vsub.f32 %v13300_v10, %v5511_v17 }
0x18c0   :  { %v13370_v37 = vpop.eup %9810  ;;  %v5521_v39 = vpop.xlane.xlu1 %5520 }
0x18c1   :  { %9820 = vpow2.f32 %v5556_v11  ;;  %v5558_v40 = vmul.f32 1.442695, %v5537_v23  ;;  %v5542_v3 = vsub.f32 %v13306_v0, %v5521_v39  ;;  %5584 = vadd.xlane.f32.xlu0 %v13370_v37 }
0x18c2   :  { %v5523_v52 = vpop.xlane.xlu0 %5522 }
0x18c3   :  { %9822 = vpow2.f32 %v5558_v40  ;;  %v5568_v20 = vmul.f32 1.442695, %v5542_v3  ;;  %v5543_v0 = vsub.f32 %v13312_v2, %v5523_v52 }
0x18c4   :  { %v13374_v1 = vpop.eup %9812  ;;  %v5517_v32 = vpop.xlane.xlu1 %5516  ;;  %9824 = vpow2.f32 %v5562_v46 }
0x18c5   :  { %v5540_v42 = vsub.f32 %v13318_v27, %v5517_v32  ;;  %5580 = vadd.xlane.f32.xlu0 %v13374_v1  ;;  %9826 = vpow2.f32 %v5568_v20  ;;  %v5570_v54 = vmul.f32 1.442695, %v5543_v0 }
0x18c6   :  { %v5519_v29 = vpop.xlane.xlu0 %5518 }
0x18c7   :  { %v5541_v10 = vsub.f32 %v13324_v50, %v5519_v29  ;;  %v5564_v22 = vmul.f32 1.442695, %v5540_v42 }
0x18c8   :  { %v13379_v21 = vpop.eup %9814  ;;  %v5529_v12 = vpop.xlane.xlu1 %5528 }
0x18c9   :  { %v5566_v7 = vmul.f32 1.442695, %v5541_v10  ;;  %v5546_v57 = vsub.f32 %v13330_v25, %v5529_v12  ;;  %5586 = vadd.xlane.f32.xlu0 %v13379_v21 }
0x18ca   :  { %v13384_v15 = vpop.eup %9816  ;;  %v5659_v40 = vpop.permute.xlu0 %5658 }
0x18cb   :  { %9828 = vpow2.f32 %v5566_v7  ;;  %v5576_v27 = vmul.f32 1.442695, %v5546_v57  ;;  %5592 = vadd.xlane.f32.xlu1 %v13384_v15  ;;  %v13387_v30 = vpop.eup %9818  ;;  %v9105_v7 = vpop.f32.mrf.mxu1 }
0x18cc   :  { %v5525_v50 = vpop.xlane.xlu1 %5524  ;;  %9830 = vpow2.f32 %v5564_v22 }
0x18cd   :  { %v5544_v2 = vsub.f32 %v13337_v5, %v5525_v50  ;;  %5582 = vadd.xlane.f32.xlu0 %v13387_v30  ;;  %9832 = vpow2.f32 %v5576_v27  ;;  %v6035_v50 = vpop.f32.mrf.mxu1 }
0x18ce   :  { %v13391_v17 = vpop.eup %9820  ;;  %9834 = vpow2.f32 %v5570_v54 }
0x18cf   :  { %5588 = vadd.xlane.f32.xlu1 %v13391_v17  ;;  %v5572_v23 = vmul.f32 1.442695, %v5544_v2  ;;  %v9106_v2 = vpop.f32.mrf.mxu1 }
0x18d0   :  { %v13394_v25 = vpop.eup %9822  ;;  %v5663_v11 = vpop.permute.xlu1 %5662 }
0x18d1   :  { %9041 = vmatprep.subr.bf16.mxu0 %v5663_v11  ;;  %5590 = vadd.xlane.f32.xlu0 %v13394_v25  ;;  %v13397_v39 = vpop.eup %9824  ;;  %9836 = vpow2.f32 %v5572_v23  ;;  %v6038_v23 = vpop.f32.mrf.mxu1 }
0x18d2   :  { %9042 = vmatpush3.bf16.msra.mxu0 %v5663_v11  ;;  %v13400_v46 = vpop.eup %9826 }
0x18d3   :  { %5594 = vadd.xlane.f32.xlu1 %v13397_v39 }
0x18d4   :  { %v5661_v5 = vpop.permute.xlu1 %5660 }
0x18d5   :  { %9043 = vmatprep.subr.bf16.mxu0 %v5661_v5 }
0x18d6   :  { %9044 = vmatpush3.bf16.msra.mxu0 %v5661_v5  ;;  %v9109_v5 = vpop.f32.mrf.mxu1 }
0x18d7   :  { %5600 = vadd.xlane.f32.xlu1 %v13400_v46  ;;  %9045 = vmatprep.subr.bf16.mxu0 %v5659_v40 }
0x18d8   :  { %v13403_v3 = vpop.eup %9828  ;;  %v5655_v54 = vpop.permute.xlu1 %5654 }
0x18d9   :  { %5598 = vadd.xlane.f32.xlu0 %v13403_v3  ;;  %v13406_v52 = vpop.eup %9830 }
0x18da   :  { %9046 = vmatpush3.bf16.msra.mxu0 %v5659_v40  ;;  %v13409_v32 = vpop.eup %9832  ;;  %v13431_v40 = vadd.f32 %v13267_v18, %v6038_v23 }
0x18db   :  { %5596 = vadd.xlane.f32.xlu1 %v13406_v52  ;;  %v13412_v20 = vpop.eup %9834 }
0x18dd   :  { %5608 = vadd.xlane.f32.xlu0 %v13409_v32 }
0x18de   :  { %v13415_v42 = vpop.eup %9836 }
0x18df   :  { %5602 = vadd.xlane.f32.xlu1 %v13412_v20 }
0x18e3   :  { %5604 = vadd.xlane.f32.xlu1 %v13415_v42 }
0x18fb   :  { %v5531_v29 = vpop.xlane.xlu0 %5530 }
0x18fc   :  { %v5547_v10 = vsub.f32 %v13351_v55, %v5531_v29  ;;  %v13424_v55 = vadd.f32 %v13262_v56, %v6035_v50  ;;  %v6051_v29 = vpop.f32.mrf.mxu1  ;;  %v13439_v56 = vadd.f32 %v13273_v35, %v9106_v2 }
0x18fe   :  { %v5578_v0 = vmul.f32 1.442695, %v5547_v10  ;;  %v13435_v10 = vadd.f32 %v13256_v31, %v9105_v7 }
0x18ff   :  { %v5527_v12 = vpop.xlane.xlu0 %5526 }
0x1900   :  { %9838 = vpow2.f32 %v5578_v0  ;;  %v5545_v22 = vsub.f32 %v13357_v41, %v5527_v12  ;;  %v9110_v0 = vpop.f32.mrf.mxu1 }
0x1901   :  { %v13451_v7 = vadd.f32 %v13285_v38, %v9110_v0 }
0x1902   :  { %v5574_v57 = vmul.f32 1.442695, %v5545_v22  ;;  %v6054_v12 = vpop.f32.mrf.mxu1  ;;  %v13443_v22 = vadd.f32 %v13291_v44, %v6051_v29 }
0x1903   :  { %v5657_v27 = vpop.permute.xlu0 %5656 }
0x1904   :  { %9840 = vpow2.f32 %v5574_v57  ;;  %9047 = vmatprep.subr.bf16.mxu0 %v5657_v27  ;;  %v9113_v18 = vpop.f32.mrf.mxu1  ;;  %v13447_v57 = vadd.f32 %v13279_v13, %v9109_v5 }
0x1905   :  { %9048 = vmatpush3.bf16.msra.mxu0 %v5657_v27  ;;  %v13465_v38 = vadd.f32 %v13303_v63, %v9113_v18 }
0x1906   :  { %9049 = vmatprep.subr.bf16.mxu0 %v5655_v54  ;;  %v6067_v31 = vpop.f32.mrf.mxu1 }
0x1907   :  { %v13457_v44 = vadd.f32 %v13315_v34, %v6067_v31 }
0x1908   :  { %v9114_v35 = vpop.f32.mrf.mxu1 }
0x1909   :  { %9050 = vmatpush3.bf16.msra.mxu0 %v5655_v54  ;;  %v13469_v2 = vadd.f32 %v13309_v61, %v9114_v35  ;;  %v13484_v61 = vadd.f32 %v13297_v59, %v6054_v12 }
0x190a   :  { %v6070_v27 = vpop.f32.mrf.mxu1 }
0x190b   :  { %v13461_v13 = vadd.f32 %v13321_v24, %v6070_v27 }
0x190c   :  { %v9117_v50 = vpop.f32.mrf.mxu1 }
0x190d   :  { %v13420_v11 = vpop.eup %9838 }
0x190e   :  { %5610 = vadd.xlane.f32.xlu1 %v13420_v11  ;;  %v6083_v54 = vpop.f32.mrf.mxu1 }
0x190f   :  { %v13473_v23 = vadd.f32 %v13334_v33, %v6083_v54  ;;  %v13489_v33 = vadd.f32 %v13327_v8, %v9117_v50 }
0x1910   :  { %v9118_v34 = vpop.f32.mrf.mxu1 }
0x1911   :  { %v13426_v41 = vpop.eup %9840  ;;  %v13481_v63 = vadd.f32 %v13348_v43, %v9118_v34 }
0x1912   :  { %6098 = vmax.xlane.f32.xlu1 %v13424_v55  ;;  %5606 = vadd.xlane.f32.xlu0 %v13426_v41  ;;  %v6086_v24 = vpop.f32.mrf.mxu1 }
0x1913   :  { %v13477_v5 = vadd.f32 %v13354_v47, %v6086_v24 }
0x1916   :  { %6100 = vmax.xlane.f32.xlu1 %v13431_v40 }
0x191a   :  { %6102 = vmax.xlane.f32.xlu1 %v13435_v10 }
0x191e   :  { %6104 = vmax.xlane.f32.xlu1 %v13439_v56 }
0x1922   :  { %6106 = vmax.xlane.f32.xlu1 %v13443_v22 }
0x1926   :  { %6110 = vmax.xlane.f32.xlu1 %v13447_v57 }
0x1928   :  { %5652 = vrot.lane.b32.xlu0 %v12400_v45, %s10420_s22 }
0x192a   :  { %6112 = vmax.xlane.f32.xlu1 %v13451_v7 }
0x192e   :  { %6114 = vmax.xlane.f32.xlu1 %v13457_v44 }
0x1932   :  { %6116 = vmax.xlane.f32.xlu1 %v13461_v13 }
0x1936   :  { %6118 = vmax.xlane.f32.xlu1 %v13465_v38 }
0x193a   :  { %6120 = vmax.xlane.f32.xlu1 %v13469_v2 }
0x193e   :  { %6122 = vmax.xlane.f32.xlu1 %v13473_v23 }
0x1942   :  { %6124 = vmax.xlane.f32.xlu1 %v13477_v5 }
0x1946   :  { %6128 = vmax.xlane.f32.xlu1 %v13481_v63 }
0x1947   :  { %6108 = vmax.xlane.f32.xlu0 %v13484_v61 }
0x194a   :  { %v5585_v29 = vpop.xlane.xlu0 %5584 }
0x194b   :  { %6126 = vmax.xlane.f32.xlu0 %v13489_v33 }
0x194e   :  { %v5581_v47 = vpop.xlane.xlu0 %5580 }
0x194f   :  { %9842 = vrcp.f32 %v5581_v47 }
0x1952   :  { %v5587_v0 = vpop.xlane.xlu0 %5586 }
0x1956   :  { %v5583_v18 = vpop.xlane.xlu0 %5582 }
0x1957   :  { %9844 = vrcp.f32 %v5583_v18  ;;  %6262 = vrot.lane.b32.xlu1 %v12406_v9, %s10422_s13  ;;  %v5593_v9 = vpop.xlane.xlu1 %5592 }
0x1958   :  { %9846 = vrcp.f32 %v5587_v0 }
0x195a   :  { %v5591_v27 = vpop.xlane.xlu0 %5590 }
0x195b   :  { %6256 = vrot.lane.b32.xlu1 %v12420_v36, %s10422_s13  ;;  %v5589_v36 = vpop.xlane.xlu1 %5588  ;;  %9848 = vrcp.f32 %v5591_v27 }
0x195c   :  { %v9843_v59 = vpop.eup %9842  ;;  %9850 = vrcp.f32 %v5585_v29 }
0x195d   :  { %v5628_v43 = vmul.f32 %v9843_v59, %v13374_v1  ;;  %9852 = vrcp.f32 %v5589_v36 }
0x195f   :  { %6254 = vrot.lane.b32.xlu1 %v12424_v19, %s10422_s13 }
0x1961   :  { %6264 = vrot.lane.b32.xlu0 %v12402_v49, %s10422_s13  ;;  %v5595_v49 = vpop.xlane.xlu1 %5594 }
0x1962   :  { %9854 = vrcp.f32 %v5595_v49 }
0x1964   :  { %v9845_v8 = vpop.eup %9844 }
0x1965   :  { %6260 = vrot.lane.b32.xlu0 %v12410_v60, %s10422_s13  ;;  %v5629_v12 = vmul.f32 %v9845_v8, %v13387_v30  ;;  %v5601_v19 = vpop.xlane.xlu1 %5600  ;;  %v5599_v60 = vpop.xlane.xlu0 %5598 }
0x1967   :  { %v5644_v31 = vpack.c.bf16 %v5629_v12, %v5628_v43  ;;  %v340_v43 = vld [vmem:[%s14568_s10 + $0x8] sm:$0xf] }
0x1969   :  { %6258 = vrot.lane.b32.xlu0 %v12416_v51, %s10422_s13  ;;  %9053 = vmatprep.mubr.bf16.mxu0 %v5644_v31  ;;  %v5597_v35 = vpop.xlane.xlu1 %5596  ;;  %v5609_v51 = vpop.xlane.xlu0 %5608 }
0x196a   :  { %9856 = vrcp.f32 %v5597_v35 }
0x196b   :  { %9858 = vrcp.f32 %v5593_v9 }
0x196c   :  { %9860 = vrcp.f32 %v5599_v60 }
0x196d   :  { %6252 = vrot.lane.b32.xlu0 %v12398_v4, %s10422_s13  ;;  %v5603_v50 = vpop.xlane.xlu1 %5602  ;;  %v9847_v4 = vpop.eup %9846 }
0x196e   :  { %v9849_v24 = vpop.eup %9848  ;;  %v5631_v0 = vmul.f32 %v9847_v4, %v13379_v21  ;;  %9862 = vrcp.f32 %v5603_v50  ;;  %v5806_v21 = vsel %vm1546_vm2, %v340_v43, 0 }
0x196f   :  { %v9851_v47 = vpop.eup %9850  ;;  %v5633_v8 = vmul.f32 %v9849_v24, %v13394_v25 }
0x1970   :  { %v9853_v18 = vpop.eup %9852  ;;  %v5630_v12 = vmul.f32 %v9851_v47, %v13370_v37 }
0x1971   :  { %v5605_v1 = vpop.xlane.xlu1 %5604  ;;  %v5632_v31 = vmul.f32 %v9853_v18, %v13391_v17  ;;  %v9855_v36 = vpop.eup %9854 }
0x1972   :  { %v5645_v9 = vpack.c.bf16 %v5631_v0, %v5630_v12  ;;  %v5635_v60 = vmul.f32 %v9855_v36, %v13397_v39 }
0x1973   :  { %v5646_v35 = vpack.c.bf16 %v5633_v8, %v5632_v31 }
0x1977   :  { %v9857_v27 = vpop.eup %9856 }
0x1978   :  { %v9859_v37 = vpop.eup %9858  ;;  %v5636_v4 = vmul.f32 %v9857_v27, %v13406_v52 }
0x1997   :  { %v5611_v30 = vpop.xlane.xlu1 %5610 }
0x199b   :  { %v6099_v54 = vpop.xlane.xlu1 %6098  ;;  %v5607_v34 = vpop.xlane.xlu0 %5606 }
0x199c   :  { %9864 = vrcp.f32 %v5607_v34  ;;  %v6130_v25 = vsub.f32 %v13424_v55, %v6099_v54  ;;  %v5634_v55 = vmul.f32 %v9859_v37, %v13384_v15 }
0x199d   :  { %9866 = vrcp.f32 %v5601_v19  ;;  %v9861_v19 = vpop.eup %9860 }
0x199e   :  { %9868 = vrcp.f32 %v5605_v1  ;;  %v6146_v34 = vmul.f32 1.442695, %v6130_v25  ;;  %v5647_v54 = vpack.c.bf16 %v5635_v60, %v5634_v55  ;;  %v9863_v47 = vpop.eup %9862 }
0x199f   :  { %v6101_v29 = vpop.xlane.xlu1 %6100  ;;  %v5653_v59 = vpop.permute.xlu0 %5652  ;;  %9870 = vrcp.f32 %v5611_v30  ;;  %v5639_v8 = vmul.f32 %v9863_v47, %v13412_v20 }
0x19a0   :  { %9051 = vmatprep.subr.bf16.mxu0 %v5653_v59  ;;  %9872 = vrcp.f32 %v5609_v51  ;;  %v6131_v18 = vsub.f32 %v13431_v40, %v6101_v29 }
0x19a1   :  { %9052 = vmatpush3.bf16.msra.mxu0 %v5653_v59 }
0x19a2   :  { %9275 = vmatprep.subr.msk.bf16.mxu0 %vm1546_vm2, %v340_v43 }
0x19a3   :  { %v6103_v49 = vpop.xlane.xlu1 %6102 }
0x19a4   :  { %v6132_v50 = vsub.f32 %v13435_v10, %v6103_v49  ;;  %9054 = vmatmul.mubr.bf16.vlgmr.msra.gmra.mxu0 %v5645_v9  ;;  %v5637_v10 = vmul.f32 %v9861_v19, %v13403_v3 }
0x19a5   :  { %9057 = vmatprep.mubr.bf16.mxu0 %v5646_v35  ;;  %9070 = vmatpush3.bf16.msra.mxu0 %v5806_v21 }
0x19a6   :  { %v6150_v17 = vmul.f32 1.442695, %v6132_v50  ;;  %v5648_v0 = vpack.c.bf16 %v5637_v10, %v5636_v4 }
0x19a7   :  { %v6105_v1 = vpop.xlane.xlu1 %6104 }
0x19a8   :  { %9874 = vpow2.f32 %v6150_v17  ;;  %v6133_v24 = vsub.f32 %v13439_v56, %v6105_v1  ;;  %v6148_v56 = vmul.f32 1.442695, %v6131_v18 }
0x19a9   :  { %v9865_v59 = vpop.eup %9864  ;;  %9876 = vpow2.f32 %v6146_v34 }
0x19aa   :  { %v6152_v39 = vmul.f32 1.442695, %v6133_v24  ;;  %v9867_v51 = vpop.eup %9866  ;;  %v5641_v15 = vmul.f32 %v9865_v59, %v13426_v41 }
0x19ab   :  { %v6107_v30 = vpop.xlane.xlu1 %6106  ;;  %v9869_v52 = vpop.eup %9868  ;;  %v5638_v29 = vmul.f32 %v9867_v51, %v13400_v46 }
0x19ac   :  { %9058 = vmatmul.mubr.bf16.gmra.mxu0 %v5647_v54  ;;  %9878 = vpow2.f32 %v6152_v39  ;;  %v6134_v3 = vsub.f32 %v13443_v22, %v6107_v30  ;;  %v5640_v12 = vmul.f32 %v9869_v52, %v13415_v42  ;;  %v9871_v21 = vpop.eup %9870 }
0x19ad   :  { %9061 = vmatprep.mubr.bf16.mxu0 %v5648_v0  ;;  %v5649_v9 = vpack.c.bf16 %v5639_v8, %v5638_v29  ;;  %9880 = vpow2.f32 %v6148_v56  ;;  %v9873_v20 = vpop.eup %9872  ;;  %v5643_v46 = vmul.f32 %v9871_v21, %v13420_v11  ;;  %v13591_v21 = vpop.f32.mrf.mxu0 }
0x19ae   :  { %v5650_v49 = vpack.c.bf16 %v5641_v15, %v5640_v12  ;;  %v6154_v35 = vmul.f32 1.442695, %v6134_v3 }
0x19af   :  { %v6111_v43 = vpop.xlane.xlu1 %6110 }
0x19b0   :  { %v6136_v40 = vsub.f32 %v13447_v57, %v6111_v43  ;;  %v5642_v57 = vmul.f32 %v9873_v20, %v13409_v32 }
0x19b2   :  { %v6158_v31 = vmul.f32 1.442695, %v6136_v40  ;;  %v5651_v50 = vpack.c.bf16 %v5643_v46, %v5642_v57 }
0x19b3   :  { %v6113_v36 = vpop.xlane.xlu1 %6112 }
0x19b4   :  { %9882 = vpow2.f32 %v6158_v31  ;;  %v6137_v41 = vsub.f32 %v13451_v7, %v6113_v36  ;;  %9062 = vmatmul.mubr.bf16.gmra.mxu0 %v5649_v9  ;;  %v13593_v36 = vpop.f32.mrf.mxu0 }
0x19b5   :  { %v13530_v27 = vpop.eup %9874  ;;  %9065 = vmatprep.mubr.bf16.mxu0 %v5650_v49  ;;  %9884 = vpow2.f32 %v6154_v35 }
0x19b6   :  { %6182 = vadd.xlane.f32.xlu1 %v13530_v27  ;;  %v6160_v22 = vmul.f32 1.442695, %v6137_v41  ;;  %v13535_v25 = vpop.eup %9876  ;;  %v13595_v49 = vpop.f32.mrf.mxu0 }
0x19b7   :  { %v6115_v42 = vpop.xlane.xlu1 %6114 }
0x19b8   :  { %9886 = vpow2.f32 %v6160_v22  ;;  %v6138_v11 = vsub.f32 %v13457_v44, %v6115_v42  ;;  %v13597_v20 = vpop.f32.mrf.mxu0 }
0x19b9   :  { %v13538_v7 = vpop.eup %9878 }
0x19ba   :  { %6178 = vadd.xlane.f32.xlu1 %v13535_v25  ;;  %v13541_v17 = vpop.eup %9880  ;;  %v6162_v34 = vmul.f32 1.442695, %v6138_v11  ;;  %v13599_v35 = vpop.f32.mrf.mxu0 }
0x19bb   :  { %v6117_v37 = vpop.xlane.xlu1 %6116 }
0x19bc   :  { %9066 = vmatmul.mubr.bf16.gmra.mxu0 %v5651_v50  ;;  %v6139_v39 = vsub.f32 %v13461_v13, %v6117_v37  ;;  %v13601_v41 = vpop.f32.mrf.mxu0 }
0x19be   :  { %6184 = vadd.xlane.f32.xlu1 %v13538_v7  ;;  %v13603_v46 = vpop.f32.mrf.mxu0 }
0x19bf   :  { %v6119_v19 = vpop.xlane.xlu1 %6118 }
0x19c0   :  { %v6140_v60 = vsub.f32 %v13465_v38, %v6119_v19  ;;  %v13605_v42 = vpop.f32.mrf.mxu0 }
0x19c1   :  { %v13545_v32 = vpop.eup %9882 }
0x19c2   :  { %v6166_v1 = vmul.f32 1.442695, %v6140_v60  ;;  %6180 = vadd.xlane.f32.xlu1 %v13541_v17  ;;  %6190 = vadd.xlane.f32.xlu0 %v13545_v32  ;;  %v13550_v55 = vpop.eup %9884  ;;  %v13607_v22 = vpop.f32.mrf.mxu0 }
0x19c3   :  { %v6121_v4 = vpop.xlane.xlu1 %6120 }
0x19c4   :  { %9888 = vpow2.f32 %v6166_v1  ;;  %v6141_v24 = vsub.f32 %v13469_v2, %v6121_v4 }
0x19c5   :  { %9890 = vpow2.f32 %v6162_v34  ;;  %v13553_v38 = vpop.eup %9886 }
0x19c6   :  { %6186 = vadd.xlane.f32.xlu0 %v13550_v55  ;;  %v6168_v44 = vmul.f32 1.442695, %v6141_v24 }
0x19c7   :  { %v6123_v10 = vpop.xlane.xlu1 %6122 }
0x19c8   :  { %9892 = vpow2.f32 %v6168_v44  ;;  %v6142_v13 = vsub.f32 %v13473_v23, %v6123_v10 }
0x19ca   :  { %6192 = vadd.xlane.f32.xlu0 %v13553_v38  ;;  %v6170_v29 = vmul.f32 1.442695, %v6142_v13 }
0x19cb   :  { %v6125_v54 = vpop.xlane.xlu1 %6124 }
0x19cc   :  { %v6143_v47 = vsub.f32 %v13477_v5, %v6125_v54  ;;  %v6164_v5 = vmul.f32 1.442695, %v6139_v39 }
0x19ce   :  { %v6172_v18 = vmul.f32 1.442695, %v6143_v47 }
0x19cf   :  { %v6129_v30 = vpop.xlane.xlu1 %6128 }
0x19d0   :  { %9894 = vpow2.f32 %v6172_v18  ;;  %v6145_v2 = vsub.f32 %v13481_v63, %v6129_v30  ;;  %v6109_v0 = vpop.xlane.xlu0 %6108 }
0x19d1   :  { %v13558_v59 = vpop.eup %9888  ;;  %v6135_v51 = vsub.f32 %v13484_v61, %v6109_v0 }
0x19d2   :  { %v6176_v52 = vmul.f32 1.442695, %v6145_v2  ;;  %6198 = vadd.xlane.f32.xlu0 %v13558_v59  ;;  %v13563_v43 = vpop.eup %9890 }
0x19d3   :  { %v6156_v8 = vmul.f32 1.442695, %v6135_v51  ;;  %v6263_v57 = vpop.permute.xlu1 %6262 }
0x19d4   :  { %9896 = vpow2.f32 %v6176_v52  ;;  %v6127_v56 = vpop.xlane.xlu0 %6126 }
0x19d5   :  { %9898 = vpow2.f32 %v6156_v8  ;;  %v6144_v15 = vsub.f32 %v13489_v33, %v6127_v56  ;;  %v13567_v3 = vpop.eup %9892 }
0x19d6   :  { %6194 = vadd.xlane.f32.xlu0 %v13563_v43  ;;  %9900 = vpow2.f32 %v6164_v5 }
0x19d7   :  { %v6174_v61 = vmul.f32 1.442695, %v6144_v15  ;;  %v13611_v50 = vpop.permute.xlu1 %6256 }
0x19d8   :  { %v6265_v63 = vpop.permute.xlu0 %6264 }
0x19d9   :  { %9119 = vmatprep.subr.bf16.mxu0 %v6265_v63  ;;  %9902 = vpow2.f32 %v6174_v61 }
0x19da   :  { %6200 = vadd.xlane.f32.xlu0 %v13567_v3  ;;  %9904 = vpow2.f32 %v6170_v29 }
0x19db   :  { %v13617_v11 = vpop.permute.xlu1 %6254 }
0x19dc   :  { %v6261_v1 = vpop.permute.xlu0 %6260 }
0x19dd   :  { %v13571_v40 = vpop.eup %9894 }
0x19de   :  { %6204 = vadd.xlane.f32.xlu0 %v13571_v40 }
0x19e0   :  { %v6259_v24 = vpop.permute.xlu0 %6258 }
0x19e1   :  { %v13574_v12 = vpop.eup %9896 }
0x19e2   :  { %v13576_v33 = vpop.eup %9898  ;;  %6208 = vadd.xlane.f32.xlu0 %v13574_v12 }
0x19e3   :  { %6188 = vadd.xlane.f32.xlu1 %v13576_v33  ;;  %v13580_v23 = vpop.eup %9900 }
0x19e4   :  { %v13627_v47 = vpop.permute.xlu0 %6252 }
0x19e6   :  { %v13583_v31 = vpop.eup %9902 }
0x19e7   :  { %6196 = vadd.xlane.f32.xlu1 %v13580_v23  ;;  %v13586_v9 = vpop.eup %9904 }
0x19eb   :  { %6206 = vadd.xlane.f32.xlu1 %v13583_v31 }
0x19ef   :  { %6202 = vadd.xlane.f32.xlu1 %v13586_v9 }
0x1a00   :  { %6250 = vrot.lane.b32.xlu1 %v12400_v45, %s10422_s13  ;;  %v13609_v45 = vpop.f32.mrf.mxu0 }
0x1a02   :  { %v13613_v37 = vpop.f32.mrf.mxu0 }
0x1a04   :  { %v13615_v19 = vpop.f32.mrf.mxu0 }
0x1a06   :  { %v13619_v60 = vpop.f32.mrf.mxu0 }
0x1a07   :  { %14576 = vst [vmem:[#allocation71_spill] sm:$0xff] %v13619_v60 }
0x1a08   :  { %v13621_v34 = vpop.f32.mrf.mxu0 }
0x1a09   :  { %14577 = vst [vmem:[#allocation72_spill] sm:$0xff] %v13621_v34 }
0x1a0a   :  { %v13623_v10 = vpop.f32.mrf.mxu0 }
0x1a0b   :  { %14578 = vst [vmem:[#allocation73_spill] sm:$0xff] %v13623_v10 }
0x1a0c   :  { %v13625_v54 = vpop.f32.mrf.mxu0 }
0x1a0d   :  { %14579 = vst [vmem:[#allocation74_spill] sm:$0xff] %v13625_v54 }
0x1a3f   :  { %v6183_v4 = vpop.xlane.xlu1 %6182 }
0x1a43   :  { %v6179_v44 = vpop.xlane.xlu1 %6178 }
0x1a47   :  { %v6185_v30 = vpop.xlane.xlu1 %6184 }
0x1a4b   :  { %v6191_v2 = vpop.xlane.xlu0 %6190  ;;  %v6181_v52 = vpop.xlane.xlu1 %6180 }
0x1a4c   :  { %9906 = vrcp.f32 %v6181_v52 }
0x1a4d   :  { %9908 = vrcp.f32 %v6179_v44 }
0x1a4e   :  { %9910 = vrcp.f32 %v6185_v30 }
0x1a4f   :  { %v6187_v56 = vpop.xlane.xlu0 %6186 }
0x1a53   :  { %v6193_v54 = vpop.xlane.xlu0 %6192 }
0x1a64   :  { %v9055_v18 = vpop.f32.mrf.mxu0 }
0x1a66   :  { %v5710_v0 = vpop.f32.mrf.mxu0 }
0x1a68   :  { %v9056_v39 = vpop.f32.mrf.mxu0 }
0x1a69   :  { %v5774_v5 = vpack.c.bf16 %v9056_v39, %v9055_v18  ;;  %v6199_v39 = vpop.xlane.xlu0 %6198 }
0x1a6a   :  { %v5713_v51 = vpop.f32.mrf.mxu0 }
0x1a6b   :  { %v5773_v8 = vpack.c.bf16 %v5713_v51, %v5710_v0 }
0x1a6c   :  { %v9059_v15 = vpop.f32.mrf.mxu0  ;;  %v6189_v61 = vpop.xlane.xlu1 %6188 }
0x1a6d   :  { %9071 = vmatprep.mubr.msk.bf16.mxu0 %vm629_vm1, %v5773_v8  ;;  %9912 = vrcp.f32 %v6189_v61  ;;  %v6195_v44 = vpop.xlane.xlu0 %6194 }
0x1a6e   :  { %v5726_v13 = vpop.f32.mrf.mxu0  ;;  %9072 = vmatmul.mubr.msk.bf16.vlgmr.msra.gmra.mxu0 %vm629_vm1, %v5774_v5  ;;  %9914 = vrcp.f32 %v6183_v4  ;;  %v9907_v5 = vpop.eup %9906 }
0x1a6f   :  { %9120 = vmatpush3.bf16.msra.mxu0 %v6265_v63  ;;  %9916 = vrcp.f32 %v6187_v56  ;;  %v6227_v30 = vmul.f32 %v9907_v5, %v13541_v17 }
0x1a70   :  { %9121 = vmatprep.subr.bf16.mxu0 %v6263_v57  ;;  %v9060_v29 = vpop.f32.mrf.mxu0  ;;  %v6197_v18 = vpop.xlane.xlu1 %6196  ;;  %9918 = vrcp.f32 %v6193_v54 }
0x1a71   :  { %v5776_v60 = vpack.c.bf16 %v9060_v29, %v9059_v15  ;;  %9920 = vrcp.f32 %v6197_v18  ;;  %v6201_v56 = vpop.xlane.xlu0 %6200 }
0x1a72   :  { %v5729_v10 = vpop.f32.mrf.mxu0  ;;  %9922 = vrcp.f32 %v6191_v2 }
0x1a73   :  { %v5775_v34 = vpack.c.bf16 %v5729_v10, %v5726_v13  ;;  %9122 = vmatpush3.bf16.msra.mxu0 %v6263_v57  ;;  %9924 = vrcp.f32 %v6195_v44 }
0x1a74   :  { %9123 = vmatprep.subr.bf16.mxu0 %v6261_v1  ;;  %v9063_v0 = vpop.f32.mrf.mxu0  ;;  %v6207_v10 = vpop.xlane.xlu1 %6206  ;;  %9926 = vrcp.f32 %v6201_v56 }
0x1a75   :  { %9075 = vmatprep.mubr.msk.bf16.mxu0 %vm629_vm1, %v5775_v34 }
0x1a76   :  { %v5742_v51 = vpop.f32.mrf.mxu0  ;;  %9076 = vmatmul.mubr.msk.bf16.gmra.mxu0 %vm629_vm1, %v5776_v60 }
0x1a77   :  { %9124 = vmatpush3.bf16.msra.mxu0 %v6261_v1  ;;  %v9909_v1 = vpop.eup %9908 }
0x1a78   :  { %9125 = vmatprep.subr.bf16.mxu0 %v6259_v24  ;;  %v9064_v63 = vpop.f32.mrf.mxu0  ;;  %v6226_v61 = vmul.f32 %v9909_v1, %v13535_v25  ;;  %v6205_v25 = vpop.xlane.xlu0 %6204 }
0x1a79   :  { %v5778_v8 = vpack.c.bf16 %v9064_v63, %v9063_v0 }
0x1a7a   :  { %v5745_v52 = vpop.f32.mrf.mxu0  ;;  %v6242_v54 = vpack.c.bf16 %v6227_v30, %v6226_v61 }
0x1a7b   :  { %v5777_v57 = vpack.c.bf16 %v5745_v52, %v5742_v51  ;;  %9126 = vmatpush3.bf16.msra.mxu0 %v6259_v24  ;;  %v6203_v24 = vpop.xlane.xlu1 %6202 }
0x1a7c   :  { %9127 = vmatprep.subr.bf16.mxu0 %v13611_v50  ;;  %v9067_v34 = vpop.f32.mrf.mxu0  ;;  %9928 = vrcp.f32 %v6203_v24 }
0x1a7d   :  { %9079 = vmatprep.mubr.msk.bf16.mxu0 %vm629_vm1, %v5777_v57  ;;  %9930 = vrcp.f32 %v6199_v39 }
0x1a7e   :  { %v5758_v60 = vpop.f32.mrf.mxu0  ;;  %9080 = vmatmul.mubr.msk.bf16.gmra.mxu0 %vm629_vm1, %v5778_v8  ;;  %9932 = vrcp.f32 %v6205_v25 }
0x1a7f   :  { %9128 = vmatpush3.bf16.msra.mxu0 %v13611_v50  ;;  %v9911_v50 = vpop.eup %9910  ;;  %v6251_v2 = vpop.permute.xlu1 %6250  ;;  %9934 = vrcp.f32 %v6207_v10 }
0x1a80   :  { %9129 = vmatprep.subr.bf16.mxu0 %v13617_v11  ;;  %v9068_v4 = vpop.f32.mrf.mxu0  ;;  %v9913_v0 = vpop.eup %9912 }
0x1a81   :  { %v5780_v29 = vpack.c.bf16 %v9068_v4, %v9067_v34  ;;  %v9915_v17 = vpop.eup %9914  ;;  %v6231_v51 = vmul.f32 %v9913_v0, %v13576_v33  ;;  %v341_v0 = vld [vmem:[%s14568_s10 + $0xc] sm:$0xf] }
0x1a82   :  { %v5761_v15 = vpop.f32.mrf.mxu0  ;;  %v9917_v18 = vpop.eup %9916  ;;  %v6228_v63 = vmul.f32 %v9915_v17, %v13530_v27 }
0x1a83   :  { %v5779_v13 = vpack.c.bf16 %v5761_v15, %v5758_v60  ;;  %9130 = vmatpush3.bf16.msra.mxu0 %v13617_v11  ;;  %v6229_v11 = vmul.f32 %v9911_v50, %v13538_v7  ;;  %v6230_v52 = vmul.f32 %v9917_v18, %v13550_v55  ;;  %v9919_v44 = vpop.eup %9918  ;;  %v6209_v7 = vpop.xlane.xlu0 %6208 }
0x1a84   :  { %9131 = vmatprep.subr.bf16.mxu0 %v13627_v47  ;;  %v9921_v8 = vpop.eup %9920  ;;  %v6233_v60 = vmul.f32 %v9919_v44, %v13553_v38  ;;  %9936 = vrcp.f32 %v6209_v7 }
0x1a85   :  { %9083 = vmatprep.mubr.msk.bf16.mxu0 %vm629_vm1, %v5779_v13  ;;  %v6243_v57 = vpack.c.bf16 %v6229_v11, %v6228_v63  ;;  %v9923_v34 = vpop.eup %9922  ;;  %v6235_v33 = vmul.f32 %v9921_v8, %v13580_v23  ;;  %v5264_v11 = vadd.f32 %v13597_v20, %v13230_v28  ;;  %v5280_v20 = vadd.f32 %v13605_v42, %v13238_v48  ;;  %v14582_v42 = vld [vmem:[#allocation66_spill] sm:$0xff] }
0x1a86   :  { %9084 = vmatmul.mubr.msk.bf16.gmra.mxu0 %vm629_vm1, %v5780_v29  ;;  %v9925_v5 = vpop.eup %9924  ;;  %v6232_v27 = vmul.f32 %v9923_v34, %v13545_v32 }
0x1a87   :  { %9132 = vmatpush3.bf16.msra.mxu0 %v13627_v47  ;;  %9135 = vmatprep.mubr.bf16.mxu0 %v6242_v54  ;;  %v6244_v47 = vpack.c.bf16 %v6231_v51, %v6230_v52  ;;  %v6234_v39 = vmul.f32 %v9925_v5, %v13563_v43  ;;  %v9927_v1 = vpop.eup %9926  ;;  %v5296_v5 = vadd.f32 %v13615_v19, %v14582_v42 }
0x1a88   :  { %9133 = vmatprep.subr.bf16.mxu0 %v6251_v2  ;;  %v6245_v55 = vpack.c.bf16 %v6233_v60, %v6232_v27  ;;  %v6237_v10 = vmul.f32 %v9927_v1, %v13567_v3  ;;  %v6404_v3 = vsel %vm1546_vm2, %v341_v0, 0  ;;  %v14586_v1 = vld [vmem:[#allocation72_spill] sm:$0xff] }
0x1a89   :  { %v6246_v4 = vpack.c.bf16 %v6235_v33, %v6234_v39  ;;  %v9929_v24 = vpop.eup %9928  ;;  %v14584_v33 = vld [vmem:[#allocation71_spill] sm:$0xff] }
0x1a8a   :  { %v9931_v30 = vpop.eup %9930  ;;  %v6238_v38 = vmul.f32 %v9929_v24, %v13586_v9  ;;  %v5261_v9 = vadd.f32 %v13593_v36, %v13226_v62  ;;  %v5277_v36 = vadd.f32 %v13601_v41, %v13234_v58  ;;  %v14580_v41 = vld [vmem:[#allocation64_spill] sm:$0xff] }
0x1a8b   :  { %9134 = vmatpush3.bf16.msra.mxu0 %v6251_v2  ;;  %v9933_v56 = vpop.eup %9932  ;;  %v6236_v23 = vmul.f32 %v9931_v30, %v13558_v59  ;;  %v5269_v59 = vadd.f32 %v13591_v21, %v13224_v26  ;;  %v5285_v26 = vadd.f32 %v13599_v35, %v13232_v6  ;;  %v5301_v35 = vadd.f32 %v13607_v22, %v13240_v53  ;;  %v14583_v22 = vld [vmem:[#allocation67_spill] sm:$0xff]  ;;  %v14587_v30 = vld [vmem:[#allocation69_spill] sm:$0xff] }
0x1a8c   :  { %v6239_v15 = vmul.f32 %v9933_v56, %v13571_v40  ;;  %v9935_v13 = vpop.eup %9934  ;;  %9284 = vmatprep.subr.msk.bf16.mxu0 %vm1546_vm2, %v341_v0  ;;  %v5317_v27 = vadd.f32 %v14584_v33, %v14583_v22  ;;  %v14588_v56 = vld [vmem:[#allocation73_spill] sm:$0xff]  ;;  %v14592_v33 = vld [vmem:[#allocation51_spill] sm:$0xff] }
0x1a8d   :  { %v6247_v32 = vpack.c.bf16 %v6237_v10, %v6236_v23  ;;  %v6240_v29 = vmul.f32 %v9935_v13, %v13583_v31  ;;  %v5320_v10 = vadd.f32 %v14588_v56, %v14587_v30  ;;  %v14589_v23 = vld [vmem:[#allocation70_spill] sm:$0xff] }
0x1a8e   :  { %9136 = vmatmul.mubr.bf16.vlgmr.msra.gmra.mxu0 %v6243_v57  ;;  %v6248_v43 = vpack.c.bf16 %v6239_v15, %v6238_v38  ;;  %v14590_v15 = vld [vmem:[#allocation74_spill] sm:$0xff] }
0x1a8f   :  { %9139 = vmatprep.mubr.bf16.mxu0 %v6244_v47  ;;  %9152 = vmatpush3.bf16.msra.mxu0 %v6404_v3  ;;  %v5293_v47 = vadd.f32 %v13609_v45, %v14580_v41 }
0x1a91   :  { %v9937_v61 = vpop.eup %9936 }
0x1a92   :  { %v6241_v50 = vmul.f32 %v9937_v61, %v13574_v12  ;;  %v5272_v12 = vadd.f32 %v13595_v49, %v13228_v16  ;;  %v5288_v49 = vadd.f32 %v13603_v46, %v13236_v14  ;;  %v14581_v46 = vld [vmem:[#allocation65_spill] sm:$0xff] }
0x1a93   :  { %v5304_v34 = vadd.f32 %v13613_v37, %v14581_v46 }
0x1a94   :  { %v6249_v54 = vpack.c.bf16 %v6241_v50, %v6240_v29 }
0x1a96   :  { %9140 = vmatmul.mubr.bf16.gmra.mxu0 %v6245_v55  ;;  %v14585_v55 = vld [vmem:[#allocation68_spill] sm:$0xff] }
0x1a97   :  { %9143 = vmatprep.mubr.bf16.mxu0 %v6246_v4  ;;  %v5309_v4 = vadd.f32 %v14586_v1, %v14585_v55 }
0x1a9e   :  { %9144 = vmatmul.mubr.bf16.gmra.mxu0 %v6247_v32  ;;  %v5312_v32 = vadd.f32 %v14590_v15, %v14589_v23  ;;  %v14594_v23 = vld [vmem:[#allocation53_spill] sm:$0xff] }
0x1a9f   :  { %9147 = vmatprep.mubr.bf16.mxu0 %v6248_v43 }
0x1aa6   :  { %9148 = vmatmul.mubr.bf16.gmra.mxu0 %v6249_v54 }
0x1b2e   :  { %v9073_v40 = vpop.f32.mrf.mxu0 }
0x1b2f   :  { %v13666_v17 = vadd.f32 %v9073_v40, %v5269_v59 }
0x1b30   :  { %v5842_v31 = vpop.f32.mrf.mxu0 }
0x1b31   :  { %v13670_v2 = vadd.f32 %v5842_v31, %v5261_v9 }
0x1b32   :  { %v9074_v18 = vpop.f32.mrf.mxu0 }
0x1b33   :  { %v13674_v25 = vadd.f32 %v9074_v18, %v5272_v12 }
0x1b34   :  { %v5845_v51 = vpop.f32.mrf.mxu0 }
0x1b35   :  { %v13678_v21 = vadd.f32 %v5845_v51, %v5264_v11 }
0x1b36   :  { %v9077_v62 = vpop.f32.mrf.mxu0 }
0x1b37   :  { %v13682_v63 = vadd.f32 %v9077_v62, %v5285_v26 }
0x1b38   :  { %v5858_v16 = vpop.f32.mrf.mxu0 }
0x1b39   :  { %v13686_v52 = vadd.f32 %v5858_v16, %v5277_v36 }
0x1b3a   :  { %v9078_v28 = vpop.f32.mrf.mxu0 }
0x1b3b   :  { %v13690_v57 = vadd.f32 %v9078_v28, %v5288_v49 }
0x1b3c   :  { %v5861_v6 = vpop.f32.mrf.mxu0 }
0x1b3d   :  { %v13694_v44 = vadd.f32 %v5861_v6, %v5280_v20 }
0x1b3e   :  { %v9081_v58 = vpop.f32.mrf.mxu0 }
0x1b3f   :  { %v13698_v8 = vadd.f32 %v9081_v58, %v5301_v35 }
0x1b40   :  { %v5874_v14 = vpop.f32.mrf.mxu0 }
0x1b41   :  { %v13702_v7 = vadd.f32 %v5874_v14, %v5293_v47  ;;  %v13735_v47 = vld [vmem:[%s14591_s11] ss:$0 sm:$0xff] }
0x1b42   :  { %v9082_v48 = vpop.f32.mrf.mxu0 }
0x1b43   :  { %v13706_v60 = vadd.f32 %v9082_v48, %v5304_v34 }
0x1b44   :  { %v5877_v53 = vpop.f32.mrf.mxu0 }
0x1b45   :  { %v13710_v39 = vadd.f32 %v5877_v53, %v5296_v5 }
0x1b46   :  { %v9085_v45 = vpop.f32.mrf.mxu0 }
0x1b47   :  { %v13714_v24 = vadd.f32 %v9085_v45, %v5317_v27 }
0x1b48   :  { %v5890_v37 = vpop.f32.mrf.mxu0 }
0x1b49   :  { %v13718_v38 = vadd.f32 %v5890_v37, %v5309_v4  ;;  %v14593_v4 = vld [vmem:[#allocation50_spill] sm:$0xff] }
0x1b4a   :  { %v9086_v19 = vpop.f32.mrf.mxu0 }
0x1b4b   :  { %v13722_v13 = vadd.f32 %v9086_v19, %v5320_v10 }
0x1b4c   :  { %v5893_v43 = vpop.f32.mrf.mxu0 }
0x1b4d   :  { %v13724_v61 = vadd.f32 %v5893_v43, %v5312_v32 }
0x1b4e   :  { %v9137_v29 = vpop.f32.mrf.mxu0 }
0x1b50   :  { %v6308_v50 = vpop.f32.mrf.mxu0 }
0x1b52   :  { %v9138_v54 = vpop.f32.mrf.mxu0 }
0x1b53   :  { %v6372_v59 = vpack.c.bf16 %v9138_v54, %v9137_v29  ;;  %v14595_v54 = vld [vmem:[#allocation54_spill] sm:$0xff] }
0x1b54   :  { %v6311_v0 = vpop.f32.mrf.mxu0 }
0x1b55   :  { %v6371_v3 = vpack.c.bf16 %v6311_v0, %v6308_v50  ;;  %v14596_v0 = vld [vmem:[#allocation49_spill] sm:$0xff] }
0x1b56   :  { %v9141_v40 = vpop.f32.mrf.mxu0 }
0x1b57   :  { %9153 = vmatprep.mubr.msk.bf16.mxu0 %vm629_vm1, %v6371_v3 }
0x1b58   :  { %v6324_v9 = vpop.f32.mrf.mxu0  ;;  %9154 = vmatmul.mubr.msk.bf16.vlgmr.msra.gmra.mxu0 %vm629_vm1, %v6372_v59 }
0x1b5a   :  { %v9142_v31 = vpop.f32.mrf.mxu0 }
0x1b5b   :  { %v6374_v11 = vpack.c.bf16 %v9142_v31, %v9141_v40 }
0x1b5c   :  { %v6327_v12 = vpop.f32.mrf.mxu0 }
0x1b5d   :  { %v6373_v18 = vpack.c.bf16 %v6327_v12, %v6324_v9 }
0x1b5e   :  { %v9145_v51 = vpop.f32.mrf.mxu0 }
0x1b5f   :  { %9157 = vmatprep.mubr.msk.bf16.mxu0 %vm629_vm1, %v6373_v18  ;;  %v14597_v18 = vld [vmem:[#allocation57_spill] sm:$0xff] }
0x1b60   :  { %v6340_v26 = vpop.f32.mrf.mxu0  ;;  %9158 = vmatmul.mubr.msk.bf16.gmra.mxu0 %vm629_vm1, %v6374_v11 }
0x1b62   :  { %v9146_v62 = vpop.f32.mrf.mxu0 }
0x1b63   :  { %v6376_v49 = vpack.c.bf16 %v9146_v62, %v9145_v51 }
0x1b64   :  { %v6343_v36 = vpop.f32.mrf.mxu0 }
0x1b65   :  { %v6375_v16 = vpack.c.bf16 %v6343_v36, %v6340_v26 }
0x1b66   :  { %v9149_v28 = vpop.f32.mrf.mxu0 }
0x1b67   :  { %9161 = vmatprep.mubr.msk.bf16.mxu0 %vm629_vm1, %v6375_v16 }
0x1b68   :  { %v6356_v20 = vpop.f32.mrf.mxu0  ;;  %9162 = vmatmul.mubr.msk.bf16.gmra.mxu0 %vm629_vm1, %v6376_v49  ;;  %v14598_v49 = vld [vmem:[#allocation58_spill] sm:$0xff] }
0x1b6a   :  { %v9150_v6 = vpop.f32.mrf.mxu0 }
0x1b6b   :  { %v6378_v41 = vpack.c.bf16 %v9150_v6, %v9149_v28 }
0x1b6c   :  { %v6359_v35 = vpop.f32.mrf.mxu0 }
0x1b6d   :  { %v6377_v58 = vpack.c.bf16 %v6359_v35, %v6356_v20 }
0x1b6f   :  { %9165 = vmatprep.mubr.msk.bf16.mxu0 %vm629_vm1, %v6377_v58 }
0x1b70   :  { %9166 = vmatmul.mubr.msk.bf16.gmra.mxu0 %vm629_vm1, %v6378_v41 }
0x1c18   :  { %v9155_v14 = vpop.f32.mrf.mxu0 }
0x1c19   :  { %v6505_v46 = vadd.f32 %v9155_v14, %v13666_v17 }
0x1c1a   :  { %v6440_v34 = vpop.f32.mrf.mxu0 }
0x1c1b   :  { %v6527_v48 = vadd.f32 %v13735_v47, %v6505_v46  ;;  %v6503_v42 = vadd.f32 %v6440_v34, %v13670_v2  ;;  %v14600_v46 = vld [vmem:[#allocation62_spill] sm:$0xff] }
0x1c1c   :  { %v9156_v5 = vpop.f32.mrf.mxu0 }
0x1c1d   :  { %v6525_v53 = vadd.f32 %v13735_v47, %v6503_v42  ;;  %v6506_v22 = vadd.f32 %v9156_v5, %v13674_v25  ;;  %v13743_v27 = vadd.f32 %v6527_v48, %v14592_v33  ;;  %v14601_v5 = vld [vmem:[#allocation52_spill] sm:$0xff] }
0x1c1e   :  { %v6443_v45 = vpop.f32.mrf.mxu0 }
0x1c1f   :  { %v6528_v55 = vadd.f32 %v13735_v47, %v6506_v22  ;;  %v6504_v1 = vadd.f32 %v6443_v45, %v13678_v21  ;;  %v6563_v17 = vsel %vm451_vm0, %v13743_v27, 0.0  ;;  %v13750_v37 = vadd.f32 %v6525_v53, %v14593_v4 }
0x1c20   :  { %6564 = vadd.xlane.f32.xlu0 %v6563_v17  ;;  %v9159_v2 = vpop.f32.mrf.mxu0 }
0x1c21   :  { %v6509_v30 = vadd.f32 %v9159_v2, %v13682_v63  ;;  %v6526_v25 = vadd.f32 %v13735_v47, %v6504_v1  ;;  %v6557_v19 = vsel %vm451_vm0, %v13750_v37, 0.0  ;;  %v13758_v21 = vadd.f32 %v6528_v55, %v14594_v23 }
0x1c22   :  { %v6456_v56 = vpop.f32.mrf.mxu0 }
0x1c23   :  { %v6507_v10 = vadd.f32 %v6456_v56, %v13686_v52  ;;  %v6531_v43 = vadd.f32 %v13735_v47, %v6509_v30  ;;  %v6566_v50 = vsel %vm451_vm0, %v13758_v21, 0.0  ;;  %v13769_v3 = vadd.f32 %v6526_v25, %v14596_v0 }
0x1c24   :  { %6558 = vadd.xlane.f32.xlu0 %v6557_v19  ;;  %v9160_v15 = vpop.f32.mrf.mxu0 }
0x1c25   :  { %v6529_v32 = vadd.f32 %v13735_v47, %v6507_v10  ;;  %v6510_v63 = vadd.f32 %v9160_v15, %v13690_v57  ;;  %v6560_v12 = vsel %vm451_vm0, %v13769_v3, 0.0  ;;  %v13778_v11 = vadd.f32 %v6531_v43, %v14597_v18  ;;  %v14603_v10 = vld [vmem:[#allocation56_spill] sm:$0xff] }
0x1c26   :  { %v6459_v29 = vpop.f32.mrf.mxu0 }
0x1c27   :  { %v13766_v52 = vadd.f32 %v6529_v32, %v14595_v54  ;;  %v6532_v31 = vadd.f32 %v13735_v47, %v6510_v63  ;;  %v6508_v57 = vadd.f32 %v6459_v29, %v13694_v44  ;;  %v6575_v16 = vsel %vm451_vm0, %v13778_v11, 0.0  ;;  %v14604_v29 = vld [vmem:[#allocation48_spill] sm:$0xff] }
0x1c28   :  { %6567 = vadd.xlane.f32.xlu0 %v6566_v50  ;;  %v9163_v59 = vpop.f32.mrf.mxu0 }
0x1c29   :  { %v6569_v40 = vsel %vm451_vm0, %v13766_v52, 0.0  ;;  %v6530_v62 = vadd.f32 %v13735_v47, %v6508_v57  ;;  %v6513_v36 = vadd.f32 %v9163_v59, %v13698_v8  ;;  %v13785_v28 = vadd.f32 %v6532_v31, %v14598_v49  ;;  %v14599_v8 = vld [vmem:[#allocation55_spill] sm:$0xff]  ;;  %v14606_v57 = vld [vmem:[#allocation61_spill] sm:$0xff] }
0x1c2a   :  { %6570 = vadd.xlane.f32.xlu1 %v6569_v40  ;;  %v6472_v9 = vpop.f32.mrf.mxu0  ;;  %v14605_v40 = vld [vmem:[#allocation60_spill] sm:$0xff] }
0x1c2b   :  { %v6511_v6 = vadd.f32 %v6472_v9, %v13702_v7  ;;  %v6535_v35 = vadd.f32 %v13735_v47, %v6513_v36  ;;  %v6578_v41 = vsel %vm451_vm0, %v13785_v28, 0.0  ;;  %v13794_v14 = vadd.f32 %v6530_v62, %v14599_v8 }
0x1c2c   :  { %6561 = vadd.xlane.f32.xlu0 %v6560_v12  ;;  %v9164_v51 = vpop.f32.mrf.mxu0 }
0x1c2d   :  { %v6533_v48 = vadd.f32 %v13735_v47, %v6511_v6  ;;  %v6572_v7 = vsel %vm451_vm0, %v13794_v14, 0.0  ;;  %v13806_v53 = vadd.f32 %v6535_v35, %v14601_v5 }
0x1c2e   :  { %v6475_v26 = vpop.f32.mrf.mxu0 }
0x1c2f   :  { %v6512_v55 = vadd.f32 %v6475_v26, %v13710_v39  ;;  %v6587_v1 = vsel %vm451_vm0, %v13806_v53, 0.0 }
0x1c30   :  { %6576 = vadd.xlane.f32.xlu0 %v6575_v16  ;;  %v9167_v44 = vpop.f32.mrf.mxu0 }
0x1c31   :  { %v6517_v20 = vadd.f32 %v9167_v44, %v13714_v24  ;;  %v6514_v24 = vadd.f32 %v9164_v51, %v13706_v60  ;;  %v14602_v60 = vld [vmem:[#allocation59_spill] sm:$0xff]  ;;  %v6534_v30 = vadd.f32 %v13735_v47, %v6512_v55 }
0x1c32   :  { %v6488_v22 = vpop.f32.mrf.mxu0  ;;  %v13813_v17 = vadd.f32 %v6533_v48, %v14602_v60  ;;  %v14607_v51 = vld [vmem:[#allocation63_spill] sm:$0xff] }
0x1c33   :  { %v6539_v58 = vadd.f32 %v13735_v47, %v6517_v20  ;;  %v6536_v45 = vadd.f32 %v13735_v47, %v6514_v24  ;;  %v6515_v56 = vadd.f32 %v6488_v22, %v13718_v38  ;;  %v13827_v63 = vadd.f32 %v6534_v30, %v14604_v29 }
0x1c34   :  { %6579 = vadd.xlane.f32.xlu0 %v6578_v41  ;;  %v9168_v2 = vpop.f32.mrf.mxu0  ;;  %v6581_v25 = vsel %vm451_vm0, %v13813_v17, 0.0 }
0x1c35   :  { %v13797_v34 = vadd.f32 %v6539_v58, %v14600_v46  ;;  %v13820_v19 = vadd.f32 %v6536_v45, %v14603_v10  ;;  %v6537_v39 = vadd.f32 %v13735_v47, %v6515_v56  ;;  %v6518_v38 = vadd.f32 %v9168_v2, %v13722_v13 }
0x1c36   :  { %v6491_v15 = vpop.f32.mrf.mxu0  ;;  %v6584_v59 = vsel %vm451_vm0, %v13827_v63, 0.0 }
0x1c37   :  { %v6599_v42 = vsel %vm451_vm0, %v13797_v34, 0.0  ;;  %v6516_v32 = vadd.f32 %v6491_v15, %v13724_v61  ;;  %v6590_v43 = vsel %vm451_vm0, %v13820_v19, 0.0  ;;  %v13834_v9 = vadd.f32 %v6537_v39, %v14605_v40 }
0x1c38   :  { %6573 = vadd.xlane.f32.xlu0 %v6572_v7  ;;  %6600 = vadd.xlane.f32.xlu1 %v6599_v42  ;;  %v6540_v61 = vadd.f32 %v13735_v47, %v6518_v38 }
0x1c39   :  { %v6538_v50 = vadd.f32 %v13735_v47, %v6516_v32  ;;  %v6593_v31 = vsel %vm451_vm0, %v13834_v9, 0.0 }
0x1c3a   :  { %v13845_v26 = vadd.f32 %v6540_v61, %v14607_v51 }
0x1c3b   :  { %v13840_v12 = vadd.f32 %v6538_v50, %v14606_v57 }
0x1c3c   :  { %6588 = vadd.xlane.f32.xlu0 %v6587_v1  ;;  %v6602_v62 = vsel %vm451_vm0, %v13845_v26, 0.0 }
0x1c3d   :  { %v6596_v13 = vsel %vm451_vm0, %v13840_v12, 0.0 }
0x1c40   :  { %6582 = vadd.xlane.f32.xlu0 %v6581_v25 }
0x1c44   :  { %6591 = vadd.xlane.f32.xlu0 %v6590_v43 }
0x1c48   :  { %6585 = vadd.xlane.f32.xlu0 %v6584_v59 }
0x1c4c   :  { %6594 = vadd.xlane.f32.xlu0 %v6593_v31 }
0x1c50   :  { %6597 = vadd.xlane.f32.xlu0 %v6596_v13 }
0x1c54   :  { %6603 = vadd.xlane.f32.xlu0 %v6602_v62 }
0x1ca9   :  { %v6565_v36 = vpop.xlane.xlu0 %6564 }
0x1caa   :  { %v6607_v47 = vmul.f32 0.03125, %v6565_v36 }
0x1cac   :  { %v13850_v20 = vsub.f32 %v13743_v27, %v6607_v47 }
0x1cad   :  { %v6559_v16 = vpop.xlane.xlu0 %6558 }
0x1cae   :  { %v6605_v44 = vmul.f32 0.03125, %v6559_v16  ;;  %v6639_v42 = vmul.f32 %v13850_v20, %v13850_v20 }
0x1cb0   :  { %v13853_v6 = vsub.f32 %v13750_v37, %v6605_v44  ;;  %v6659_v1 = vsel %vm451_vm0, %v6639_v42, 0.0 }
0x1cb1   :  { %v6568_v35 = vpop.xlane.xlu0 %6567 }
0x1cb2   :  { %v6637_v58 = vmul.f32 %v13853_v6, %v13853_v6  ;;  %v6608_v48 = vmul.f32 0.03125, %v6568_v35 }
0x1cb3   :  { %v6571_v41 = vpop.xlane.xlu1 %6570 }
0x1cb4   :  { %v6609_v24 = vmul.f32 0.03125, %v6571_v41  ;;  %v6653_v7 = vsel %vm451_vm0, %v6637_v58, 0.0  ;;  %v13864_v37 = vsub.f32 %v13758_v21, %v6608_v48 }
0x1cb5   :  { %v6562_v22 = vpop.xlane.xlu0 %6561  ;;  %6654 = vadd.xlane.f32.xlu1 %v6653_v7 }
0x1cb6   :  { %v13861_v27 = vsub.f32 %v13766_v52, %v6609_v24  ;;  %v6606_v45 = vmul.f32 0.03125, %v6562_v22 }
0x1cb8   :  { %v13867_v55 = vsub.f32 %v13769_v3, %v6606_v45  ;;  %v6641_v2 = vmul.f32 %v13861_v27, %v13861_v27  ;;  %v6640_v3 = vmul.f32 %v13864_v37, %v13864_v37 }
0x1cb9   :  { %v6577_v30 = vpop.xlane.xlu0 %6576  ;;  %6660 = vadd.xlane.f32.xlu1 %v6659_v1 }
0x1cba   :  { %v6611_v56 = vmul.f32 0.03125, %v6577_v30  ;;  %v6638_v25 = vmul.f32 %v13867_v55, %v13867_v55  ;;  %v6665_v21 = vsel %vm451_vm0, %v6641_v2, 0.0  ;;  %v6662_v50 = vsel %vm451_vm0, %v6640_v3, 0.0 }
0x1cbc   :  { %v13875_v52 = vsub.f32 %v13778_v11, %v6611_v56  ;;  %v6656_v15 = vsel %vm451_vm0, %v6638_v25, 0.0 }
0x1cbd   :  { %v6580_v39 = vpop.xlane.xlu0 %6579  ;;  %6666 = vadd.xlane.f32.xlu1 %v6665_v21  ;;  %6657 = vadd.xlane.f32.xlu0 %v6656_v15 }
0x1cbe   :  { %v6643_v32 = vmul.f32 %v13875_v52, %v13875_v52  ;;  %v6612_v43 = vmul.f32 0.03125, %v6580_v39 }
0x1cc0   :  { %v6671_v38 = vsel %vm451_vm0, %v6643_v32, 0.0  ;;  %v13886_v61 = vsub.f32 %v13785_v28, %v6612_v43 }
0x1cc1   :  { %v6574_v11 = vpop.xlane.xlu0 %6573  ;;  %6672 = vadd.xlane.f32.xlu1 %v6671_v38  ;;  %6663 = vadd.xlane.f32.xlu0 %v6662_v50  ;;  %v6601_v22 = vpop.xlane.xlu1 %6600 }
0x1cc2   :  { %v6610_v59 = vmul.f32 0.03125, %v6574_v11  ;;  %v6644_v16 = vmul.f32 %v13886_v61, %v13886_v61  ;;  %v6619_v1 = vmul.f32 0.03125, %v6601_v22  ;;  %v9356_v11 = vld [vmem:[#allocation23 + $0x8] sm:$0xff]  }
0x1cc3   :  { %9169 = vmatprep.subr.bf16.mxu1 %v9356_v11 }
0x1cc4   :  { %v13889_v31 = vsub.f32 %v13794_v14, %v6610_v59  ;;  %v6674_v14 = vsel %vm451_vm0, %v6644_v16, 0.0  ;;  %v13918_v15 = vsub.f32 %v13797_v34, %v6619_v1  ;;  %9170 = vmatpush3.bf16.msra.mxu1 %v9356_v11  ;;  %v9357_v16 = vld [vmem:[#allocation23] sm:$0xff]  }
0x1cc5   :  { %v6589_v13 = vpop.xlane.xlu0 %6588  ;;  %9171 = vmatprep.subr.bf16.mxu1 %v9357_v16 }
0x1cc6   :  { %v6642_v62 = vmul.f32 %v13889_v31, %v13889_v31  ;;  %v6615_v36 = vmul.f32 0.03125, %v6589_v13 }
0x1cc8   :  { %v6668_v47 = vsel %vm451_vm0, %v6642_v62, 0.0  ;;  %v13897_v58 = vsub.f32 %v13806_v53, %v6615_v36  ;;  %9172 = vmatpush3.bf16.msra.mxu1 %v9357_v16 }
0x1cc9   :  { %v6583_v44 = vpop.xlane.xlu0 %6582  ;;  %6669 = vadd.xlane.f32.xlu0 %v6668_v47 }
0x1cca   :  { %v6613_v35 = vmul.f32 0.03125, %v6583_v44  ;;  %v6647_v42 = vmul.f32 %v13897_v58, %v13897_v58 }
0x1ccc   :  { %v13900_v28 = vsub.f32 %v13813_v17, %v6613_v35  ;;  %v6683_v30 = vsel %vm451_vm0, %v6647_v42, 0.0 }
0x1ccd   :  { %v6592_v41 = vpop.xlane.xlu0 %6591  ;;  %6675 = vadd.xlane.f32.xlu0 %v6674_v14  ;;  %v9358_v14 = vld [vmem:[%s14608_s9 + $0x18] sm:$0xff]  }
0x1cce   :  { %v6645_v48 = vmul.f32 %v13900_v28, %v13900_v28  ;;  %v6616_v24 = vmul.f32 0.03125, %v6592_v41  ;;  %9189 = vmatprep.subr.bf16.mxu0 %v9358_v14 }
0x1ccf   :  { %9190 = vmatpush3.bf16.msra.mxu0 %v9358_v14 }
0x1cd0   :  { %v6677_v7 = vsel %vm451_vm0, %v6645_v48, 0.0  ;;  %v13909_v17 = vsub.f32 %v13820_v19, %v6616_v24 }
0x1cd1   :  { %v6586_v45 = vpop.xlane.xlu0 %6585  ;;  %6678 = vadd.xlane.f32.xlu1 %v6677_v7 }
0x1cd2   :  { %v6614_v53 = vmul.f32 0.03125, %v6586_v45 }
0x1cd4   :  { %v13912_v2 = vsub.f32 %v13827_v63, %v6614_v53  ;;  %v6648_v63 = vmul.f32 %v13909_v17, %v13909_v17 }
0x1cd5   :  { %6684 = vadd.xlane.f32.xlu1 %v6683_v30  ;;  %v6595_v56 = vpop.xlane.xlu0 %6594 }
0x1cd6   :  { %v6617_v25 = vmul.f32 0.03125, %v6595_v56  ;;  %v6646_v21 = vmul.f32 %v13912_v2, %v13912_v2  ;;  %v6686_v50 = vsel %vm451_vm0, %v6648_v63, 0.0 }
0x1cd8   :  { %v13921_v3 = vsub.f32 %v13834_v9, %v6617_v25  ;;  %v6680_v19 = vsel %vm451_vm0, %v6646_v21, 0.0  ;;  %v6651_v9 = vmul.f32 %v13918_v15, %v13918_v15 }
0x1cd9   :  { %6681 = vadd.xlane.f32.xlu0 %v6680_v19  ;;  %v6598_v39 = vpop.xlane.xlu0 %6597 }
0x1cda   :  { %v6618_v32 = vmul.f32 0.03125, %v6598_v39  ;;  %v6649_v43 = vmul.f32 %v13921_v3, %v13921_v3  ;;  %v6695_v36 = vsel %vm451_vm0, %v6651_v9, 0.0 }
0x1cdc   :  { %v13929_v38 = vsub.f32 %v13840_v12, %v6618_v32  ;;  %v6689_v34 = vsel %vm451_vm0, %v6649_v43, 0.0 }
0x1cdd   :  { %6690 = vadd.xlane.f32.xlu1 %v6689_v34  ;;  %6687 = vadd.xlane.f32.xlu0 %v6686_v50  ;;  %v6604_v59 = vpop.xlane.xlu0 %6603 }
0x1cde   :  { %v6620_v13 = vmul.f32 0.03125, %v6604_v59  ;;  %v6650_v62 = vmul.f32 %v13929_v38, %v13929_v38 }
0x1ce0   :  { %v13938_v12 = vsub.f32 %v13845_v26, %v6620_v13  ;;  %v6692_v47 = vsel %vm451_vm0, %v6650_v62, 0.0  ;;  %v13948_v62 = vld [vmem:[%s14609_s6] ss:$0 sm:$0xff] }
0x1ce1   :  { %6696 = vadd.xlane.f32.xlu1 %v6695_v36  ;;  %6693 = vadd.xlane.f32.xlu0 %v6692_v47 }
0x1ce2   :  { %v6652_v44 = vmul.f32 %v13938_v12, %v13938_v12 }
0x1ce4   :  { %v6698_v35 = vsel %vm451_vm0, %v6652_v44, 0.0 }
0x1ce5   :  { %6699 = vadd.xlane.f32.xlu0 %v6698_v35 }
0x1d3e   :  { %v6655_v26 = vpop.xlane.xlu1 %6654 }
0x1d3f   :  { %v6701_v41 = vmul.f32 0.03125, %v6655_v26 }
0x1d41   :  { %v6717_v48 = vadd.f32 1e-05, %v6701_v41  ;;  %v13954_v41 = vld [vmem:[%s10570_s8] ss:$0 sm:$0xff]  ;;  %s14610_s8 = sld [smem:[#allocation44_spill]] }
0x1d42   :  { %v6661_v24 = vpop.xlane.xlu1 %6660 }
0x1d43   :  { %v6703_v7 = vmul.f32 0.03125, %v6661_v24  ;;  %9938 = vrsqrt.f32 %v6717_v48 }
0x1d45   :  { %v6719_v42 = vadd.f32 1e-05, %v6703_v7 }
0x1d46   :  { %v6667_v22 = vpop.xlane.xlu1 %6666  ;;  %v6658_v45 = vpop.xlane.xlu0 %6657 }
0x1d47   :  { %v6705_v53 = vmul.f32 0.03125, %v6667_v22  ;;  %v6702_v1 = vmul.f32 0.03125, %v6658_v45  ;;  %9940 = vrsqrt.f32 %v6719_v42 }
0x1d49   :  { %v6718_v30 = vadd.f32 1e-05, %v6702_v1  ;;  %v6721_v25 = vadd.f32 1e-05, %v6705_v53 }
0x1d4a   :  { %v6664_v56 = vpop.xlane.xlu0 %6663  ;;  %v6673_v21 = vpop.xlane.xlu1 %6672 }
0x1d4b   :  { %v6704_v19 = vmul.f32 0.03125, %v6664_v56  ;;  %9942 = vrsqrt.f32 %v6718_v30  ;;  %v6707_v39 = vmul.f32 0.03125, %v6673_v21 }
0x1d4c   :  { %9944 = vrsqrt.f32 %v6721_v25 }
0x1d4d   :  { %v6720_v63 = vadd.f32 1e-05, %v6704_v19  ;;  %v6723_v32 = vadd.f32 1e-05, %v6707_v39 }
0x1d4f   :  { %9946 = vrsqrt.f32 %v6720_v63 }
0x1d50   :  { %v9939_v34 = vpop.eup %9938  ;;  %9948 = vrsqrt.f32 %v6723_v32 }
0x1d51   :  { %v6749_v59 = vmul.f32 %v9939_v34, %v13853_v6 }
0x1d52   :  { %v6670_v43 = vpop.xlane.xlu0 %6669 }
0x1d53   :  { %v6706_v50 = vmul.f32 0.03125, %v6670_v43  ;;  %v6771_v26 = vmul.f32 %v13948_v62, %v6749_v59 }
0x1d54   :  { %v9941_v13 = vpop.eup %9940 }
0x1d55   :  { %v6722_v9 = vadd.f32 1e-05, %v6706_v50  ;;  %v6751_v44 = vmul.f32 %v9941_v13, %v13850_v20  ;;  %v13960_v20 = vadd.f32 %v13954_v41, %v6771_v26 }
0x1d56   :  { %v6676_v11 = vpop.xlane.xlu0 %6675 }
0x1d57   :  { %9950 = vrsqrt.f32 %v6722_v9  ;;  %v6708_v36 = vmul.f32 0.03125, %v6676_v11  ;;  %v6773_v22 = vmul.f32 %v13948_v62, %v6751_v44 }
0x1d58   :  { %v9943_v47 = vpop.eup %9942 }
0x1d59   :  { %v6724_v16 = vadd.f32 1e-05, %v6708_v36  ;;  %v6750_v14 = vmul.f32 %v9943_v47, %v13867_v55  ;;  %v9945_v24 = vpop.eup %9944  ;;  %v13970_v21 = vadd.f32 %v13954_v41, %v6773_v22 }
0x1d5a   :  { %v6679_v35 = vpop.xlane.xlu1 %6678  ;;  %v6753_v25 = vmul.f32 %v9945_v24, %v13861_v27 }
0x1d5b   :  { %9952 = vrsqrt.f32 %v6724_v16  ;;  %v6709_v48 = vmul.f32 0.03125, %v6679_v35  ;;  %v6772_v6 = vmul.f32 %v13948_v62, %v6750_v14 }
0x1d5c   :  { %v9947_v7 = vpop.eup %9946  ;;  %v6775_v50 = vmul.f32 %v13948_v62, %v6753_v25 }
0x1d5d   :  { %v6725_v42 = vadd.f32 1e-05, %v6709_v48  ;;  %v6752_v45 = vmul.f32 %v9947_v7, %v13864_v37  ;;  %v13963_v55 = vadd.f32 %v13954_v41, %v6772_v6  ;;  %v9949_v39 = vpop.eup %9948 }
0x1d5e   :  { %v6685_v53 = vpop.xlane.xlu1 %6684  ;;  %v6755_v11 = vmul.f32 %v9949_v39, %v13875_v52  ;;  %v13984_v35 = vadd.f32 %v13954_v41, %v6775_v50 }
0x1d5f   :  { %v6711_v1 = vmul.f32 0.03125, %v6685_v53  ;;  %v6774_v30 = vmul.f32 %v13948_v62, %v6752_v45  ;;  %v6809_v56 = vpack.c.bf16 %v13963_v55, %v13960_v20  ;;  %9954 = vrsqrt.f32 %v6725_v42 }
0x1d60   :  { %v6777_v6 = vmul.f32 %v13948_v62, %v6755_v11 }
0x1d61   :  { %v13973_v37 = vadd.f32 %v13954_v41, %v6774_v30  ;;  %v6727_v19 = vadd.f32 1e-05, %v6711_v1  ;;  %9173 = vmatprep.mubr.msk.bf16.mxu1 %vm451_vm0, %v6809_v56 }
0x1d62   :  { %v6682_v63 = vpop.xlane.xlu0 %6681  ;;  %v13996_v56 = vadd.f32 %v13954_v41, %v6777_v6 }
0x1d63   :  { %v6710_v32 = vmul.f32 0.03125, %v6682_v63  ;;  %v6810_v34 = vpack.c.bf16 %v13973_v37, %v13970_v21  ;;  %9956 = vrsqrt.f32 %v6727_v19 }
0x1d64   :  { %v9951_v43 = vpop.eup %9950 }
0x1d65   :  { %v6726_v27 = vadd.f32 1e-05, %v6710_v32  ;;  %v6754_v9 = vmul.f32 %v9951_v43, %v13889_v31  ;;  %9174 = vmatmul.mubr.msk.bf16.vlgmr.msra.gmra.mxu1 %vm451_vm0, %v6810_v34 }
0x1d66   :  { %v6691_v59 = vpop.xlane.xlu1 %6690  ;;  %v6688_v13 = vpop.xlane.xlu0 %6687 }
0x1d67   :  { %9958 = vrsqrt.f32 %v6726_v27  ;;  %v6713_v36 = vmul.f32 0.03125, %v6691_v59  ;;  %v6712_v47 = vmul.f32 0.03125, %v6688_v13  ;;  %v6776_v16 = vmul.f32 %v13948_v62, %v6754_v9 }
0x1d68   :  { %v9953_v44 = vpop.eup %9952 }
0x1d69   :  { %v6756_v14 = vmul.f32 %v9953_v44, %v13886_v61  ;;  %v6729_v26 = vadd.f32 1e-05, %v6713_v36  ;;  %v6728_v31 = vadd.f32 1e-05, %v6712_v47  ;;  %v13988_v52 = vadd.f32 %v13954_v41, %v6776_v16 }
0x1d6a   :  { %v6697_v48 = vpop.xlane.xlu1 %6696  ;;  %v6694_v24 = vpop.xlane.xlu0 %6693 }
0x1d6b   :  { %9960 = vrsqrt.f32 %v6729_v26  ;;  %v6715_v7 = vmul.f32 0.03125, %v6697_v48  ;;  %v6714_v42 = vmul.f32 0.03125, %v6694_v24  ;;  %v6811_v22 = vpack.c.bf16 %v13988_v52, %v13984_v35 }
0x1d6c   :  { %9962 = vrsqrt.f32 %v6728_v31  ;;  %v6778_v45 = vmul.f32 %v13948_v62, %v6756_v14  ;;  %v9955_v1 = vpop.eup %9954 }
0x1d6d   :  { %v6731_v53 = vadd.f32 1e-05, %v6715_v7  ;;  %v6730_v61 = vadd.f32 1e-05, %v6714_v42  ;;  %9177 = vmatprep.mubr.msk.bf16.mxu1 %vm451_vm0, %v6811_v22  ;;  %v6757_v32 = vmul.f32 %v9955_v1, %v13900_v28 }
0x1d6e   :  { %v6700_v30 = vpop.xlane.xlu0 %6699  ;;  %v13999_v25 = vadd.f32 %v13954_v41, %v6778_v45 }
0x1d6f   :  { %9964 = vrsqrt.f32 %v6731_v53  ;;  %v6716_v19 = vmul.f32 0.03125, %v6700_v30  ;;  %v6779_v27 = vmul.f32 %v13948_v62, %v6757_v32 }
0x1d70   :  { %9966 = vrsqrt.f32 %v6730_v61  ;;  %v6812_v63 = vpack.c.bf16 %v13999_v25, %v13996_v56  ;;  %v9957_v43 = vpop.eup %9956 }
0x1d71   :  { %v6732_v39 = vadd.f32 1e-05, %v6716_v19  ;;  %v6759_v9 = vmul.f32 %v9957_v43, %v13897_v58  ;;  %v14010_v36 = vadd.f32 %v13954_v41, %v6779_v27  ;;  %v9359_v19 = vld [vmem:[%s14608_s9 + $0x10] sm:$0xff]  }
0x1d72   :  { %9178 = vmatmul.mubr.msk.bf16.gmra.mxu1 %vm451_vm0, %v6812_v63  ;;  %9191 = vmatprep.subr.bf16.mxu0 %v9359_v19  ;;  %v9361_v63 = vld [vmem:[%s14608_s9] sm:$0xff]  }
0x1d73   :  { %9968 = vrsqrt.f32 %v6732_v39  ;;  %v6781_v16 = vmul.f32 %v13948_v62, %v6759_v9  ;;  %9192 = vmatpush3.bf16.msra.mxu0 %v9359_v19 }
0x1d74   :  { %v9959_v34 = vpop.eup %9958 }
0x1d75   :  { %v6758_v50 = vmul.f32 %v9959_v34, %v13912_v2  ;;  %v14024_v48 = vadd.f32 %v13954_v41, %v6781_v16 }
0x1d77   :  { %v6780_v11 = vmul.f32 %v13948_v62, %v6758_v50 }
0x1d78   :  { %v9961_v59 = vpop.eup %9960 }
0x1d79   :  { %v9963_v13 = vpop.eup %9962  ;;  %v14013_v28 = vadd.f32 %v13954_v41, %v6780_v11  ;;  %v6761_v2 = vmul.f32 %v9961_v59, %v13921_v3 }
0x1d7a   :  { %v6760_v47 = vmul.f32 %v9963_v13, %v13909_v17 }
0x1d7b   :  { %v6813_v44 = vpack.c.bf16 %v14013_v28, %v14010_v36  ;;  %v6783_v3 = vmul.f32 %v13948_v62, %v6761_v2 }
0x1d7c   :  { %v9965_v58 = vpop.eup %9964  ;;  %v6782_v14 = vmul.f32 %v13948_v62, %v6760_v47 }
0x1d7d   :  { %v9967_v26 = vpop.eup %9966  ;;  %v6763_v31 = vmul.f32 %v9965_v58, %v13918_v15  ;;  %9181 = vmatprep.mubr.msk.bf16.mxu1 %vm451_vm0, %v6813_v44  ;;  %v14038_v45 = vadd.f32 %v13954_v41, %v6783_v3 }
0x1d7e   :  { %v14027_v17 = vadd.f32 %v13954_v41, %v6782_v14  ;;  %v6762_v24 = vmul.f32 %v9967_v26, %v13929_v38 }
0x1d7f   :  { %v6785_v22 = vmul.f32 %v13948_v62, %v6763_v31 }
0x1d80   :  { %v9969_v6 = vpop.eup %9968  ;;  %v6814_v7 = vpack.c.bf16 %v14027_v17, %v14024_v48  ;;  %v6784_v42 = vmul.f32 %v13948_v62, %v6762_v24 }
0x1d81   :  { %v6764_v15 = vmul.f32 %v9969_v6, %v13938_v12  ;;  %v14047_v1 = vadd.f32 %v13954_v41, %v6785_v22 }
0x1d82   :  { %9182 = vmatmul.mubr.msk.bf16.gmra.mxu1 %vm451_vm0, %v6814_v7  ;;  %v14041_v38 = vadd.f32 %v13954_v41, %v6784_v42 }
0x1d83   :  { %v6786_v53 = vmul.f32 %v13948_v62, %v6764_v15  ;;  %v9360_v62 = vld [vmem:[%s14608_s9 + $0x8] sm:$0xff]  }
0x1d84   :  { %v6815_v61 = vpack.c.bf16 %v14041_v38, %v14038_v45  ;;  %9193 = vmatprep.subr.bf16.mxu0 %v9360_v62 }
0x1d85   :  { %v14050_v12 = vadd.f32 %v13954_v41, %v6786_v53  ;;  %9194 = vmatpush3.bf16.msra.mxu0 %v9360_v62  ;;  %v7981_v41 = vld [vmem:[%s14610_s8] ss:$0 sm:$0xff] }
0x1d86   :  { %9185 = vmatprep.mubr.msk.bf16.mxu1 %vm451_vm0, %v6815_v61  ;;  %9195 = vmatprep.subr.bf16.mxu0 %v9361_v63 }
0x1d87   :  { %v6816_v30 = vpack.c.bf16 %v14050_v12, %v14047_v1 }
0x1d89   :  { %9196 = vmatpush3.bf16.msra.mxu0 %v9361_v63 }
0x1d8a   :  { %9186 = vmatmul.mubr.msk.bf16.gmra.mxu1 %vm451_vm0, %v6816_v30 }
0x1e25   :  { %v9175_v39 = vpop.f32.mrf.mxu1 }
0x1e26   :  { %v6902_v27 = vadd.f32 %v9175_v39, %v7981_v41 }
0x1e27   :  { %v6893_v32 = vpop.f32.mrf.mxu1 }
0x1e28   :  { %v6894_v34 = vadd.f32 %v7981_v41, %v6893_v32  ;;  %v6958_v16 = vmax.f32 %v6902_v27, 0.0 }
0x1e29   :  { %v9176_v43 = vpop.f32.mrf.mxu1 }
0x1e2a   :  { %v6905_v50 = vadd.f32 %v9176_v43, %v7981_v41  ;;  %v6956_v13 = vmax.f32 %v6894_v34, 0.0 }
0x1e2b   :  { %v6896_v9 = vpop.f32.mrf.mxu1 }
0x1e2c   :  { %v6897_v11 = vadd.f32 %v7981_v41, %v6896_v9  ;;  %v6959_v59 = vmax.f32 %v6905_v50, 0.0 }
0x1e2e   :  { %v6957_v47 = vmax.f32 %v6897_v11, 0.0  ;;  %v6973_v44 = vpack.c.bf16 %v6959_v59, %v6958_v16 }
0x1e30   :  { %v6972_v2 = vpack.c.bf16 %v6957_v47, %v6956_v13 }
0x1e32   :  { %v9179_v58 = vpop.f32.mrf.mxu1  ;;  %9197 = vmatprep.mubr.msk.bf16.mxu0 %vm3459_vm3, %v6972_v2 }
0x1e33   :  { %9198 = vmatmul.mubr.msk.bf16.vlgmr.msra.gmra.mxu0 %vm3459_vm3, %v6973_v44  ;;  %v6918_v3 = vadd.f32 %v9179_v58, %v7981_v41 }
0x1e34   :  { %v6909_v14 = vpop.f32.mrf.mxu1 }
0x1e35   :  { %v6910_v31 = vadd.f32 %v7981_v41, %v6909_v14  ;;  %v6962_v53 = vmax.f32 %v6918_v3, 0.0 }
0x1e36   :  { %v9180_v26 = vpop.f32.mrf.mxu1 }
0x1e37   :  { %v6921_v24 = vadd.f32 %v9180_v26, %v7981_v41  ;;  %v6960_v15 = vmax.f32 %v6910_v31, 0.0 }
0x1e38   :  { %v6912_v6 = vpop.f32.mrf.mxu1 }
0x1e39   :  { %v6913_v7 = vadd.f32 %v7981_v41, %v6912_v6  ;;  %v6963_v42 = vmax.f32 %v6921_v24, 0.0 }
0x1e3b   :  { %v6961_v22 = vmax.f32 %v6913_v7, 0.0  ;;  %v6975_v30 = vpack.c.bf16 %v6963_v42, %v6962_v53  ;;  %v14069_v53 = vld [vmem:[%s14611_s20] ss:$0 sm:$0xff] }
0x1e3d   :  { %v6974_v61 = vpack.c.bf16 %v6961_v22, %v6960_v15 }
0x1e3f   :  { %9201 = vmatprep.mubr.msk.bf16.mxu0 %vm3459_vm3, %v6974_v61 }
0x1e40   :  { %9202 = vmatmul.mubr.msk.bf16.gmra.mxu0 %vm3459_vm3, %v6975_v30 }
0x1e42   :  { %v9183_v19 = vpop.f32.mrf.mxu1 }
0x1e43   :  { %v6934_v43 = vadd.f32 %v9183_v19, %v7981_v41 }
0x1e44   :  { %v6925_v62 = vpop.f32.mrf.mxu1 }
0x1e45   :  { %v6926_v39 = vadd.f32 %v7981_v41, %v6925_v62  ;;  %v6966_v13 = vmax.f32 %v6934_v43, 0.0 }
0x1e46   :  { %v9184_v63 = vpop.f32.mrf.mxu1 }
0x1e47   :  { %v6937_v32 = vadd.f32 %v9184_v63, %v7981_v41  ;;  %v6964_v11 = vmax.f32 %v6926_v39, 0.0 }
0x1e48   :  { %v6928_v34 = vpop.f32.mrf.mxu1 }
0x1e49   :  { %v6929_v50 = vadd.f32 %v7981_v41, %v6928_v34  ;;  %v6967_v27 = vmax.f32 %v6937_v32, 0.0 }
0x1e4a   :  { %v9187_v9 = vpop.f32.mrf.mxu1 }
0x1e4b   :  { %v6965_v59 = vmax.f32 %v6929_v50, 0.0  ;;  %v6977_v2 = vpack.c.bf16 %v6967_v27, %v6966_v13  ;;  %v6950_v26 = vadd.f32 %v9187_v9, %v7981_v41 }
0x1e4c   :  { %v6941_v47 = vpop.f32.mrf.mxu1 }
0x1e4d   :  { %v6976_v16 = vpack.c.bf16 %v6965_v59, %v6964_v11  ;;  %v6942_v58 = vadd.f32 %v7981_v41, %v6941_v47  ;;  %v6970_v42 = vmax.f32 %v6950_v26, 0.0 }
0x1e4e   :  { %v9188_v44 = vpop.f32.mrf.mxu1 }
0x1e4f   :  { %v6953_v14 = vadd.f32 %v9188_v44, %v7981_v41  ;;  %9205 = vmatprep.mubr.msk.bf16.mxu0 %vm3459_vm3, %v6976_v16  ;;  %v6968_v6 = vmax.f32 %v6942_v58, 0.0 }
0x1e50   :  { %v6944_v31 = vpop.f32.mrf.mxu1  ;;  %9206 = vmatmul.mubr.msk.bf16.gmra.mxu0 %vm3459_vm3, %v6977_v2 }
0x1e51   :  { %v6945_v24 = vadd.f32 %v7981_v41, %v6944_v31  ;;  %v6971_v3 = vmax.f32 %v6953_v14, 0.0 }
0x1e53   :  { %v6969_v7 = vmax.f32 %v6945_v24, 0.0  ;;  %v6979_v22 = vpack.c.bf16 %v6971_v3, %v6970_v42 }
0x1e55   :  { %v6978_v15 = vpack.c.bf16 %v6969_v7, %v6968_v6 }
0x1e57   :  { %9209 = vmatprep.mubr.msk.bf16.mxu0 %vm3459_vm3, %v6978_v15 }
0x1e58   :  { %9210 = vmatmul.mubr.msk.bf16.gmra.mxu0 %vm3459_vm3, %v6979_v22 }
0x1ef3   :  { %v9199_v61 = vpop.f32.mrf.mxu0 }
0x1ef4   :  { %v7077_v30 = vadd.f32 %v9199_v61, %v14069_v53 }
0x1ef5   :  { %v7068_v19 = vpop.f32.mrf.mxu0 }
0x1ef6   :  { %v14073_v62 = vadd.f32 %v7077_v30, %v13970_v21  ;;  %v7069_v41 = vadd.f32 %v14069_v53, %v7068_v19 }
0x1ef7   :  { %v9200_v63 = vpop.f32.mrf.mxu0 }
0x1ef8   :  { %v14077_v39 = vadd.f32 %v7069_v41, %v13960_v20  ;;  %v7080_v32 = vadd.f32 %v9200_v63, %v14069_v53  ;;  %v7153_v43 = vsel %vm451_vm0, %v14073_v62, 0.0 }
0x1ef9   :  { %7154 = vadd.xlane.f32.xlu1 %v7153_v43  ;;  %v7071_v34 = vpop.f32.mrf.mxu0 }
0x1efa   :  { %v7072_v50 = vadd.f32 %v14069_v53, %v7071_v34  ;;  %v14084_v27 = vadd.f32 %v7080_v32, %v13973_v37  ;;  %v7147_v9 = vsel %vm451_vm0, %v14077_v39, 0.0 }
0x1efc   :  { %v14087_v21 = vadd.f32 %v7072_v50, %v13963_v55  ;;  %v7156_v59 = vsel %vm451_vm0, %v14084_v27, 0.0 }
0x1efd   :  { %7148 = vadd.xlane.f32.xlu1 %v7147_v9 }
0x1efe   :  { %v7150_v20 = vsel %vm451_vm0, %v14087_v21, 0.0 }
0x1eff   :  { %7151 = vadd.xlane.f32.xlu0 %v7150_v20 }
0x1f00   :  { %v9203_v11 = vpop.f32.mrf.mxu0 }
0x1f01   :  { %7157 = vadd.xlane.f32.xlu1 %v7156_v59 }
0x1f02   :  { %v7084_v13 = vpop.f32.mrf.mxu0 }
0x1f03   :  { %v7085_v37 = vadd.f32 %v14069_v53, %v7084_v13 }
0x1f04   :  { %v9204_v47 = vpop.f32.mrf.mxu0 }
0x1f05   :  { %v14097_v55 = vadd.f32 %v7085_v37, %v13984_v35  ;;  %v7093_v35 = vadd.f32 %v9203_v11, %v14069_v53  ;;  %v7096_v30 = vadd.f32 %v9204_v47, %v14069_v53 }
0x1f06   :  { %v7087_v16 = vpop.f32.mrf.mxu0 }
0x1f07   :  { %v7088_v2 = vadd.f32 %v14069_v53, %v7087_v16  ;;  %v7159_v44 = vsel %vm451_vm0, %v14097_v55, 0.0  ;;  %v14120_v22 = vadd.f32 %v7093_v35, %v13996_v56 }
0x1f08   :  { %7160 = vadd.xlane.f32.xlu1 %v7159_v44 }
0x1f09   :  { %v14103_v58 = vadd.f32 %v7088_v2, %v13988_v52  ;;  %v7165_v34 = vsel %vm451_vm0, %v14120_v22, 0.0 }
0x1f0b   :  { %v7162_v14 = vsel %vm451_vm0, %v14103_v58, 0.0 }
0x1f0c   :  { %7163 = vadd.xlane.f32.xlu1 %v7162_v14 }
0x1f10   :  { %v9207_v26 = vpop.f32.mrf.mxu0 }
0x1f11   :  { %v7109_v31 = vadd.f32 %v9207_v26, %v14069_v53 }
0x1f12   :  { %v7100_v24 = vpop.f32.mrf.mxu0 }
0x1f13   :  { %v14110_v3 = vadd.f32 %v7109_v31, %v14024_v48  ;;  %v7101_v6 = vadd.f32 %v14069_v53, %v7100_v24 }
0x1f14   :  { %v9208_v7 = vpop.f32.mrf.mxu0 }
0x1f15   :  { %v14114_v42 = vadd.f32 %v7101_v6, %v14010_v36  ;;  %v7112_v52 = vadd.f32 %v9208_v7, %v14069_v53  ;;  %v7177_v15 = vsel %vm451_vm0, %v14110_v3, 0.0 }
0x1f16   :  { %7178 = vadd.xlane.f32.xlu0 %v7177_v15  ;;  %v7103_v61 = vpop.f32.mrf.mxu0 }
0x1f17   :  { %v14124_v48 = vadd.f32 %v7112_v52, %v14027_v17  ;;  %v7104_v19 = vadd.f32 %v14069_v53, %v7103_v61  ;;  %v7171_v36 = vsel %vm451_vm0, %v14114_v42, 0.0  ;;  %v14136_v17 = vadd.f32 %v7096_v30, %v13999_v25 }
0x1f18   :  { %7172 = vadd.xlane.f32.xlu1 %v7171_v36  ;;  %v9211_v41 = vpop.f32.mrf.mxu0 }
0x1f19   :  { %v14130_v63 = vadd.f32 %v7104_v19, %v14013_v28  ;;  %v7125_v56 = vadd.f32 %v9211_v41, %v14069_v53  ;;  %v7180_v32 = vsel %vm451_vm0, %v14124_v48, 0.0  ;;  %v7168_v59 = vsel %vm451_vm0, %v14136_v17, 0.0 }
0x1f1a   :  { %7181 = vadd.xlane.f32.xlu0 %v7180_v32  ;;  %v7116_v43 = vpop.f32.mrf.mxu0 }
0x1f1b   :  { %v14141_v9 = vadd.f32 %v7125_v56, %v14047_v1  ;;  %v7117_v28 = vadd.f32 %v14069_v53, %v7116_v43  ;;  %v7174_v20 = vsel %vm451_vm0, %v14130_v63, 0.0 }
0x1f1c   :  { %7166 = vadd.xlane.f32.xlu1 %v7165_v34  ;;  %v9212_v50 = vpop.f32.mrf.mxu0 }
0x1f1d   :  { %v14149_v25 = vadd.f32 %v7117_v28, %v14038_v45  ;;  %v7189_v1 = vsel %vm451_vm0, %v14141_v9, 0.0  ;;  %v7128_v37 = vadd.f32 %v9212_v50, %v14069_v53 }
0x1f1e   :  { %7175 = vadd.xlane.f32.xlu0 %v7174_v20  ;;  %v7119_v11 = vpop.f32.mrf.mxu0 }
0x1f1f   :  { %v7120_v13 = vadd.f32 %v14069_v53, %v7119_v11  ;;  %v7183_v16 = vsel %vm451_vm0, %v14149_v25, 0.0  ;;  %v14161_v2 = vadd.f32 %v7128_v37, %v14050_v12 }
0x1f20   :  { %7169 = vadd.xlane.f32.xlu1 %v7168_v59 }
0x1f21   :  { %v14156_v47 = vadd.f32 %v7120_v13, %v14041_v38  ;;  %v7192_v44 = vsel %vm451_vm0, %v14161_v2, 0.0 }
0x1f22   :  { %7190 = vadd.xlane.f32.xlu0 %v7189_v1 }
0x1f23   :  { %v7186_v45 = vsel %vm451_vm0, %v14156_v47, 0.0 }
0x1f26   :  { %7184 = vadd.xlane.f32.xlu0 %v7183_v16 }
0x1f2a   :  { %7187 = vadd.xlane.f32.xlu0 %v7186_v45 }
0x1f2e   :  { %7193 = vadd.xlane.f32.xlu0 %v7192_v44 }
0x1f82   :  { %v7155_v14 = vpop.xlane.xlu1 %7154 }
0x1f83   :  { %v7197_v53 = vmul.f32 0.03125, %v7155_v14 }
0x1f85   :  { %v14168_v38 = vsub.f32 %v14073_v62, %v7197_v53 }
0x1f86   :  { %v7149_v26 = vpop.xlane.xlu1 %7148 }
0x1f87   :  { %v7195_v31 = vmul.f32 0.03125, %v7149_v26  ;;  %v7229_v35 = vmul.f32 %v14168_v38, %v14168_v38 }
0x1f88   :  { %v7152_v12 = vpop.xlane.xlu0 %7151 }
0x1f89   :  { %v14173_v24 = vsub.f32 %v14077_v39, %v7195_v31  ;;  %v7196_v6 = vmul.f32 0.03125, %v7152_v12  ;;  %v7249_v7 = vsel %vm451_vm0, %v7229_v35, 0.0 }
0x1f8a   :  { %v7158_v52 = vpop.xlane.xlu1 %7157  ;;  %7250 = vadd.xlane.f32.xlu1 %v7249_v7 }
0x1f8b   :  { %v14177_v15 = vsub.f32 %v14087_v21, %v7196_v6  ;;  %v7198_v61 = vmul.f32 0.03125, %v7158_v52  ;;  %v7227_v62 = vmul.f32 %v14173_v24, %v14173_v24 }
0x1f8d   :  { %v14182_v30 = vsub.f32 %v14084_v27, %v7198_v61  ;;  %v7243_v19 = vsel %vm451_vm0, %v7227_v62, 0.0  ;;  %v7228_v39 = vmul.f32 %v14177_v15, %v14177_v15 }
0x1f8e   :  { %7244 = vadd.xlane.f32.xlu1 %v7243_v19 }
0x1f8f   :  { %v7246_v36 = vsel %vm451_vm0, %v7228_v39, 0.0  ;;  %v7230_v41 = vmul.f32 %v14182_v30, %v14182_v30 }
0x1f90   :  { %7247 = vadd.xlane.f32.xlu0 %v7246_v36 }
0x1f91   :  { %v7161_v21 = vpop.xlane.xlu1 %7160  ;;  %v7252_v32 = vsel %vm451_vm0, %v7230_v41, 0.0 }
0x1f92   :  { %v7199_v56 = vmul.f32 0.03125, %v7161_v21  ;;  %7253 = vadd.xlane.f32.xlu1 %v7252_v32 }
0x1f94   :  { %v14192_v27 = vsub.f32 %v14097_v55, %v7199_v56 }
0x1f95   :  { %v7164_v43 = vpop.xlane.xlu1 %7163 }
0x1f96   :  { %v7200_v34 = vmul.f32 0.03125, %v7164_v43  ;;  %v7231_v50 = vmul.f32 %v14192_v27, %v14192_v27 }
0x1f98   :  { %v14197_v28 = vsub.f32 %v14103_v58, %v7200_v34  ;;  %v7255_v20 = vsel %vm451_vm0, %v7231_v50, 0.0 }
0x1f99   :  { %7256 = vadd.xlane.f32.xlu1 %v7255_v20 }
0x1f9a   :  { %v7232_v11 = vmul.f32 %v14197_v28, %v14197_v28 }
0x1f9c   :  { %v7258_v59 = vsel %vm451_vm0, %v7232_v11, 0.0 }
0x1f9d   :  { %7259 = vadd.xlane.f32.xlu1 %v7258_v59 }
0x1f9f   :  { %v7179_v13 = vpop.xlane.xlu0 %7178 }
0x1fa0   :  { %v7205_v55 = vmul.f32 0.03125, %v7179_v13 }
0x1fa1   :  { %v7173_v1 = vpop.xlane.xlu1 %7172 }
0x1fa2   :  { %v14204_v37 = vsub.f32 %v14110_v3, %v7205_v55  ;;  %v7203_v16 = vmul.f32 0.03125, %v7173_v1  ;;  %v7399_v55 = vsel %vm451_vm0, %v14593_v4, 0.0 }
0x1fa3   :  { %v7182_v45 = vpop.xlane.xlu0 %7181 }
0x1fa4   :  { %v14207_v58 = vsub.f32 %v14114_v42, %v7203_v16  ;;  %v7206_v44 = vmul.f32 0.03125, %v7182_v45  ;;  %v7237_v14 = vmul.f32 %v14204_v37, %v14204_v37 }
0x1fa5   :  { %v7167_v53 = vpop.xlane.xlu1 %7166 }
0x1fa6   :  { %v14212_v26 = vsub.f32 %v14124_v48, %v7206_v44  ;;  %v7201_v31 = vmul.f32 0.03125, %v7167_v53  ;;  %v7273_v35 = vsel %vm451_vm0, %v7237_v14, 0.0  ;;  %v7235_v3 = vmul.f32 %v14207_v58, %v14207_v58 }
0x1fa7   :  { %7274 = vadd.xlane.f32.xlu0 %v7273_v35  ;;  %v7176_v12 = vpop.xlane.xlu0 %7175  ;;  %v7423_v14 = vsel %vm451_vm0, %v14602_v60, 0.0  ;;  %v7408_v60 = vsel %vm451_vm0, %v14594_v23, 0.0  ;;  %v7429_v23 = vsel %vm451_vm0, %v14601_v5, 0.0  ;;  %v7441_v5 = vsel %vm451_vm0, %v14600_v46, 0.0 }
0x1fa8   :  { %v14218_v6 = vsub.f32 %v14120_v22, %v7201_v31  ;;  %v7204_v42 = vmul.f32 0.03125, %v7176_v12  ;;  %v7267_v7 = vsel %vm451_vm0, %v7235_v3, 0.0  ;;  %v7238_v52 = vmul.f32 %v14212_v26, %v14212_v26 }
0x1fa9   :  { %7268 = vadd.xlane.f32.xlu1 %v7267_v7  ;;  %v7170_v48 = vpop.xlane.xlu1 %7169  ;;  %v7411_v12 = vsel %vm451_vm0, %v14595_v54, 0.0  ;;  %v7432_v54 = vsel %vm451_vm0, %v14603_v10, 0.0 }
0x1faa   :  { %v14224_v61 = vsub.f32 %v14130_v63, %v7204_v42  ;;  %v7202_v62 = vmul.f32 0.03125, %v7170_v48  ;;  %v7276_v19 = vsel %vm451_vm0, %v7238_v52, 0.0  ;;  %v7233_v39 = vmul.f32 %v14218_v6, %v14218_v6 }
0x1fab   :  { %7277 = vadd.xlane.f32.xlu0 %v7276_v19  ;;  %v7191_v22 = vpop.xlane.xlu0 %7190  ;;  %v7414_v42 = vsel %vm451_vm0, %v14599_v8, 0.0  ;;  %v7438_v8 = vsel %vm451_vm0, %v14606_v57, 0.0 }
0x1fac   :  { %v14230_v36 = vsub.f32 %v14136_v17, %v7202_v62  ;;  %v7209_v41 = vmul.f32 0.03125, %v7191_v22  ;;  %v7261_v21 = vsel %vm451_vm0, %v7233_v39, 0.0  ;;  %v7236_v56 = vmul.f32 %v14224_v61, %v14224_v61 }
0x1fad   :  { %7262 = vadd.xlane.f32.xlu1 %v7261_v21  ;;  %v14292_v21 = vld [vmem:[%s10575_s27] ss:$0 sm:$0xff] }
0x1fae   :  { %v14236_v63 = vsub.f32 %v14141_v9, %v7209_v41  ;;  %v7270_v32 = vsel %vm451_vm0, %v7236_v56, 0.0  ;;  %v7234_v43 = vmul.f32 %v14230_v36, %v14230_v36 }
0x1faf   :  { %7271 = vadd.xlane.f32.xlu0 %v7270_v32  ;;  %v7185_v34 = vpop.xlane.xlu0 %7184 }
0x1fb0   :  { %v7207_v50 = vmul.f32 0.03125, %v7185_v34  ;;  %v7264_v17 = vsel %vm451_vm0, %v7234_v43, 0.0  ;;  %v7241_v20 = vmul.f32 %v14236_v63, %v14236_v63  ;;  %v14296_v43 = vld [vmem:[%s10580_s29] ss:$0 sm:$0xff]  ;;  %s10426_s29 = smov [#allocation25]  }
0x1fb1   :  { %7265 = vadd.xlane.f32.xlu1 %v7264_v17  ;;  %s7739_s27 = sshll.u32 %s10426_s29, 4  ;;  %s7740_s27 = int_to_ptr.vmem [resolvable:$true] %s7739_s27 }
0x1fb2   :  { %v14245_v11 = vsub.f32 %v14149_v25, %v7207_v50  ;;  %v7285_v9 = vsel %vm451_vm0, %v7241_v20, 0.0  ;;  %s10330_s30 = scalar_lea.vmem %s7740_s27, 256  ;;  %p10335_p1 = scmp.lt.s32.totalorder %s7740_s27, %s7740_s27 }
0x1fb3   :  { %7286 = vadd.xlane.f32.xlu0 %v7285_v9  ;;  %v7188_v59 = vpop.xlane.xlu0 %7187  ;;  %p10331_p0 = scmp.ne.s32.totalorder %s7740_s27, %s10330_s30  ;;  %p10336_p2 = scmp.lt.s32.totalorder %s10330_s30, %s10330_s30 }
0x1fb4   :  { %v7208_v13 = vmul.f32 0.03125, %v7188_v59  ;;  %v7239_v1 = vmul.f32 %v14245_v11, %v14245_v11 }
0x1fb5   :  { %7400 = vadd.xlane.f32.xlu1 %v7399_v55  ;;  %p10337_p3 = por %p10336_p2, %p10335_p1 }
0x1fb6   :  { %v14253_v16 = vsub.f32 %v14156_v47, %v7208_v13  ;;  %v7279_v45 = vsel %vm451_vm0, %v7239_v1, 0.0  ;;  %v7405_v47 = vsel %vm451_vm0, %v14592_v33, 0.0  ;;  %v7426_v33 = vsel %vm451_vm0, %v14604_v29, 0.0 }
0x1fb7   :  { %7280 = vadd.xlane.f32.xlu0 %v7279_v45  ;;  %v7194_v25 = vpop.xlane.xlu0 %7193  ;;  %v7435_v29 = vsel %vm451_vm0, %v14605_v40, 0.0  ;;  %p10338_p4 = pnand %p10337_p3, %p10331_p0 }
0x1fb8   :  { %v7210_v44 = vmul.f32 0.03125, %v7194_v25  ;;  %v7240_v53 = vmul.f32 %v14253_v16, %v14253_v16 }
0x1fb9   :  { %7424 = vadd.xlane.f32.xlu1 %v7423_v14 }
0x1fba   :  { %v14261_v4 = vsub.f32 %v14161_v2, %v7210_v44  ;;  %v7282_v31 = vsel %vm451_vm0, %v7240_v53, 0.0  ;;  %v7402_v2 = vsel %vm451_vm0, %v14596_v0, 0.0  ;;  %v7417_v0 = vsel %vm451_vm0, %v14597_v18, 0.0 }
0x1fbb   :  { %7283 = vadd.xlane.f32.xlu0 %v7282_v31 }
0x1fbc   :  { %v7242_v35 = vmul.f32 %v14261_v4, %v14261_v4 }
0x1fbd   :  { %7406 = vadd.xlane.f32.xlu1 %v7405_v47 }
0x1fbe   :  { %v7288_v3 = vsel %vm451_vm0, %v7242_v35, 0.0 }
0x1fbf   :  { %7289 = vadd.xlane.f32.xlu0 %v7288_v3 }
0x1fc1   :  { %7409 = vadd.xlane.f32.xlu1 %v7408_v60 }
0x1fc3   :  { %7403 = vadd.xlane.f32.xlu0 %v7402_v2 }
0x1fc5   :  { %7412 = vadd.xlane.f32.xlu1 %v7411_v12 }
0x1fc7   :  { %7427 = vadd.xlane.f32.xlu0 %v7426_v33 }
0x1fc9   :  { %7415 = vadd.xlane.f32.xlu1 %v7414_v42 }
0x1fcb   :  { %7430 = vadd.xlane.f32.xlu0 %v7429_v23 }
0x1fcd   :  { %7418 = vadd.xlane.f32.xlu1 %v7417_v0 }
0x1fcf   :  { %7433 = vadd.xlane.f32.xlu0 %v7432_v54 }
0x1fd3   :  { %7436 = vadd.xlane.f32.xlu0 %v7435_v29 }
0x1fd7   :  { %7439 = vadd.xlane.f32.xlu0 %v7438_v8 }
0x1fdb   :  { %7442 = vadd.xlane.f32.xlu0 %v7441_v5 }
0x2013   :  { %v7251_v7 = vpop.xlane.xlu1 %7250 }
0x2014   :  { %v7293_v52 = vmul.f32 0.03125, %v7251_v7 }
0x2016   :  { %v7309_v18 = vadd.f32 1e-05, %v7293_v52 }
0x2017   :  { %v7245_v48 = vpop.xlane.xlu1 %7244 }
0x2018   :  { %9970 = vrsqrt.f32 %v7309_v18  ;;  %v7291_v10 = vmul.f32 0.03125, %v7245_v48 }
0x2019   :  { %v7248_v62 = vpop.xlane.xlu0 %7247 }
0x201a   :  { %v7307_v19 = vadd.f32 1e-05, %v7291_v10  ;;  %v7292_v40 = vmul.f32 0.03125, %v7248_v62 }
0x201b   :  { %v7254_v39 = vpop.xlane.xlu1 %7253 }
0x201c   :  { %9972 = vrsqrt.f32 %v7307_v19  ;;  %v7308_v22 = vadd.f32 1e-05, %v7292_v40  ;;  %v7294_v57 = vmul.f32 0.03125, %v7254_v39 }
0x201e   :  { %9974 = vrsqrt.f32 %v7308_v22  ;;  %v7310_v41 = vadd.f32 1e-05, %v7294_v57 }
0x2020   :  { %9976 = vrsqrt.f32 %v7310_v41 }
0x2022   :  { %v7257_v32 = vpop.xlane.xlu1 %7256 }
0x2023   :  { %v7295_v14 = vmul.f32 0.03125, %v7257_v32 }
0x2025   :  { %v9971_v46 = vpop.eup %9970  ;;  %v7311_v12 = vadd.f32 1e-05, %v7295_v14 }
0x2026   :  { %v7341_v56 = vmul.f32 %v9971_v46, %v14168_v38  ;;  %v7260_v45 = vpop.xlane.xlu1 %7259 }
0x2027   :  { %v7296_v33 = vmul.f32 0.03125, %v7260_v45 }
0x2028   :  { %v7363_v34 = vmul.f32 %v14292_v21, %v7341_v56 }
0x2029   :  { %v9973_v50 = vpop.eup %9972  ;;  %v7312_v8 = vadd.f32 1e-05, %v7296_v33 }
0x202a   :  { %v7385_v17 = vadd.f32 %v14296_v43, %v7363_v34  ;;  %v7339_v20 = vmul.f32 %v9973_v50, %v14173_v24 }
0x202b   :  { %v9975_v9 = vpop.eup %9974 }
0x202c   :  { %v7469_v59 = vsel %vm451_vm0, %v7385_v17, 0.0  ;;  %v7361_v13 = vmul.f32 %v14292_v21, %v7339_v20  ;;  %v7340_v55 = vmul.f32 %v9975_v9, %v14177_v15 }
0x202d   :  { %v9977_v1 = vpop.eup %9976  ;;  %7470 = vadd.xlane.f32.xlu1 %v7469_v59 }
0x202e   :  { %v7383_v38 = vadd.f32 %v14296_v43, %v7361_v13  ;;  %v7362_v25 = vmul.f32 %v14292_v21, %v7340_v55  ;;  %v7342_v44 = vmul.f32 %v9977_v1, %v14182_v30 }
0x2030   :  { %v7275_v53 = vpop.xlane.xlu0 %7274  ;;  %v7463_v24 = vsel %vm451_vm0, %v7383_v38, 0.0  ;;  %v7384_v47 = vadd.f32 %v14296_v43, %v7362_v25  ;;  %v7364_v35 = vmul.f32 %v14292_v21, %v7342_v44 }
0x2031   :  { %v7301_v31 = vmul.f32 0.03125, %v7275_v53  ;;  %7464 = vadd.xlane.f32.xlu1 %v7463_v24 }
0x2032   :  { %v7269_v15 = vpop.xlane.xlu1 %7268  ;;  %v7466_v60 = vsel %vm451_vm0, %v7384_v47, 0.0  ;;  %v7386_v2 = vadd.f32 %v14296_v43, %v7364_v35 }
0x2033   :  { %v7317_v3 = vadd.f32 1e-05, %v7301_v31  ;;  %7467 = vadd.xlane.f32.xlu0 %v7466_v60  ;;  %v7299_v5 = vmul.f32 0.03125, %v7269_v15  ;;  %v7444_v60 = vsel %vm451_vm0, %v14607_v51, 0.0 }
0x2034   :  { %v7278_v30 = vpop.xlane.xlu0 %7277  ;;  %v7472_v23 = vsel %vm451_vm0, %v7386_v2, 0.0 }
0x2035   :  { %9978 = vrsqrt.f32 %v7317_v3  ;;  %v7302_v42 = vmul.f32 0.03125, %v7278_v30  ;;  %7473 = vadd.xlane.f32.xlu1 %v7472_v23  ;;  %v7315_v10 = vadd.f32 1e-05, %v7299_v5 }
0x2036   :  { %v7263_v0 = vpop.xlane.xlu1 %7262  ;;  %9980 = vrsqrt.f32 %v7311_v12 }
0x2037   :  { %v7318_v54 = vadd.f32 1e-05, %v7302_v42  ;;  %v7297_v29 = vmul.f32 0.03125, %v7263_v0 }
0x2038   :  { %v7272_v7 = vpop.xlane.xlu0 %7271 }
0x2039   :  { %9982 = vrsqrt.f32 %v7318_v54  ;;  %v7313_v52 = vadd.f32 1e-05, %v7297_v29  ;;  %v7300_v18 = vmul.f32 0.03125, %v7272_v7 }
0x203a   :  { %v7266_v19 = vpop.xlane.xlu1 %7265 }
0x203b   :  { %9984 = vrsqrt.f32 %v7313_v52  ;;  %v7316_v48 = vadd.f32 1e-05, %v7300_v18  ;;  %v7298_v22 = vmul.f32 0.03125, %v7266_v19 }
0x203c   :  { %9986 = vrsqrt.f32 %v7312_v8  ;;  %v7287_v62 = vpop.xlane.xlu0 %7286 }
0x203d   :  { %9988 = vrsqrt.f32 %v7316_v48  ;;  %v7305_v40 = vmul.f32 0.03125, %v7287_v62  ;;  %v7314_v34 = vadd.f32 1e-05, %v7298_v22 }
0x203e   :  { %9990 = vrsqrt.f32 %v7315_v10 }
0x203f   :  { %v7321_v39 = vadd.f32 1e-05, %v7305_v40 }
0x2040   :  { %v7281_v57 = vpop.xlane.xlu0 %7280 }
0x2041   :  { %9992 = vrsqrt.f32 %v7321_v39  ;;  %v7303_v41 = vmul.f32 0.03125, %v7281_v57 }
0x2042   :  { %v9979_v46 = vpop.eup %9978 }
0x2043   :  { %v7319_v56 = vadd.f32 1e-05, %v7303_v41  ;;  %v7349_v32 = vmul.f32 %v9979_v46, %v14204_v37  ;;  %v9981_v17 = vpop.eup %9980 }
0x2044   :  { %v7284_v50 = vpop.xlane.xlu0 %7283  ;;  %v7343_v25 = vmul.f32 %v9981_v17, %v14192_v27 }
0x2045   :  { %9994 = vrsqrt.f32 %v7319_v56  ;;  %v7304_v20 = vmul.f32 0.03125, %v7284_v50  ;;  %v7371_v9 = vmul.f32 %v14292_v21, %v7349_v32  ;;  %v7420_v50 = vsel %vm451_vm0, %v14598_v49, 0.0 }
0x2046   :  { %v9983_v59 = vpop.eup %9982  ;;  %9996 = vrsqrt.f32 %v7314_v34  ;;  %v7365_v15 = vmul.f32 %v14292_v21, %v7343_v25 }
0x2047   :  { %v7320_v13 = vadd.f32 1e-05, %v7304_v20  ;;  %v7393_v55 = vadd.f32 %v14296_v43, %v7371_v9  ;;  %v7350_v1 = vmul.f32 %v9983_v59, %v14212_v26 }
0x2048   :  { %v9985_v45 = vpop.eup %9984  ;;  %v7290_v38 = vpop.xlane.xlu0 %7289  ;;  %v7387_v42 = vadd.f32 %v14296_v43, %v7365_v15 }
0x2049   :  { %v9987_v44 = vpop.eup %9986  ;;  %9998 = vrsqrt.f32 %v7320_v13  ;;  %v7306_v37 = vmul.f32 0.03125, %v7290_v38  ;;  %v7493_v14 = vsel %vm451_vm0, %v7393_v55, 0.0  ;;  %v7345_v31 = vmul.f32 %v9985_v45, %v14218_v6  ;;  %v7401_v13 = vpop.xlane.xlu1 %7400 }
0x204a   :  { %v9989_v53 = vpop.eup %9988  ;;  %7494 = vadd.xlane.f32.xlu0 %v7493_v14  ;;  %v7372_v24 = vmul.f32 %v14292_v21, %v7350_v1  ;;  %v7344_v27 = vmul.f32 %v9987_v44, %v14197_v28 }
0x204b   :  { %v7322_v47 = vadd.f32 1e-05, %v7306_v37  ;;  %v7348_v35 = vmul.f32 %v9989_v53, %v14224_v61  ;;  %v7367_v26 = vmul.f32 %v14292_v21, %v7345_v31  ;;  %v9991_v3 = vpop.eup %9990 }
0x204c   :  { %v7394_v2 = vadd.f32 %v14296_v43, %v7372_v24  ;;  %v7366_v28 = vmul.f32 %v14292_v21, %v7344_v27  ;;  %v7347_v23 = vmul.f32 %v9991_v3, %v14207_v58 }
0x204d   :  { %10000 = vrsqrt.f32 %v7322_v47  ;;  %v7370_v6 = vmul.f32 %v14292_v21, %v7348_v35  ;;  %v7389_v33 = vadd.f32 %v14296_v43, %v7367_v26  ;;  %v7425_v55 = vpop.xlane.xlu1 %7424  ;;  %v7543_v47 = vlaneseq }
0x204e   :  { %v9993_v12 = vpop.eup %9992  ;;  %7445 = vadd.xlane.f32.xlu0 %v7444_v60  ;;  %v7496_v51 = vsel %vm451_vm0, %v7394_v2, 0.0  ;;  %v7388_v5 = vadd.f32 %v14296_v43, %v7366_v28  ;;  %v7369_v7 = vmul.f32 %v14292_v21, %v7347_v23 }
0x204f   :  { %v7353_v61 = vmul.f32 %v9993_v12, %v14236_v63  ;;  %v7481_v30 = vsel %vm451_vm0, %v7389_v33, 0.0  ;;  %v7392_v0 = vadd.f32 %v14296_v43, %v7370_v6  ;;  %v7475_v63 = vsel %vm451_vm0, %v7387_v42, 0.0 }
0x2050   :  { %7482 = vadd.xlane.f32.xlu1 %v7481_v30  ;;  %v7478_v62 = vsel %vm451_vm0, %v7388_v5, 0.0  ;;  %v7544_v26 = vand.u32 127, %v7543_v47  ;;  %v7546_v15 = vshrl.u32 %v7543_v47, 7  ;;  %v7447_v6 = vmul.f32 0.03125, %v7401_v13 }
0x2051   :  { %v7375_v29 = vmul.f32 %v14292_v21, %v7353_v61  ;;  %v7490_v58 = vsel %vm451_vm0, %v7392_v0, 0.0  ;;  %v7407_v45 = vpop.xlane.xlu1 %7406 }
0x2052   :  { %v9995_v54 = vpop.eup %9994  ;;  %7497 = vadd.xlane.f32.xlu0 %v7496_v51  ;;  %v14371_v2 = vsub.s32 %v7544_v26, %v7546_v15  ;;  %v7449_v61 = vmul.f32 0.03125, %v7407_v45 }
0x2053   :  { %v7351_v8 = vmul.f32 %v9995_v54, %v14245_v11  ;;  %v9997_v52 = vpop.eup %9996  ;;  %v7397_v18 = vadd.f32 %v14296_v43, %v7375_v29  ;;  %v7391_v11 = vadd.f32 %v14296_v43, %v7369_v7 }
0x2054   :  { %7476 = vadd.xlane.f32.xlu1 %v7475_v63  ;;  %v7346_v40 = vmul.f32 %v9997_v52, %v14230_v36  ;;  %v7548_v42 = vrot.slane %v7447_v6, %v14371_v2  ;;  %v7556_v0 = vrot.slane %v7449_v61, %v14371_v2  ;;  %v7648_v52 = vadd.s32 4294967288, %v7544_v26 }
0x2055   :  { %v7373_v48 = vmul.f32 %v14292_v21, %v7351_v8  ;;  %v7505_v39 = vsel %vm451_vm0, %v7397_v18, 0.0  ;;  %v7487_v56 = vsel %vm451_vm0, %v7391_v11, 0.0  ;;  %v7410_v38 = vpop.xlane.xlu1 %7409 }
0x2056   :  { %v9999_v10 = vpop.eup %9998  ;;  %7491 = vadd.xlane.f32.xlu0 %v7490_v58  ;;  %v7368_v32 = vmul.f32 %v14292_v21, %v7346_v40  ;;  %v7450_v28 = vmul.f32 0.03125, %v7410_v38  ;;  %v7455_v58 = vmul.f32 0.03125, %v7425_v55 }
0x2057   :  { %v7352_v19 = vmul.f32 %v9999_v10, %v14253_v16  ;;  %v7395_v22 = vadd.f32 %v14296_v43, %v7373_v48 }
0x2058   :  { %7479 = vadd.xlane.f32.xlu1 %v7478_v62  ;;  %v7390_v17 = vadd.f32 %v14296_v43, %v7368_v32  ;;  %v7560_v18 = vrot.slane %v7450_v28, %v14371_v2 }
0x2059   :  { %v7374_v41 = vmul.f32 %v14292_v21, %v7352_v19  ;;  %v7499_v16 = vsel %vm451_vm0, %v7395_v22, 0.0  ;;  %v7413_v44 = vpop.xlane.xlu1 %7412 }
0x205a   :  { %v10001_v57 = vpop.eup %10000  ;;  %7506 = vadd.xlane.f32.xlu0 %v7505_v39  ;;  %v7484_v9 = vsel %vm451_vm0, %v7390_v17, 0.0  ;;  %v7451_v54 = vmul.f32 0.03125, %v7413_v44 }
0x205b   :  { %v7354_v46 = vmul.f32 %v10001_v57, %v14261_v4  ;;  %v7396_v36 = vadd.f32 %v14296_v43, %v7374_v41  ;;  %v14388_v41 = vsub.s32 %v7648_v52, %v7546_v15 }
0x205c   :  { %7488 = vadd.xlane.f32.xlu1 %v7487_v56  ;;  %v7564_v10 = vrot.slane %v7451_v54, %v14371_v2  ;;  %v7580_v56 = vrot.slane %v7455_v58, %v14371_v2 }
0x205d   :  { %v7376_v34 = vmul.f32 %v14292_v21, %v7354_v46  ;;  %v7502_v4 = vsel %vm451_vm0, %v7396_v36, 0.0  ;;  %v7404_v21 = vpop.xlane.xlu0 %7403  ;;  %v7416_v14 = vpop.xlane.xlu1 %7415 }
0x205e   :  { %7500 = vadd.xlane.f32.xlu0 %v7499_v16  ;;  %v7448_v3 = vmul.f32 0.03125, %v7404_v21  ;;  %v7452_v63 = vmul.f32 0.03125, %v7416_v14 }
0x205f   :  { %v7398_v20 = vadd.f32 %v14296_v43, %v7376_v34 }
0x2060   :  { %7421 = vadd.xlane.f32.xlu1 %v7420_v50  ;;  %v7552_v12 = vrot.slane %v7448_v3, %v14371_v2  ;;  %v7568_v22 = vrot.slane %v7452_v63, %v14371_v2 }
0x2061   :  { %v7508_v59 = vsel %vm451_vm0, %v7398_v20, 0.0  ;;  %v7428_v1 = vpop.xlane.xlu0 %7427  ;;  %v7419_v53 = vpop.xlane.xlu1 %7418 }
0x2062   :  { %7503 = vadd.xlane.f32.xlu0 %v7502_v4  ;;  %v7610_v23 = vsel %vm7609_vm4, %v7552_v12, %v7548_v42  ;;  %v7456_v8 = vmul.f32 0.03125, %v7428_v1  ;;  %v14391_v32 = vmul.f32 0.03125, %v7419_v53 }
0x2063   :  { %v7612_v5 = vsel %vm7611_vm5, %v7556_v0, %v7610_v23 }
0x2064   :  { %7485 = vadd.xlane.f32.xlu1 %v7484_v9  ;;  %v7614_v40 = vsel %vm7613_vm6, %v7560_v18, %v7612_v5  ;;  %v7584_v39 = vrot.slane %v7456_v8, %v14371_v2  ;;  %v7572_v1 = vrot.slane %v14391_v32, %v14371_v2 }
0x2065   :  { %v7431_v49 = vpop.xlane.xlu0 %7430  ;;  %v7616_v36 = vsel %vm7615_vm7, %v7564_v10, %v7614_v40 }
0x2066   :  { %7509 = vadd.xlane.f32.xlu0 %v7508_v59  ;;  %v7457_v7 = vmul.f32 0.03125, %v7431_v49  ;;  %v7623_v4 = vsel %vm7609_vm4, %v7584_v39, %v7580_v56  ;;  %v7618_v20 = vsel %vm7617_vm8, %v7568_v22, %v7616_v36 }
0x2068   :  { %v7588_v57 = vrot.slane %v7457_v7, %v14371_v2 }
0x2069   :  { %v7434_v25 = vpop.xlane.xlu0 %7433 }
0x206a   :  { %v7458_v62 = vmul.f32 0.03125, %v7434_v25  ;;  %v7624_v59 = vsel %vm7611_vm5, %v7588_v57, %v7623_v4 }
0x206c   :  { %v7592_v34 = vrot.slane %v7458_v62, %v14371_v2 }
0x206d   :  { %v14365_v37 = vpop.xlane.xlu0 %7436 }
0x206e   :  { %v7625_v44 = vsel %vm7613_vm6, %v7592_v34, %v7624_v59 }
0x2071   :  { %v14367_v43 = vpop.xlane.xlu0 %7439 }
0x2072   :  { %v7460_v26 = vmul.f32 0.03125, %v14367_v43 }
0x2075   :  { %v14369_v24 = vpop.xlane.xlu0 %7442 }
0x2076   :  { %v7461_v3 = vmul.f32 0.03125, %v14369_v24 }
0x2078   :  { %v7604_v10 = vrot.slane %v7461_v3, %v14371_v2 }
0x20b6   :  { %v7471_v31 = vpop.xlane.xlu1 %7470 }
0x20b7   :  { %v7513_v9 = vmul.f32 0.03125, %v7471_v31 }
0x20b9   :  { %v7660_v15 = vrot.slane %v7513_v9, %v14388_v41 }
0x20ba   :  { %v7465_v27 = vpop.xlane.xlu1 %7464 }
0x20bb   :  { %v7511_v46 = vmul.f32 0.03125, %v7465_v27 }
0x20bc   :  { %v7468_v35 = vpop.xlane.xlu0 %7467 }
0x20bd   :  { %v7512_v11 = vmul.f32 0.03125, %v7468_v35  ;;  %v7652_v13 = vrot.slane %v7511_v46, %v14388_v41  ;;  %v7459_v35 = vmul.f32 0.03125, %v14365_v37 }
0x20be   :  { %v7474_v33 = vpop.xlane.xlu1 %7473 }
0x20bf   :  { %v7656_v50 = vrot.slane %v7512_v11, %v14388_v41  ;;  %v7514_v21 = vmul.f32 0.03125, %v7474_v33  ;;  %v7596_v7 = vrot.slane %v7459_v35, %v14371_v2 }
0x20c1   :  { %v7713_v14 = vsel %vm7609_vm4, %v7656_v50, %v7652_v13  ;;  %v7626_v36 = vsel %vm7615_vm7, %v7596_v7, %v7625_v44 }
0x20c2   :  { %v7714_v33 = vsel %vm7611_vm5, %v7660_v15, %v7713_v14 }
0x20d3   :  { %v7495_v60 = vpop.xlane.xlu0 %7494 }
0x20d4   :  { %v7521_v45 = vmul.f32 0.03125, %v7495_v60  ;;  %v7664_v60 = vrot.slane %v7514_v21, %v14388_v41 }
0x20d6   :  { %v7692_v61 = vrot.slane %v7521_v45, %v14388_v41  ;;  %v7715_v52 = vsel %vm7613_vm6, %v7664_v60, %v7714_v33 }
0x20d7   :  { %v14374_v30 = vpop.xlane.xlu0 %7445 }
0x20d9   :  { %v14378_v51 = vpop.xlane.xlu1 %7482 }
0x20da   :  { %v7517_v8 = vmul.f32 0.03125, %v14378_v51 }
0x20db   :  { %v7498_v29 = vpop.xlane.xlu0 %7497 }
0x20dc   :  { %v7522_v49 = vmul.f32 0.03125, %v7498_v29  ;;  %v7462_v29 = vmul.f32 0.03125, %v14374_v30  ;;  %v7676_v46 = vrot.slane %v7517_v8, %v14388_v41 }
0x20dd   :  { %v7477_v48 = vpop.xlane.xlu1 %7476 }
0x20de   :  { %v7515_v38 = vmul.f32 0.03125, %v7477_v48  ;;  %v7696_v37 = vrot.slane %v7522_v49, %v14388_v41  ;;  %v7600_v48 = vrot.slane %v7460_v26, %v14371_v2  ;;  %v7608_v57 = vrot.slane %v7462_v29, %v14371_v2 }
0x20df   :  { %v7492_v19 = vpop.xlane.xlu0 %7491 }
0x20e0   :  { %v7520_v55 = vmul.f32 0.03125, %v7492_v19  ;;  %v7668_v43 = vrot.slane %v7515_v38, %v14388_v41 }
0x20e1   :  { %v7480_v16 = vpop.xlane.xlu1 %7479 }
0x20e2   :  { %v7516_v53 = vmul.f32 0.03125, %v7480_v16  ;;  %v7688_v6 = vrot.slane %v7520_v55, %v14388_v41  ;;  %v7716_v62 = vsel %vm7615_vm7, %v7668_v43, %v7715_v52  ;;  %v7620_v16 = vsel %vm7619_vm9, %v7572_v1, %v7618_v20 }
0x20e3   :  { %v7507_v17 = vpop.xlane.xlu0 %7506 }
0x20e4   :  { %v7672_v28 = vrot.slane %v7516_v53, %v14388_v41  ;;  %v7525_v58 = vmul.f32 0.03125, %v7507_v17  ;;  %v7627_v17 = vsel %vm7617_vm8, %v7600_v48, %v7626_v36 }
0x20e5   :  { %v7489_v25 = vpop.xlane.xlu1 %7488  ;;  %v7628_v9 = vsel %vm7619_vm9, %v7604_v10, %v7627_v17 }
0x20e6   :  { %v7519_v31 = vmul.f32 0.03125, %v7489_v25  ;;  %v7717_v51 = vsel %vm7617_vm8, %v7672_v28, %v7716_v62  ;;  %v7708_v34 = vrot.slane %v7525_v58, %v14388_v41  ;;  %v7629_v21 = vsel %vm7621_vm10, %v7608_v57, %v7628_v9 }
0x20e7   :  { %v7501_v47 = vpop.xlane.xlu0 %7500  ;;  %v7718_v4 = vsel %vm7619_vm9, %v7676_v46, %v7717_v51 }
0x20e8   :  { %v7523_v27 = vmul.f32 0.03125, %v7501_v47  ;;  %v7684_v12 = vrot.slane %v7519_v31, %v14388_v41 }
0x20e9   :  { %v7422_v42 = vpop.xlane.xlu1 %7421 }
0x20ea   :  { %v7720_v24 = vsel %vm7609_vm4, %v7688_v6, %v7684_v12  ;;  %v7700_v23 = vrot.slane %v7523_v27, %v14388_v41  ;;  %v7454_v0 = vmul.f32 0.03125, %v7422_v42 }
0x20eb   :  { %v7504_v54 = vpop.xlane.xlu0 %7503  ;;  %v7721_v63 = vsel %vm7611_vm5, %v7692_v61, %v7720_v24 }
0x20ec   :  { %v7524_v5 = vmul.f32 0.03125, %v7504_v54  ;;  %v7722_v18 = vsel %vm7613_vm6, %v7696_v37, %v7721_v63  ;;  %v7576_v40 = vrot.slane %v7454_v0, %v14371_v2 }
0x20ed   :  { %v7486_v11 = vpop.xlane.xlu1 %7485  ;;  %v7723_v19 = vsel %vm7615_vm7, %v7700_v23, %v7722_v18 }
0x20ee   :  { %v7704_v30 = vrot.slane %v7524_v5, %v14388_v41  ;;  %v7518_v39 = vmul.f32 0.03125, %v7486_v11  ;;  %v7622_v59 = vsel %vm7621_vm10, %v7576_v40, %v7620_v16 }
0x20ef   :  { %v7510_v22 = vpop.xlane.xlu0 %7509 }
0x20f0   :  { %v7724_v56 = vsel %vm7617_vm8, %v7704_v30, %v7723_v19  ;;  %v7526_v32 = vmul.f32 0.03125, %v7510_v22  ;;  %v7680_v50 = vrot.slane %v7518_v39, %v14388_v41 }
0x20f1   :  { %v7725_v13 = vsel %vm7619_vm9, %v7708_v34, %v7724_v56 }
0x20f2   :  { %v7712_v2 = vrot.slane %v7526_v32, %v14388_v41  ;;  %v7719_v20 = vsel %vm7621_vm10, %v7680_v50, %v7718_v4 }
0x20f3   :  { %v7729_v1 = vsel %vm629_vm1, %v7622_v59, %v7719_v20 }
0x20f4   :  { %v7726_v55 = vsel %vm7621_vm10, %v7712_v2, %v7725_v13  ;;  %7732 = vst.msk [vmem:[#allocation25] sm:$0xff] %vm7731_vm11, %v7729_v1 }
0x20f5   :  { %v7730_v45 = vsel %vm629_vm1, %v7629_v21, %v7726_v55 }
0x20f6   :  { %7733 = vst.msk [vmem:[#allocation25 + $0x8] sm:$0xff] %vm7731_vm11, %v7730_v45 }
0x20f7   :  { %10341 = shalt.err (!%p10338_p4)
}
0x20f8   :  { %7745 = dma.vmem_to_hbm [thread:$0]  %s7740_s27, 256, %s10585_s21, [#allocation4], %s10400_s0, %s10400_s0, %s10401_s26  }
0x20f9   :  { %10366 = dma.done.wait [#allocation4], 256  }
0x20fa   :  { %10367 = vsyncadd [#allocation4], 4294967040 }
0x20fb   :  { %7749 = vsyncpa [#allocation3], 1 }
0x20fc   :  { %7750 = vsyncpa [#allocation6], 1 }
0x20fd   :  { %7751 = vsyncpa [#allocation9], 1 }
0x20fe   :  { %7752 = vsyncpa [#allocation12], 1 }
0x20ff   :  { %7753 = vsyncpa [#allocation15], 1 }
0x2100   :  { %7754 = vsyncpa [#allocation18], 1 }
0x2101   :  { %7755 = vsyncpa [#allocation21], 1 }
0x2102   :  { %7756 = vsyncpa [#allocation24], 1 }
0x2103   :  { %7757 = vsyncpa [#allocation4], 1 }

</bundles_post_ra>
